<compile_context>
chip_gen: v5e
topology: v5e:2x2
jax: 0.10.0
libtpu: 0.0.40
codegen_flags: <defaults>
</compile_context>

<pallas_src>
import functools

import jax
import jax.numpy as jnp
from jax.experimental import pallas as pl
from jax.experimental.pallas import tpu as pltpu


def _round_up(n, m):
    return ((n + m - 1) // m) * m


def _gen_mlp_kernel(x_ref, w1_ref, b1_ref, w2_ref, b2_ref, w3_ref, b3_ref, o_ref):
    """fc1 -> relu -> fc2 -> relu -> out -> tanh, all for one batch tile."""
    mm_dtype = w1_ref.dtype  # bf16 or f32; MXU accumulates in f32 either way.

    # fc1 -> relu (f32 accumulate, f32 epilogue)
    h1 = jnp.dot(x_ref[...], w1_ref[...], preferred_element_type=jnp.float32)
    h1 = jnp.maximum(h1 + b1_ref[...], 0.0)

    # fc2 -> relu
    h2 = jnp.dot(h1.astype(mm_dtype), w2_ref[...], preferred_element_type=jnp.float32)
    h2 = jnp.maximum(h2 + b2_ref[...], 0.0)

    # out -> tanh (lane-dense padded width)
    y = jnp.dot(h2.astype(mm_dtype), w3_ref[...], preferred_element_type=jnp.float32)
    o_ref[...] = jnp.tanh(y + b3_ref[...]).astype(o_ref.dtype)


@functools.partial(jax.jit, static_argnames=("block_b", "use_bf16"))
def gen_forward(x, params, block_b=256, use_bf16=True):
    """Pallas implementation of Gen.forward: 64 -> 256 -> 512 -> 784 MLP."""
    w1, b1, w2, b2, w3, b3 = params
    B, D_in = x.shape
    H1 = w1.shape[1]
    H2 = w2.shape[1]
    D_out = w3.shape[1]

    # --- Lane-dense output: pad 784 -> 896 (7 * 128) so the last matmul and
    # the output stores are full-lane instead of masked tails.
    D_pad = _round_up(D_out, 128)
    if D_pad != D_out:
        w3 = jnp.pad(w3, ((0, 0), (0, D_pad - D_out)))
        b3 = jnp.pad(b3, ((0, 0), (0, D_pad - D_out)))

    # --- dtype plumbing: matmul operands optionally bf16, biases/epilogue f32.
    mm_dtype = jnp.bfloat16 if use_bf16 else jnp.float32
    xc = x.astype(mm_dtype)
    w1c, w2c, w3c = (w.astype(mm_dtype) for w in (w1, w2, w3))
    b1f, b2f, b3f = (b.astype(jnp.float32) for b in (b1, b2, b3))

    # --- Batch tiling: fill the MXU M dim when B is large, but don't over-pad
    # tiny batches. Pad B up to a multiple of the tile (zero rows, sliced off).
    blk = min(block_b, _round_up(B, 8))
    B_pad = _round_up(B, blk)
    if B_pad != B:
        xc = jnp.pad(xc, ((0, B_pad - B), (0, 0)))

    # Weights are small (< 3 MB total) and fully resident in VMEM; only the
    # batch dimension is tiled across the grid.
    const_spec = lambda shape: pl.BlockSpec(shape, lambda i: (0, 0))

    out = pl.pallas_call(
        _gen_mlp_kernel,
        out_shape=jax.ShapeDtypeStruct((B_pad, D_pad), jnp.float32),
        grid_spec=pltpu.PrefetchScalarGridSpec(
            num_scalar_prefetch=0,
            grid=(B_pad // blk,),
            in_specs=[
                pl.BlockSpec((blk, D_in), lambda i: (i, 0)),  # x tile
                const_spec((D_in, H1)),                        # W1
                const_spec((1, H1)),                           # b1
                const_spec((H1, H2)),                          # W2
                const_spec((1, H2)),                           # b2
                const_spec((H2, D_pad)),                       # W3 (padded)
                const_spec((1, D_pad)),                        # b3 (padded)
            ],
            out_specs=pl.BlockSpec((blk, D_pad), lambda i: (i, 0)),
        ),
        compiler_params=pltpu.CompilerParams(
            dimension_semantics=("parallel",),
        ),
    )(xc, w1c, b1f, w2c, b2f, w3c, b3f)

    return out[:B, :D_out]


def init_params(key):
    """Deterministic init matching PyTorch nn.Linear default (uniform +/- 1/sqrt(fan_in))."""
    def linear(key, fan_in, fan_out):
        kw, kb = jax.random.split(key)
        bound = 1.0 / jnp.sqrt(fan_in)
        w = jax.random.uniform(kw, (fan_in, fan_out), jnp.float32, -bound, bound)
        b = jax.random.uniform(kb, (1, fan_out), jnp.float32, -bound, bound)
        return w, b

    k1, k2, k3 = jax.random.split(key, 3)
    w1, b1 = linear(k1, 64, 256)
    w2, b2 = linear(k2, 256, 512)
    w3, b3 = linear(k3, 512, 784)
    return (w1, b1, w2, b2, w3, b3)


def reference_forward(x, params):
    w1, b1, w2, b2, w3, b3 = params
    h = jnp.maximum(x @ w1 + b1, 0.0)
    h = jnp.maximum(h @ w2 + b2, 0.0)
    return jnp.tanh(h @ w3 + b3)


if __name__ == "__main__":
    key = jax.random.PRNGKey(0)
    k_params, k_x1, k_x2 = jax.random.split(key, 3)
    params = init_params(k_params)

    # Throughput path: batch big enough for 2 grid steps of 256 rows each
    # (fills the MXU M dim; both v7x TensorCores get a tile), bf16 matmuls.
    B = 512
    x = jax.random.normal(k_x1, (B, 64), jnp.float32)
    out = jax.block_until_ready(gen_forward(x, params, block_b=256, use_bf16=True))
    ref = reference_forward(x, params)
    assert out.shape == (B, 784), out.shape
    assert jnp.allclose(out, ref, atol=2e-2), float(jnp.abs(out - ref).max())

    # Small, non-aligned batch on the f32 path: exercises batch padding and
    # matches the reference at tight tolerance.
    B2 = 10
    x2 = jax.random.normal(k_x2, (B2, 64), jnp.float32)
    out2 = jax.block_until_ready(gen_forward(x2, params, block_b=256, use_bf16=False))
    ref2 = reference_forward(x2, params)
    assert out2.shape == (B2, 784), out2.shape
    assert jnp.allclose(out2, ref2, atol=1e-5, rtol=1e-5), "mismatch vs reference"

    print("KERNEL_OK")
</pallas_src>

<mosaic_0001>
module attributes {stable_mosaic.version = 11 : i64} {
  func.func @_gen_mlp_kernel(%arg0: i32, %arg1: memref<256x64xbf16, #tpu.memory_space<vmem>>, %arg2: memref<64x256xbf16, #tpu.memory_space<vmem>>, %arg3: memref<1x256xf32, #tpu.memory_space<vmem>>, %arg4: memref<256x512xbf16, #tpu.memory_space<vmem>>, %arg5: memref<1x512xf32, #tpu.memory_space<vmem>>, %arg6: memref<512x896xbf16, #tpu.memory_space<vmem>>, %arg7: memref<1x896xf32, #tpu.memory_space<vmem>>, %arg8: memref<256x896xf32, #tpu.memory_space<vmem>>) attributes {dimension_semantics = [#tpu.dimension_semantics<parallel>], iteration_bounds = array<i64: 2>, scalar_prefetch = 0 : i64, scratch_operands = 0 : i64, tpu.core_type = #tpu.core_type<tc>, window_params = [{transform_indices = @transform_0, window_bounds = array<i64: 256, 64>}, {pipeline_mode = #tpu.pipeline_mode<synchronous>, transform_indices = @transform_1, window_bounds = array<i64: 64, 256>}, {pipeline_mode = #tpu.pipeline_mode<synchronous>, transform_indices = @transform_2, window_bounds = array<i64: 1, 256>}, {pipeline_mode = #tpu.pipeline_mode<synchronous>, transform_indices = @transform_3, window_bounds = array<i64: 256, 512>}, {pipeline_mode = #tpu.pipeline_mode<synchronous>, transform_indices = @transform_4, window_bounds = array<i64: 1, 512>}, {pipeline_mode = #tpu.pipeline_mode<synchronous>, transform_indices = @transform_5, window_bounds = array<i64: 512, 896>}, {pipeline_mode = #tpu.pipeline_mode<synchronous>, transform_indices = @transform_6, window_bounds = array<i64: 1, 896>}, {transform_indices = @transform_7, window_bounds = array<i64: 256, 896>}]} {
    %c0 = arith.constant 0 : index
    %c0_0 = arith.constant 0 : index
    %0 = vector.load %arg1[%c0, %c0_0] : memref<256x64xbf16, #tpu.memory_space<vmem>>, vector<256x64xbf16>
    %c0_1 = arith.constant 0 : index
    %c0_2 = arith.constant 0 : index
    %1 = vector.load %arg2[%c0_1, %c0_2] : memref<64x256xbf16, #tpu.memory_space<vmem>>, vector<64x256xbf16>
    %cst = arith.constant dense<0.000000e+00> : vector<256x256xf32>
    %2 = tpu.matmul %0, %1, %cst {dimension_numbers = #tpu.dot_dimension_numbers<[1], [0], [0], [1], [0, 0, 1, 1], [], []>} : vector<256x64xbf16>, vector<64x256xbf16>, vector<256x256xf32> -> vector<256x256xf32>
    %c0_3 = arith.constant 0 : index
    %c0_4 = arith.constant 0 : index
    %3 = vector.load %arg3[%c0_3, %c0_4] : memref<1x256xf32, #tpu.memory_space<vmem>>, vector<1x256xf32>
    %4 = vector.broadcast %3 : vector<1x256xf32> to vector<256x256xf32>
    %5 = arith.addf %2, %4 : vector<256x256xf32>
    %cst_5 = arith.constant 0.000000e+00 : f32
    %6 = vector.broadcast %cst_5 : f32 to vector<256x256xf32>
    %7 = arith.maximumf %5, %6 : vector<256x256xf32>
    %8 = arith.truncf %7 : vector<256x256xf32> to vector<256x256xbf16>
    %c0_6 = arith.constant 0 : index
    %c0_7 = arith.constant 0 : index
    %9 = vector.load %arg4[%c0_6, %c0_7] : memref<256x512xbf16, #tpu.memory_space<vmem>>, vector<256x512xbf16>
    %cst_8 = arith.constant dense<0.000000e+00> : vector<256x512xf32>
    %10 = tpu.matmul %8, %9, %cst_8 {dimension_numbers = #tpu.dot_dimension_numbers<[1], [0], [0], [1], [0, 0, 1, 1], [], []>} : vector<256x256xbf16>, vector<256x512xbf16>, vector<256x512xf32> -> vector<256x512xf32>
    %c0_9 = arith.constant 0 : index
    %c0_10 = arith.constant 0 : index
    %11 = vector.load %arg5[%c0_9, %c0_10] : memref<1x512xf32, #tpu.memory_space<vmem>>, vector<1x512xf32>
    %12 = vector.broadcast %11 : vector<1x512xf32> to vector<256x512xf32>
    %13 = arith.addf %10, %12 : vector<256x512xf32>
    %cst_11 = arith.constant 0.000000e+00 : f32
    %14 = vector.broadcast %cst_11 : f32 to vector<256x512xf32>
    %15 = arith.maximumf %13, %14 : vector<256x512xf32>
    %16 = arith.truncf %15 : vector<256x512xf32> to vector<256x512xbf16>
    %c0_12 = arith.constant 0 : index
    %c0_13 = arith.constant 0 : index
    %17 = vector.load %arg6[%c0_12, %c0_13] : memref<512x896xbf16, #tpu.memory_space<vmem>>, vector<512x896xbf16>
    %cst_14 = arith.constant dense<0.000000e+00> : vector<256x896xf32>
    %18 = tpu.matmul %16, %17, %cst_14 {dimension_numbers = #tpu.dot_dimension_numbers<[1], [0], [0], [1], [0, 0, 1, 1], [], []>} : vector<256x512xbf16>, vector<512x896xbf16>, vector<256x896xf32> -> vector<256x896xf32>
    %c0_15 = arith.constant 0 : index
    %c0_16 = arith.constant 0 : index
    %19 = vector.load %arg7[%c0_15, %c0_16] : memref<1x896xf32, #tpu.memory_space<vmem>>, vector<1x896xf32>
    %20 = vector.broadcast %19 : vector<1x896xf32> to vector<256x896xf32>
    %21 = arith.addf %18, %20 : vector<256x896xf32>
    %22 = math.tanh %21 : vector<256x896xf32>
    %c0_17 = arith.constant 0 : index
    %c0_18 = arith.constant 0 : index
    %23 = vector.load %arg8[%c0_17, %c0_18] : memref<256x896xf32, #tpu.memory_space<vmem>>, vector<256x896xf32>
    tpu.vector_store %arg8[%c0_17, %c0_18], %22 {strides = array<i32>} : memref<256x896xf32, #tpu.memory_space<vmem>>, vector<256x896xf32>,
    return
  }
  func.func @transform_0(%arg0: i32) -> (i32, i32) {
    %c0_i32 = arith.constant 0 : i32
    %c0_i32_0 = arith.constant 0 : i32
    return %arg0, %c0_i32 : i32, i32
  }
  func.func @transform_1(%arg0: i32) -> (i32, i32) {
    %c0_i32 = arith.constant 0 : i32
    %c0_i32_0 = arith.constant 0 : i32
    %c0_i32_1 = arith.constant 0 : i32
    return %c0_i32, %c0_i32_0 : i32, i32
  }
  func.func @transform_2(%arg0: i32) -> (i32, i32) {
    %c0_i32 = arith.constant 0 : i32
    %c0_i32_0 = arith.constant 0 : i32
    %c0_i32_1 = arith.constant 0 : i32
    return %c0_i32, %c0_i32_0 : i32, i32
  }
  func.func @transform_3(%arg0: i32) -> (i32, i32) {
    %c0_i32 = arith.constant 0 : i32
    %c0_i32_0 = arith.constant 0 : i32
    %c0_i32_1 = arith.constant 0 : i32
    return %c0_i32, %c0_i32_0 : i32, i32
  }
  func.func @transform_4(%arg0: i32) -> (i32, i32) {
    %c0_i32 = arith.constant 0 : i32
    %c0_i32_0 = arith.constant 0 : i32
    %c0_i32_1 = arith.constant 0 : i32
    return %c0_i32, %c0_i32_0 : i32, i32
  }
  func.func @transform_5(%arg0: i32) -> (i32, i32) {
    %c0_i32 = arith.constant 0 : i32
    %c0_i32_0 = arith.constant 0 : i32
    %c0_i32_1 = arith.constant 0 : i32
    return %c0_i32, %c0_i32_0 : i32, i32
  }
  func.func @transform_6(%arg0: i32) -> (i32, i32) {
    %c0_i32 = arith.constant 0 : i32
    %c0_i32_0 = arith.constant 0 : i32
    %c0_i32_1 = arith.constant 0 : i32
    return %c0_i32, %c0_i32_0 : i32, i32
  }
  func.func @transform_7(%arg0: i32) -> (i32, i32) {
    %c0_i32 = arith.constant 0 : i32
    %c0_i32_0 = arith.constant 0 : i32
    return %arg0, %c0_i32 : i32, i32
  }
}

</mosaic_0001>

<bundles_post_ra>
// kernel: gen_forward.1
= control target key start
LH: loop header
LB: loop body
LE: loop exit
PB: predicated region body
PF: predicated region fallthrough
CT: control target
= control target key end

     0   :  { %s8624_s24 = smov 0   ;;  %s12008_s0 = inlined_call_operand.vmem [shape: bf16[512,64], index: 0, kind: input, shape index: {}]   ;;  %s12009_s1 = inlined_call_operand.vmem [shape: bf16[64,256], index: 1, kind: input, shape index: {}]   ;;  %s12010_s2 = inlined_call_operand.vmem [shape: f32[1,256], index: 2, kind: input, shape index: {}]   ;;  %s12011_s3 = inlined_call_operand.vmem [shape: bf16[256,512], index: 3, kind: input, shape index: {}]   ;;  %s12012_s4 = inlined_call_operand.vmem [shape: f32[1,512], index: 4, kind: input, shape index: {}]   ;;  %s12013_s5 = inlined_call_operand.vmem [shape: bf16[512,896], index: 5, kind: input, shape index: {}]   ;;  %s12014_s6 = inlined_call_operand.vmem [shape: f32[1,896], index: 6, kind: input, shape index: {}]   ;;  %s12015_s7 = inlined_call_operand.vmem [shape: f32[512,896], index: 7, kind: output, shape index: {}]  }
   0x1 LB: > { %s6494_s25 = sadd.s32 4294967295, %s8582_s24   ;;  %p6498_p0 = scmp.ge.s32.totalorder %s8582_s24, 1  ;;  %s8582_s24 = sphi %s8624_s24, %s17_s24  }
   0x2   : > { %p238_p1 = scmp.lt.s32.totalorder %s8582_s24, 3 }
   0x4   : > { %p239_p2 = pnand %p6498_p0, %p238_p1 }
   0x6   : > { %242 = sbr.rel (%p239_p2) target bundleno = 2625 (0xa41), region = 48 }
   0xb   : > { %v6593_v0 = vld [vmem:[%s12009_s1 + $0x30] sm:$0xf]  ;;  %v7808_v1 = vld [vmem:[%s12009_s1 + $0x34] sm:$0xf0]  ;;  %v7807_v2 = vld [vmem:[%s12009_s1 + $0x34] sm:$0xf] }
   0xc   : > { %v6594_v3 = vor.u32 %v7808_v1, %v6593_v0  ;;  %v6595_v4 = vld [vmem:[%s12009_s1 + $0x38] sm:$0xf0]  ;;  %v6585_v5 = vld [vmem:[%s12009_s1 + $0x20] sm:$0xf]  ;;  %v7806_v6 = vld [vmem:[%s12009_s1 + $0x24] sm:$0xf0] }
   0xd   : > { %v6598_v7 = vor.u32 %v7807_v2, %v6595_v4  ;;  %v7805_v8 = vld [vmem:[%s12009_s1 + $0x24] sm:$0xf]  ;;  %v6587_v9 = vld [vmem:[%s12009_s1 + $0x28] sm:$0xf0]  ;;  %v6586_v10 = vor.u32 %v7806_v6, %v6585_v5  ;;  %v6577_v12 = vld [vmem:[%s12009_s1 + $0x10] sm:$0xf] }
   0xe   : > { %504 = vmatpush.bf16.msra.mxu0 %v6594_v3  ;;  %8097 = vmatpush.bf16.msra.mxu2 %v6594_v3  ;;  %v6590_v11 = vor.u32 %v7805_v8, %v6587_v9  ;;  %v7804_v13 = vld [vmem:[%s12009_s1 + $0x14] sm:$0xf0]  ;;  %v7803_v14 = vld [vmem:[%s12009_s1 + $0x14] sm:$0xf]  ;;  %v6579_v15 = vld [vmem:[%s12009_s1 + $0x18] sm:$0xf0] }
   0xf   : > { %593 = vmatpush.bf16.msra.mxu1 %v6598_v7  ;;  %8101 = vmatpush.bf16.msra.mxu3 %v6598_v7  ;;  %s6499_s29 = sshll.u32 %s6494_s25, 5  ;;  %v6578_v16 = vor.u32 %v7804_v13, %v6577_v12  ;;  %v6569_v17 = vld [vmem:[%s12009_s1] sm:$0xf]  ;;  %v6582_v18 = vor.u32 %v7803_v14, %v6579_v15  ;;  %v7802_v19 = vld [vmem:[%s12009_s1 + $0x4] sm:$0xf0]  ;;  %vm451_vm0 = vcmask 523264  }
  0x10   : > { %p272_p3 = scmp.lt.s32.totalorder %s6499_s29, 63  ;;  %v7801_v20 = vld [vmem:[%s12009_s1 + $0x4] sm:$0xf]  ;;  %v6571_v21 = vld [vmem:[%s12009_s1 + $0x8] sm:$0xf0]  ;;  %v6570_v26 = vor.u32 %v7802_v19, %v6569_v17 }
  0x11   : > { %v6873_v22 = vld [vmem:[%s12011_s3 + $0x1e0] sm:$0xf]  ;;  %v7871_v23 = vld [vmem:[%s12011_s3 + $0x1ec] sm:$0xf0]  ;;  %v6574_v27 = vor.u32 %v7801_v20, %v6571_v21  ;;  %v7837_v33 = vld [vmem:[%s12011_s3 + $0xe4] sm:$0xf] }
  0x12   : > { %505 = vmatpush.bf16.msra.mxu0 %v6586_v10  ;;  %8098 = vmatpush.bf16.msra.mxu2 %v6586_v10  ;;  %s12239_s29 = smov (!%p272_p3, %s6499_s29), 63  ;;  %v6745_v24 = vld [vmem:[%s12011_s3 + $0xe0] sm:$0xf]  ;;  %v7839_v25 = vld [vmem:[%s12011_s3 + $0xec] sm:$0xf0]  ;;  %v6874_v28 = vor.u32 %v7871_v23, %v6873_v22 }
  0x13   : > { %594 = vmatpush.bf16.msra.mxu1 %v6590_v11  ;;  %8102 = vmatpush.bf16.msra.mxu3 %v6590_v11  ;;  %s6500_s18 = sshll.u32 %s12239_s29, 2  ;;  %v6746_v29 = vor.u32 %v7839_v25, %v6745_v24  ;;  %v6747_v34 = vld [vmem:[%s12011_s3 + $0xf0] sm:$0xf0]  ;;  %v7869_v36 = vld [vmem:[%s12011_s3 + $0x1e4] sm:$0xf]  ;;  %s8113_s25 = smul.u32 56, %s12239_s29 }
  0x14   : > { %s8698_s27 = scalar_lea.vmem %s12008_s0, %s6500_s18  ;;  %v6750_v35 = vor.u32 %v7837_v33, %v6747_v34  ;;  %v6875_v37 = vld [vmem:[%s12011_s3 + $0x1f0] sm:$0xf0]  ;;  %v6729_v38 = vld [vmem:[%s12011_s3 + $0xc0] sm:$0xf]  ;;  %v7835_v40 = vld [vmem:[%s12011_s3 + $0xcc] sm:$0xf0] }
  0x15   : > { %v7785_v30 = vld [vmem:[%s8698_s27] sm:$0xff]  ;;  %v7794_v31 = vld [vmem:[%s8698_s27 + $0x48] sm:$0xff]  ;;  %v6878_v39 = vor.u32 %v7869_v36, %v6875_v37  ;;  %v7867_v42 = vld [vmem:[%s12011_s3 + $0x1cc] sm:$0xf0]  ;;  %v6730_v43 = vor.u32 %v7835_v40, %v6729_v38  ;;  %s10058_s15 = scalar_lea.vmem %s12015_s7, %s8113_s25 }
  0x16   : > { %506 = vmatpush.bf16.msra.mxu0 %v6578_v16  ;;  %8099 = vmatpush.bf16.msra.mxu2 %v6578_v16  ;;  %v8703_v32 = vld [vmem:[%s8698_s27 + $0x40] sm:$0xff]  ;;  %v7786_v45 = vld [vmem:[%s8698_s27 + $0x8] sm:$0xff]  ;;  %v7795_v46 = vld [vmem:[%s8698_s27 + $0x50] sm:$0xff] }
  0x17   : > { %595 = vmatpush.bf16.msra.mxu1 %v6582_v18  ;;  %8103 = vmatpush.bf16.msra.mxu3 %v6582_v18  ;;  %v6857_v41 = vld [vmem:[%s12011_s3 + $0x1c0] sm:$0xf]  ;;  %v7833_v47 = vld [vmem:[%s12011_s3 + $0xc4] sm:$0xf]  ;;  %v6731_v48 = vld [vmem:[%s12011_s3 + $0xd0] sm:$0xf0] }
  0x18   : > { %v6858_v44 = vor.u32 %v7867_v42, %v6857_v41  ;;  %v6734_v49 = vor.u32 %v7833_v47, %v6731_v48  ;;  %v7865_v50 = vld [vmem:[%s12011_s3 + $0x1c4] sm:$0xf]  ;;  %v6859_v51 = vld [vmem:[%s12011_s3 + $0x1d0] sm:$0xf0]  ;;  %v6713_v52 = vld [vmem:[%s12011_s3 + $0xa0] sm:$0xf] }
  0x19   : > { %v6862_v53 = vor.u32 %v7865_v50, %v6859_v51  ;;  %v7831_v54 = vld [vmem:[%s12011_s3 + $0xac] sm:$0xf0]  ;;  %v6841_v55 = vld [vmem:[%s12011_s3 + $0x1a0] sm:$0xf]  ;;  %v7796_v60 = vld [vmem:[%s8698_s27 + $0x58] sm:$0xff] }
  0x1a   : > { %507 = vmatpush.bf16.msra.mxu0 %v6570_v26  ;;  %8100 = vmatpush.bf16.msra.mxu2 %v6570_v26  ;;  %v7863_v56 = vld [vmem:[%s12011_s3 + $0x1ac] sm:$0xf0]  ;;  %v6714_v57 = vor.u32 %v7831_v54, %v6713_v52  ;;  %v7861_v61 = vld [vmem:[%s12011_s3 + $0x1a4] sm:$0xf]  ;;  %v6843_v62 = vld [vmem:[%s12011_s3 + $0x1b0] sm:$0xf0] }
  0x1b   : > { %596 = vmatpush.bf16.msra.mxu1 %v6574_v27  ;;  %8104 = vmatpush.bf16.msra.mxu3 %v6574_v27  ;;  %v6842_v58 = vor.u32 %v7863_v56, %v6841_v55  ;;  %v7787_v59 = vld [vmem:[%s8698_s27 + $0x10] sm:$0xff]  ;;  %v6846_v63 = vor.u32 %v7861_v61, %v6843_v62  ;;  %v6697_v0 = vld [vmem:[%s12011_s3 + $0x80] sm:$0xf]  ;;  %v7829_v2 = vld [vmem:[%s12011_s3 + $0xa4] sm:$0xf] }
  0x1c   : > { %v7827_v1 = vld [vmem:[%s12011_s3 + $0x8c] sm:$0xf0]  ;;  %v6715_v4 = vld [vmem:[%s12011_s3 + $0xb0] sm:$0xf0]  ;;  %v6825_v5 = vld [vmem:[%s12011_s3 + $0x180] sm:$0xf] }
  0x1d   : > { %6599 = vmatmul.msk.bf16.vlgmr.msra.gmra.mxu0 %vm451_vm0, %v7785_v30  ;;  %6608 = vmatmul.msk.bf16.vlgmr.msra.gmra.mxu2 %vm451_vm0, %v7794_v31  ;;  %v6698_v3 = vor.u32 %v7827_v1, %v6697_v0  ;;  %v7859_v6 = vld [vmem:[%s12011_s3 + $0x18c] sm:$0xf0]  ;;  %v6718_v7 = vor.u32 %v7829_v2, %v6715_v4  ;;  %v7788_v9 = vld [vmem:[%s8698_s27 + $0x18] sm:$0xff]  ;;  %v7797_v10 = vld [vmem:[%s8698_s27 + $0x60] sm:$0xff] }
  0x1e   : > { %1168 = vmatpush.bf16.msrb.mxu2 %v6746_v29  ;;  %6615 = vmatmul.msk.bf16.vlgmr.msra.gmra.mxu1 %vm451_vm0, %v7785_v30  ;;  %v6826_v8 = vor.u32 %v7859_v6, %v6825_v5  ;;  %v6681_v11 = vld [vmem:[%s12011_s3 + $0x60] sm:$0xf]  ;;  %v7823_v12 = vld [vmem:[%s12011_s3 + $0x6c] sm:$0xf0]  ;;  %v7857_v14 = vld [vmem:[%s12011_s3 + $0x184] sm:$0xf] }
  0x1f   : > { %1257 = vmatpush.bf16.msrb.mxu3 %v6874_v28  ;;  %1346 = vmatpush.bf16.msrb.mxu0 %v6750_v35  ;;  %v6682_v13 = vor.u32 %v7823_v12, %v6681_v11  ;;  %v6827_v15 = vld [vmem:[%s12011_s3 + $0x190] sm:$0xf0]  ;;  %v7825_v16 = vld [vmem:[%s12011_s3 + $0x84] sm:$0xf]  ;;  %v6809_v19 = vld [vmem:[%s12011_s3 + $0x160] sm:$0xf] }
  0x20   : > { %6623 = vmatmul.msk.bf16.vlgmr.msra.gmra.mxu3 %vm451_vm0, %v8703_v32  ;;  %1435 = vmatpush.bf16.msrb.mxu1 %v6878_v39  ;;  %v6830_v17 = vor.u32 %v7857_v14, %v6827_v15  ;;  %v6699_v18 = vld [vmem:[%s12011_s3 + $0x90] sm:$0xf0]  ;;  %v7855_v20 = vld [vmem:[%s12011_s3 + $0x16c] sm:$0xf0]  ;;  %v7789_v23 = vld [vmem:[%s8698_s27 + $0x20] sm:$0xff] }
  0x21   : > { %v6702_v21 = vor.u32 %v7825_v16, %v6699_v18  ;;  %v6810_v22 = vor.u32 %v7855_v20, %v6809_v19  ;;  %v7798_v24 = vld [vmem:[%s8698_s27 + $0x68] sm:$0xff]  ;;  %v6665_v25 = vld [vmem:[%s12011_s3 + $0x40] sm:$0xf]  ;;  %v7819_v26 = vld [vmem:[%s12011_s3 + $0x4c] sm:$0xf0] }
  0x22   : > { %1169 = vmatpush.bf16.msrb.mxu2 %v6730_v43  ;;  %v6666_v27 = vor.u32 %v7819_v26, %v6665_v25  ;;  %v7853_v28 = vld [vmem:[%s12011_s3 + $0x164] sm:$0xf]  ;;  %v6811_v29 = vld [vmem:[%s12011_s3 + $0x170] sm:$0xf0]  ;;  %v6793_v30 = vld [vmem:[%s12011_s3 + $0x140] sm:$0xf] }
  0x23   : > { %1258 = vmatpush.bf16.msrb.mxu3 %v6858_v44  ;;  %1347 = vmatpush.bf16.msrb.mxu0 %v6734_v49  ;;  %v7851_v33 = vld [vmem:[%s12011_s3 + $0x14c] sm:$0xf0]  ;;  %v7821_v34 = vld [vmem:[%s12011_s3 + $0x64] sm:$0xf]  ;;  %v6683_v35 = vld [vmem:[%s12011_s3 + $0x70] sm:$0xf0] }
  0x24   : > { %1436 = vmatpush.bf16.msrb.mxu1 %v6862_v53  ;;  %v6794_v36 = vor.u32 %v7851_v33, %v6793_v30  ;;  %v6686_v37 = vor.u32 %v7821_v34, %v6683_v35  ;;  %v7790_v38 = vld [vmem:[%s8698_s27 + $0x28] sm:$0xff]  ;;  %v7799_v39 = vld [vmem:[%s8698_s27 + $0x70] sm:$0xff]  ;;  %v6649_v40 = vld [vmem:[%s12011_s3 + $0x20] sm:$0xf] }
  0x25   : > { %v7815_v41 = vld [vmem:[%s12011_s3 + $0x2c] sm:$0xf0]  ;;  %v7849_v43 = vld [vmem:[%s12011_s3 + $0x144] sm:$0xf]  ;;  %v6795_v44 = vld [vmem:[%s12011_s3 + $0x150] sm:$0xf0] }
  0x26   : > { %1170 = vmatpush.bf16.msrb.mxu2 %v6714_v57  ;;  %v6650_v42 = vor.u32 %v7815_v41, %v6649_v40  ;;  %v7847_v47 = vld [vmem:[%s12011_s3 + $0x12c] sm:$0xf0]  ;;  %v7817_v48 = vld [vmem:[%s12011_s3 + $0x44] sm:$0xf]  ;;  %v6667_v49 = vld [vmem:[%s12011_s3 + $0x50] sm:$0xf0] }
  0x27   : > { %1259 = vmatpush.bf16.msrb.mxu3 %v6842_v58  ;;  %1348 = vmatpush.bf16.msrb.mxu0 %v6718_v7  ;;  %v6670_v51 = vor.u32 %v7817_v48, %v6667_v49  ;;  %v7791_v52 = vld [vmem:[%s8698_s27 + $0x30] sm:$0xff]  ;;  %v7800_v53 = vld [vmem:[%s8698_s27 + $0x78] sm:$0xff]  ;;  %v6633_v54 = vld [vmem:[%s12011_s3] sm:$0xf] }
  0x28   : > { %1437 = vmatpush.bf16.msrb.mxu1 %v6846_v63  ;;  %v7811_v55 = vld [vmem:[%s12011_s3 + $0xc] sm:$0xf0]  ;;  %v7845_v56 = vld [vmem:[%s12011_s3 + $0x124] sm:$0xf]  ;;  %v6779_v58 = vld [vmem:[%s12011_s3 + $0x130] sm:$0xf0] }
  0x29   : > { %v6634_v57 = vor.u32 %v7811_v55, %v6633_v54  ;;  %v7843_v61 = vld [vmem:[%s12011_s3 + $0x10c] sm:$0xf0]  ;;  %v7813_v62 = vld [vmem:[%s12011_s3 + $0x24] sm:$0xf]  ;;  %v6651_v0 = vld [vmem:[%s12011_s3 + $0x30] sm:$0xf0] }
  0x2a   : > { %1171 = vmatpush.bf16.msrb.mxu2 %v6698_v3  ;;  %v7841_v1 = vld [vmem:[%s12011_s3 + $0x104] sm:$0xf]  ;;  %v6763_v2 = vld [vmem:[%s12011_s3 + $0x110] sm:$0xf0]  ;;  %v6654_v3 = vor.u32 %v7813_v62, %v6651_v0  ;;  %v7792_v7 = vld [vmem:[%s8698_s27 + $0x38] sm:$0xff] }
  0x2b   : > { %1260 = vmatpush.bf16.msrb.mxu3 %v6826_v8  ;;  %1349 = vmatpush.bf16.msrb.mxu0 %v6702_v21  ;;  %v6766_v4 = vor.u32 %v7841_v1, %v6763_v2  ;;  %v7809_v5 = vld [vmem:[%s12011_s3 + $0x4] sm:$0xf]  ;;  %v6635_v6 = vld [vmem:[%s12011_s3 + $0x10] sm:$0xf0]  ;;  %v6881_v12 = vld [vmem:[%s12011_s3 + $0x1e8] sm:$0xf] }
  0x2c   : > { %1438 = vmatpush.bf16.msrb.mxu1 %v6830_v17  ;;  %v6638_v8 = vor.u32 %v7809_v5, %v6635_v6  ;;  %v325_v15 = vld [vmem:[%s12010_s2] sm:$0x3]  ;;  %v7870_v20 = vld [vmem:[%s12011_s3 + $0x1ec] sm:$0xf]  ;;  %v6883_v21 = vld [vmem:[%s12011_s3 + $0x1f8] sm:$0xf0] }
  0x2d   : > { %6600 = vmatmul.msk.bf16.gmra.mxu0 %vm451_vm0, %v7786_v45  ;;  %6609 = vmatmul.msk.bf16.gmra.mxu2 %vm451_vm0, %v7795_v46  ;;  %v8945_v18 = vperm.slane %v325_v15, 1  ;;  %v8947_v19 = vperm.slane %v325_v15, 0  ;;  %v7838_v49 = vld [vmem:[%s12011_s3 + $0xec] sm:$0xf] }
  0x2e   : > { %6616 = vmatmul.msk.bf16.gmra.mxu1 %vm451_vm0, %v7786_v45  ;;  %1172 = vmatpush.bf16.msrb.mxu2 %v6682_v13  ;;  %v6777_v45 = vld [vmem:[%s12011_s3 + $0x120] sm:$0xf]  ;;  %v7872_v13 = vld [vmem:[%s12011_s3 + $0x1f4] sm:$0xf0] }
  0x2f   : > { %1261 = vmatpush.bf16.msrb.mxu3 %v6810_v22  ;;  %1350 = vmatpush.bf16.msrb.mxu0 %v6686_v37  ;;  %v6778_v50 = vor.u32 %v7847_v47, %v6777_v45  ;;  %v6882_v14 = vor.u32 %v7872_v13, %v6881_v12  ;;  %v6886_v22 = vor.u32 %v7870_v20, %v6883_v21  ;;  %v7866_v13 = vld [vmem:[%s12011_s3 + $0x1cc] sm:$0xf] }
  0x30   : > { %6624 = vmatmul.msk.bf16.gmra.mxu3 %vm451_vm0, %v7794_v31  ;;  %v6814_v31 = vor.u32 %v7853_v28, %v6811_v29 }
  0x32   : > { %1173 = vmatpush.bf16.msrb.mxu2 %v6666_v27  ;;  %1439 = vmatpush.bf16.msrb.mxu1 %v6814_v31 }
  0x33   : > { %1262 = vmatpush.bf16.msrb.mxu3 %v6794_v36  ;;  %1351 = vmatpush.bf16.msrb.mxu0 %v6670_v51 }
  0x36   : > { %1174 = vmatpush.bf16.msrb.mxu2 %v6650_v42  ;;  %v6737_v42 = vld [vmem:[%s12011_s3 + $0xc8] sm:$0xf] }
  0x37   : > { %1263 = vmatpush.bf16.msrb.mxu3 %v6778_v50  ;;  %1352 = vmatpush.bf16.msrb.mxu0 %v6654_v3  ;;  %v6755_v50 = vld [vmem:[%s12011_s3 + $0xf8] sm:$0xf0]  ;;  %v6865_v3 = vld [vmem:[%s12011_s3 + $0x1c8] sm:$0xf] }
  0x38   : > { %v6758_v51 = vor.u32 %v7838_v49, %v6755_v50  ;;  %v7834_v49 = vld [vmem:[%s12011_s3 + $0xcc] sm:$0xf]  ;;  %v6739_v50 = vld [vmem:[%s12011_s3 + $0xd8] sm:$0xf0] }
  0x3a   : > { %1175 = vmatpush.bf16.msrb.mxu2 %v6634_v57 }
  0x3b   : > { %1353 = vmatpush.bf16.msrb.mxu0 %v6638_v8 }
  0x3d   : > { %6601 = vmatmul.msk.bf16.gmra.mxu0 %vm451_vm0, %v7787_v59  ;;  %6610 = vmatmul.msk.bf16.gmra.mxu2 %vm451_vm0, %v7796_v60 }
  0x3e   : > { %6617 = vmatmul.msk.bf16.gmra.mxu1 %vm451_vm0, %v7787_v59  ;;  %v6782_v59 = vor.u32 %v7845_v56, %v6779_v58 }
  0x3f   : > { %1702 = vmatpush.bf16.msra.mxu0 %v6758_v51  ;;  %v6742_v51 = vor.u32 %v7834_v49, %v6739_v50 }
  0x40   : > { %6625 = vmatmul.msk.bf16.gmra.mxu3 %vm451_vm0, %v7795_v46  ;;  %v6798_v46 = vor.u32 %v7849_v43, %v6795_v44  ;;  %v7836_v43 = vld [vmem:[%s12011_s3 + $0xd4] sm:$0xf0] }
  0x41   : > { %v6738_v45 = vor.u32 %v7836_v43, %v6737_v42  ;;  %v7832_v42 = vld [vmem:[%s12011_s3 + $0xb4] sm:$0xf0] }
  0x42   : > { %1440 = vmatpush.bf16.msrb.mxu1 %v6798_v46 }
  0x43   : > { %1703 = vmatpush.bf16.msra.mxu0 %v6742_v51 }
  0x46   : > { %1441 = vmatpush.bf16.msrb.mxu1 %v6782_v59 }
  0x4a   : > { %1442 = vmatpush.bf16.msrb.mxu1 %v6766_v4  ;;  %v7868_v4 = vld [vmem:[%s12011_s3 + $0x1d4] sm:$0xf0] }
  0x4b   : > { %v6866_v6 = vor.u32 %v7868_v4, %v6865_v3 }
  0x4d   : > { %6602 = vmatmul.msk.bf16.gmra.mxu0 %vm451_vm0, %v7788_v9  ;;  %6611 = vmatmul.msk.bf16.gmra.mxu2 %vm451_vm0, %v7797_v10 }
  0x4e   : > { %6618 = vmatmul.msk.bf16.gmra.mxu1 %vm451_vm0, %v7788_v9  ;;  %v6753_v9 = vld [vmem:[%s12011_s3 + $0xe8] sm:$0xf] }
  0x4f   : > { %1791 = vmatpush.bf16.msra.mxu1 %v6886_v22 }
  0x50   : > { %6626 = vmatmul.msk.bf16.gmra.mxu3 %vm451_vm0, %v7796_v60  ;;  %v6761_v60 = vld [vmem:[%s12011_s3 + $0x100] sm:$0xf] }
  0x51   : > { %v6762_v63 = vor.u32 %v7843_v61, %v6761_v60 }
  0x53   : > { %1264 = vmatpush.bf16.msrb.mxu3 %v6762_v63 }
  0x57   : > { %1613 = vmatpush.bf16.msra.mxu3 %v6882_v14  ;;  %v6867_v14 = vld [vmem:[%s12011_s3 + $0x1d8] sm:$0xf0] }
  0x58   : > { %v6870_v15 = vor.u32 %v7866_v13, %v6867_v14 }
  0x5a   : > { %1792 = vmatpush.bf16.msra.mxu1 %v6870_v15 }
  0x5b   : > { %1614 = vmatpush.bf16.msra.mxu3 %v6866_v6  ;;  %v6849_v6 = vld [vmem:[%s12011_s3 + $0x1a8] sm:$0xf] }
  0x5d   : > { %6603 = vmatmul.msk.bf16.gmra.mxu0 %vm451_vm0, %v7789_v23  ;;  %6612 = vmatmul.msk.bf16.gmra.mxu2 %vm451_vm0, %v7798_v24 }
  0x5e   : > { %6619 = vmatmul.msk.bf16.gmra.mxu1 %vm451_vm0, %v7789_v23 }
  0x60   : > { %6627 = vmatmul.msk.bf16.gmra.mxu3 %vm451_vm0, %v7797_v10  ;;  %v7840_v10 = vld [vmem:[%s12011_s3 + $0xf4] sm:$0xf0] }
  0x61   : > { %v6754_v11 = vor.u32 %v7840_v10, %v6753_v9 }
  0x63   : > { %1524 = vmatpush.bf16.msra.mxu2 %v6754_v11 }
  0x67   : > { %1525 = vmatpush.bf16.msra.mxu2 %v6738_v45 }
  0x6d   : > { %6604 = vmatmul.msk.bf16.gmra.mxu0 %vm451_vm0, %v7790_v38  ;;  %6613 = vmatmul.msk.bf16.gmra.mxu2 %vm451_vm0, %v7799_v39 }
  0x6e   : > { %6620 = vmatmul.msk.bf16.gmra.mxu1 %vm451_vm0, %v7790_v38 }
  0x70   : > { %6628 = vmatmul.msk.bf16.gmra.mxu3 %vm451_vm0, %v7798_v24 }
  0x7d   : > { %6605 = vmatmul.msk.bf16.gmra.mxu0 %vm451_vm0, %v7791_v52  ;;  %6614 = vmatmul.msk.bf16.gmra.mxu2 %vm451_vm0, %v7800_v53 }
  0x7e   : > { %6621 = vmatmul.msk.bf16.gmra.mxu1 %vm451_vm0, %v7791_v52 }
  0x80   : > { %6629 = vmatmul.msk.bf16.gmra.mxu3 %vm451_vm0, %v7799_v39 }
  0x8d   : > { %6606 = vmatmul.msk.bf16.gmra.mxu0 %vm451_vm0, %v7792_v7 }
  0x8e   : > { %6622 = vmatmul.msk.bf16.gmra.mxu1 %vm451_vm0, %v7792_v7 }
  0x90   : > { %6630 = vmatmul.msk.bf16.gmra.mxu3 %vm451_vm0, %v7800_v53 }
  0x9a   : > { %v509_v16 = vpop.f32.mrf.mxu0 }
  0x9b   : > { %v598_v17 = vpop.f32.mrf.mxu1  ;;  %v510_v24 = vadd.f32 %v509_v16, %v8947_v19 }
  0x9c   : > { %v599_v23 = vadd.f32 %v598_v17, %v8945_v18 }
  0x9d   : > { %6607 = vmatmul.msk.bf16.gmra.mxu0 %vm451_vm0, %v8703_v32  ;;  %v678_v31 = vmax.f32 %v510_v24, 0.0 }
  0x9e   : > { %v679_v29 = vmax.f32 %v599_v23, 0.0 }
  0xa0   : > { %v8959_v27 = vpop.f32.mrf.mxu2 }
  0xa2   : > { %v511_v26 = vpop.f32.mrf.mxu0 }
  0xa3   : > { %v638_v25 = vpop.f32.mrf.mxu3  ;;  %v512_v32 = vadd.f32 %v511_v26, %v8947_v19  ;;  %v600_v28 = vpop.f32.mrf.mxu1 }
  0xa4   : > { %v601_v30 = vadd.f32 %v600_v28, %v8945_v18  ;;  %v639_v35 = vadd.f32 %v638_v25, %v8945_v18 }
  0xa5   : > { %v680_v33 = vmax.f32 %v512_v32, 0.0 }
  0xa6   : > { %v681_v34 = vmax.f32 %v601_v30, 0.0  ;;  %v711_v40 = vmax.f32 %v639_v35, 0.0 }
  0xa7   : > { %v8964_v36 = vpack.c.bf16 %v680_v33, %v678_v31 }
  0xa8   : > { %v8966_v37 = vpack.c.bf16 %v681_v34, %v679_v29  ;;  %v8978_v47 = vpop.f32.mrf.mxu2 }
  0xa9   : > { %1176 = vmatmul.bf16.vlgmr.msrb.gmra.mxu2 %v8964_v36 }
  0xaa   : > { %1265 = vmatmul.bf16.vlgmr.msrb.gmra.mxu3 %v8966_v37  ;;  %1443 = vmatmul.bf16.vlgmr.msrb.gmra.mxu1 %v8966_v37  ;;  %v514_v39 = vpop.f32.mrf.mxu0 }
  0xab   : > { %v640_v38 = vpop.f32.mrf.mxu3  ;;  %v603_v44 = vpop.f32.mrf.mxu1  ;;  %v515_v53 = vadd.f32 %v514_v39, %v8947_v19 }
  0xac   : > { %v641_v41 = vadd.f32 %v640_v38, %v8945_v18  ;;  %v604_v52 = vadd.f32 %v603_v44, %v8945_v18 }
  0xad   : > { %1354 = vmatmul.bf16.vlgmr.msrb.gmra.mxu0 %v8964_v36  ;;  %v682_v60 = vmax.f32 %v515_v53, 0.0 }
  0xae   : > { %v713_v46 = vmax.f32 %v641_v41, 0.0  ;;  %v683_v58 = vmax.f32 %v604_v52, 0.0  ;;  %v6721_v41 = vld [vmem:[%s12011_s3 + $0xa8] sm:$0xf] }
  0xaf   : > { %v6722_v44 = vor.u32 %v7832_v42, %v6721_v41 }
  0xb0   : > { %v8981_v48 = vpack.c.bf16 %v713_v46, %v711_v40  ;;  %v8994_v0 = vpop.f32.mrf.mxu2 }
  0xb1   : > { %1526 = vmatpush.bf16.msra.mxu2 %v6722_v44 }
  0xb2   : > { %v516_v55 = vpop.f32.mrf.mxu0 }
  0xb3   : > { %v643_v54 = vpop.f32.mrf.mxu3  ;;  %v517_v56 = vadd.f32 %v516_v55, %v8947_v19  ;;  %v605_v57 = vpop.f32.mrf.mxu1 }
  0xb4   : > { %v606_v59 = vadd.f32 %v605_v57, %v8945_v18  ;;  %v644_v63 = vadd.f32 %v643_v54, %v8945_v18 }
  0xb5   : > { %v684_v61 = vmax.f32 %v517_v56, 0.0 }
  0xb6   : > { %v685_v62 = vmax.f32 %v606_v59, 0.0  ;;  %v715_v8 = vmax.f32 %v644_v63, 0.0 }
  0xb7   : > { %v8996_v1 = vpack.c.bf16 %v684_v61, %v682_v60 }
  0xb8   : > { %v8998_v2 = vpack.c.bf16 %v685_v62, %v683_v58  ;;  %v9020_v17 = vpop.f32.mrf.mxu2 }
  0xb9   : > { %1181 = vmatmul.bf16.gmra.mxu2 %v8996_v1 }
  0xba   : > { %1270 = vmatmul.bf16.gmra.mxu3 %v8998_v2  ;;  %1448 = vmatmul.bf16.gmra.mxu1 %v8998_v2  ;;  %v519_v7 = vpop.f32.mrf.mxu0 }
  0xbb   : > { %v645_v5 = vpop.f32.mrf.mxu3  ;;  %v608_v10 = vpop.f32.mrf.mxu1  ;;  %v520_v20 = vadd.f32 %v519_v7, %v8947_v19  ;;  %v7864_v7 = vld [vmem:[%s12011_s3 + $0x1b4] sm:$0xf0] }
  0xbc   : > { %v646_v9 = vadd.f32 %v645_v5, %v8945_v18  ;;  %v609_v16 = vadd.f32 %v608_v10, %v8945_v18 }
  0xbd   : > { %1359 = vmatmul.bf16.gmra.mxu0 %v8996_v1  ;;  %v686_v32 = vmax.f32 %v520_v20, 0.0 }
  0xbe   : > { %v717_v11 = vmax.f32 %v646_v9, 0.0  ;;  %v687_v25 = vmax.f32 %v609_v16, 0.0  ;;  %v6850_v9 = vor.u32 %v7864_v7, %v6849_v6 }
  0xc0   : > { %v9011_v12 = vpack.c.bf16 %v717_v11, %v715_v8  ;;  %v9033_v39 = vpop.f32.mrf.mxu2  ;;  %1615 = vmatpush.bf16.msra.mxu3 %v6850_v9 }
  0xc2   : > { %v521_v22 = vpop.f32.mrf.mxu0 }
  0xc3   : > { %v648_v21 = vpop.f32.mrf.mxu3  ;;  %v522_v23 = vadd.f32 %v521_v22, %v8947_v19  ;;  %v610_v24 = vpop.f32.mrf.mxu1  ;;  %v6851_v22 = vld [vmem:[%s12011_s3 + $0x1b8] sm:$0xf0] }
  0xc4   : > { %v611_v26 = vadd.f32 %v610_v24, %v8945_v18  ;;  %v649_v30 = vadd.f32 %v648_v21, %v8945_v18  ;;  %v7862_v21 = vld [vmem:[%s12011_s3 + $0x1ac] sm:$0xf] }
  0xc5   : > { %v688_v28 = vmax.f32 %v522_v23, 0.0  ;;  %v6854_v23 = vor.u32 %v7862_v21, %v6851_v22 }
  0xc6   : > { %v689_v29 = vmax.f32 %v611_v26, 0.0  ;;  %v719_v38 = vmax.f32 %v649_v30, 0.0 }
  0xc7   : > { %v9026_v31 = vpack.c.bf16 %v688_v28, %v686_v32  ;;  %1793 = vmatpush.bf16.msra.mxu1 %v6854_v23 }
  0xc8   : > { %v9028_v33 = vpack.c.bf16 %v689_v29, %v687_v25  ;;  %v9055_v60 = vpop.f32.mrf.mxu2 }
  0xc9   : > { %1186 = vmatmul.bf16.gmra.mxu2 %v9026_v31 }
  0xca   : > { %1275 = vmatmul.bf16.gmra.mxu3 %v9028_v33  ;;  %1453 = vmatmul.bf16.gmra.mxu1 %v9028_v33  ;;  %v524_v35 = vpop.f32.mrf.mxu0 }
  0xcb   : > { %v650_v34 = vpop.f32.mrf.mxu3  ;;  %v613_v43 = vpop.f32.mrf.mxu1  ;;  %v525_v53 = vadd.f32 %v524_v35, %v8947_v19 }
  0xcc   : > { %v651_v40 = vadd.f32 %v650_v34, %v8945_v18  ;;  %v614_v52 = vadd.f32 %v613_v43, %v8945_v18 }
  0xcd   : > { %1364 = vmatmul.bf16.gmra.mxu0 %v9026_v31  ;;  %v690_v61 = vmax.f32 %v525_v53, 0.0  ;;  %v7828_v53 = vld [vmem:[%s12011_s3 + $0x94] sm:$0xf0] }
  0xce   : > { %v721_v45 = vmax.f32 %v651_v40, 0.0  ;;  %v691_v58 = vmax.f32 %v614_v52, 0.0  ;;  %v6705_v52 = vld [vmem:[%s12011_s3 + $0x88] sm:$0xf] }
  0xd0   : > { %v9043_v46 = vpack.c.bf16 %v721_v45, %v719_v38  ;;  %v9073_v16 = vpop.f32.mrf.mxu2 }
  0xd2   : > { %v526_v55 = vpop.f32.mrf.mxu0 }
  0xd3   : > { %v653_v54 = vpop.f32.mrf.mxu3  ;;  %v527_v56 = vadd.f32 %v526_v55, %v8947_v19  ;;  %v615_v57 = vpop.f32.mrf.mxu1  ;;  %v6706_v55 = vor.u32 %v7828_v53, %v6705_v52 }
  0xd4   : > { %v616_v59 = vadd.f32 %v615_v57, %v8945_v18  ;;  %v654_v3 = vadd.f32 %v653_v54, %v8945_v18 }
  0xd5   : > { %v692_v62 = vmax.f32 %v527_v56, 0.0  ;;  %1527 = vmatpush.bf16.msra.mxu2 %v6706_v55 }
  0xd6   : > { %v693_v63 = vmax.f32 %v616_v59, 0.0  ;;  %v723_v11 = vmax.f32 %v654_v3, 0.0  ;;  %v6723_v59 = vld [vmem:[%s12011_s3 + $0xb8] sm:$0xf0] }
  0xd7   : > { %v9058_v4 = vpack.c.bf16 %v692_v62, %v690_v61 }
  0xd8   : > { %v9060_v5 = vpack.c.bf16 %v693_v63, %v691_v58  ;;  %v9092_v44 = vpop.f32.mrf.mxu2  ;;  %v7830_v58 = vld [vmem:[%s12011_s3 + $0xac] sm:$0xf] }
  0xd9   : > { %1191 = vmatmul.bf16.gmra.mxu2 %v9058_v4  ;;  %v6726_v61 = vor.u32 %v7830_v58, %v6723_v59 }
  0xda   : > { %1280 = vmatmul.bf16.gmra.mxu3 %v9060_v5  ;;  %1458 = vmatmul.bf16.gmra.mxu1 %v9060_v5  ;;  %v529_v10 = vpop.f32.mrf.mxu0 }
  0xdb   : > { %v655_v8 = vpop.f32.mrf.mxu3  ;;  %v618_v14 = vpop.f32.mrf.mxu1  ;;  %v530_v25 = vadd.f32 %v529_v10, %v8947_v19  ;;  %1704 = vmatpush.bf16.msra.mxu0 %v6726_v61 }
  0xdc   : > { %v656_v13 = vadd.f32 %v655_v8, %v8945_v18  ;;  %v619_v24 = vadd.f32 %v618_v14, %v8945_v18 }
  0xdd   : > { %1369 = vmatmul.bf16.gmra.mxu0 %v9058_v4  ;;  %v694_v35 = vmax.f32 %v530_v25, 0.0  ;;  %v7860_v25 = vld [vmem:[%s12011_s3 + $0x194] sm:$0xf0] }
  0xde   : > { %v725_v15 = vmax.f32 %v656_v13, 0.0  ;;  %v695_v30 = vmax.f32 %v619_v24, 0.0  ;;  %v6833_v24 = vld [vmem:[%s12011_s3 + $0x188] sm:$0xf] }
  0xe0   : > { %v9075_v20 = vpack.c.bf16 %v725_v15, %v723_v11  ;;  %v9115_v7 = vpop.f32.mrf.mxu2 }
  0xe2   : > { %v531_v32 = vpop.f32.mrf.mxu0 }
  0xe3   : > { %v658_v26 = vpop.f32.mrf.mxu3  ;;  %v532_v28 = vadd.f32 %v531_v32, %v8947_v19  ;;  %v620_v29 = vpop.f32.mrf.mxu1  ;;  %v6834_v32 = vor.u32 %v7860_v25, %v6833_v24 }
  0xe4   : > { %v621_v34 = vadd.f32 %v620_v29, %v8945_v18  ;;  %v659_v41 = vadd.f32 %v658_v26, %v8945_v18 }
  0xe5   : > { %v696_v38 = vmax.f32 %v532_v28, 0.0  ;;  %1616 = vmatpush.bf16.msra.mxu3 %v6834_v32 }
  0xe6   : > { %v697_v40 = vmax.f32 %v621_v34, 0.0  ;;  %v727_v50 = vmax.f32 %v659_v41, 0.0  ;;  %v6835_v41 = vld [vmem:[%s12011_s3 + $0x198] sm:$0xf0] }
  0xe7   : > { %v9088_v42 = vpack.c.bf16 %v696_v38, %v694_v35 }
  0xe8   : > { %v9090_v43 = vpack.c.bf16 %v697_v40, %v695_v30  ;;  %v9134_v35 = vpop.f32.mrf.mxu2  ;;  %v7858_v40 = vld [vmem:[%s12011_s3 + $0x18c] sm:$0xf] }
  0xe9   : > { %1196 = vmatmul.bf16.gmra.mxu2 %v9088_v42 }
  0xea   : > { %1285 = vmatmul.bf16.gmra.mxu3 %v9090_v43  ;;  %1463 = vmatmul.bf16.gmra.mxu1 %v9090_v43  ;;  %v534_v49 = vpop.f32.mrf.mxu0 }
  0xeb   : > { %v660_v45 = vpop.f32.mrf.mxu3  ;;  %v623_v54 = vpop.f32.mrf.mxu1  ;;  %v535_v63 = vadd.f32 %v534_v49, %v8947_v19  ;;  %v6838_v49 = vor.u32 %v7858_v40, %v6835_v41 }
  0xec   : > { %v661_v51 = vadd.f32 %v660_v45, %v8945_v18  ;;  %v624_v62 = vadd.f32 %v623_v54, %v8945_v18 }
  0xed   : > { %1374 = vmatmul.bf16.gmra.mxu0 %v9088_v42  ;;  %v698_v13 = vmax.f32 %v535_v63, 0.0  ;;  %1794 = vmatpush.bf16.msra.mxu1 %v6838_v49 }
  0xee   : > { %v729_v56 = vmax.f32 %v661_v51, 0.0  ;;  %v699_v10 = vmax.f32 %v624_v62, 0.0 }
  0xf0   : > { %v9105_v57 = vpack.c.bf16 %v729_v56, %v727_v50  ;;  %v9149_v63 = vpop.f32.mrf.mxu2 }
  0xf2   : > { %v536_v6 = vpop.f32.mrf.mxu0 }
  0xf3   : > { %v663_v3 = vpop.f32.mrf.mxu3  ;;  %v537_v8 = vadd.f32 %v536_v6, %v8947_v19  ;;  %v625_v9 = vpop.f32.mrf.mxu1 }
  0xf4   : > { %v626_v11 = vadd.f32 %v625_v9, %v8945_v18  ;;  %v664_v21 = vadd.f32 %v663_v3, %v8945_v18 }
  0xf5   : > { %v700_v14 = vmax.f32 %v537_v8, 0.0 }
  0xf6   : > { %v701_v15 = vmax.f32 %v626_v11, 0.0  ;;  %v731_v29 = vmax.f32 %v664_v21, 0.0 }
  0xf7   : > { %v9120_v22 = vpack.c.bf16 %v700_v14, %v698_v13  ;;  %v6689_v14 = vld [vmem:[%s12011_s3 + $0x68] sm:$0xf] }
  0xf8   : > { %v9122_v23 = vpack.c.bf16 %v701_v15, %v699_v10  ;;  %v7824_v15 = vld [vmem:[%s12011_s3 + $0x74] sm:$0xf0] }
  0xf9   : > { %1201 = vmatmul.bf16.gmra.mxu2 %v9120_v22  ;;  %v6690_v24 = vor.u32 %v7824_v15, %v6689_v14 }
  0xfa   : > { %1290 = vmatmul.bf16.gmra.mxu3 %v9122_v23  ;;  %1468 = vmatmul.bf16.gmra.mxu1 %v9122_v23  ;;  %v539_v28 = vpop.f32.mrf.mxu0 }
  0xfb   : > { %v665_v26 = vpop.f32.mrf.mxu3  ;;  %v628_v34 = vpop.f32.mrf.mxu1  ;;  %v540_v51 = vadd.f32 %v539_v28, %v8947_v19  ;;  %1528 = vmatpush.bf16.msra.mxu2 %v6690_v24 }
  0xfc   : > { %v666_v30 = vadd.f32 %v665_v26, %v8945_v18  ;;  %v629_v50 = vadd.f32 %v628_v34, %v8945_v18  ;;  %v9170_v28 = vpop.f32.mrf.mxu2  ;;  %v7826_v34 = vld [vmem:[%s12011_s3 + $0x8c] sm:$0xf] }
  0xfd   : > { %1379 = vmatmul.bf16.gmra.mxu0 %v9120_v22  ;;  %v702_v59 = vmax.f32 %v540_v51, 0.0 }
  0xfe   : > { %v733_v38 = vmax.f32 %v666_v30, 0.0  ;;  %v703_v56 = vmax.f32 %v629_v50, 0.0 }
 0x100   : > { %v9143_v45 = vpack.c.bf16 %v733_v38, %v731_v29  ;;  %v6707_v38 = vld [vmem:[%s12011_s3 + $0x98] sm:$0xf0] }
 0x101   : > { %v6710_v41 = vor.u32 %v7826_v34, %v6707_v38  ;;  %v838_v38 = vld [vmem:[%s12012_s4] sm:$0xf] }
 0x102   : > { %v541_v53 = vpop.f32.mrf.mxu0 }
 0x103   : > { %v668_v52 = vpop.f32.mrf.mxu3  ;;  %v542_v54 = vadd.f32 %v541_v53, %v8947_v19  ;;  %v630_v55 = vpop.f32.mrf.mxu1  ;;  %1705 = vmatpush.bf16.msra.mxu0 %v6710_v41 }
 0x104   : > { %v631_v58 = vadd.f32 %v630_v55, %v8945_v18  ;;  %v669_v3 = vadd.f32 %v668_v52, %v8945_v18 }
 0x105   : > { %v704_v61 = vmax.f32 %v542_v54, 0.0 }
 0x106   : > { %v705_v62 = vmax.f32 %v631_v58, 0.0  ;;  %v735_v11 = vmax.f32 %v669_v3, 0.0 }
 0x107   : > { %v9152_v6 = vpack.c.bf16 %v704_v61, %v702_v59 }
 0x108   : > { %v9154_v8 = vpack.c.bf16 %v705_v62, %v703_v56  ;;  %v9187_v62 = vpop.f32.mrf.mxu2 }
 0x109   : > { %1206 = vmatmul.bf16.gmra.mxu2 %v9152_v6 }
 0x10a   : > { %1295 = vmatmul.bf16.gmra.mxu3 %v9154_v8  ;;  %1473 = vmatmul.bf16.gmra.mxu1 %v9154_v8  ;;  %v544_v10 = vpop.f32.mrf.mxu0 }
 0x10b   : > { %v670_v9 = vpop.f32.mrf.mxu3  ;;  %v633_v21 = vpop.f32.mrf.mxu1  ;;  %v545_v29 = vadd.f32 %v544_v10, %v8947_v19 }
 0x10c   : > { %v671_v13 = vadd.f32 %v670_v9, %v8945_v18  ;;  %v634_v32 = vadd.f32 %v633_v21, %v8945_v18 }
 0x10d   : > { %1384 = vmatmul.bf16.gmra.mxu0 %v9152_v6  ;;  %v706_v53 = vmax.f32 %v545_v29, 0.0 }
 0x10e   : > { %v737_v25 = vmax.f32 %v671_v13, 0.0  ;;  %v707_v51 = vmax.f32 %v634_v32, 0.0  ;;  %v7856_v13 = vld [vmem:[%s12011_s3 + $0x174] sm:$0xf0] }
 0x110   : > { %v9167_v26 = vpack.c.bf16 %v737_v25, %v735_v11  ;;  %v6817_v11 = vld [vmem:[%s12011_s3 + $0x168] sm:$0xf]  ;;  %v6819_v25 = vld [vmem:[%s12011_s3 + $0x178] sm:$0xf0]  ;;  %v9209_v34 = vpop.f32.mrf.mxu2 }
 0x111   : > { %v6818_v15 = vor.u32 %v7856_v13, %v6817_v11  ;;  %v555_v13 = vadd.f32 %v8959_v27, %v8947_v19 }
 0x112   : > { %v546_v40 = vpop.f32.mrf.mxu0 }
 0x113   : > { %v673_v30 = vpop.f32.mrf.mxu3  ;;  %v547_v49 = vadd.f32 %v546_v40, %v8947_v19  ;;  %v635_v50 = vpop.f32.mrf.mxu1  ;;  %1617 = vmatpush.bf16.msra.mxu3 %v6818_v15 }
 0x114   : > { %v636_v52 = vadd.f32 %v635_v50, %v8945_v18  ;;  %v674_v56 = vadd.f32 %v673_v30, %v8945_v18 }
 0x115   : > { %v708_v54 = vmax.f32 %v547_v49, 0.0 }
 0x116   : > { %v709_v55 = vmax.f32 %v636_v52, 0.0  ;;  %v739_v9 = vmax.f32 %v674_v56, 0.0  ;;  %v9219_v52 = vperm.slane %v838_v38, 0  ;;  %v7820_v56 = vld [vmem:[%s12011_s3 + $0x54] sm:$0xf0] }
 0x117   : > { %v9182_v58 = vpack.c.bf16 %v708_v54, %v706_v53 }
 0x118   : > { %v9184_v59 = vpack.c.bf16 %v709_v55, %v707_v51  ;;  %v9216_v51 = vperm.slane %v838_v38, 1  ;;  %v6673_v55 = vld [vmem:[%s12011_s3 + $0x48] sm:$0xf] }
 0x119   : > { %1211 = vmatmul.bf16.gmra.mxu2 %v9182_v58 }
 0x11a   : > { %1300 = vmatmul.bf16.gmra.mxu3 %v9184_v59  ;;  %1478 = vmatmul.bf16.gmra.mxu1 %v9184_v59  ;;  %v549_v3 = vpop.f32.mrf.mxu0 }
 0x11b   : > { %v675_v61 = vpop.f32.mrf.mxu3  ;;  %v550_v24 = vadd.f32 %v549_v3, %v8947_v19  ;;  %v6674_v3 = vor.u32 %v7820_v56, %v6673_v55 }
 0x11c   : > { %v676_v10 = vadd.f32 %v675_v61, %v8945_v18  ;;  %v7854_v18 = vld [vmem:[%s12011_s3 + $0x16c] sm:$0xf] }
 0x11d   : > { %1389 = vmatmul.bf16.gmra.mxu0 %v9182_v58  ;;  %v6822_v29 = vor.u32 %v7854_v18, %v6819_v25  ;;  %v710_v40 = vmax.f32 %v550_v24, 0.0  ;;  %1529 = vmatpush.bf16.msra.mxu2 %v6674_v3  ;;  %v7822_v18 = vld [vmem:[%s12011_s3 + $0x6c] sm:$0xf]  ;;  %v6691_v25 = vld [vmem:[%s12011_s3 + $0x78] sm:$0xf0] }
 0x11e   : > { %v741_v14 = vmax.f32 %v676_v10, 0.0 }
 0x11f   : > { %1795 = vmatpush.bf16.msra.mxu1 %v6822_v29  ;;  %v6694_v29 = vor.u32 %v7822_v18, %v6691_v25 }
 0x120   : > { %v9199_v21 = vpack.c.bf16 %v741_v14, %v739_v9  ;;  %v557_v14 = vadd.f32 %v8978_v47, %v8947_v19 }
 0x121   : > { %1706 = vmatpush.bf16.msra.mxu0 %v6694_v29 }
 0x122   : > { %v551_v32 = vpop.f32.mrf.mxu0  ;;  %v716_v38 = vmax.f32 %v557_v14, 0.0 }
 0x123   : > { %v552_v30 = vadd.f32 %v551_v32, %v8947_v19 }
 0x125   : > { %v712_v41 = vmax.f32 %v552_v30, 0.0  ;;  %v714_v30 = vmax.f32 %v555_v13, 0.0 }
 0x127   : > { %v9214_v49 = vpack.c.bf16 %v712_v41, %v710_v40  ;;  %v1444_v50 = vpop.f32.mrf.mxu1 }
 0x129   : > { %1216 = vmatmul.bf16.gmra.mxu2 %v9214_v49 }
 0x12a   : > { %1305 = vmatmul.bf16.gmra.mxu3 %v8981_v48  ;;  %1483 = vmatmul.bf16.gmra.mxu1 %v8981_v48  ;;  %v1355_v53 = vpop.f32.mrf.mxu0 }
 0x12b   : > { %v1356_v54 = vadd.f32 %v1355_v53, %v9216_v51  ;;  %v9244_v53 = vpack.c.bf16 %v716_v38, %v714_v30  ;;  %v560_v38 = vadd.f32 %v8994_v0, %v8947_v19 }
 0x12c   : > { %v1177_v61 = vpop.f32.mrf.mxu2 }
 0x12d   : > { %v1445_v9 = vadd.f32 %v1444_v50, %v1356_v54  ;;  %v1178_v10 = vadd.f32 %v1177_v61, %v9219_v52  ;;  %v1266_v11 = vpop.f32.mrf.mxu3  ;;  %1394 = vmatmul.bf16.gmra.mxu0 %v9214_v49 }
 0x12f   : > { %v1267_v15 = vadd.f32 %v1266_v11, %v1178_v10  ;;  %v1446_v24 = vpop.f32.mrf.mxu1  ;;  %v1881_v54 = vmax.f32 %v1445_v9, 0.0  ;;  %v6801_v9 = vld [vmem:[%s12011_s3 + $0x148] sm:$0xf] }
 0x131   : > { %v1880_v3 = vmax.f32 %v1267_v15, 0.0  ;;  %v7852_v15 = vld [vmem:[%s12011_s3 + $0x154] sm:$0xf0] }
 0x132   : > { %v1357_v32 = vpop.f32.mrf.mxu0  ;;  %v6802_v25 = vor.u32 %v7852_v15, %v6801_v9 }
 0x133   : > { %v1358_v40 = vadd.f32 %v1357_v32, %v9216_v51 }
 0x134   : > { %v1179_v27 = vpop.f32.mrf.mxu2  ;;  %1618 = vmatpush.bf16.msra.mxu3 %v6802_v25 }
 0x135   : > { %v1447_v41 = vadd.f32 %v1446_v24, %v1358_v40  ;;  %v1180_v47 = vadd.f32 %v1179_v27, %v9219_v52  ;;  %v1268_v50 = vpop.f32.mrf.mxu3  ;;  %v562_v40 = vadd.f32 %v9020_v17, %v8947_v19 }
 0x137   : > { %v1885_v55 = vmax.f32 %v1447_v41, 0.0  ;;  %v1269_v56 = vadd.f32 %v1268_v50, %v1180_v47  ;;  %v1449_v61 = vpop.f32.mrf.mxu1  ;;  %v7850_v47 = vld [vmem:[%s12011_s3 + $0x14c] sm:$0xf]  ;;  %v6803_v50 = vld [vmem:[%s12011_s3 + $0x158] sm:$0xf0] }
 0x139   : > { %v9246_v10 = vpack.c.bf16 %v1885_v55, %v1881_v54  ;;  %v1884_v11 = vmax.f32 %v1269_v56, 0.0  ;;  %1221 = vmatmul.bf16.gmra.mxu2 %v9244_v53  ;;  %v6806_v55 = vor.u32 %v7850_v47, %v6803_v50  ;;  %v718_v56 = vmax.f32 %v560_v38, 0.0 }
 0x13a   : > { %1310 = vmatmul.bf16.gmra.mxu3 %v9011_v12  ;;  %1488 = vmatmul.bf16.gmra.mxu1 %v9011_v12  ;;  %v1360_v13 = vpop.f32.mrf.mxu0 }
 0x13b   : > { %12086 = vst [vmem:[#allocation2_spill] sm:$0xff] %v9246_v10  ;;  %v9251_v14 = vpack.c.bf16 %v1884_v11, %v1880_v3  ;;  %v1361_v24 = vadd.f32 %v1360_v13, %v9216_v51  ;;  %1796 = vmatpush.bf16.msra.mxu1 %v6806_v55 }
 0x13c   : > { %v1182_v18 = vpop.f32.mrf.mxu2 }
 0x13d   : > { %12087 = vst [vmem:[#allocation3_spill] sm:$0xff] %v9251_v14  ;;  %v1450_v32 = vadd.f32 %v1449_v61, %v1361_v24  ;;  %v1183_v29 = vadd.f32 %v1182_v18, %v9219_v52  ;;  %v1271_v30 = vpop.f32.mrf.mxu3  ;;  %1399 = vmatmul.bf16.gmra.mxu0 %v9244_v53  ;;  %v720_v61 = vmax.f32 %v562_v40, 0.0 }
 0x13f   : > { %v1272_v27 = vadd.f32 %v1271_v30, %v1183_v29  ;;  %v1451_v41 = vpop.f32.mrf.mxu1  ;;  %v9274_v24 = vpack.c.bf16 %v720_v61, %v718_v56  ;;  %v1889_v9 = vmax.f32 %v1450_v32, 0.0  ;;  %v6657_v32 = vld [vmem:[%s12011_s3 + $0x28] sm:$0xf] }
 0x141   : > { %v1888_v29 = vmax.f32 %v1272_v27, 0.0  ;;  %v7816_v27 = vld [vmem:[%s12011_s3 + $0x34] sm:$0xf0] }
 0x142   : > { %v1362_v54 = vpop.f32.mrf.mxu0 }
 0x143   : > { %v1363_v3 = vadd.f32 %v1362_v54, %v9216_v51  ;;  %v6658_v54 = vor.u32 %v7816_v27, %v6657_v32 }
 0x144   : > { %v1184_v0 = vpop.f32.mrf.mxu2 }
 0x145   : > { %v1452_v11 = vadd.f32 %v1451_v41, %v1363_v3  ;;  %v1185_v17 = vadd.f32 %v1184_v0, %v9219_v52  ;;  %v1273_v13 = vpop.f32.mrf.mxu3  ;;  %1530 = vmatpush.bf16.msra.mxu2 %v6658_v54  ;;  %v565_v3 = vadd.f32 %v9033_v39, %v8947_v19  ;;  %v567_v0 = vadd.f32 %v9055_v60, %v8947_v19 }
 0x147   : > { %v1893_v15 = vmax.f32 %v1452_v11, 0.0  ;;  %v1274_v18 = vadd.f32 %v1273_v13, %v1185_v17  ;;  %v1454_v25 = vpop.f32.mrf.mxu1  ;;  %v7818_v13 = vld [vmem:[%s12011_s3 + $0x4c] sm:$0xf] }
 0x149   : > { %v9276_v30 = vpack.c.bf16 %v1893_v15, %v1889_v9  ;;  %v1892_v47 = vmax.f32 %v1274_v18, 0.0  ;;  %1226 = vmatmul.bf16.gmra.mxu2 %v9274_v24  ;;  %v6675_v9 = vld [vmem:[%s12011_s3 + $0x58] sm:$0xf0] }
 0x14a   : > { %1315 = vmatmul.bf16.gmra.mxu3 %v9043_v46  ;;  %1493 = vmatmul.bf16.gmra.mxu1 %v9043_v46  ;;  %v1365_v38 = vpop.f32.mrf.mxu0  ;;  %v6678_v18 = vor.u32 %v7818_v13, %v6675_v9 }
 0x14b   : > { %12088 = vst [vmem:[#allocation4_spill] sm:$0xff] %v9276_v30  ;;  %v9281_v40 = vpack.c.bf16 %v1892_v47, %v1888_v29  ;;  %v1366_v41 = vadd.f32 %v1365_v38, %v9216_v51  ;;  %v724_v29 = vmax.f32 %v567_v0, 0.0 }
 0x14c   : > { %v1187_v50 = vpop.f32.mrf.mxu2  ;;  %1707 = vmatpush.bf16.msra.mxu0 %v6678_v18 }
 0x14d   : > { %12089 = vst [vmem:[#allocation5_spill] sm:$0xff] %v9281_v40  ;;  %v1455_v55 = vadd.f32 %v1454_v25, %v1366_v41  ;;  %v1188_v56 = vadd.f32 %v1187_v50, %v9219_v52  ;;  %v1276_v61 = vpop.f32.mrf.mxu3  ;;  %1404 = vmatmul.bf16.gmra.mxu0 %v9274_v24  ;;  %v722_v25 = vmax.f32 %v565_v3, 0.0 }
 0x14f   : > { %v1277_v11 = vadd.f32 %v1276_v61, %v1188_v56  ;;  %v1456_v17 = vpop.f32.mrf.mxu1  ;;  %v9304_v32 = vpack.c.bf16 %v724_v29, %v722_v25  ;;  %v1897_v27 = vmax.f32 %v1455_v55, 0.0  ;;  %v6785_v55 = vld [vmem:[%s12011_s3 + $0x128] sm:$0xf] }
 0x151   : > { %v1896_v61 = vmax.f32 %v1277_v11, 0.0  ;;  %v7848_v11 = vld [vmem:[%s12011_s3 + $0x134] sm:$0xf0] }
 0x152   : > { %v1367_v15 = vpop.f32.mrf.mxu0 }
 0x153   : > { %v1368_v47 = vadd.f32 %v1367_v15, %v9216_v51  ;;  %v6786_v15 = vor.u32 %v7848_v11, %v6785_v55 }
 0x154   : > { %v1189_v39 = vpop.f32.mrf.mxu2 }
 0x155   : > { %v1457_v38 = vadd.f32 %v1456_v17, %v1368_v47  ;;  %v1190_v60 = vadd.f32 %v1189_v39, %v9219_v52  ;;  %v1278_v41 = vpop.f32.mrf.mxu3  ;;  %1619 = vmatpush.bf16.msra.mxu3 %v6786_v15  ;;  %v570_v47 = vadd.f32 %v9073_v16, %v8947_v19  ;;  %v572_v39 = vadd.f32 %v9092_v44, %v8947_v19 }
 0x157   : > { %v1901_v50 = vmax.f32 %v1457_v38, 0.0  ;;  %v1279_v54 = vadd.f32 %v1278_v41, %v1190_v60  ;;  %v1459_v56 = vpop.f32.mrf.mxu1  ;;  %v7846_v41 = vld [vmem:[%s12011_s3 + $0x12c] sm:$0xf] }
 0x159   : > { %v9306_v30 = vpack.c.bf16 %v1901_v50, %v1897_v27  ;;  %v1900_v13 = vmax.f32 %v1279_v54, 0.0  ;;  %1231 = vmatmul.bf16.gmra.mxu2 %v9304_v32  ;;  %v6787_v27 = vld [vmem:[%s12011_s3 + $0x138] sm:$0xf0] }
 0x15a   : > { %1320 = vmatmul.bf16.gmra.mxu3 %v9075_v20  ;;  %1498 = vmatmul.bf16.gmra.mxu1 %v9075_v20  ;;  %v1370_v3 = vpop.f32.mrf.mxu0  ;;  %v6790_v54 = vor.u32 %v7846_v41, %v6787_v27 }
 0x15b   : > { %12090 = vst [vmem:[#allocation6_spill] sm:$0xff] %v9306_v30  ;;  %v9311_v0 = vpack.c.bf16 %v1900_v13, %v1896_v61  ;;  %v1371_v17 = vadd.f32 %v1370_v3, %v9216_v51  ;;  %v728_v61 = vmax.f32 %v572_v39, 0.0 }
 0x15c   : > { %v1192_v9 = vpop.f32.mrf.mxu2  ;;  %1797 = vmatpush.bf16.msra.mxu1 %v6790_v54 }
 0x15d   : > { %12091 = vst [vmem:[#allocation7_spill] sm:$0xff] %v9311_v0  ;;  %v1460_v18 = vadd.f32 %v1459_v56, %v1371_v17  ;;  %v1193_v25 = vadd.f32 %v1192_v9, %v9219_v52  ;;  %v1281_v29 = vpop.f32.mrf.mxu3  ;;  %1409 = vmatmul.bf16.gmra.mxu0 %v9304_v32  ;;  %v726_v56 = vmax.f32 %v570_v47, 0.0 }
 0x15f   : > { %v1282_v38 = vadd.f32 %v1281_v29, %v1193_v25  ;;  %v1461_v60 = vpop.f32.mrf.mxu1  ;;  %v9334_v55 = vpack.c.bf16 %v728_v61, %v726_v56  ;;  %v1905_v11 = vmax.f32 %v1460_v18, 0.0  ;;  %v6641_v18 = vld [vmem:[%s12011_s3 + $0x8] sm:$0xf] }
 0x161   : > { %v1904_v29 = vmax.f32 %v1282_v38, 0.0  ;;  %v7812_v38 = vld [vmem:[%s12011_s3 + $0x14] sm:$0xf0] }
 0x162   : > { %v1372_v50 = vpop.f32.mrf.mxu0 }
 0x163   : > { %v1373_v13 = vadd.f32 %v1372_v50, %v9216_v51  ;;  %v6642_v50 = vor.u32 %v7812_v38, %v6641_v18 }
 0x164   : > { %v1194_v16 = vpop.f32.mrf.mxu2 }
 0x165   : > { %v1462_v3 = vadd.f32 %v1461_v60, %v1373_v13  ;;  %v1195_v44 = vadd.f32 %v1194_v16, %v9219_v52  ;;  %v1283_v17 = vpop.f32.mrf.mxu3  ;;  %1531 = vmatpush.bf16.msra.mxu2 %v6642_v50  ;;  %v575_v13 = vadd.f32 %v9115_v7, %v8947_v19  ;;  %v577_v16 = vadd.f32 %v9134_v35, %v8947_v19 }
 0x167   : > { %v1909_v9 = vmax.f32 %v1462_v3, 0.0  ;;  %v1284_v15 = vadd.f32 %v1283_v17, %v1195_v44  ;;  %v1464_v25 = vpop.f32.mrf.mxu1  ;;  %v7814_v17 = vld [vmem:[%s12011_s3 + $0x2c] sm:$0xf] }
 0x169   : > { %v9336_v30 = vpack.c.bf16 %v1909_v9, %v1905_v11  ;;  %v1908_v41 = vmax.f32 %v1284_v15, 0.0  ;;  %1236 = vmatmul.bf16.gmra.mxu2 %v9334_v55  ;;  %v6659_v11 = vld [vmem:[%s12011_s3 + $0x38] sm:$0xf0] }
 0x16a   : > { %1325 = vmatmul.bf16.gmra.mxu3 %v9105_v57  ;;  %1503 = vmatmul.bf16.gmra.mxu1 %v9105_v57  ;;  %v1375_v47 = vpop.f32.mrf.mxu0  ;;  %v6662_v15 = vor.u32 %v7814_v17, %v6659_v11 }
 0x16b   : > { %12092 = vst [vmem:[#allocation8_spill] sm:$0xff] %v9336_v30  ;;  %v9341_v39 = vpack.c.bf16 %v1908_v41, %v1904_v29  ;;  %v1376_v60 = vadd.f32 %v1375_v47, %v9216_v51  ;;  %v732_v29 = vmax.f32 %v577_v16, 0.0 }
 0x16c   : > { %v1197_v27 = vpop.f32.mrf.mxu2  ;;  %1708 = vmatpush.bf16.msra.mxu0 %v6662_v15 }
 0x16d   : > { %12093 = vst [vmem:[#allocation9_spill] sm:$0xff] %v9341_v39  ;;  %v1465_v54 = vadd.f32 %v1464_v25, %v1376_v60  ;;  %v1198_v56 = vadd.f32 %v1197_v27, %v9219_v52  ;;  %v1286_v61 = vpop.f32.mrf.mxu3  ;;  %1414 = vmatmul.bf16.gmra.mxu0 %v9334_v55  ;;  %v730_v25 = vmax.f32 %v575_v13, 0.0 }
 0x16f   : > { %v1287_v3 = vadd.f32 %v1286_v61, %v1198_v56  ;;  %v1466_v44 = vpop.f32.mrf.mxu1  ;;  %v9364_v18 = vpack.c.bf16 %v732_v29, %v730_v25  ;;  %v1913_v38 = vmax.f32 %v1465_v54, 0.0  ;;  %v6769_v54 = vld [vmem:[%s12011_s3 + $0x108] sm:$0xf] }
 0x171   : > { %v1912_v61 = vmax.f32 %v1287_v3, 0.0  ;;  %v7844_v3 = vld [vmem:[%s12011_s3 + $0x114] sm:$0xf0] }
 0x172   : > { %v1377_v9 = vpop.f32.mrf.mxu0 }
 0x173   : > { %v1378_v41 = vadd.f32 %v1377_v9, %v9216_v51  ;;  %v6770_v9 = vor.u32 %v7844_v3, %v6769_v54 }
 0x174   : > { %v1199_v7 = vpop.f32.mrf.mxu2 }
 0x175   : > { %v1467_v47 = vadd.f32 %v1466_v44, %v1378_v41  ;;  %v1200_v35 = vadd.f32 %v1199_v7, %v9219_v52  ;;  %v1288_v60 = vpop.f32.mrf.mxu3  ;;  %1620 = vmatpush.bf16.msra.mxu3 %v6770_v9  ;;  %v580_v41 = vadd.f32 %v9149_v63, %v8947_v19  ;;  %v582_v7 = vadd.f32 %v9170_v28, %v8947_v19 }
 0x177   : > { %v1917_v27 = vmax.f32 %v1467_v47, 0.0  ;;  %v1289_v50 = vadd.f32 %v1288_v60, %v1200_v35  ;;  %v1469_v56 = vpop.f32.mrf.mxu1  ;;  %v7842_v60 = vld [vmem:[%s12011_s3 + $0x10c] sm:$0xf] }
 0x179   : > { %v9366_v30 = vpack.c.bf16 %v1917_v27, %v1913_v38  ;;  %v1916_v17 = vmax.f32 %v1289_v50, 0.0  ;;  %1241 = vmatmul.bf16.gmra.mxu2 %v9364_v18  ;;  %v6771_v38 = vld [vmem:[%s12011_s3 + $0x118] sm:$0xf0] }
 0x17a   : > { %1330 = vmatmul.bf16.gmra.mxu3 %v9143_v45  ;;  %1508 = vmatmul.bf16.gmra.mxu1 %v9143_v45  ;;  %v1380_v13 = vpop.f32.mrf.mxu0  ;;  %v6774_v50 = vor.u32 %v7842_v60, %v6771_v38 }
 0x17b   : > { %12094 = vst [vmem:[#allocation10_spill] sm:$0xff] %v9366_v30  ;;  %v9371_v16 = vpack.c.bf16 %v1916_v17, %v1912_v61  ;;  %v1381_v44 = vadd.f32 %v1380_v13, %v9216_v51  ;;  %v736_v61 = vmax.f32 %v582_v7, 0.0 }
 0x17c   : > { %v1202_v11 = vpop.f32.mrf.mxu2  ;;  %1798 = vmatpush.bf16.msra.mxu1 %v6774_v50 }
 0x17d   : > { %12095 = vst [vmem:[#allocation11_spill] sm:$0xff] %v9371_v16  ;;  %v1470_v15 = vadd.f32 %v1469_v56, %v1381_v44  ;;  %v1203_v25 = vadd.f32 %v1202_v11, %v9219_v52  ;;  %v1291_v29 = vpop.f32.mrf.mxu3  ;;  %1419 = vmatmul.bf16.gmra.mxu0 %v9364_v18  ;;  %v734_v56 = vmax.f32 %v580_v41, 0.0  ;;  %v6643_v41 = vld [vmem:[%s12011_s3 + $0x18] sm:$0xf0] }
 0x17f   : > { %v1292_v47 = vadd.f32 %v1291_v29, %v1203_v25  ;;  %v1471_v35 = vpop.f32.mrf.mxu1  ;;  %v9394_v54 = vpack.c.bf16 %v736_v61, %v734_v56  ;;  %v1921_v3 = vmax.f32 %v1470_v15, 0.0  ;;  %v7810_v29 = vld [vmem:[%s12011_s3 + $0xc] sm:$0xf]  ;;  %v7085_v56 = vld [vmem:[%s12013_s5 + $0x188] sm:$0xf] }
 0x180   : > { %v6646_v38 = vor.u32 %v7810_v29, %v6643_v41 }
 0x181   : > { %v1920_v7 = vmax.f32 %v1292_v47, 0.0  ;;  %v7925_v47 = vld [vmem:[%s12013_s5 + $0x1a0] sm:$0xf0] }
 0x182   : > { %v1382_v27 = vpop.f32.mrf.mxu0  ;;  %1709 = vmatpush.bf16.msra.mxu0 %v6646_v38 }
 0x183   : > { %v1383_v17 = vadd.f32 %v1382_v27, %v9216_v51 }
 0x184   : > { %v1204_v63 = vpop.f32.mrf.mxu2 }
 0x185   : > { %v1472_v13 = vadd.f32 %v1471_v35, %v1383_v17  ;;  %v1205_v28 = vadd.f32 %v1204_v63, %v9219_v52  ;;  %v1293_v44 = vpop.f32.mrf.mxu3  ;;  %v7086_v17 = vor.u32 %v7925_v47, %v7085_v56 }
 0x187   : > { %v1925_v11 = vmax.f32 %v1472_v13, 0.0  ;;  %v1294_v9 = vadd.f32 %v1293_v44, %v1205_v28  ;;  %v1474_v25 = vpop.f32.mrf.mxu1  ;;  %3496 = vmatpush.bf16.msrb.mxu2 %v7086_v17  ;;  %v585_v44 = vadd.f32 %v9187_v62, %v8947_v19 }
 0x189   : > { %v9402_v60 = vpack.c.bf16 %v1925_v11, %v1921_v3  ;;  %v1924_v35 = vmax.f32 %v1294_v9, 0.0  ;;  %1246 = vmatmul.bf16.gmra.mxu2 %v9394_v54  ;;  %v587_v3 = vadd.f32 %v9209_v34, %v8947_v19  ;;  %v738_v41 = vmax.f32 %v585_v44, 0.0 }
 0x18a   : > { %1335 = vmatmul.bf16.gmra.mxu3 %v9167_v26  ;;  %1513 = vmatmul.bf16.gmra.mxu1 %v9167_v26  ;;  %v1385_v15 = vpop.f32.mrf.mxu0 }
 0x18b   : > { %12096 = vst [vmem:[#allocation12_spill] sm:$0xff] %v9402_v60  ;;  %v9407_v27 = vpack.c.bf16 %v1924_v35, %v1920_v7  ;;  %v1386_v50 = vadd.f32 %v1385_v15, %v9216_v51  ;;  %v740_v7 = vmax.f32 %v587_v3, 0.0  ;;  %v7981_v3 = vld [vmem:[%s12013_s5 + $0x360] sm:$0xf0] }
 0x18c   : > { %v1207_v61 = vpop.f32.mrf.mxu2 }
 0x18d   : > { %v1475_v63 = vadd.f32 %v1474_v25, %v1386_v50  ;;  %v1208_v13 = vadd.f32 %v1207_v61, %v9219_v52  ;;  %v1296_v28 = vpop.f32.mrf.mxu3  ;;  %1424 = vmatmul.bf16.gmra.mxu0 %v9394_v54  ;;  %v9424_v56 = vpack.c.bf16 %v740_v7, %v738_v41 }
 0x18f   : > { %v1297_v11 = vadd.f32 %v1296_v28, %v1208_v13  ;;  %v1476_v9 = vpop.f32.mrf.mxu1  ;;  %v1929_v47 = vmax.f32 %v1475_v63, 0.0  ;;  %v7309_v63 = vld [vmem:[%s12013_s5 + $0x348] sm:$0xf] }
 0x191   : > { %v1928_v60 = vmax.f32 %v1297_v11, 0.0 }
 0x192   : > { %v1387_v29 = vpop.f32.mrf.mxu0 }
 0x193   : > { %v1388_v35 = vadd.f32 %v1387_v29, %v9216_v51 }
 0x194   : > { %v1209_v25 = vpop.f32.mrf.mxu2 }
 0x195   : > { %v1477_v38 = vadd.f32 %v1476_v9, %v1388_v35  ;;  %v1210_v15 = vadd.f32 %v1209_v25, %v9219_v52  ;;  %v1298_v50 = vpop.f32.mrf.mxu3  ;;  %v7310_v9 = vor.u32 %v7981_v3, %v7309_v63  ;;  %v7757_v25 = vld [vmem:[%s12013_s5 + $0x6c8] sm:$0xf] }
 0x197   : > { %v1933_v61 = vmax.f32 %v1477_v38, 0.0  ;;  %v1299_v62 = vadd.f32 %v1298_v50, %v1210_v15  ;;  %v1479_v17 = vpop.f32.mrf.mxu1  ;;  %3585 = vmatpush.bf16.msrb.mxu3 %v7310_v9  ;;  %v8093_v38 = vld [vmem:[%s12013_s5 + $0x6e0] sm:$0xf0] }
 0x198   : > { %v7758_v50 = vor.u32 %v8093_v38, %v7757_v25 }
 0x199   : > { %v9426_v19 = vpack.c.bf16 %v1933_v61, %v1929_v47  ;;  %v1932_v34 = vmax.f32 %v1299_v62, 0.0  ;;  %1251 = vmatmul.bf16.gmra.mxu2 %v9424_v56 }
 0x19a   : > { %1340 = vmatmul.bf16.gmra.mxu3 %v9199_v21  ;;  %1518 = vmatmul.bf16.gmra.mxu1 %v9199_v21  ;;  %v1390_v13 = vpop.f32.mrf.mxu0 }
 0x19b   : > { %12097 = vst [vmem:[#allocation13_spill] sm:$0xff] %v9426_v19  ;;  %v9431_v28 = vpack.c.bf16 %v1932_v34, %v1928_v60  ;;  %v1391_v44 = vadd.f32 %v1390_v13, %v9216_v51  ;;  %3763 = vmatpush.bf16.msrb.mxu1 %v7758_v50 }
 0x19c   : > { %v1212_v11 = vpop.f32.mrf.mxu2 }
 0x19d   : > { %v1480_v29 = vadd.f32 %v1479_v17, %v1391_v44  ;;  %v1213_v41 = vadd.f32 %v1212_v11, %v9219_v52  ;;  %v1301_v7 = vpop.f32.mrf.mxu3  ;;  %1429 = vmatmul.bf16.gmra.mxu0 %v9424_v56 }
 0x19f   : > { %v1302_v60 = vadd.f32 %v1301_v7, %v1213_v41  ;;  %v1481_v35 = vpop.f32.mrf.mxu1  ;;  %v1937_v13 = vmax.f32 %v1480_v29, 0.0  ;;  %v7057_v29 = vld [vmem:[%s12013_s5 + $0x150] sm:$0xf] }
 0x1a1   : > { %v1936_v11 = vmax.f32 %v1302_v60, 0.0  ;;  %v7918_v60 = vld [vmem:[%s12013_s5 + $0x168] sm:$0xf0] }
 0x1a2   : > { %v1392_v15 = vpop.f32.mrf.mxu0 }
 0x1a3   : > { %v1393_v47 = vadd.f32 %v1392_v15, %v9216_v51  ;;  %v7058_v15 = vor.u32 %v7918_v60, %v7057_v29 }
 0x1a4   : > { %v1214_v61 = vpop.f32.mrf.mxu2 }
 0x1a5   : > { %v1482_v62 = vadd.f32 %v1481_v35, %v1393_v47  ;;  %v1215_v17 = vadd.f32 %v1214_v61, %v9219_v52  ;;  %v1303_v34 = vpop.f32.mrf.mxu3  ;;  %3497 = vmatpush.bf16.msrb.mxu2 %v7058_v15 }
 0x1a7   : > { %v1941_v44 = vmax.f32 %v1482_v62, 0.0  ;;  %v1304_v63 = vadd.f32 %v1303_v34, %v1215_v17  ;;  %v1484_v3 = vpop.f32.mrf.mxu1  ;;  %v7533_v17 = vld [vmem:[%s12013_s5 + $0x508] sm:$0xf]  ;;  %v8037_v34 = vld [vmem:[%s12013_s5 + $0x520] sm:$0xf0] }
 0x1a9   : > { %v9450_v9 = vpack.c.bf16 %v1941_v44, %v1937_v13  ;;  %v1940_v41 = vmax.f32 %v1304_v63, 0.0  ;;  %1532 = vmatmul.bf16.vlgmr.msra.gmra.mxu2 %v8964_v36  ;;  %v7534_v44 = vor.u32 %v8037_v34, %v7533_v17 }
 0x1aa   : > { %1621 = vmatmul.bf16.vlgmr.msra.gmra.mxu3 %v8966_v37  ;;  %1799 = vmatmul.bf16.vlgmr.msra.gmra.mxu1 %v8966_v37  ;;  %v1395_v7 = vpop.f32.mrf.mxu0 }
 0x1ab   : > { %v9455_v25 = vpack.c.bf16 %v1940_v41, %v1936_v11  ;;  %v1396_v35 = vadd.f32 %v1395_v7, %v9216_v51  ;;  %3674 = vmatpush.bf16.msrb.mxu0 %v7534_v44 }
 0x1ac   : > { %v1217_v38 = vpop.f32.mrf.mxu2 }
 0x1ad   : > { %v1485_v50 = vadd.f32 %v1484_v3, %v1396_v35  ;;  %v1218_v47 = vadd.f32 %v1217_v38, %v9219_v52  ;;  %v1306_v61 = vpop.f32.mrf.mxu3  ;;  %1710 = vmatmul.bf16.vlgmr.msra.gmra.mxu0 %v8964_v36 }
 0x1af   : > { %v1307_v37 = vadd.f32 %v1306_v61, %v1218_v47  ;;  %v1486_v62 = vpop.f32.mrf.mxu1  ;;  %v1945_v7 = vmax.f32 %v1485_v50, 0.0  ;;  %v7281_v50 = vld [vmem:[%s12013_s5 + $0x310] sm:$0xf] }
 0x1b1   : > { %v1944_v38 = vmax.f32 %v1307_v37, 0.0  ;;  %v7974_v37 = vld [vmem:[%s12013_s5 + $0x328] sm:$0xf0] }
 0x1b2   : > { %v1397_v13 = vpop.f32.mrf.mxu0 }
 0x1b3   : > { %v1398_v63 = vadd.f32 %v1397_v13, %v9216_v51  ;;  %v7282_v13 = vor.u32 %v7974_v37, %v7281_v50 }
 0x1b4   : > { %v1219_v3 = vpop.f32.mrf.mxu2 }
 0x1b5   : > { %v1487_v11 = vadd.f32 %v1486_v62, %v1398_v63  ;;  %v1220_v36 = vadd.f32 %v1219_v3, %v9219_v52  ;;  %v1308_v41 = vpop.f32.mrf.mxu3  ;;  %3586 = vmatpush.bf16.msrb.mxu3 %v7282_v13 }
 0x1b7   : > { %v1949_v35 = vmax.f32 %v1487_v11, 0.0  ;;  %v1309_v29 = vadd.f32 %v1308_v41, %v1220_v36  ;;  %v1489_v60 = vpop.f32.mrf.mxu1  ;;  %v7729_v36 = vld [vmem:[%s12013_s5 + $0x690] sm:$0xf]  ;;  %v8086_v41 = vld [vmem:[%s12013_s5 + $0x6a8] sm:$0xf0] }
 0x1b9   : > { %v9474_v15 = vpack.c.bf16 %v1949_v35, %v1945_v7  ;;  %v1948_v47 = vmax.f32 %v1309_v29, 0.0  ;;  %1537 = vmatmul.bf16.gmra.mxu2 %v8996_v1  ;;  %v7730_v35 = vor.u32 %v8086_v41, %v7729_v36 }
 0x1ba   : > { %1626 = vmatmul.bf16.gmra.mxu3 %v8998_v2  ;;  %1804 = vmatmul.bf16.gmra.mxu1 %v8998_v2  ;;  %v1400_v61 = vpop.f32.mrf.mxu0 }
 0x1bb   : > { %12098 = vst [vmem:[#allocation14_spill] sm:$0xff] %v9474_v15  ;;  %v9479_v17 = vpack.c.bf16 %v1948_v47, %v1944_v38  ;;  %v1401_v62 = vadd.f32 %v1400_v61, %v9216_v51  ;;  %3764 = vmatpush.bf16.msrb.mxu1 %v7730_v35 }
 0x1bc   : > { %v1222_v34 = vpop.f32.mrf.mxu2 }
 0x1bd   : > { %v1490_v44 = vadd.f32 %v1489_v60, %v1401_v62  ;;  %v1223_v63 = vadd.f32 %v1222_v34, %v9219_v52  ;;  %v1311_v3 = vpop.f32.mrf.mxu3  ;;  %1715 = vmatmul.bf16.gmra.mxu0 %v8996_v1 }
 0x1bf   : > { %v1312_v2 = vadd.f32 %v1311_v3, %v1223_v63  ;;  %v1491_v11 = vpop.f32.mrf.mxu1  ;;  %v1953_v61 = vmax.f32 %v1490_v44, 0.0  ;;  %v7029_v44 = vld [vmem:[%s12013_s5 + $0x118] sm:$0xf] }
 0x1c1   : > { %v1952_v34 = vmax.f32 %v1312_v2, 0.0  ;;  %v7911_v2 = vld [vmem:[%s12013_s5 + $0x130] sm:$0xf0] }
 0x1c2   : > { %v1402_v7 = vpop.f32.mrf.mxu0 }
 0x1c3   : > { %v1403_v29 = vadd.f32 %v1402_v7, %v9216_v51  ;;  %v7030_v7 = vor.u32 %v7911_v2, %v7029_v44 }
 0x1c4   : > { %v1224_v60 = vpop.f32.mrf.mxu2 }
 0x1c5   : > { %v1492_v38 = vadd.f32 %v1491_v11, %v1403_v29  ;;  %v1225_v1 = vadd.f32 %v1224_v60, %v9219_v52  ;;  %v1313_v47 = vpop.f32.mrf.mxu3  ;;  %3498 = vmatpush.bf16.msrb.mxu2 %v7030_v7 }
 0x1c7   : > { %v1957_v62 = vmax.f32 %v1492_v38, 0.0  ;;  %v1314_v50 = vadd.f32 %v1313_v47, %v1225_v1  ;;  %v1494_v37 = vpop.f32.mrf.mxu1  ;;  %v7505_v1 = vld [vmem:[%s12013_s5 + $0x4d0] sm:$0xf]  ;;  %v8030_v47 = vld [vmem:[%s12013_s5 + $0x4e8] sm:$0xf0] }
 0x1c9   : > { %v9498_v13 = vpack.c.bf16 %v1957_v62, %v1953_v61  ;;  %v1956_v63 = vmax.f32 %v1314_v50, 0.0  ;;  %1542 = vmatmul.bf16.gmra.mxu2 %v9026_v31  ;;  %v7506_v62 = vor.u32 %v8030_v47, %v7505_v1 }
 0x1ca   : > { %1631 = vmatmul.bf16.gmra.mxu3 %v9028_v33  ;;  %1809 = vmatmul.bf16.gmra.mxu1 %v9028_v33  ;;  %v1405_v3 = vpop.f32.mrf.mxu0 }
 0x1cb   : > { %v9503_v36 = vpack.c.bf16 %v1956_v63, %v1952_v34  ;;  %v1406_v11 = vadd.f32 %v1405_v3, %v9216_v51  ;;  %3675 = vmatpush.bf16.msrb.mxu0 %v7506_v62 }
 0x1cc   : > { %v1227_v41 = vpop.f32.mrf.mxu2 }
 0x1cd   : > { %v1495_v35 = vadd.f32 %v1494_v37, %v1406_v11  ;;  %v1228_v29 = vadd.f32 %v1227_v41, %v9219_v52  ;;  %v1316_v60 = vpop.f32.mrf.mxu3  ;;  %1720 = vmatmul.bf16.gmra.mxu0 %v9026_v31 }
 0x1cf   : > { %v1317_v33 = vadd.f32 %v1316_v60, %v1228_v29  ;;  %v1496_v38 = vpop.f32.mrf.mxu1  ;;  %v1961_v3 = vmax.f32 %v1495_v35, 0.0  ;;  %v7253_v35 = vld [vmem:[%s12013_s5 + $0x2d8] sm:$0xf] }
 0x1d1   : > { %v1960_v41 = vmax.f32 %v1317_v33, 0.0  ;;  %v7967_v33 = vld [vmem:[%s12013_s5 + $0x2f0] sm:$0xf0] }
 0x1d2   : > { %v1407_v61 = vpop.f32.mrf.mxu0 }
 0x1d3   : > { %v1408_v50 = vadd.f32 %v1407_v61, %v9216_v51  ;;  %v7254_v61 = vor.u32 %v7967_v33, %v7253_v35 }
 0x1d4   : > { %v1229_v37 = vpop.f32.mrf.mxu2 }
 0x1d5   : > { %v1497_v34 = vadd.f32 %v1496_v38, %v1408_v50  ;;  %v1230_v31 = vadd.f32 %v1229_v37, %v9219_v52  ;;  %v1318_v63 = vpop.f32.mrf.mxu3  ;;  %3587 = vmatpush.bf16.msrb.mxu3 %v7254_v61 }
 0x1d7   : > { %v1965_v11 = vmax.f32 %v1497_v34, 0.0  ;;  %v1319_v44 = vadd.f32 %v1318_v63, %v1230_v31  ;;  %v1499_v2 = vpop.f32.mrf.mxu1  ;;  %v7701_v31 = vld [vmem:[%s12013_s5 + $0x658] sm:$0xf]  ;;  %v8079_v63 = vld [vmem:[%s12013_s5 + $0x670] sm:$0xf0] }
 0x1d9   : > { %v9522_v7 = vpack.c.bf16 %v1965_v11, %v1961_v3  ;;  %v1964_v29 = vmax.f32 %v1319_v44, 0.0  ;;  %1547 = vmatmul.bf16.gmra.mxu2 %v9058_v4  ;;  %v7702_v11 = vor.u32 %v8079_v63, %v7701_v31 }
 0x1da   : > { %1636 = vmatmul.bf16.gmra.mxu3 %v9060_v5  ;;  %1814 = vmatmul.bf16.gmra.mxu1 %v9060_v5  ;;  %v1410_v60 = vpop.f32.mrf.mxu0 }
 0x1db   : > { %v9527_v1 = vpack.c.bf16 %v1964_v29, %v1960_v41  ;;  %v1411_v38 = vadd.f32 %v1410_v60, %v9216_v51  ;;  %3765 = vmatpush.bf16.msrb.mxu1 %v7702_v11 }
 0x1dc   : > { %v1232_v47 = vpop.f32.mrf.mxu2 }
 0x1dd   : > { %v1500_v62 = vadd.f32 %v1499_v2, %v1411_v38  ;;  %v1233_v50 = vadd.f32 %v1232_v47, %v9219_v52  ;;  %v1321_v37 = vpop.f32.mrf.mxu3  ;;  %1725 = vmatmul.bf16.gmra.mxu0 %v9058_v4 }
 0x1df   : > { %v1322_v5 = vadd.f32 %v1321_v37, %v1233_v50  ;;  %v1501_v34 = vpop.f32.mrf.mxu1  ;;  %v1969_v60 = vmax.f32 %v1500_v62, 0.0  ;;  %v7001_v62 = vld [vmem:[%s12013_s5 + $0xe0] sm:$0xf] }
 0x1e1   : > { %v1968_v47 = vmax.f32 %v1322_v5, 0.0  ;;  %v7904_v5 = vld [vmem:[%s12013_s5 + $0xf8] sm:$0xf0] }
 0x1e2   : > { %v1412_v3 = vpop.f32.mrf.mxu0 }
 0x1e3   : > { %v1413_v44 = vadd.f32 %v1412_v3, %v9216_v51  ;;  %v7002_v3 = vor.u32 %v7904_v5, %v7001_v62 }
 0x1e4   : > { %v1234_v2 = vpop.f32.mrf.mxu2 }
 0x1e5   : > { %v1502_v41 = vadd.f32 %v1501_v34, %v1413_v44  ;;  %v1235_v4 = vadd.f32 %v1234_v2, %v9219_v52  ;;  %v1323_v29 = vpop.f32.mrf.mxu3  ;;  %3499 = vmatpush.bf16.msrb.mxu2 %v7002_v3 }
 0x1e7   : > { %v1973_v38 = vmax.f32 %v1502_v41, 0.0  ;;  %v1324_v35 = vadd.f32 %v1323_v29, %v1235_v4  ;;  %v1504_v33 = vpop.f32.mrf.mxu1  ;;  %v7477_v4 = vld [vmem:[%s12013_s5 + $0x498] sm:$0xf]  ;;  %v8023_v29 = vld [vmem:[%s12013_s5 + $0x4b0] sm:$0xf0] }
 0x1e9   : > { %v9546_v61 = vpack.c.bf16 %v1973_v38, %v1969_v60  ;;  %v1972_v50 = vmax.f32 %v1324_v35, 0.0  ;;  %1552 = vmatmul.bf16.gmra.mxu2 %v9088_v42  ;;  %v7478_v38 = vor.u32 %v8023_v29, %v7477_v4 }
 0x1ea   : > { %1641 = vmatmul.bf16.gmra.mxu3 %v9090_v43  ;;  %1819 = vmatmul.bf16.gmra.mxu1 %v9090_v43  ;;  %v1415_v37 = vpop.f32.mrf.mxu0 }
 0x1eb   : > { %v9551_v31 = vpack.c.bf16 %v1972_v50, %v1968_v47  ;;  %v1416_v34 = vadd.f32 %v1415_v37, %v9216_v51  ;;  %3676 = vmatpush.bf16.msrb.mxu0 %v7478_v38 }
 0x1ec   : > { %v1237_v63 = vpop.f32.mrf.mxu2 }
 0x1ed   : > { %v1505_v11 = vadd.f32 %v1504_v33, %v1416_v34  ;;  %v1238_v44 = vadd.f32 %v1237_v63, %v9219_v52  ;;  %v1326_v2 = vpop.f32.mrf.mxu3  ;;  %1730 = vmatmul.bf16.gmra.mxu0 %v9088_v42 }
 0x1ef   : > { %v1327_v43 = vadd.f32 %v1326_v2, %v1238_v44  ;;  %v1506_v41 = vpop.f32.mrf.mxu1  ;;  %v1977_v37 = vmax.f32 %v1505_v11, 0.0  ;;  %v7225_v11 = vld [vmem:[%s12013_s5 + $0x2a0] sm:$0xf] }
 0x1f1   : > { %v1976_v63 = vmax.f32 %v1327_v43, 0.0  ;;  %v7960_v43 = vld [vmem:[%s12013_s5 + $0x2b8] sm:$0xf0] }
 0x1f2   : > { %v1417_v60 = vpop.f32.mrf.mxu0 }
 0x1f3   : > { %v1418_v35 = vadd.f32 %v1417_v60, %v9216_v51  ;;  %v7226_v60 = vor.u32 %v7960_v43, %v7225_v11 }
 0x1f4   : > { %v1239_v33 = vpop.f32.mrf.mxu2 }
 0x1f5   : > { %v1507_v47 = vadd.f32 %v1506_v41, %v1418_v35  ;;  %v1240_v42 = vadd.f32 %v1239_v33, %v9219_v52  ;;  %v1328_v50 = vpop.f32.mrf.mxu3  ;;  %3588 = vmatpush.bf16.msrb.mxu3 %v7226_v60 }
 0x1f7   : > { %v1981_v34 = vmax.f32 %v1507_v47, 0.0  ;;  %v1329_v62 = vadd.f32 %v1328_v50, %v1240_v42  ;;  %v1509_v5 = vpop.f32.mrf.mxu1  ;;  %v7673_v42 = vld [vmem:[%s12013_s5 + $0x620] sm:$0xf]  ;;  %v8072_v50 = vld [vmem:[%s12013_s5 + $0x638] sm:$0xf0] }
 0x1f9   : > { %v9570_v3 = vpack.c.bf16 %v1981_v34, %v1977_v37  ;;  %v1980_v44 = vmax.f32 %v1329_v62, 0.0  ;;  %1557 = vmatmul.bf16.gmra.mxu2 %v9120_v22  ;;  %v7674_v34 = vor.u32 %v8072_v50, %v7673_v42 }
 0x1fa   : > { %1646 = vmatmul.bf16.gmra.mxu3 %v9122_v23  ;;  %1824 = vmatmul.bf16.gmra.mxu1 %v9122_v23  ;;  %v1420_v2 = vpop.f32.mrf.mxu0 }
 0x1fb   : > { %v9575_v4 = vpack.c.bf16 %v1980_v44, %v1976_v63  ;;  %v1421_v41 = vadd.f32 %v1420_v2, %v9216_v51  ;;  %3766 = vmatpush.bf16.msrb.mxu1 %v7674_v34 }
 0x1fc   : > { %v1242_v29 = vpop.f32.mrf.mxu2 }
 0x1fd   : > { %v1510_v38 = vadd.f32 %v1509_v5, %v1421_v41  ;;  %v1243_v35 = vadd.f32 %v1242_v29, %v9219_v52  ;;  %v1331_v33 = vpop.f32.mrf.mxu3  ;;  %1735 = vmatmul.bf16.gmra.mxu0 %v9120_v22 }
 0x1ff   : > { %v1332_v23 = vadd.f32 %v1331_v33, %v1243_v35  ;;  %v1511_v47 = vpop.f32.mrf.mxu1  ;;  %v1985_v2 = vmax.f32 %v1510_v38, 0.0  ;;  %v6973_v38 = vld [vmem:[%s12013_s5 + $0xa8] sm:$0xf] }
 0x201   : > { %v1984_v29 = vmax.f32 %v1332_v23, 0.0  ;;  %v7897_v23 = vld [vmem:[%s12013_s5 + $0xc0] sm:$0xf0] }
 0x202   : > { %v1422_v37 = vpop.f32.mrf.mxu0 }
 0x203   : > { %v1423_v62 = vadd.f32 %v1422_v37, %v9216_v51  ;;  %v6974_v37 = vor.u32 %v7897_v23, %v6973_v38 }
 0x204   : > { %v1244_v5 = vpop.f32.mrf.mxu2 }
 0x205   : > { %v1512_v63 = vadd.f32 %v1511_v47, %v1423_v62  ;;  %v1245_v22 = vadd.f32 %v1244_v5, %v9219_v52  ;;  %v1333_v44 = vpop.f32.mrf.mxu3  ;;  %3500 = vmatpush.bf16.msrb.mxu2 %v6974_v37 }
 0x207   : > { %v1989_v41 = vmax.f32 %v1512_v63, 0.0  ;;  %v1334_v11 = vadd.f32 %v1333_v44, %v1245_v22  ;;  %v1514_v43 = vpop.f32.mrf.mxu1  ;;  %v7449_v22 = vld [vmem:[%s12013_s5 + $0x460] sm:$0xf]  ;;  %v8016_v44 = vld [vmem:[%s12013_s5 + $0x478] sm:$0xf0] }
 0x209   : > { %v9594_v60 = vpack.c.bf16 %v1989_v41, %v1985_v2  ;;  %v1988_v35 = vmax.f32 %v1334_v11, 0.0  ;;  %1562 = vmatmul.bf16.gmra.mxu2 %v9152_v6  ;;  %v7450_v41 = vor.u32 %v8016_v44, %v7449_v22 }
 0x20a   : > { %1651 = vmatmul.bf16.gmra.mxu3 %v9154_v8  ;;  %1829 = vmatmul.bf16.gmra.mxu1 %v9154_v8  ;;  %v1425_v33 = vpop.f32.mrf.mxu0 }
 0x20b   : > { %v9599_v42 = vpack.c.bf16 %v1988_v35, %v1984_v29  ;;  %v1426_v47 = vadd.f32 %v1425_v33, %v9216_v51  ;;  %3677 = vmatpush.bf16.msrb.mxu0 %v7450_v41 }
 0x20c   : > { %v1247_v50 = vpop.f32.mrf.mxu2 }
 0x20d   : > { %v1515_v34 = vadd.f32 %v1514_v43, %v1426_v47  ;;  %v1248_v62 = vadd.f32 %v1247_v50, %v9219_v52  ;;  %v1336_v5 = vpop.f32.mrf.mxu3  ;;  %1740 = vmatmul.bf16.gmra.mxu0 %v9152_v6 }
 0x20f   : > { %v1337_v8 = vadd.f32 %v1336_v5, %v1248_v62  ;;  %v1516_v63 = vpop.f32.mrf.mxu1  ;;  %v1993_v33 = vmax.f32 %v1515_v34, 0.0  ;;  %v7197_v34 = vld [vmem:[%s12013_s5 + $0x268] sm:$0xf] }
 0x211   : > { %v1992_v50 = vmax.f32 %v1337_v8, 0.0  ;;  %v7953_v8 = vld [vmem:[%s12013_s5 + $0x280] sm:$0xf0] }
 0x212   : > { %v1427_v2 = vpop.f32.mrf.mxu0 }
 0x213   : > { %v1428_v11 = vadd.f32 %v1427_v2, %v9216_v51  ;;  %v7198_v2 = vor.u32 %v7953_v8, %v7197_v34 }
 0x214   : > { %v1249_v43 = vpop.f32.mrf.mxu2 }
 0x215   : > { %v1517_v29 = vadd.f32 %v1516_v63, %v1428_v11  ;;  %v1250_v6 = vadd.f32 %v1249_v43, %v9219_v52  ;;  %v1338_v35 = vpop.f32.mrf.mxu3  ;;  %3589 = vmatpush.bf16.msrb.mxu3 %v7198_v2 }
 0x217   : > { %v1997_v47 = vmax.f32 %v1517_v29, 0.0  ;;  %v1339_v38 = vadd.f32 %v1338_v35, %v1250_v6  ;;  %v1519_v23 = vpop.f32.mrf.mxu1  ;;  %v7645_v6 = vld [vmem:[%s12013_s5 + $0x5e8] sm:$0xf]  ;;  %v8065_v35 = vld [vmem:[%s12013_s5 + $0x600] sm:$0xf0] }
 0x219   : > { %v9618_v37 = vpack.c.bf16 %v1997_v47, %v1993_v33  ;;  %v1996_v62 = vmax.f32 %v1339_v38, 0.0  ;;  %1567 = vmatmul.bf16.gmra.mxu2 %v9182_v58  ;;  %v7646_v47 = vor.u32 %v8065_v35, %v7645_v6  ;;  %v7890_v35 = vld [vmem:[%s12013_s5 + $0x88] sm:$0xf0] }
 0x21a   : > { %1656 = vmatmul.bf16.gmra.mxu3 %v9184_v59  ;;  %1834 = vmatmul.bf16.gmra.mxu1 %v9184_v59  ;;  %v1430_v5 = vpop.f32.mrf.mxu0 }
 0x21b   : > { %v9623_v22 = vpack.c.bf16 %v1996_v62, %v1992_v50  ;;  %v1431_v63 = vadd.f32 %v1430_v5, %v9216_v51  ;;  %3767 = vmatpush.bf16.msrb.mxu1 %v7646_v47 }
 0x21c   : > { %v1252_v44 = vpop.f32.mrf.mxu2 }
 0x21d   : > { %v1520_v41 = vadd.f32 %v1519_v23, %v1431_v63  ;;  %v1253_v11 = vadd.f32 %v1252_v44, %v9219_v52  ;;  %v1341_v43 = vpop.f32.mrf.mxu3  ;;  %1745 = vmatmul.bf16.gmra.mxu0 %v9182_v58  ;;  %v8570_v44 = vld [vmem:[%s12012_s4] sm:$0xf] }
 0x21e   : > { %v9645_v2 = vperm.slane %v8570_v44, 3 }
 0x21f   : > { %v1342_v59 = vadd.f32 %v1341_v43, %v1253_v11  ;;  %v1521_v29 = vpop.f32.mrf.mxu1  ;;  %v2001_v5 = vmax.f32 %v1520_v41, 0.0 }
 0x221   : > { %v2000_v11 = vmax.f32 %v1342_v59, 0.0  ;;  %v6945_v59 = vld [vmem:[%s12013_s5 + $0x70] sm:$0xf] }
 0x222   : > { %v1432_v33 = vpop.f32.mrf.mxu0  ;;  %v6946_v47 = vor.u32 %v7890_v35, %v6945_v59 }
 0x223   : > { %v1433_v38 = vadd.f32 %v1432_v33, %v9216_v51 }
 0x224   : > { %v1254_v23 = vpop.f32.mrf.mxu2  ;;  %3501 = vmatpush.bf16.msrb.mxu2 %v6946_v47 }
 0x225   : > { %v1522_v50 = vadd.f32 %v1521_v29, %v1433_v38  ;;  %v1255_v58 = vadd.f32 %v1254_v23, %v9219_v52  ;;  %v1343_v62 = vpop.f32.mrf.mxu3  ;;  %v9650_v29 = vperm.slane %v8570_v44, 2 }
 0x227   : > { %v2005_v63 = vmax.f32 %v1522_v50, 0.0  ;;  %v1344_v34 = vadd.f32 %v1343_v62, %v1255_v58  ;;  %v1800_v8 = vpop.f32.mrf.mxu1  ;;  %v7421_v62 = vld [vmem:[%s12013_s5 + $0x428] sm:$0xf] }
 0x229   : > { %v9647_v43 = vpack.c.bf16 %v2005_v63, %v2001_v5  ;;  %v2004_v51 = vmax.f32 %v1344_v34, 0.0  ;;  %1572 = vmatmul.bf16.gmra.mxu2 %v9214_v49  ;;  %v8009_v5 = vld [vmem:[%s12013_s5 + $0x440] sm:$0xf0] }
 0x22a   : > { %1661 = vmatmul.bf16.gmra.mxu3 %v8981_v48  ;;  %1839 = vmatmul.bf16.gmra.mxu1 %v8981_v48  ;;  %v1711_v52 = vpop.f32.mrf.mxu0  ;;  %v7422_v34 = vor.u32 %v8009_v5, %v7421_v62 }
 0x22b   : > { %v9654_v41 = vpack.c.bf16 %v2004_v51, %v2000_v11  ;;  %v1712_v6 = vadd.f32 %v1711_v52, %v9645_v2 }
 0x22c   : > { %v1533_v33 = vpop.f32.mrf.mxu2  ;;  %3678 = vmatpush.bf16.msrb.mxu0 %v7422_v34 }
 0x22d   : > { %v1801_v38 = vadd.f32 %v1800_v8, %v1712_v6  ;;  %v1534_v23 = vadd.f32 %v1533_v33, %v9650_v29  ;;  %v1622_v50 = vpop.f32.mrf.mxu3  ;;  %1750 = vmatmul.bf16.gmra.mxu0 %v9214_v49 }
 0x22f   : > { %v1623_v48 = vadd.f32 %v1622_v50, %v1534_v23  ;;  %v1802_v58 = vpop.f32.mrf.mxu1  ;;  %v1883_v52 = vmax.f32 %v1801_v38, 0.0  ;;  %v7169_v38 = vld [vmem:[%s12013_s5 + $0x230] sm:$0xf] }
 0x231   : > { %v1882_v33 = vmax.f32 %v1623_v48, 0.0  ;;  %v7946_v48 = vld [vmem:[%s12013_s5 + $0x248] sm:$0xf0] }
 0x232   : > { %v1713_v63 = vpop.f32.mrf.mxu0 }
 0x233   : > { %v1714_v8 = vadd.f32 %v1713_v63, %v9645_v2  ;;  %v7170_v63 = vor.u32 %v7946_v48, %v7169_v38 }
 0x234   : > { %v1535_v44 = vpop.f32.mrf.mxu2 }
 0x235   : > { %v1803_v11 = vadd.f32 %v1802_v58, %v1714_v8  ;;  %v1536_v49 = vadd.f32 %v1535_v44, %v9650_v29  ;;  %v1624_v51 = vpop.f32.mrf.mxu3  ;;  %3590 = vmatpush.bf16.msrb.mxu3 %v7170_v63 }
 0x237   : > { %v1887_v6 = vmax.f32 %v1803_v11, 0.0  ;;  %v1625_v59 = vadd.f32 %v1624_v51, %v1536_v49  ;;  %v1805_v35 = vpop.f32.mrf.mxu1  ;;  %v7617_v49 = vld [vmem:[%s12013_s5 + $0x5b0] sm:$0xf]  ;;  %v8058_v51 = vld [vmem:[%s12013_s5 + $0x5c8] sm:$0xf0] }
 0x239   : > { %v9673_v47 = vpack.c.bf16 %v1887_v6, %v1883_v52  ;;  %v1886_v23 = vmax.f32 %v1625_v59, 0.0  ;;  %1577 = vmatmul.bf16.gmra.mxu2 %v9244_v53  ;;  %v7618_v6 = vor.u32 %v8058_v51, %v7617_v49 }
 0x23a   : > { %1666 = vmatmul.bf16.gmra.mxu3 %v9011_v12  ;;  %1844 = vmatmul.bf16.gmra.mxu1 %v9011_v12  ;;  %v1716_v50 = vpop.f32.mrf.mxu0 }
 0x23b   : > { %12099 = vst [vmem:[#allocation15_spill] sm:$0xff] %v9673_v47  ;;  %v9678_v62 = vpack.c.bf16 %v1886_v23, %v1882_v33  ;;  %v1717_v58 = vadd.f32 %v1716_v50, %v9645_v2  ;;  %3768 = vmatpush.bf16.msrb.mxu1 %v7618_v6 }
 0x23c   : > { %v1538_v5 = vpop.f32.mrf.mxu2 }
 0x23d   : > { %12100 = vst [vmem:[#allocation16_spill] sm:$0xff] %v9678_v62  ;;  %v1806_v34 = vadd.f32 %v1805_v35, %v1717_v58  ;;  %v1539_v8 = vadd.f32 %v1538_v5, %v9650_v29  ;;  %v1627_v44 = vpop.f32.mrf.mxu3  ;;  %1755 = vmatmul.bf16.gmra.mxu0 %v9244_v53 }
 0x23f   : > { %v1628_v12 = vadd.f32 %v1627_v44, %v1539_v8  ;;  %v1807_v11 = vpop.f32.mrf.mxu1  ;;  %v1891_v50 = vmax.f32 %v1806_v34, 0.0  ;;  %v6917_v34 = vld [vmem:[%s12013_s5 + $0x38] sm:$0xf] }
 0x241   : > { %v1890_v5 = vmax.f32 %v1628_v12, 0.0  ;;  %v7883_v12 = vld [vmem:[%s12013_s5 + $0x50] sm:$0xf0] }
 0x242   : > { %v1718_v52 = vpop.f32.mrf.mxu0 }
 0x243   : > { %v1719_v59 = vadd.f32 %v1718_v52, %v9645_v2  ;;  %v6918_v52 = vor.u32 %v7883_v12, %v6917_v34 }
 0x244   : > { %v1540_v35 = vpop.f32.mrf.mxu2 }
 0x245   : > { %v1808_v33 = vadd.f32 %v1807_v11, %v1719_v59  ;;  %v1541_v53 = vadd.f32 %v1540_v35, %v9650_v29  ;;  %v1629_v23 = vpop.f32.mrf.mxu3  ;;  %3502 = vmatpush.bf16.msrb.mxu2 %v6918_v52 }
 0x247   : > { %v1895_v58 = vmax.f32 %v1808_v33, 0.0  ;;  %v1630_v38 = vadd.f32 %v1629_v23, %v1541_v53  ;;  %v1810_v48 = vpop.f32.mrf.mxu1  ;;  %v7393_v53 = vld [vmem:[%s12013_s5 + $0x3f0] sm:$0xf]  ;;  %v8002_v23 = vld [vmem:[%s12013_s5 + $0x408] sm:$0xf0] }
 0x249   : > { %v9697_v63 = vpack.c.bf16 %v1895_v58, %v1891_v50  ;;  %v1894_v8 = vmax.f32 %v1630_v38, 0.0  ;;  %1582 = vmatmul.bf16.gmra.mxu2 %v9274_v24  ;;  %v7394_v58 = vor.u32 %v8002_v23, %v7393_v53 }
 0x24a   : > { %1671 = vmatmul.bf16.gmra.mxu3 %v9043_v46  ;;  %1849 = vmatmul.bf16.gmra.mxu1 %v9043_v46  ;;  %v1721_v44 = vpop.f32.mrf.mxu0 }
 0x24b   : > { %12101 = vst [vmem:[#allocation17_spill] sm:$0xff] %v9697_v63  ;;  %v9702_v49 = vpack.c.bf16 %v1894_v8, %v1890_v5  ;;  %v1722_v11 = vadd.f32 %v1721_v44, %v9645_v2  ;;  %3679 = vmatpush.bf16.msrb.mxu0 %v7394_v58 }
 0x24c   : > { %v1543_v51 = vpop.f32.mrf.mxu2 }
 0x24d   : > { %12102 = vst [vmem:[#allocation18_spill] sm:$0xff] %v9702_v49  ;;  %v1811_v6 = vadd.f32 %v1810_v48, %v1722_v11  ;;  %v1544_v59 = vadd.f32 %v1543_v51, %v9650_v29  ;;  %v1632_v35 = vpop.f32.mrf.mxu3  ;;  %1760 = vmatmul.bf16.gmra.mxu0 %v9274_v24 }
 0x24f   : > { %v1633_v46 = vadd.f32 %v1632_v35, %v1544_v59  ;;  %v1812_v33 = vpop.f32.mrf.mxu1  ;;  %v1899_v44 = vmax.f32 %v1811_v6, 0.0  ;;  %v7141_v6 = vld [vmem:[%s12013_s5 + $0x1f8] sm:$0xf] }
 0x251   : > { %v1898_v51 = vmax.f32 %v1633_v46, 0.0  ;;  %v7939_v46 = vld [vmem:[%s12013_s5 + $0x210] sm:$0xf0] }
 0x252   : > { %v1723_v50 = vpop.f32.mrf.mxu0 }
 0x253   : > { %v1724_v38 = vadd.f32 %v1723_v50, %v9645_v2  ;;  %v7142_v50 = vor.u32 %v7939_v46, %v7141_v6 }
 0x254   : > { %v1545_v48 = vpop.f32.mrf.mxu2 }
 0x255   : > { %v1813_v5 = vadd.f32 %v1812_v33, %v1724_v38  ;;  %v1546_v24 = vadd.f32 %v1545_v48, %v9650_v29  ;;  %v1634_v8 = vpop.f32.mrf.mxu3  ;;  %3591 = vmatpush.bf16.msrb.mxu3 %v7142_v50 }
 0x257   : > { %v1903_v11 = vmax.f32 %v1813_v5, 0.0  ;;  %v1635_v34 = vadd.f32 %v1634_v8, %v1546_v24  ;;  %v1815_v12 = vpop.f32.mrf.mxu1  ;;  %v7589_v24 = vld [vmem:[%s12013_s5 + $0x578] sm:$0xf]  ;;  %v8051_v8 = vld [vmem:[%s12013_s5 + $0x590] sm:$0xf0] }
 0x259   : > { %v9721_v52 = vpack.c.bf16 %v1903_v11, %v1899_v44  ;;  %v1902_v59 = vmax.f32 %v1635_v34, 0.0  ;;  %1587 = vmatmul.bf16.gmra.mxu2 %v9304_v32  ;;  %v7590_v11 = vor.u32 %v8051_v8, %v7589_v24 }
 0x25a   : > { %1676 = vmatmul.bf16.gmra.mxu3 %v9075_v20  ;;  %1854 = vmatmul.bf16.gmra.mxu1 %v9075_v20  ;;  %v1726_v35 = vpop.f32.mrf.mxu0 }
 0x25b   : > { %12103 = vst [vmem:[#allocation19_spill] sm:$0xff] %v9721_v52  ;;  %v9726_v53 = vpack.c.bf16 %v1902_v59, %v1898_v51  ;;  %v1727_v33 = vadd.f32 %v1726_v35, %v9645_v2  ;;  %3769 = vmatpush.bf16.msrb.mxu1 %v7590_v11 }
 0x25c   : > { %v1548_v23 = vpop.f32.mrf.mxu2 }
 0x25d   : > { %12104 = vst [vmem:[#allocation20_spill] sm:$0xff] %v9726_v53  ;;  %v1816_v58 = vadd.f32 %v1815_v12, %v1727_v33  ;;  %v1549_v38 = vadd.f32 %v1548_v23, %v9650_v29  ;;  %v1637_v48 = vpop.f32.mrf.mxu3  ;;  %1765 = vmatmul.bf16.gmra.mxu0 %v9304_v32 }
 0x25f   : > { %v1638_v20 = vadd.f32 %v1637_v48, %v1549_v38  ;;  %v1817_v5 = vpop.f32.mrf.mxu1  ;;  %v1907_v35 = vmax.f32 %v1816_v58, 0.0  ;;  %v6889_v58 = vld [vmem:[%s12013_s5] sm:$0xf] }
 0x261   : > { %v1906_v23 = vmax.f32 %v1638_v20, 0.0  ;;  %v7876_v20 = vld [vmem:[%s12013_s5 + $0x18] sm:$0xf0] }
 0x262   : > { %v1728_v44 = vpop.f32.mrf.mxu0 }
 0x263   : > { %v1729_v34 = vadd.f32 %v1728_v44, %v9645_v2  ;;  %v6890_v44 = vor.u32 %v7876_v20, %v6889_v58 }
 0x264   : > { %v1550_v12 = vpop.f32.mrf.mxu2 }
 0x265   : > { %v1818_v51 = vadd.f32 %v1817_v5, %v1729_v34  ;;  %v1551_v32 = vadd.f32 %v1550_v12, %v9650_v29  ;;  %v1639_v59 = vpop.f32.mrf.mxu3  ;;  %3503 = vmatpush.bf16.msrb.mxu2 %v6890_v44 }
 0x267   : > { %v1911_v33 = vmax.f32 %v1818_v51, 0.0  ;;  %v1640_v6 = vadd.f32 %v1639_v59, %v1551_v32  ;;  %v1820_v46 = vpop.f32.mrf.mxu1  ;;  %v7365_v32 = vld [vmem:[%s12013_s5 + $0x3b8] sm:$0xf]  ;;  %v7995_v59 = vld [vmem:[%s12013_s5 + $0x3d0] sm:$0xf0] }
 0x269   : > { %v9745_v50 = vpack.c.bf16 %v1911_v33, %v1907_v35  ;;  %v1910_v38 = vmax.f32 %v1640_v6, 0.0  ;;  %1592 = vmatmul.bf16.gmra.mxu2 %v9334_v55  ;;  %v7366_v33 = vor.u32 %v7995_v59, %v7365_v32 }
 0x26a   : > { %1681 = vmatmul.bf16.gmra.mxu3 %v9105_v57  ;;  %1859 = vmatmul.bf16.gmra.mxu1 %v9105_v57  ;;  %v1731_v48 = vpop.f32.mrf.mxu0 }
 0x26b   : > { %12105 = vst [vmem:[#allocation21_spill] sm:$0xff] %v9745_v50  ;;  %v9750_v24 = vpack.c.bf16 %v1910_v38, %v1906_v23  ;;  %v1732_v5 = vadd.f32 %v1731_v48, %v9645_v2  ;;  %3680 = vmatpush.bf16.msrb.mxu0 %v7366_v33 }
 0x26c   : > { %v1553_v8 = vpop.f32.mrf.mxu2 }
 0x26d   : > { %12106 = vst [vmem:[#allocation22_spill] sm:$0xff] %v9750_v24  ;;  %v1821_v11 = vadd.f32 %v1820_v46, %v1732_v5  ;;  %v1554_v34 = vadd.f32 %v1553_v8, %v9650_v29  ;;  %v1642_v12 = vpop.f32.mrf.mxu3  ;;  %1770 = vmatmul.bf16.gmra.mxu0 %v9334_v55 }
 0x26f   : > { %v1643_v57 = vadd.f32 %v1642_v12, %v1554_v34  ;;  %v1822_v51 = vpop.f32.mrf.mxu1  ;;  %v1915_v48 = vmax.f32 %v1821_v11, 0.0  ;;  %v7113_v11 = vld [vmem:[%s12013_s5 + $0x1c0] sm:$0xf] }
 0x271   : > { %v1914_v8 = vmax.f32 %v1643_v57, 0.0  ;;  %v7932_v57 = vld [vmem:[%s12013_s5 + $0x1d8] sm:$0xf0] }
 0x272   : > { %v1733_v35 = vpop.f32.mrf.mxu0 }
 0x273   : > { %v1734_v6 = vadd.f32 %v1733_v35, %v9645_v2  ;;  %v7114_v35 = vor.u32 %v7932_v57, %v7113_v11 }
 0x274   : > { %v1555_v46 = vpop.f32.mrf.mxu2 }
 0x275   : > { %v1823_v23 = vadd.f32 %v1822_v51, %v1734_v6  ;;  %v1556_v55 = vadd.f32 %v1555_v46, %v9650_v29  ;;  %v1644_v38 = vpop.f32.mrf.mxu3  ;;  %3592 = vmatpush.bf16.msrb.mxu3 %v7114_v35  ;;  %v7988_v35 = vld [vmem:[%s12013_s5 + $0x398] sm:$0xf0] }
 0x277   : > { %v1919_v5 = vmax.f32 %v1823_v23, 0.0  ;;  %v1645_v58 = vadd.f32 %v1644_v38, %v1556_v55  ;;  %v1825_v20 = vpop.f32.mrf.mxu1  ;;  %v7561_v55 = vld [vmem:[%s12013_s5 + $0x540] sm:$0xf]  ;;  %v8044_v38 = vld [vmem:[%s12013_s5 + $0x558] sm:$0xf0] }
 0x279   : > { %v9769_v44 = vpack.c.bf16 %v1919_v5, %v1915_v48  ;;  %v1918_v34 = vmax.f32 %v1645_v58, 0.0  ;;  %1597 = vmatmul.bf16.gmra.mxu2 %v9364_v18  ;;  %v7562_v5 = vor.u32 %v8044_v38, %v7561_v55 }
 0x27a   : > { %1686 = vmatmul.bf16.gmra.mxu3 %v9143_v45  ;;  %1864 = vmatmul.bf16.gmra.mxu1 %v9143_v45  ;;  %v1736_v12 = vpop.f32.mrf.mxu0 }
 0x27b   : > { %12107 = vst [vmem:[#allocation23_spill] sm:$0xff] %v9769_v44  ;;  %v9774_v32 = vpack.c.bf16 %v1918_v34, %v1914_v8  ;;  %v1737_v51 = vadd.f32 %v1736_v12, %v9645_v2  ;;  %3770 = vmatpush.bf16.msrb.mxu1 %v7562_v5  ;;  %v7922_v5 = vld [vmem:[%s12013_s5 + $0x18c] sm:$0xf] }
 0x27c   : > { %v1558_v59 = vpop.f32.mrf.mxu2 }
 0x27d   : > { %12108 = vst [vmem:[#allocation24_spill] sm:$0xff] %v9774_v32  ;;  %v1826_v33 = vadd.f32 %v1825_v20, %v1737_v51  ;;  %v1559_v6 = vadd.f32 %v1558_v59, %v9650_v29  ;;  %v1647_v46 = vpop.f32.mrf.mxu3  ;;  %1775 = vmatmul.bf16.gmra.mxu0 %v9364_v18  ;;  %v7337_v59 = vld [vmem:[%s12013_s5 + $0x380] sm:$0xf] }
 0x27f   : > { %v1648_v45 = vadd.f32 %v1647_v46, %v1559_v6  ;;  %v1827_v23 = vpop.f32.mrf.mxu1  ;;  %v1923_v12 = vmax.f32 %v1826_v33, 0.0 }
 0x281   : > { %v1922_v6 = vmax.f32 %v1648_v45, 0.0  ;;  %v7087_v45 = vld [vmem:[%s12013_s5 + $0x1a4] sm:$0xf0] }
 0x282   : > { %v1738_v48 = vpop.f32.mrf.mxu0 }
 0x283   : > { %v1739_v58 = vadd.f32 %v1738_v48, %v9645_v2 }
 0x284   : > { %v1560_v20 = vpop.f32.mrf.mxu2 }
 0x285   : > { %v1828_v8 = vadd.f32 %v1827_v23, %v1739_v58  ;;  %v1561_v18 = vadd.f32 %v1560_v20, %v9650_v29  ;;  %v1649_v34 = vpop.f32.mrf.mxu3  ;;  %v7338_v23 = vor.u32 %v7988_v35, %v7337_v59  ;;  %v7090_v20 = vor.u32 %v7922_v5, %v7087_v45 }
 0x287   : > { %v1927_v51 = vmax.f32 %v1828_v8, 0.0  ;;  %v1650_v11 = vadd.f32 %v1649_v34, %v1561_v18  ;;  %v1830_v57 = vpop.f32.mrf.mxu1  ;;  %3681 = vmatpush.bf16.msrb.mxu0 %v7338_v23  ;;  %3852 = vmatpush.bf16.msra.mxu2 %v7090_v20 }
 0x289   : > { %v9799_v46 = vpack.c.bf16 %v1927_v51, %v1923_v12  ;;  %v1926_v55 = vmax.f32 %v1650_v11, 0.0  ;;  %1602 = vmatmul.bf16.gmra.mxu2 %v9394_v54 }
 0x28a   : > { %1691 = vmatmul.bf16.gmra.mxu3 %v9167_v26  ;;  %1869 = vmatmul.bf16.gmra.mxu1 %v9167_v26  ;;  %v1741_v33 = vpop.f32.mrf.mxu0 }
 0x28b   : > { %12109 = vst [vmem:[#allocation25_spill] sm:$0xff] %v9799_v46  ;;  %v9804_v38 = vpack.c.bf16 %v1926_v55, %v1922_v6  ;;  %v1742_v48 = vadd.f32 %v1741_v33, %v9645_v2 }
 0x28c   : > { %v1563_v58 = vpop.f32.mrf.mxu2 }
 0x28d   : > { %12110 = vst [vmem:[#allocation26_spill] sm:$0xff] %v9804_v38  ;;  %v1831_v8 = vadd.f32 %v1830_v57, %v1742_v48  ;;  %v1564_v18 = vadd.f32 %v1563_v58, %v9650_v29  ;;  %v1652_v26 = vpop.f32.mrf.mxu3  ;;  %1780 = vmatmul.bf16.gmra.mxu0 %v9394_v54 }
 0x28f   : > { %v1653_v34 = vadd.f32 %v1652_v26, %v1564_v18  ;;  %v1832_v12 = vpop.f32.mrf.mxu1  ;;  %v1931_v23 = vmax.f32 %v1831_v8, 0.0  ;;  %v7978_v8 = vld [vmem:[%s12013_s5 + $0x34c] sm:$0xf]  ;;  %v7311_v26 = vld [vmem:[%s12013_s5 + $0x364] sm:$0xf0] }
 0x291   : > { %v1930_v48 = vmax.f32 %v1653_v34, 0.0 }
 0x292   : > { %v1743_v51 = vpop.f32.mrf.mxu0 }
 0x293   : > { %v1744_v11 = vadd.f32 %v1743_v51, %v9645_v2 }
 0x294   : > { %v1565_v59 = vpop.f32.mrf.mxu2 }
 0x295   : > { %v1833_v35 = vadd.f32 %v1832_v12, %v1744_v11  ;;  %v1566_v6 = vadd.f32 %v1565_v59, %v9650_v29  ;;  %v1654_v55 = vpop.f32.mrf.mxu3  ;;  %v7314_v12 = vor.u32 %v7978_v8, %v7311_v26 }
 0x297   : > { %v1935_v33 = vmax.f32 %v1833_v35, 0.0  ;;  %v1655_v5 = vadd.f32 %v1654_v55, %v1566_v6  ;;  %v1835_v57 = vpop.f32.mrf.mxu1  ;;  %3941 = vmatpush.bf16.msra.mxu3 %v7314_v12  ;;  %v8090_v6 = vld [vmem:[%s12013_s5 + $0x6cc] sm:$0xf]  ;;  %v7759_v55 = vld [vmem:[%s12013_s5 + $0x6e4] sm:$0xf0] }
 0x299   : > { %v9817_v45 = vpack.c.bf16 %v1935_v33, %v1931_v23  ;;  %v1934_v58 = vmax.f32 %v1655_v5, 0.0  ;;  %1607 = vmatmul.bf16.gmra.mxu2 %v9424_v56  ;;  %v7762_v33 = vor.u32 %v8090_v6, %v7759_v55 }
 0x29a   : > { %1696 = vmatmul.bf16.gmra.mxu3 %v9199_v21  ;;  %1874 = vmatmul.bf16.gmra.mxu1 %v9199_v21  ;;  %v1746_v54 = vpop.f32.mrf.mxu0 }
 0x29b   : > { %12111 = vst [vmem:[#allocation27_spill] sm:$0xff] %v9817_v45  ;;  %v9822_v20 = vpack.c.bf16 %v1934_v58, %v1930_v48  ;;  %v1747_v18 = vadd.f32 %v1746_v54, %v9645_v2  ;;  %4119 = vmatpush.bf16.msra.mxu1 %v7762_v33 }
 0x29c   : > { %v1568_v34 = vpop.f32.mrf.mxu2 }
 0x29d   : > { %v1836_v51 = vadd.f32 %v1835_v57, %v1747_v18  ;;  %v1569_v11 = vadd.f32 %v1568_v34, %v9650_v29  ;;  %v1657_v59 = vpop.f32.mrf.mxu3  ;;  %1785 = vmatmul.bf16.gmra.mxu0 %v9424_v56 }
 0x29f   : > { %v1658_v21 = vadd.f32 %v1657_v59, %v1569_v11  ;;  %v1837_v35 = vpop.f32.mrf.mxu1  ;;  %v1939_v54 = vmax.f32 %v1836_v51, 0.0  ;;  %v7915_v51 = vld [vmem:[%s12013_s5 + $0x154] sm:$0xf] }
 0x2a1   : > { %v1938_v34 = vmax.f32 %v1658_v21, 0.0  ;;  %v7059_v21 = vld [vmem:[%s12013_s5 + $0x16c] sm:$0xf0] }
 0x2a2   : > { %v1748_v23 = vpop.f32.mrf.mxu0 }
 0x2a3   : > { %v1749_v5 = vadd.f32 %v1748_v23, %v9645_v2  ;;  %v7062_v23 = vor.u32 %v7915_v51, %v7059_v21 }
 0x2a4   : > { %v1570_v57 = vpop.f32.mrf.mxu2 }
 0x2a5   : > { %v1838_v48 = vadd.f32 %v1837_v35, %v1749_v5  ;;  %v1571_v56 = vadd.f32 %v1570_v57, %v9650_v29  ;;  %v1659_v58 = vpop.f32.mrf.mxu3  ;;  %3853 = vmatpush.bf16.msra.mxu2 %v7062_v23 }
 0x2a7   : > { %v1943_v18 = vmax.f32 %v1838_v48, 0.0  ;;  %v1660_v8 = vadd.f32 %v1659_v58, %v1571_v56  ;;  %v1840_v26 = vpop.f32.mrf.mxu1  ;;  %v8034_v58 = vld [vmem:[%s12013_s5 + $0x50c] sm:$0xf] }
 0x2a9   : > { %v9841_v12 = vpack.c.bf16 %v1943_v18, %v1939_v54  ;;  %v1942_v11 = vmax.f32 %v1660_v8, 0.0  ;;  %3504 = vmatmul.bf16.vlgmr.msrb.gmra.mxu2 %v9251_v14  ;;  %v7535_v54 = vld [vmem:[%s12013_s5 + $0x524] sm:$0xf0] }
 0x2aa   : > { %3593 = vmatmul.bf16.vlgmr.msrb.gmra.mxu3 %v9246_v10  ;;  %3771 = vmatmul.bf16.vlgmr.msrb.gmra.mxu1 %v9673_v47  ;;  %v1751_v59 = vpop.f32.mrf.mxu0  ;;  %v7538_v8 = vor.u32 %v8034_v58, %v7535_v54  ;;  %v12115_v47 = vld [vmem:[#allocation4_spill] sm:$0xff] }
 0x2ab   : > { %12112 = vst [vmem:[#allocation28_spill] sm:$0xff] %v9841_v12  ;;  %v9846_v6 = vpack.c.bf16 %v1942_v11, %v1938_v34  ;;  %v1752_v35 = vadd.f32 %v1751_v59, %v9645_v2 }
 0x2ac   : > { %v1573_v55 = vpop.f32.mrf.mxu2  ;;  %4030 = vmatpush.bf16.msra.mxu0 %v7538_v8 }
 0x2ad   : > { %12113 = vst [vmem:[#allocation29_spill] sm:$0xff] %v9846_v6  ;;  %v1841_v33 = vadd.f32 %v1840_v26, %v1752_v35  ;;  %v1574_v5 = vadd.f32 %v1573_v55, %v9650_v29  ;;  %v1662_v57 = vpop.f32.mrf.mxu3  ;;  %3682 = vmatmul.bf16.vlgmr.msrb.gmra.mxu0 %v9678_v62 }
 0x2af   : > { %v1663_v48 = vadd.f32 %v1662_v57, %v1574_v5  ;;  %v1842_v56 = vpop.f32.mrf.mxu1  ;;  %v1947_v51 = vmax.f32 %v1841_v33, 0.0  ;;  %v7971_v33 = vld [vmem:[%s12013_s5 + $0x314] sm:$0xf] }
 0x2b1   : > { %v1946_v5 = vmax.f32 %v1663_v48, 0.0  ;;  %v7283_v48 = vld [vmem:[%s12013_s5 + $0x32c] sm:$0xf0] }
 0x2b2   : > { %v1753_v18 = vpop.f32.mrf.mxu0  ;;  %v7286_v8 = vor.u32 %v7971_v33, %v7283_v48 }
 0x2b3   : > { %v1754_v26 = vadd.f32 %v1753_v18, %v9645_v2 }
 0x2b4   : > { %v1575_v34 = vpop.f32.mrf.mxu2  ;;  %3942 = vmatpush.bf16.msra.mxu3 %v7286_v8 }
 0x2b5   : > { %v1843_v11 = vadd.f32 %v1842_v56, %v1754_v26  ;;  %v1576_v59 = vadd.f32 %v1575_v34, %v9650_v29  ;;  %v1664_v35 = vpop.f32.mrf.mxu3 }
 0x2b7   : > { %v1951_v21 = vmax.f32 %v1843_v11, 0.0  ;;  %v1665_v55 = vadd.f32 %v1664_v35, %v1576_v59  ;;  %v1845_v23 = vpop.f32.mrf.mxu1  ;;  %v8083_v35 = vld [vmem:[%s12013_s5 + $0x694] sm:$0xf] }
 0x2b9   : > { %v9865_v57 = vpack.c.bf16 %v1951_v21, %v1947_v51  ;;  %v1950_v62 = vmax.f32 %v1665_v55, 0.0  ;;  %3509 = vmatmul.bf16.gmra.mxu2 %v9281_v40  ;;  %v7731_v51 = vld [vmem:[%s12013_s5 + $0x6ac] sm:$0xf0] }
 0x2ba   : > { %3598 = vmatmul.bf16.gmra.mxu3 %v12115_v47  ;;  %3776 = vmatmul.bf16.gmra.mxu1 %v9697_v63  ;;  %v1756_v58 = vpop.f32.mrf.mxu0  ;;  %v7734_v55 = vor.u32 %v8083_v35, %v7731_v51  ;;  %v12116_v47 = vld [vmem:[#allocation6_spill] sm:$0xff] }
 0x2bb   : > { %12114 = vst [vmem:[#allocation30_spill] sm:$0xff] %v9865_v57  ;;  %v9870_v54 = vpack.c.bf16 %v1950_v62, %v1946_v5  ;;  %v1757_v56 = vadd.f32 %v1756_v58, %v9645_v2 }
 0x2bc   : > { %v1578_v18 = vpop.f32.mrf.mxu2  ;;  %4120 = vmatpush.bf16.msra.mxu1 %v7734_v55 }
 0x2bd   : > { %v1846_v26 = vadd.f32 %v1845_v23, %v1757_v56  ;;  %v1579_v34 = vadd.f32 %v1578_v18, %v9650_v29  ;;  %v1667_v11 = vpop.f32.mrf.mxu3  ;;  %3687 = vmatmul.bf16.gmra.mxu0 %v9702_v49 }
 0x2bf   : > { %v1668_v62 = vadd.f32 %v1667_v11, %v1579_v34  ;;  %v1847_v59 = vpop.f32.mrf.mxu1  ;;  %v1955_v48 = vmax.f32 %v1846_v26, 0.0  ;;  %v7908_v26 = vld [vmem:[%s12013_s5 + $0x11c] sm:$0xf] }
 0x2c1   : > { %v1954_v11 = vmax.f32 %v1668_v62, 0.0  ;;  %v7031_v62 = vld [vmem:[%s12013_s5 + $0x134] sm:$0xf0] }
 0x2c2   : > { %v1758_v21 = vpop.f32.mrf.mxu0  ;;  %v7034_v55 = vor.u32 %v7908_v26, %v7031_v62 }
 0x2c3   : > { %v1759_v23 = vadd.f32 %v1758_v21, %v9645_v2 }
 0x2c4   : > { %v1580_v5 = vpop.f32.mrf.mxu2  ;;  %3854 = vmatpush.bf16.msra.mxu2 %v7034_v55 }
 0x2c5   : > { %v1848_v58 = vadd.f32 %v1847_v59, %v1759_v23  ;;  %v1581_v56 = vadd.f32 %v1580_v5, %v9650_v29  ;;  %v1669_v33 = vpop.f32.mrf.mxu3 }
 0x2c7   : > { %v1959_v18 = vmax.f32 %v1848_v58, 0.0  ;;  %v1670_v8 = vadd.f32 %v1669_v33, %v1581_v56  ;;  %v1850_v34 = vpop.f32.mrf.mxu1  ;;  %v8027_v33 = vld [vmem:[%s12013_s5 + $0x4d4] sm:$0xf] }
 0x2c9   : > { %v9889_v49 = vpack.c.bf16 %v1959_v18, %v1955_v48  ;;  %v1958_v63 = vmax.f32 %v1670_v8, 0.0  ;;  %3514 = vmatmul.bf16.gmra.mxu2 %v9311_v0  ;;  %v7507_v48 = vld [vmem:[%s12013_s5 + $0x4ec] sm:$0xf0] }
 0x2ca   : > { %3603 = vmatmul.bf16.gmra.mxu3 %v12116_v47  ;;  %3781 = vmatmul.bf16.gmra.mxu1 %v9721_v52  ;;  %v1761_v35 = vpop.f32.mrf.mxu0  ;;  %v7510_v8 = vor.u32 %v8027_v33, %v7507_v48  ;;  %v12118_v47 = vld [vmem:[#allocation8_spill] sm:$0xff] }
 0x2cb   : > { %v9894_v51 = vpack.c.bf16 %v1958_v63, %v1954_v11  ;;  %v1762_v59 = vadd.f32 %v1761_v35, %v9645_v2 }
 0x2cc   : > { %v1583_v21 = vpop.f32.mrf.mxu2  ;;  %4031 = vmatpush.bf16.msra.mxu0 %v7510_v8 }
 0x2cd   : > { %v1851_v23 = vadd.f32 %v1850_v34, %v1762_v59  ;;  %v1584_v5 = vadd.f32 %v1583_v21, %v9650_v29  ;;  %v1672_v58 = vpop.f32.mrf.mxu3  ;;  %3692 = vmatmul.bf16.gmra.mxu0 %v9726_v53 }
 0x2cf   : > { %v1673_v63 = vadd.f32 %v1672_v58, %v1584_v5  ;;  %v1852_v56 = vpop.f32.mrf.mxu1  ;;  %v1963_v62 = vmax.f32 %v1851_v23, 0.0  ;;  %v7964_v23 = vld [vmem:[%s12013_s5 + $0x2dc] sm:$0xf] }
 0x2d1   : > { %v1962_v58 = vmax.f32 %v1673_v63, 0.0  ;;  %v7255_v63 = vld [vmem:[%s12013_s5 + $0x2f4] sm:$0xf0] }
 0x2d2   : > { %v1763_v18 = vpop.f32.mrf.mxu0  ;;  %v7258_v8 = vor.u32 %v7964_v23, %v7255_v63 }
 0x2d3   : > { %v1764_v34 = vadd.f32 %v1763_v18, %v9645_v2 }
 0x2d4   : > { %v1585_v11 = vpop.f32.mrf.mxu2  ;;  %3943 = vmatpush.bf16.msra.mxu3 %v7258_v8 }
 0x2d5   : > { %v1853_v35 = vadd.f32 %v1852_v56, %v1764_v34  ;;  %v1586_v59 = vadd.f32 %v1585_v11, %v9650_v29  ;;  %v1674_v26 = vpop.f32.mrf.mxu3 }
 0x2d7   : > { %v1967_v21 = vmax.f32 %v1853_v35, 0.0  ;;  %v1675_v55 = vadd.f32 %v1674_v26, %v1586_v59  ;;  %v1855_v5 = vpop.f32.mrf.mxu1  ;;  %v8076_v26 = vld [vmem:[%s12013_s5 + $0x65c] sm:$0xf] }
 0x2d9   : > { %v9913_v53 = vpack.c.bf16 %v1967_v21, %v1963_v62  ;;  %v1966_v52 = vmax.f32 %v1675_v55, 0.0  ;;  %3519 = vmatmul.bf16.gmra.mxu2 %v9341_v39  ;;  %v7703_v62 = vld [vmem:[%s12013_s5 + $0x674] sm:$0xf0] }
 0x2da   : > { %3608 = vmatmul.bf16.gmra.mxu3 %v12118_v47  ;;  %3786 = vmatmul.bf16.gmra.mxu1 %v9745_v50  ;;  %v1766_v33 = vpop.f32.mrf.mxu0  ;;  %v7706_v55 = vor.u32 %v8076_v26, %v7703_v62 }
 0x2db   : > { %12117 = vst [vmem:[#allocation31_spill] sm:$0xff] %v9913_v53  ;;  %v9918_v48 = vpack.c.bf16 %v1966_v52, %v1962_v58  ;;  %v1767_v56 = vadd.f32 %v1766_v33, %v9645_v2 }
 0x2dc   : > { %v1588_v18 = vpop.f32.mrf.mxu2  ;;  %4121 = vmatpush.bf16.msra.mxu1 %v7706_v55 }
 0x2dd   : > { %v1856_v34 = vadd.f32 %v1855_v5, %v1767_v56  ;;  %v1589_v11 = vadd.f32 %v1588_v18, %v9650_v29  ;;  %v1677_v35 = vpop.f32.mrf.mxu3  ;;  %3697 = vmatmul.bf16.gmra.mxu0 %v9750_v24 }
 0x2df   : > { %v1678_v52 = vadd.f32 %v1677_v35, %v1589_v11  ;;  %v1857_v59 = vpop.f32.mrf.mxu1  ;;  %v1971_v63 = vmax.f32 %v1856_v34, 0.0  ;;  %v7901_v34 = vld [vmem:[%s12013_s5 + $0xe4] sm:$0xf] }
 0x2e1   : > { %v1970_v35 = vmax.f32 %v1678_v52, 0.0  ;;  %v7003_v52 = vld [vmem:[%s12013_s5 + $0xfc] sm:$0xf0] }
 0x2e2   : > { %v1768_v21 = vpop.f32.mrf.mxu0  ;;  %v7006_v55 = vor.u32 %v7901_v34, %v7003_v52 }
 0x2e3   : > { %v1769_v5 = vadd.f32 %v1768_v21, %v9645_v2 }
 0x2e4   : > { %v1590_v58 = vpop.f32.mrf.mxu2  ;;  %3855 = vmatpush.bf16.msra.mxu2 %v7006_v55 }
 0x2e5   : > { %v1858_v33 = vadd.f32 %v1857_v59, %v1769_v5  ;;  %v1591_v56 = vadd.f32 %v1590_v58, %v9650_v29  ;;  %v1679_v23 = vpop.f32.mrf.mxu3 }
 0x2e7   : > { %v1975_v18 = vmax.f32 %v1858_v33, 0.0  ;;  %v1680_v8 = vadd.f32 %v1679_v23, %v1591_v56  ;;  %v1860_v11 = vpop.f32.mrf.mxu1  ;;  %v8020_v23 = vld [vmem:[%s12013_s5 + $0x49c] sm:$0xf] }
 0x2e9   : > { %v9937_v24 = vpack.c.bf16 %v1975_v18, %v1971_v63  ;;  %v1974_v50 = vmax.f32 %v1680_v8, 0.0  ;;  %3524 = vmatmul.bf16.gmra.mxu2 %v9371_v16  ;;  %v7479_v63 = vld [vmem:[%s12013_s5 + $0x4b4] sm:$0xf0] }
 0x2ea   : > { %3613 = vmatmul.bf16.gmra.mxu3 %v9366_v30  ;;  %3791 = vmatmul.bf16.gmra.mxu1 %v9769_v44  ;;  %v1771_v26 = vpop.f32.mrf.mxu0  ;;  %v7482_v8 = vor.u32 %v8020_v23, %v7479_v63  ;;  %v12120_v30 = vld [vmem:[#allocation12_spill] sm:$0xff] }
 0x2eb   : > { %v9942_v62 = vpack.c.bf16 %v1974_v50, %v1970_v35  ;;  %v1772_v59 = vadd.f32 %v1771_v26, %v9645_v2 }
 0x2ec   : > { %v1593_v21 = vpop.f32.mrf.mxu2  ;;  %4032 = vmatpush.bf16.msra.mxu0 %v7482_v8 }
 0x2ed   : > { %v1861_v5 = vadd.f32 %v1860_v11, %v1772_v59  ;;  %v1594_v58 = vadd.f32 %v1593_v21, %v9650_v29  ;;  %v1682_v33 = vpop.f32.mrf.mxu3  ;;  %3702 = vmatmul.bf16.gmra.mxu0 %v9774_v32 }
 0x2ef   : > { %v1683_v50 = vadd.f32 %v1682_v33, %v1594_v58  ;;  %v1862_v56 = vpop.f32.mrf.mxu1  ;;  %v1979_v52 = vmax.f32 %v1861_v5, 0.0  ;;  %v7957_v5 = vld [vmem:[%s12013_s5 + $0x2a4] sm:$0xf] }
 0x2f1   : > { %v1978_v33 = vmax.f32 %v1683_v50, 0.0  ;;  %v7227_v50 = vld [vmem:[%s12013_s5 + $0x2bc] sm:$0xf0] }
 0x2f2   : > { %v1773_v18 = vpop.f32.mrf.mxu0  ;;  %v7230_v8 = vor.u32 %v7957_v5, %v7227_v50 }
 0x2f3   : > { %v1774_v11 = vadd.f32 %v1773_v18, %v9645_v2 }
 0x2f4   : > { %v1595_v35 = vpop.f32.mrf.mxu2  ;;  %3944 = vmatpush.bf16.msra.mxu3 %v7230_v8 }
 0x2f5   : > { %v1863_v26 = vadd.f32 %v1862_v56, %v1774_v11  ;;  %v1596_v59 = vadd.f32 %v1595_v35, %v9650_v29  ;;  %v1684_v34 = vpop.f32.mrf.mxu3 }
 0x2f7   : > { %v1983_v21 = vmax.f32 %v1863_v26, 0.0  ;;  %v1685_v55 = vadd.f32 %v1684_v34, %v1596_v59  ;;  %v1865_v58 = vpop.f32.mrf.mxu1  ;;  %v8069_v34 = vld [vmem:[%s12013_s5 + $0x624] sm:$0xf] }
 0x2f9   : > { %v9961_v32 = vpack.c.bf16 %v1983_v21, %v1979_v52  ;;  %v1982_v44 = vmax.f32 %v1685_v55, 0.0  ;;  %3529 = vmatmul.bf16.gmra.mxu2 %v9407_v27  ;;  %v7675_v52 = vld [vmem:[%s12013_s5 + $0x63c] sm:$0xf0] }
 0x2fa   : > { %3618 = vmatmul.bf16.gmra.mxu3 %v12120_v30  ;;  %3796 = vmatmul.bf16.gmra.mxu1 %v9799_v46  ;;  %v1776_v23 = vpop.f32.mrf.mxu0  ;;  %v7678_v55 = vor.u32 %v8069_v34, %v7675_v52 }
 0x2fb   : > { %12119 = vst [vmem:[#allocation32_spill] sm:$0xff] %v9961_v32  ;;  %v9966_v63 = vpack.c.bf16 %v1982_v44, %v1978_v33  ;;  %v1777_v56 = vadd.f32 %v1776_v23, %v9645_v2 }
 0x2fc   : > { %v1598_v18 = vpop.f32.mrf.mxu2  ;;  %4122 = vmatpush.bf16.msra.mxu1 %v7678_v55 }
 0x2fd   : > { %v1866_v11 = vadd.f32 %v1865_v58, %v1777_v56  ;;  %v1599_v35 = vadd.f32 %v1598_v18, %v9650_v29  ;;  %v1687_v26 = vpop.f32.mrf.mxu3  ;;  %3707 = vmatmul.bf16.gmra.mxu0 %v9804_v38 }
 0x2ff   : > { %v1688_v44 = vadd.f32 %v1687_v26, %v1599_v35  ;;  %v1867_v59 = vpop.f32.mrf.mxu1  ;;  %v1987_v50 = vmax.f32 %v1866_v11, 0.0  ;;  %v7894_v11 = vld [vmem:[%s12013_s5 + $0xac] sm:$0xf] }
 0x301   : > { %v1986_v26 = vmax.f32 %v1688_v44, 0.0  ;;  %v6975_v44 = vld [vmem:[%s12013_s5 + $0xc4] sm:$0xf0] }
 0x302   : > { %v1778_v21 = vpop.f32.mrf.mxu0  ;;  %v6978_v55 = vor.u32 %v7894_v11, %v6975_v44 }
 0x303   : > { %v1779_v58 = vadd.f32 %v1778_v21, %v9645_v2 }
 0x304   : > { %v1600_v33 = vpop.f32.mrf.mxu2  ;;  %3856 = vmatpush.bf16.msra.mxu2 %v6978_v55 }
 0x305   : > { %v1868_v23 = vadd.f32 %v1867_v59, %v1779_v58  ;;  %v1601_v56 = vadd.f32 %v1600_v33, %v9650_v29  ;;  %v1689_v5 = vpop.f32.mrf.mxu3 }
 0x307   : > { %v1991_v18 = vmax.f32 %v1868_v23, 0.0  ;;  %v1690_v8 = vadd.f32 %v1689_v5, %v1601_v56  ;;  %v1870_v35 = vpop.f32.mrf.mxu1 }
 0x309   : > { %v9985_v38 = vpack.c.bf16 %v1991_v18, %v1987_v50  ;;  %v1990_v46 = vmax.f32 %v1690_v8, 0.0  ;;  %3534 = vmatmul.bf16.gmra.mxu2 %v9431_v28 }
 0x30a   : > { %3623 = vmatmul.bf16.gmra.mxu3 %v9426_v19  ;;  %3801 = vmatmul.bf16.gmra.mxu1 %v9817_v45  ;;  %v1781_v34 = vpop.f32.mrf.mxu0 }
 0x30b   : > { %v9990_v52 = vpack.c.bf16 %v1990_v46, %v1986_v26  ;;  %v1782_v59 = vadd.f32 %v1781_v34, %v9645_v2 }
 0x30c   : > { %v1603_v21 = vpop.f32.mrf.mxu2 }
 0x30d   : > { %v1871_v58 = vadd.f32 %v1870_v35, %v1782_v59  ;;  %v1604_v33 = vadd.f32 %v1603_v21, %v9650_v29  ;;  %v1692_v23 = vpop.f32.mrf.mxu3  ;;  %3712 = vmatmul.bf16.gmra.mxu0 %v9822_v20 }
 0x30f   : > { %v1693_v46 = vadd.f32 %v1692_v23, %v1604_v33  ;;  %v1872_v56 = vpop.f32.mrf.mxu1  ;;  %v1995_v45 = vmax.f32 %v1871_v58, 0.0  ;;  %v8013_v58 = vld [vmem:[%s12013_s5 + $0x464] sm:$0xf] }
 0x311   : > { %v1994_v59 = vmax.f32 %v1693_v46, 0.0 }
 0x312   : > { %v1783_v5 = vpop.f32.mrf.mxu0 }
 0x313   : > { %v1784_v50 = vadd.f32 %v1783_v5, %v9645_v2 }
 0x314   : > { %v1605_v18 = vpop.f32.mrf.mxu2 }
 0x315   : > { %v1873_v8 = vadd.f32 %v1872_v56, %v1784_v50  ;;  %v1606_v26 = vadd.f32 %v1605_v18, %v9650_v29  ;;  %v1694_v34 = vpop.f32.mrf.mxu3 }
 0x317   : > { %v1999_v19 = vmax.f32 %v1873_v8, 0.0  ;;  %v1695_v11 = vadd.f32 %v1694_v34, %v1606_v26  ;;  %v1875_v35 = vpop.f32.mrf.mxu1 }
 0x319   : > { %v10003_v44 = vpack.c.bf16 %v1999_v19, %v1995_v45  ;;  %v1998_v21 = vmax.f32 %v1695_v11, 0.0  ;;  %3539 = vmatmul.bf16.gmra.mxu2 %v9455_v25  ;;  %v7451_v19 = vld [vmem:[%s12013_s5 + $0x47c] sm:$0xf0] }
 0x31a   : > { %3628 = vmatmul.bf16.gmra.mxu3 %v9450_v9  ;;  %3806 = vmatmul.bf16.gmra.mxu1 %v9841_v12  ;;  %v1786_v55 = vpop.f32.mrf.mxu0  ;;  %v7454_v50 = vor.u32 %v8013_v58, %v7451_v19  ;;  %v2328_v58 = vld [vmem:[%s12014_s6] sm:$0xff] }
 0x31b   : > { %v10008_v33 = vpack.c.bf16 %v1998_v21, %v1994_v59  ;;  %v1787_v23 = vadd.f32 %v1786_v55, %v9645_v2  ;;  %v7950_v59 = vld [vmem:[%s12013_s5 + $0x26c] sm:$0xf] }
 0x31c   : > { %v1608_v56 = vpop.f32.mrf.mxu2  ;;  %4033 = vmatpush.bf16.msra.mxu0 %v7454_v50 }
 0x31d   : > { %v1876_v45 = vadd.f32 %v1875_v35, %v1787_v23  ;;  %v1609_v46 = vadd.f32 %v1608_v56, %v9650_v29  ;;  %v1697_v5 = vpop.f32.mrf.mxu3  ;;  %3717 = vmatmul.bf16.gmra.mxu0 %v9846_v6  ;;  %v7199_v35 = vld [vmem:[%s12013_s5 + $0x284] sm:$0xf0] }
 0x31e   : > { %v7202_v56 = vor.u32 %v7950_v59, %v7199_v35 }
 0x31f   : > { %v1698_v18 = vadd.f32 %v1697_v5, %v1609_v46  ;;  %v1877_v8 = vpop.f32.mrf.mxu1  ;;  %v2003_v19 = vmax.f32 %v1876_v45, 0.0 }
 0x320   : > { %3945 = vmatpush.bf16.msra.mxu3 %v7202_v56 }
 0x321   : > { %v2002_v50 = vmax.f32 %v1698_v18, 0.0  ;;  %v8062_v18 = vld [vmem:[%s12013_s5 + $0x5ec] sm:$0xf] }
 0x322   : > { %v1788_v26 = vpop.f32.mrf.mxu0 }
 0x323   : > { %v1789_v34 = vadd.f32 %v1788_v26, %v9645_v2 }
 0x324   : > { %v1610_v11 = vpop.f32.mrf.mxu2 }
 0x325   : > { %v1878_v21 = vadd.f32 %v1877_v8, %v1789_v34  ;;  %v1611_v55 = vadd.f32 %v1610_v11, %v9650_v29  ;;  %v1699_v23 = vpop.f32.mrf.mxu3  ;;  %v10033_v8 = vperm.slane %v2328_v58, 0  ;;  %v7647_v11 = vld [vmem:[%s12013_s5 + $0x604] sm:$0xf0] }
 0x327   : > { %v2007_v2 = vmax.f32 %v1878_v21, 0.0  ;;  %v1700_v46 = vadd.f32 %v1699_v23, %v1611_v55  ;;  %v3772_v5 = vpop.f32.mrf.mxu1  ;;  %v7650_v21 = vor.u32 %v8062_v18, %v7647_v11 }
 0x329   : > { %v10030_v26 = vpack.c.bf16 %v2007_v2, %v2003_v19  ;;  %v2006_v6 = vmax.f32 %v1700_v46, 0.0  ;;  %3544 = vmatmul.bf16.gmra.mxu2 %v9479_v17  ;;  %4123 = vmatpush.bf16.msra.mxu1 %v7650_v21  ;;  %v7887_v2 = vld [vmem:[%s12013_s5 + $0x74] sm:$0xf]  ;;  %v6947_v46 = vld [vmem:[%s12013_s5 + $0x8c] sm:$0xf0] }
 0x32a   : > { %3633 = vmatmul.bf16.gmra.mxu3 %v9474_v15  ;;  %3811 = vmatmul.bf16.gmra.mxu1 %v9865_v57  ;;  %v3683_v29 = vpop.f32.mrf.mxu0  ;;  %v6950_v18 = vor.u32 %v7887_v2, %v6947_v46 }
 0x32b   : > { %v10037_v34 = vpack.c.bf16 %v2006_v6, %v2002_v50 }
 0x32c   : > { %v3505_v45 = vpop.f32.mrf.mxu2  ;;  %3857 = vmatpush.bf16.msra.mxu2 %v6950_v18 }
 0x32d   : > { %12121 = vst [vmem:[#allocation33_spill] sm:$0xff] %v10037_v34  ;;  %v3506_v59 = vadd.f32 %v3505_v45, %v10033_v8  ;;  %v3594_v35 = vpop.f32.mrf.mxu3  ;;  %3722 = vmatmul.bf16.gmra.mxu0 %v9870_v54 }
 0x32f   : > { %v3595_v55 = vadd.f32 %v3594_v35, %v3506_v59  ;;  %v3774_v23 = vpop.f32.mrf.mxu1 }
 0x331   : > { %v3684_v6 = vadd.f32 %v3683_v29, %v3595_v55 }
 0x332   : > { %v3685_v56 = vpop.f32.mrf.mxu0 }
 0x333   : > { %v3773_v58 = vadd.f32 %v3772_v5, %v3684_v6  ;;  %v8006_v6 = vld [vmem:[%s12013_s5 + $0x42c] sm:$0xf] }
 0x334   : > { %v3507_v19 = vpop.f32.mrf.mxu2 }
 0x335   : > { %8122 = vtanh.f32 %v3773_v58  ;;  %v3508_v50 = vadd.f32 %v3507_v19, %v10033_v8  ;;  %v3596_v45 = vpop.f32.mrf.mxu3 }
 0x337   : > { %v3597_v11 = vadd.f32 %v3596_v45, %v3508_v50  ;;  %v3777_v59 = vpop.f32.mrf.mxu1 }
 0x339   : > { %v3686_v5 = vadd.f32 %v3685_v56, %v3597_v11  ;;  %3549 = vmatmul.bf16.gmra.mxu2 %v9503_v36  ;;  %v7423_v56 = vld [vmem:[%s12013_s5 + $0x444] sm:$0xf0] }
 0x33a   : > { %3638 = vmatmul.bf16.gmra.mxu3 %v9498_v13  ;;  %3816 = vmatmul.bf16.gmra.mxu1 %v9889_v49  ;;  %v3688_v29 = vpop.f32.mrf.mxu0  ;;  %v7426_v2 = vor.u32 %v8006_v6, %v7423_v56 }
 0x33b   : > { %v8123_v35 = vpop.eup %8122  ;;  %v3775_v21 = vadd.f32 %v3774_v23, %v3686_v5 }
 0x33c   : > { %6212 = vst [vmem:[%s10058_s15] sm:$0xff] %v8123_v35  ;;  %v3510_v55 = vpop.f32.mrf.mxu2  ;;  %4034 = vmatpush.bf16.msra.mxu0 %v7426_v2  ;;  %v7943_v35 = vld [vmem:[%s12013_s5 + $0x234] sm:$0xf] }
 0x33d   : > { %8124 = vtanh.f32 %v3775_v21  ;;  %v3511_v58 = vadd.f32 %v3510_v55, %v10033_v8  ;;  %v3599_v19 = vpop.f32.mrf.mxu3  ;;  %3727 = vmatmul.bf16.gmra.mxu0 %v9894_v51  ;;  %v7171_v21 = vld [vmem:[%s12013_s5 + $0x24c] sm:$0xf0] }
 0x33e   : > { %v7174_v56 = vor.u32 %v7943_v35, %v7171_v21 }
 0x33f   : > { %v3600_v46 = vadd.f32 %v3599_v19, %v3511_v58  ;;  %v3779_v23 = vpop.f32.mrf.mxu1 }
 0x340   : > { %3946 = vmatpush.bf16.msra.mxu3 %v7174_v56 }
 0x341   : > { %v3689_v50 = vadd.f32 %v3688_v29, %v3600_v46 }
 0x342   : > { %v3690_v45 = vpop.f32.mrf.mxu0 }
 0x343   : > { %v8125_v18 = vpop.eup %8124  ;;  %v3778_v11 = vadd.f32 %v3777_v59, %v3689_v50 }
 0x344   : > { %6219 = vst [vmem:[%s10058_s15 + $0x38] sm:$0xff] %v8125_v18  ;;  %v3512_v5 = vpop.f32.mrf.mxu2  ;;  %v8055_v18 = vld [vmem:[%s12013_s5 + $0x5b4] sm:$0xf] }
 0x345   : > { %8126 = vtanh.f32 %v3778_v11  ;;  %v3513_v55 = vadd.f32 %v3512_v5, %v10033_v8  ;;  %v3601_v6 = vpop.f32.mrf.mxu3 }
 0x347   : > { %v3602_v29 = vadd.f32 %v3601_v6, %v3513_v55  ;;  %v3782_v58 = vpop.f32.mrf.mxu1 }
 0x349   : > { %v3691_v59 = vadd.f32 %v3690_v45, %v3602_v29  ;;  %3554 = vmatmul.bf16.gmra.mxu2 %v9527_v1  ;;  %v7619_v45 = vld [vmem:[%s12013_s5 + $0x5cc] sm:$0xf0] }
 0x34a   : > { %3643 = vmatmul.bf16.gmra.mxu3 %v9522_v7  ;;  %3821 = vmatmul.bf16.gmra.mxu1 %v9913_v53  ;;  %v3693_v19 = vpop.f32.mrf.mxu0  ;;  %v7622_v35 = vor.u32 %v8055_v18, %v7619_v45 }
 0x34b   : > { %v8127_v2 = vpop.eup %8126  ;;  %v3780_v46 = vadd.f32 %v3779_v23, %v3691_v59 }
 0x34c   : > { %6226 = vst [vmem:[%s10058_s15 + $0x70] sm:$0xff] %v8127_v2  ;;  %v3515_v50 = vpop.f32.mrf.mxu2  ;;  %4124 = vmatpush.bf16.msra.mxu1 %v7622_v35  ;;  %v7880_v2 = vld [vmem:[%s12013_s5 + $0x3c] sm:$0xf] }
 0x34d   : > { %8128 = vtanh.f32 %v3780_v46  ;;  %v3516_v11 = vadd.f32 %v3515_v50, %v10033_v8  ;;  %v3604_v5 = vpop.f32.mrf.mxu3  ;;  %3732 = vmatmul.bf16.gmra.mxu0 %v9918_v48  ;;  %v6919_v46 = vld [vmem:[%s12013_s5 + $0x54] sm:$0xf0] }
 0x34e   : > { %v6922_v45 = vor.u32 %v7880_v2, %v6919_v46 }
 0x34f   : > { %v3605_v21 = vadd.f32 %v3604_v5, %v3516_v11  ;;  %v3784_v23 = vpop.f32.mrf.mxu1 }
 0x350   : > { %3858 = vmatpush.bf16.msra.mxu2 %v6922_v45 }
 0x351   : > { %v3694_v55 = vadd.f32 %v3693_v19, %v3605_v21 }
 0x352   : > { %v3695_v6 = vpop.f32.mrf.mxu0 }
 0x353   : > { %v8129_v56 = vpop.eup %8128  ;;  %v3783_v29 = vadd.f32 %v3782_v58, %v3694_v55 }
 0x354   : > { %6233 = vst [vmem:[%s10058_s15 + $0xa8] sm:$0xff] %v8129_v56  ;;  %v3517_v59 = vpop.f32.mrf.mxu2  ;;  %v7999_v56 = vld [vmem:[%s12013_s5 + $0x3f4] sm:$0xf] }
 0x355   : > { %8130 = vtanh.f32 %v3783_v29  ;;  %v3518_v50 = vadd.f32 %v3517_v59, %v10033_v8  ;;  %v3606_v18 = vpop.f32.mrf.mxu3 }
 0x357   : > { %v3607_v19 = vadd.f32 %v3606_v18, %v3518_v50  ;;  %v3787_v11 = vpop.f32.mrf.mxu1 }
 0x359   : > { %v3696_v58 = vadd.f32 %v3695_v6, %v3607_v19  ;;  %3559 = vmatmul.bf16.gmra.mxu2 %v9551_v31  ;;  %v7395_v6 = vld [vmem:[%s12013_s5 + $0x40c] sm:$0xf0] }
 0x35a   : > { %3648 = vmatmul.bf16.gmra.mxu3 %v9546_v61  ;;  %3826 = vmatmul.bf16.gmra.mxu1 %v9937_v24  ;;  %v3698_v5 = vpop.f32.mrf.mxu0  ;;  %v7398_v2 = vor.u32 %v7999_v56, %v7395_v6 }
 0x35b   : > { %v8131_v35 = vpop.eup %8130  ;;  %v3785_v21 = vadd.f32 %v3784_v23, %v3696_v58 }
 0x35c   : > { %6240 = vst [vmem:[%s10058_s15 + $0xe0] sm:$0xff] %v8131_v35  ;;  %v3520_v55 = vpop.f32.mrf.mxu2  ;;  %4035 = vmatpush.bf16.msra.mxu0 %v7398_v2  ;;  %v7936_v35 = vld [vmem:[%s12013_s5 + $0x1fc] sm:$0xf] }
 0x35d   : > { %8132 = vtanh.f32 %v3785_v21  ;;  %v3521_v29 = vadd.f32 %v3520_v55, %v10033_v8  ;;  %v3609_v59 = vpop.f32.mrf.mxu3  ;;  %3737 = vmatmul.bf16.gmra.mxu0 %v9942_v62  ;;  %v7143_v21 = vld [vmem:[%s12013_s5 + $0x214] sm:$0xf0] }
 0x35e   : > { %v7146_v6 = vor.u32 %v7936_v35, %v7143_v21 }
 0x35f   : > { %v3610_v46 = vadd.f32 %v3609_v59, %v3521_v29  ;;  %v3789_v23 = vpop.f32.mrf.mxu1 }
 0x360   : > { %3947 = vmatpush.bf16.msra.mxu3 %v7146_v6 }
 0x361   : > { %v3699_v50 = vadd.f32 %v3698_v5, %v3610_v46 }
 0x362   : > { %v3700_v18 = vpop.f32.mrf.mxu0 }
 0x363   : > { %v8133_v45 = vpop.eup %8132  ;;  %v3788_v19 = vadd.f32 %v3787_v11, %v3699_v50 }
 0x364   : > { %6247 = vst [vmem:[%s10058_s15 + $0x118] sm:$0xff] %v8133_v45  ;;  %v3522_v58 = vpop.f32.mrf.mxu2  ;;  %v8048_v45 = vld [vmem:[%s12013_s5 + $0x57c] sm:$0xf] }
 0x365   : > { %8134 = vtanh.f32 %v3788_v19  ;;  %v3523_v55 = vadd.f32 %v3522_v58, %v10033_v8  ;;  %v3611_v56 = vpop.f32.mrf.mxu3 }
 0x367   : > { %v3612_v5 = vadd.f32 %v3611_v56, %v3523_v55  ;;  %v3792_v29 = vpop.f32.mrf.mxu1 }
 0x369   : > { %v3701_v11 = vadd.f32 %v3700_v18, %v3612_v5  ;;  %3564 = vmatmul.bf16.gmra.mxu2 %v9575_v4  ;;  %v7591_v18 = vld [vmem:[%s12013_s5 + $0x594] sm:$0xf0] }
 0x36a   : > { %3653 = vmatmul.bf16.gmra.mxu3 %v9570_v3  ;;  %3831 = vmatmul.bf16.gmra.mxu1 %v9961_v32  ;;  %v3703_v59 = vpop.f32.mrf.mxu0  ;;  %v7594_v35 = vor.u32 %v8048_v45, %v7591_v18 }
 0x36b   : > { %v8135_v2 = vpop.eup %8134  ;;  %v3790_v46 = vadd.f32 %v3789_v23, %v3701_v11 }
 0x36c   : > { %6254 = vst [vmem:[%s10058_s15 + $0x150] sm:$0xff] %v8135_v2  ;;  %v3525_v50 = vpop.f32.mrf.mxu2  ;;  %4125 = vmatpush.bf16.msra.mxu1 %v7594_v35  ;;  %v7873_v2 = vld [vmem:[%s12013_s5 + $0x4] sm:$0xf] }
 0x36d   : > { %8136 = vtanh.f32 %v3790_v46  ;;  %v3526_v19 = vadd.f32 %v3525_v50, %v10033_v8  ;;  %v3614_v58 = vpop.f32.mrf.mxu3  ;;  %3742 = vmatmul.bf16.gmra.mxu0 %v9966_v63  ;;  %v6891_v46 = vld [vmem:[%s12013_s5 + $0x1c] sm:$0xf0] }
 0x36e   : > { %v6894_v18 = vor.u32 %v7873_v2, %v6891_v46 }
 0x36f   : > { %v3615_v21 = vadd.f32 %v3614_v58, %v3526_v19  ;;  %v3794_v23 = vpop.f32.mrf.mxu1 }
 0x370   : > { %3859 = vmatpush.bf16.msra.mxu2 %v6894_v18 }
 0x371   : > { %v3704_v55 = vadd.f32 %v3703_v59, %v3615_v21 }
 0x372   : > { %v3705_v56 = vpop.f32.mrf.mxu0 }
 0x373   : > { %v8137_v6 = vpop.eup %8136  ;;  %v3793_v5 = vadd.f32 %v3792_v29, %v3704_v55 }
 0x374   : > { %6261 = vst [vmem:[%s10058_s15 + $0x188] sm:$0xff] %v8137_v6  ;;  %v3527_v11 = vpop.f32.mrf.mxu2  ;;  %v7992_v6 = vld [vmem:[%s12013_s5 + $0x3bc] sm:$0xf] }
 0x375   : > { %8138 = vtanh.f32 %v3793_v5  ;;  %v3528_v50 = vadd.f32 %v3527_v11, %v10033_v8  ;;  %v3616_v45 = vpop.f32.mrf.mxu3 }
 0x377   : > { %v3617_v59 = vadd.f32 %v3616_v45, %v3528_v50  ;;  %v3797_v19 = vpop.f32.mrf.mxu1 }
 0x379   : > { %v3706_v29 = vadd.f32 %v3705_v56, %v3617_v59  ;;  %3569 = vmatmul.bf16.gmra.mxu2 %v9599_v42  ;;  %v7367_v56 = vld [vmem:[%s12013_s5 + $0x3d4] sm:$0xf0] }
 0x37a   : > { %3658 = vmatmul.bf16.gmra.mxu3 %v9594_v60  ;;  %3836 = vmatmul.bf16.gmra.mxu1 %v9985_v38  ;;  %v3708_v58 = vpop.f32.mrf.mxu0  ;;  %v7370_v2 = vor.u32 %v7992_v6, %v7367_v56 }
 0x37b   : > { %v8139_v35 = vpop.eup %8138  ;;  %v3795_v21 = vadd.f32 %v3794_v23, %v3706_v29 }
 0x37c   : > { %6268 = vst [vmem:[%s10058_s15 + $0x1c0] sm:$0xff] %v8139_v35  ;;  %v3530_v55 = vpop.f32.mrf.mxu2  ;;  %4036 = vmatpush.bf16.msra.mxu0 %v7370_v2  ;;  %v7929_v35 = vld [vmem:[%s12013_s5 + $0x1c4] sm:$0xf] }
 0x37d   : > { %8140 = vtanh.f32 %v3795_v21  ;;  %v3531_v5 = vadd.f32 %v3530_v55, %v10033_v8  ;;  %v3619_v11 = vpop.f32.mrf.mxu3  ;;  %3747 = vmatmul.bf16.gmra.mxu0 %v9990_v52  ;;  %v7115_v21 = vld [vmem:[%s12013_s5 + $0x1dc] sm:$0xf0] }
 0x37e   : > { %v7118_v56 = vor.u32 %v7929_v35, %v7115_v21 }
 0x37f   : > { %v3620_v46 = vadd.f32 %v3619_v11, %v3531_v5  ;;  %v3799_v23 = vpop.f32.mrf.mxu1 }
 0x380   : > { %3948 = vmatpush.bf16.msra.mxu3 %v7118_v56 }
 0x381   : > { %v3709_v50 = vadd.f32 %v3708_v58, %v3620_v46  ;;  %v8041_v58 = vld [vmem:[%s12013_s5 + $0x544] sm:$0xf] }
 0x382   : > { %v3710_v45 = vpop.f32.mrf.mxu0  ;;  %v7985_v46 = vld [vmem:[%s12013_s5 + $0x384] sm:$0xf] }
 0x383   : > { %v8141_v18 = vpop.eup %8140  ;;  %v3798_v59 = vadd.f32 %v3797_v19, %v3709_v50  ;;  %v7563_v19 = vld [vmem:[%s12013_s5 + $0x55c] sm:$0xf0] }
 0x384   : > { %6275 = vst [vmem:[%s10058_s15 + $0x1f8] sm:$0xff] %v8141_v18  ;;  %v3532_v29 = vpop.f32.mrf.mxu2  ;;  %v7566_v5 = vor.u32 %v8041_v58, %v7563_v19  ;;  %v7339_v50 = vld [vmem:[%s12013_s5 + $0x39c] sm:$0xf0] }
 0x385   : > { %8142 = vtanh.f32 %v3798_v59  ;;  %v3533_v55 = vadd.f32 %v3532_v29, %v10033_v8  ;;  %v3621_v6 = vpop.f32.mrf.mxu3  ;;  %v7342_v59 = vor.u32 %v7985_v46, %v7339_v50 }
 0x386   : > { %4126 = vmatpush.bf16.msra.mxu1 %v7566_v5 }
 0x387   : > { %v3622_v11 = vadd.f32 %v3621_v6, %v3533_v55  ;;  %v3802_v2 = vpop.f32.mrf.mxu1  ;;  %4037 = vmatpush.bf16.msra.mxu0 %v7342_v59 }
 0x389   : > { %v3711_v18 = vadd.f32 %v3710_v45, %v3622_v11  ;;  %3574 = vmatmul.bf16.gmra.mxu2 %v9623_v22 }
 0x38a   : > { %3663 = vmatmul.bf16.gmra.mxu3 %v9618_v37  ;;  %3841 = vmatmul.bf16.gmra.mxu1 %v10003_v44  ;;  %v3713_v29 = vpop.f32.mrf.mxu0 }
 0x38b   : > { %v8143_v35 = vpop.eup %8142  ;;  %v3800_v21 = vadd.f32 %v3799_v23, %v3711_v18  ;;  %v7093_v23 = vld [vmem:[%s12013_s5 + $0x190] sm:$0xf]  ;;  %v7926_v18 = vld [vmem:[%s12013_s5 + $0x1a8] sm:$0xf0] }
 0x38c   : > { %6282 = vst [vmem:[%s10058_s15 + $0x230] sm:$0xff] %v8143_v35  ;;  %v3535_v55 = vpop.f32.mrf.mxu2 }
 0x38d   : > { %8144 = vtanh.f32 %v3800_v21  ;;  %v3536_v6 = vadd.f32 %v3535_v55, %v10033_v8  ;;  %v3624_v56 = vpop.f32.mrf.mxu3  ;;  %3752 = vmatmul.bf16.gmra.mxu0 %v10008_v33  ;;  %v7094_v21 = vor.u32 %v7926_v18, %v7093_v23 }
 0x38f   : > { %v3625_v45 = vadd.f32 %v3624_v56, %v3536_v6  ;;  %v3804_v58 = vpop.f32.mrf.mxu1  ;;  %4208 = vmatpush.bf16.msrb.mxu2 %v7094_v21 }
 0x391   : > { %v3714_v19 = vadd.f32 %v3713_v29, %v3625_v45 }
 0x392   : > { %v3715_v5 = vpop.f32.mrf.mxu0 }
 0x393   : > { %v8145_v11 = vpop.eup %8144  ;;  %v3803_v46 = vadd.f32 %v3802_v2, %v3714_v19 }
 0x394   : > { %6289 = vst [vmem:[%s10058_s15 + $0x268] sm:$0xff] %v8145_v11  ;;  %v3537_v50 = vpop.f32.mrf.mxu2 }
 0x395   : > { %8146 = vtanh.f32 %v3803_v46  ;;  %v3538_v59 = vadd.f32 %v3537_v50, %v10033_v8  ;;  %v3626_v35 = vpop.f32.mrf.mxu3 }
 0x397   : > { %v3627_v29 = vadd.f32 %v3626_v35, %v3538_v59  ;;  %v3807_v55 = vpop.f32.mrf.mxu1 }
 0x399   : > { %v3716_v2 = vadd.f32 %v3715_v5, %v3627_v29  ;;  %3579 = vmatmul.bf16.gmra.mxu2 %v9654_v41  ;;  %v7982_v29 = vld [vmem:[%s12013_s5 + $0x368] sm:$0xf0] }
 0x39a   : > { %3668 = vmatmul.bf16.gmra.mxu3 %v9647_v43  ;;  %3846 = vmatmul.bf16.gmra.mxu1 %v10030_v26  ;;  %v3718_v6 = vpop.f32.mrf.mxu0 }
 0x39b   : > { %v8147_v56 = vpop.eup %8146  ;;  %v3805_v45 = vadd.f32 %v3804_v58, %v3716_v2  ;;  %v7317_v58 = vld [vmem:[%s12013_s5 + $0x350] sm:$0xf] }
 0x39c   : > { %6296 = vst [vmem:[%s10058_s15 + $0x2a0] sm:$0xff] %v8147_v56  ;;  %v3540_v19 = vpop.f32.mrf.mxu2 }
 0x39d   : > { %8148 = vtanh.f32 %v3805_v45  ;;  %v3541_v11 = vadd.f32 %v3540_v19, %v10033_v8  ;;  %v3629_v46 = vpop.f32.mrf.mxu3  ;;  %3757 = vmatmul.bf16.gmra.mxu0 %v10037_v34  ;;  %v7318_v45 = vor.u32 %v7982_v29, %v7317_v58  ;;  %v12123_v29 = vld [vmem:[#allocation16_spill] sm:$0xff] }
 0x39f   : > { %v3630_v50 = vadd.f32 %v3629_v46, %v3541_v11  ;;  %v3809_v5 = vpop.f32.mrf.mxu1  ;;  %4297 = vmatpush.bf16.msrb.mxu3 %v7318_v45  ;;  %v12122_v11 = vld [vmem:[#allocation15_spill] sm:$0xff] }
 0x3a1   : > { %v3719_v23 = vadd.f32 %v3718_v6, %v3630_v50 }
 0x3a2   : > { %v3720_v18 = vpop.f32.mrf.mxu0 }
 0x3a3   : > { %v8149_v59 = vpop.eup %8148  ;;  %v3808_v35 = vadd.f32 %v3807_v55, %v3719_v23 }
 0x3a4   : > { %6303 = vst [vmem:[%s10058_s15 + $0x2d8] sm:$0xff] %v8149_v59  ;;  %v3542_v21 = vpop.f32.mrf.mxu2 }
 0x3a5   : > { %8150 = vtanh.f32 %v3808_v35  ;;  %v3543_v2 = vadd.f32 %v3542_v21, %v10033_v8  ;;  %v3631_v56 = vpop.f32.mrf.mxu3  ;;  %v7765_v35 = vld [vmem:[%s12013_s5 + $0x6d0] sm:$0xf] }
 0x3a7   : > { %v3632_v6 = vadd.f32 %v3631_v56, %v3543_v2  ;;  %v3812_v19 = vpop.f32.mrf.mxu1 }
 0x3a9   : > { %v3721_v55 = vadd.f32 %v3720_v18, %v3632_v6  ;;  %3860 = vmatmul.bf16.vlgmr.msra.gmra.mxu2 %v9251_v14  ;;  %v8094_v18 = vld [vmem:[%s12013_s5 + $0x6e8] sm:$0xf0] }
 0x3aa   : > { %3949 = vmatmul.bf16.vlgmr.msra.gmra.mxu3 %v9246_v10  ;;  %4127 = vmatmul.bf16.vlgmr.msra.gmra.mxu1 %v12122_v11  ;;  %v3723_v46 = vpop.f32.mrf.mxu0  ;;  %v7766_v2 = vor.u32 %v8094_v18, %v7765_v35  ;;  %v7065_v10 = vld [vmem:[%s12013_s5 + $0x158] sm:$0xf] }
 0x3ab   : > { %v8151_v50 = vpop.eup %8150  ;;  %v3810_v23 = vadd.f32 %v3809_v5, %v3721_v55 }
 0x3ac   : > { %6310 = vst [vmem:[%s10058_s15 + $0x310] sm:$0xff] %v8151_v50  ;;  %v3545_v59 = vpop.f32.mrf.mxu2  ;;  %4475 = vmatpush.bf16.msrb.mxu1 %v7766_v2  ;;  %v12125_v2 = vld [vmem:[#allocation17_spill] sm:$0xff] }
 0x3ad   : > { %8152 = vtanh.f32 %v3810_v23  ;;  %v3546_v21 = vadd.f32 %v3545_v59, %v10033_v8  ;;  %v3634_v58 = vpop.f32.mrf.mxu3  ;;  %4038 = vmatmul.bf16.vlgmr.msra.gmra.mxu0 %v12123_v29  ;;  %v7919_v23 = vld [vmem:[%s12013_s5 + $0x170] sm:$0xf0] }
 0x3ae   : > { %v7066_v18 = vor.u32 %v7919_v23, %v7065_v10  ;;  %v7541_v10 = vld [vmem:[%s12013_s5 + $0x510] sm:$0xf] }
 0x3af   : > { %v3635_v56 = vadd.f32 %v3634_v58, %v3546_v21  ;;  %v3814_v5 = vpop.f32.mrf.mxu1  ;;  %v12124_v58 = vld [vmem:[#allocation4_spill] sm:$0xff] }
 0x3b0   : > { %4209 = vmatpush.bf16.msrb.mxu2 %v7066_v18 }
 0x3b1   : > { %v3724_v45 = vadd.f32 %v3723_v46, %v3635_v56 }
 0x3b2   : > { %v3725_v6 = vpop.f32.mrf.mxu0 }
 0x3b3   : > { %v8153_v55 = vpop.eup %8152  ;;  %v3813_v50 = vadd.f32 %v3812_v19, %v3724_v45 }
 0x3b4   : > { %6317 = vst [vmem:[%s10058_s15 + $0x348] sm:$0xff] %v8153_v55  ;;  %v3547_v11 = vpop.f32.mrf.mxu2 }
 0x3b5   : > { %8154 = vtanh.f32 %v3813_v50  ;;  %v3548_v59 = vadd.f32 %v3547_v11, %v10033_v8  ;;  %v3636_v35 = vpop.f32.mrf.mxu3  ;;  %v8038_v11 = vld [vmem:[%s12013_s5 + $0x528] sm:$0xf0] }
 0x3b7   : > { %v3637_v46 = vadd.f32 %v3636_v35, %v3548_v59  ;;  %v3817_v21 = vpop.f32.mrf.mxu1  ;;  %v12126_v59 = vld [vmem:[#allocation18_spill] sm:$0xff]  ;;  %v7542_v35 = vor.u32 %v8038_v11, %v7541_v10 }
 0x3b9   : > { %v3726_v19 = vadd.f32 %v3725_v6, %v3637_v46  ;;  %3865 = vmatmul.bf16.gmra.mxu2 %v9281_v40  ;;  %4386 = vmatpush.bf16.msrb.mxu0 %v7542_v35  ;;  %v7289_v40 = vld [vmem:[%s12013_s5 + $0x318] sm:$0xf]  ;;  %v12128_v35 = vld [vmem:[#allocation19_spill] sm:$0xff] }
 0x3ba   : > { %3954 = vmatmul.bf16.gmra.mxu3 %v12124_v58  ;;  %4132 = vmatmul.bf16.gmra.mxu1 %v12125_v2  ;;  %v3728_v56 = vpop.f32.mrf.mxu0 }
 0x3bb   : > { %v8155_v45 = vpop.eup %8154  ;;  %v3815_v55 = vadd.f32 %v3814_v5, %v3726_v19 }
 0x3bc   : > { %6324 = vst [vmem:[%s10058_s15 + $0x380] sm:$0xff] %v8155_v45  ;;  %v3550_v50 = vpop.f32.mrf.mxu2 }
 0x3bd   : > { %8156 = vtanh.f32 %v3815_v55  ;;  %v3551_v6 = vadd.f32 %v3550_v50, %v10033_v8  ;;  %v3639_v23 = vpop.f32.mrf.mxu3  ;;  %4043 = vmatmul.bf16.gmra.mxu0 %v12126_v59  ;;  %v7975_v55 = vld [vmem:[%s12013_s5 + $0x330] sm:$0xf0] }
 0x3be   : > { %v7290_v11 = vor.u32 %v7975_v55, %v7289_v40  ;;  %v7737_v40 = vld [vmem:[%s12013_s5 + $0x698] sm:$0xf] }
 0x3bf   : > { %v3640_v18 = vadd.f32 %v3639_v23, %v3551_v6  ;;  %v3819_v5 = vpop.f32.mrf.mxu1  ;;  %v12127_v23 = vld [vmem:[#allocation6_spill] sm:$0xff] }
 0x3c0   : > { %4298 = vmatpush.bf16.msrb.mxu3 %v7290_v11 }
 0x3c1   : > { %v3729_v46 = vadd.f32 %v3728_v56, %v3640_v18 }
 0x3c2   : > { %v3730_v19 = vpop.f32.mrf.mxu0 }
 0x3c3   : > { %v8157_v45 = vpop.eup %8156  ;;  %v3818_v2 = vadd.f32 %v3817_v21, %v3729_v46 }
 0x3c4   : > { %6331 = vst [vmem:[%s10058_s15 + $0x3b8] sm:$0xff] %v8157_v45  ;;  %v3552_v58 = vpop.f32.mrf.mxu2 }
 0x3c5   : > { %8158 = vtanh.f32 %v3818_v2  ;;  %v3553_v50 = vadd.f32 %v3552_v58, %v10033_v8  ;;  %v3641_v10 = vpop.f32.mrf.mxu3  ;;  %v8087_v58 = vld [vmem:[%s12013_s5 + $0x6b0] sm:$0xf0] }
 0x3c7   : > { %v3642_v56 = vadd.f32 %v3641_v10, %v3553_v50  ;;  %v3822_v6 = vpop.f32.mrf.mxu1  ;;  %v12129_v50 = vld [vmem:[#allocation20_spill] sm:$0xff]  ;;  %v7738_v10 = vor.u32 %v8087_v58, %v7737_v40 }
 0x3c9   : > { %v3731_v21 = vadd.f32 %v3730_v19, %v3642_v56  ;;  %3870 = vmatmul.bf16.gmra.mxu2 %v9311_v0  ;;  %4476 = vmatpush.bf16.msrb.mxu1 %v7738_v10  ;;  %v7037_v0 = vld [vmem:[%s12013_s5 + $0x120] sm:$0xf] }
 0x3ca   : > { %3959 = vmatmul.bf16.gmra.mxu3 %v12127_v23  ;;  %4137 = vmatmul.bf16.gmra.mxu1 %v12128_v35  ;;  %v3733_v18 = vpop.f32.mrf.mxu0 }
 0x3cb   : > { %v8159_v46 = vpop.eup %8158  ;;  %v3820_v45 = vadd.f32 %v3819_v5, %v3731_v21 }
 0x3cc   : > { %6338 = vst [vmem:[%s10058_s15 + $0x3f0] sm:$0xff] %v8159_v46  ;;  %v3555_v2 = vpop.f32.mrf.mxu2 }
 0x3cd   : > { %8160 = vtanh.f32 %v3820_v45  ;;  %v3556_v19 = vadd.f32 %v3555_v2, %v10033_v8  ;;  %v3644_v55 = vpop.f32.mrf.mxu3  ;;  %4048 = vmatmul.bf16.gmra.mxu0 %v12129_v50  ;;  %v7912_v45 = vld [vmem:[%s12013_s5 + $0x138] sm:$0xf0] }
 0x3ce   : > { %v7038_v58 = vor.u32 %v7912_v45, %v7037_v0  ;;  %v7513_v0 = vld [vmem:[%s12013_s5 + $0x4d8] sm:$0xf]  ;;  %v12131_v45 = vld [vmem:[#allocation22_spill] sm:$0xff] }
 0x3cf   : > { %v3645_v11 = vadd.f32 %v3644_v55, %v3556_v19  ;;  %v3824_v5 = vpop.f32.mrf.mxu1  ;;  %v12130_v55 = vld [vmem:[#allocation21_spill] sm:$0xff] }
 0x3d0   : > { %4210 = vmatpush.bf16.msrb.mxu2 %v7038_v58 }
 0x3d1   : > { %v3734_v56 = vadd.f32 %v3733_v18, %v3645_v11 }
 0x3d2   : > { %v3735_v21 = vpop.f32.mrf.mxu0 }
 0x3d3   : > { %v8161_v46 = vpop.eup %8160  ;;  %v3823_v35 = vadd.f32 %v3822_v6, %v3734_v56 }
 0x3d4   : > { %6345 = vst [vmem:[%s10058_s15 + $0x428] sm:$0xff] %v8161_v46  ;;  %v3557_v23 = vpop.f32.mrf.mxu2 }
 0x3d5   : > { %8162 = vtanh.f32 %v3823_v35  ;;  %v3558_v2 = vadd.f32 %v3557_v23, %v10033_v8  ;;  %v3646_v40 = vpop.f32.mrf.mxu3  ;;  %v8031_v23 = vld [vmem:[%s12013_s5 + $0x4f0] sm:$0xf0] }
 0x3d7   : > { %v3647_v18 = vadd.f32 %v3646_v40, %v3558_v2  ;;  %v3827_v19 = vpop.f32.mrf.mxu1  ;;  %v7514_v2 = vor.u32 %v8031_v23, %v7513_v0 }
 0x3d9   : > { %v3736_v6 = vadd.f32 %v3735_v21, %v3647_v18  ;;  %3875 = vmatmul.bf16.gmra.mxu2 %v9341_v39  ;;  %4387 = vmatpush.bf16.msrb.mxu0 %v7514_v2  ;;  %v12133_v2 = vld [vmem:[#allocation23_spill] sm:$0xff] }
 0x3da   : > { %3964 = vmatmul.bf16.gmra.mxu3 %v12118_v47  ;;  %4142 = vmatmul.bf16.gmra.mxu1 %v12130_v55  ;;  %v3738_v10 = vpop.f32.mrf.mxu0  ;;  %v7261_v47 = vld [vmem:[%s12013_s5 + $0x2e0] sm:$0xf] }
 0x3db   : > { %v8163_v11 = vpop.eup %8162  ;;  %v3825_v56 = vadd.f32 %v3824_v5, %v3736_v6 }
 0x3dc   : > { %6352 = vst [vmem:[%s10058_s15 + $0x460] sm:$0xff] %v8163_v11  ;;  %v3560_v35 = vpop.f32.mrf.mxu2 }
 0x3dd   : > { %8164 = vtanh.f32 %v3825_v56  ;;  %v3561_v21 = vadd.f32 %v3560_v35, %v10033_v8  ;;  %v3649_v46 = vpop.f32.mrf.mxu3  ;;  %4053 = vmatmul.bf16.gmra.mxu0 %v12131_v45  ;;  %v7968_v56 = vld [vmem:[%s12013_s5 + $0x2f8] sm:$0xf0] }
 0x3de   : > { %v7262_v23 = vor.u32 %v7968_v56, %v7261_v47  ;;  %v7709_v47 = vld [vmem:[%s12013_s5 + $0x660] sm:$0xf] }
 0x3df   : > { %v3650_v40 = vadd.f32 %v3649_v46, %v3561_v21  ;;  %v3829_v5 = vpop.f32.mrf.mxu1  ;;  %v12132_v46 = vld [vmem:[#allocation10_spill] sm:$0xff] }
 0x3e0   : > { %4299 = vmatpush.bf16.msrb.mxu3 %v7262_v23 }
 0x3e1   : > { %v3739_v58 = vadd.f32 %v3738_v10, %v3650_v40 }
 0x3e2   : > { %v3740_v18 = vpop.f32.mrf.mxu0 }
 0x3e3   : > { %v8165_v6 = vpop.eup %8164  ;;  %v3828_v11 = vadd.f32 %v3827_v19, %v3739_v58 }
 0x3e4   : > { %6359 = vst [vmem:[%s10058_s15 + $0x498] sm:$0xff] %v8165_v6  ;;  %v3562_v55 = vpop.f32.mrf.mxu2 }
 0x3e5   : > { %8166 = vtanh.f32 %v3828_v11  ;;  %v3563_v35 = vadd.f32 %v3562_v55, %v10033_v8  ;;  %v3651_v0 = vpop.f32.mrf.mxu3  ;;  %v8080_v55 = vld [vmem:[%s12013_s5 + $0x678] sm:$0xf0] }
 0x3e7   : > { %v3652_v10 = vadd.f32 %v3651_v0, %v3563_v35  ;;  %v3832_v21 = vpop.f32.mrf.mxu1  ;;  %v12134_v35 = vld [vmem:[#allocation24_spill] sm:$0xff]  ;;  %v7710_v0 = vor.u32 %v8080_v55, %v7709_v47 }
 0x3e9   : > { %v3741_v19 = vadd.f32 %v3740_v18, %v3652_v10  ;;  %3880 = vmatmul.bf16.gmra.mxu2 %v9371_v16  ;;  %4477 = vmatpush.bf16.msrb.mxu1 %v7710_v0  ;;  %v7009_v16 = vld [vmem:[%s12013_s5 + $0xe8] sm:$0xf] }
 0x3ea   : > { %3969 = vmatmul.bf16.gmra.mxu3 %v12132_v46  ;;  %4147 = vmatmul.bf16.gmra.mxu1 %v12133_v2  ;;  %v3743_v40 = vpop.f32.mrf.mxu0 }
 0x3eb   : > { %v8167_v58 = vpop.eup %8166  ;;  %v3830_v6 = vadd.f32 %v3829_v5, %v3741_v19 }
 0x3ec   : > { %6366 = vst [vmem:[%s10058_s15 + $0x4d0] sm:$0xff] %v8167_v58  ;;  %v3565_v11 = vpop.f32.mrf.mxu2 }
 0x3ed   : > { %8168 = vtanh.f32 %v3830_v6  ;;  %v3566_v18 = vadd.f32 %v3565_v11, %v10033_v8  ;;  %v3654_v56 = vpop.f32.mrf.mxu3  ;;  %4058 = vmatmul.bf16.gmra.mxu0 %v12134_v35  ;;  %v7905_v6 = vld [vmem:[%s12013_s5 + $0x100] sm:$0xf0] }
 0x3ee   : > { %v7010_v55 = vor.u32 %v7905_v6, %v7009_v16  ;;  %v7485_v16 = vld [vmem:[%s12013_s5 + $0x4a0] sm:$0xf] }
 0x3ef   : > { %v3655_v23 = vadd.f32 %v3654_v56, %v3566_v18  ;;  %v3834_v5 = vpop.f32.mrf.mxu1  ;;  %v12135_v56 = vld [vmem:[#allocation25_spill] sm:$0xff]  ;;  %v12136_v6 = vld [vmem:[#allocation26_spill] sm:$0xff] }
 0x3f0   : > { %4211 = vmatpush.bf16.msrb.mxu2 %v7010_v55 }
 0x3f1   : > { %v3744_v10 = vadd.f32 %v3743_v40, %v3655_v23 }
 0x3f2   : > { %v3745_v19 = vpop.f32.mrf.mxu0 }
 0x3f3   : > { %v8169_v58 = vpop.eup %8168  ;;  %v3833_v2 = vadd.f32 %v3832_v21, %v3744_v10 }
 0x3f4   : > { %6373 = vst [vmem:[%s10058_s15 + $0x508] sm:$0xff] %v8169_v58  ;;  %v3567_v46 = vpop.f32.mrf.mxu2 }
 0x3f5   : > { %8170 = vtanh.f32 %v3833_v2  ;;  %v3568_v11 = vadd.f32 %v3567_v46, %v10033_v8  ;;  %v3656_v47 = vpop.f32.mrf.mxu3  ;;  %v8024_v46 = vld [vmem:[%s12013_s5 + $0x4b8] sm:$0xf0] }
 0x3f7   : > { %v3657_v40 = vadd.f32 %v3656_v47, %v3568_v11  ;;  %v3837_v18 = vpop.f32.mrf.mxu1  ;;  %v7486_v11 = vor.u32 %v8024_v46, %v7485_v16 }
 0x3f9   : > { %v3746_v21 = vadd.f32 %v3745_v19, %v3657_v40  ;;  %3885 = vmatmul.bf16.gmra.mxu2 %v9407_v27  ;;  %4388 = vmatpush.bf16.msrb.mxu0 %v7486_v11  ;;  %v12138_v11 = vld [vmem:[#allocation27_spill] sm:$0xff] }
 0x3fa   : > { %3974 = vmatmul.bf16.gmra.mxu3 %v12120_v30  ;;  %4152 = vmatmul.bf16.gmra.mxu1 %v12135_v56  ;;  %v3748_v0 = vpop.f32.mrf.mxu0  ;;  %v7233_v30 = vld [vmem:[%s12013_s5 + $0x2a8] sm:$0xf] }
 0x3fb   : > { %v8171_v23 = vpop.eup %8170  ;;  %v3835_v10 = vadd.f32 %v3834_v5, %v3746_v21 }
 0x3fc   : > { %6380 = vst [vmem:[%s10058_s15 + $0x540] sm:$0xff] %v8171_v23  ;;  %v3570_v2 = vpop.f32.mrf.mxu2 }
 0x3fd   : > { %8172 = vtanh.f32 %v3835_v10  ;;  %v3571_v19 = vadd.f32 %v3570_v2, %v10033_v8  ;;  %v3659_v58 = vpop.f32.mrf.mxu3  ;;  %4063 = vmatmul.bf16.gmra.mxu0 %v12136_v6  ;;  %v7961_v10 = vld [vmem:[%s12013_s5 + $0x2c0] sm:$0xf0] }
 0x3fe   : > { %v7234_v46 = vor.u32 %v7961_v10, %v7233_v30  ;;  %v7681_v30 = vld [vmem:[%s12013_s5 + $0x628] sm:$0xf] }
 0x3ff   : > { %v3660_v47 = vadd.f32 %v3659_v58, %v3571_v19  ;;  %v3839_v5 = vpop.f32.mrf.mxu1  ;;  %v12137_v58 = vld [vmem:[#allocation13_spill] sm:$0xff] }
 0x400   : > { %4300 = vmatpush.bf16.msrb.mxu3 %v7234_v46 }
 0x401   : > { %v3749_v55 = vadd.f32 %v3748_v0, %v3660_v47 }
 0x402   : > { %v3750_v40 = vpop.f32.mrf.mxu0 }
 0x403   : > { %v8173_v21 = vpop.eup %8172  ;;  %v3838_v23 = vadd.f32 %v3837_v18, %v3749_v55 }
 0x404   : > { %6387 = vst [vmem:[%s10058_s15 + $0x578] sm:$0xff] %v8173_v21  ;;  %v3572_v56 = vpop.f32.mrf.mxu2 }
 0x405   : > { %8174 = vtanh.f32 %v3838_v23  ;;  %v3573_v2 = vadd.f32 %v3572_v56, %v10033_v8  ;;  %v3661_v16 = vpop.f32.mrf.mxu3  ;;  %v8073_v56 = vld [vmem:[%s12013_s5 + $0x640] sm:$0xf0] }
 0x407   : > { %v3662_v0 = vadd.f32 %v3661_v16, %v3573_v2  ;;  %v3842_v19 = vpop.f32.mrf.mxu1  ;;  %v7682_v2 = vor.u32 %v8073_v56, %v7681_v30 }
 0x409   : > { %v3751_v18 = vadd.f32 %v3750_v40, %v3662_v0  ;;  %3890 = vmatmul.bf16.gmra.mxu2 %v9431_v28  ;;  %4478 = vmatpush.bf16.msrb.mxu1 %v7682_v2 }
 0x40a   : > { %3979 = vmatmul.bf16.gmra.mxu3 %v12137_v58  ;;  %4157 = vmatmul.bf16.gmra.mxu1 %v12138_v11  ;;  %v3753_v47 = vpop.f32.mrf.mxu0  ;;  %v6981_v58 = vld [vmem:[%s12013_s5 + $0xb0] sm:$0xf] }
 0x40b   : > { %v8175_v55 = vpop.eup %8174  ;;  %v3840_v21 = vadd.f32 %v3839_v5, %v3751_v18 }
 0x40c   : > { %6394 = vst [vmem:[%s10058_s15 + $0x5b0] sm:$0xff] %v8175_v55  ;;  %v3575_v23 = vpop.f32.mrf.mxu2 }
 0x40d   : > { %8176 = vtanh.f32 %v3840_v21  ;;  %v3576_v40 = vadd.f32 %v3575_v23, %v10033_v8  ;;  %v3664_v10 = vpop.f32.mrf.mxu3  ;;  %4068 = vmatmul.bf16.gmra.mxu0 %v9822_v20  ;;  %v7898_v21 = vld [vmem:[%s12013_s5 + $0xc8] sm:$0xf0] }
 0x40e   : > { %v6982_v56 = vor.u32 %v7898_v21, %v6981_v58  ;;  %v7457_v58 = vld [vmem:[%s12013_s5 + $0x468] sm:$0xf] }
 0x40f   : > { %v3665_v16 = vadd.f32 %v3664_v10, %v3576_v40  ;;  %v3844_v5 = vpop.f32.mrf.mxu1 }
 0x410   : > { %4212 = vmatpush.bf16.msrb.mxu2 %v6982_v56 }
 0x411   : > { %v3754_v46 = vadd.f32 %v3753_v47, %v3665_v16 }
 0x412   : > { %v3755_v0 = vpop.f32.mrf.mxu0 }
 0x413   : > { %v8177_v18 = vpop.eup %8176  ;;  %v3843_v55 = vadd.f32 %v3842_v19, %v3754_v46 }
 0x414   : > { %6401 = vst [vmem:[%s10058_s15 + $0x5e8] sm:$0xff] %v8177_v18  ;;  %v3577_v11 = vpop.f32.mrf.mxu2 }
 0x415   : > { %8178 = vtanh.f32 %v3843_v55  ;;  %v3578_v23 = vadd.f32 %v3577_v11, %v10033_v8  ;;  %v3666_v30 = vpop.f32.mrf.mxu3  ;;  %v8017_v11 = vld [vmem:[%s12013_s5 + $0x480] sm:$0xf0]  ;;  %v12139_v55 = vld [vmem:[#allocation29_spill] sm:$0xff] }
 0x416   : > { %v7458_v21 = vor.u32 %v8017_v11, %v7457_v58 }
 0x417   : > { %v3667_v47 = vadd.f32 %v3666_v30, %v3578_v23  ;;  %v3847_v40 = vpop.f32.mrf.mxu1 }
 0x418   : > { %4389 = vmatpush.bf16.msrb.mxu0 %v7458_v21 }
 0x419   : > { %v3756_v19 = vadd.f32 %v3755_v0, %v3667_v47  ;;  %3895 = vmatmul.bf16.gmra.mxu2 %v9455_v25 }
 0x41a   : > { %3984 = vmatmul.bf16.gmra.mxu3 %v9450_v9  ;;  %4162 = vmatmul.bf16.gmra.mxu1 %v9841_v12  ;;  %v3758_v10 = vpop.f32.mrf.mxu0  ;;  %v7205_v12 = vld [vmem:[%s12013_s5 + $0x270] sm:$0xf] }
 0x41b   : > { %v8179_v2 = vpop.eup %8178  ;;  %v3845_v16 = vadd.f32 %v3844_v5, %v3756_v19 }
 0x41c   : > { %6408 = vst [vmem:[%s10058_s15 + $0x620] sm:$0xff] %v8179_v2  ;;  %v3580_v46 = vpop.f32.mrf.mxu2 }
 0x41d   : > { %8180 = vtanh.f32 %v3845_v16  ;;  %v3581_v0 = vadd.f32 %v3580_v46, %v10033_v8  ;;  %v3669_v18 = vpop.f32.mrf.mxu3  ;;  %4073 = vmatmul.bf16.gmra.mxu0 %v12139_v55  ;;  %v7954_v16 = vld [vmem:[%s12013_s5 + $0x288] sm:$0xf0] }
 0x41e   : > { %v7206_v11 = vor.u32 %v7954_v16, %v7205_v12 }
 0x41f   : > { %v3670_v23 = vadd.f32 %v3669_v18, %v3581_v0  ;;  %v3849_v5 = vpop.f32.mrf.mxu1  ;;  %v8571_v18 = vld [vmem:[%s12014_s6] sm:$0xff] }
 0x420   : > { %4301 = vmatpush.bf16.msrb.mxu3 %v7206_v11  ;;  %v10364_v21 = vperm.slane %v8571_v18, 1 }
 0x421   : > { %v3759_v30 = vadd.f32 %v3758_v10, %v3670_v23 }
 0x422   : > { %v3760_v56 = vpop.f32.mrf.mxu0 }
 0x423   : > { %v8181_v47 = vpop.eup %8180  ;;  %v3848_v19 = vadd.f32 %v3847_v40, %v3759_v30 }
 0x424   : > { %6415 = vst [vmem:[%s10058_s15 + $0x658] sm:$0xff] %v8181_v47  ;;  %v3582_v2 = vpop.f32.mrf.mxu2  ;;  %v8066_v47 = vld [vmem:[%s12013_s5 + $0x608] sm:$0xf0] }
 0x425   : > { %8182 = vtanh.f32 %v3848_v19  ;;  %v3583_v46 = vadd.f32 %v3582_v2, %v10033_v8  ;;  %v3671_v58 = vpop.f32.mrf.mxu3 }
 0x427   : > { %v3672_v10 = vadd.f32 %v3671_v58, %v3583_v46  ;;  %v4128_v0 = vpop.f32.mrf.mxu1 }
 0x429   : > { %v3761_v40 = vadd.f32 %v3760_v56, %v3672_v10  ;;  %3900 = vmatmul.bf16.gmra.mxu2 %v9479_v17  ;;  %v7653_v56 = vld [vmem:[%s12013_s5 + $0x5f0] sm:$0xf] }
 0x42a   : > { %3989 = vmatmul.bf16.gmra.mxu3 %v9474_v15  ;;  %4167 = vmatmul.bf16.gmra.mxu1 %v9865_v57  ;;  %v4039_v23 = vpop.f32.mrf.mxu0  ;;  %v7654_v16 = vor.u32 %v8066_v47, %v7653_v56 }
 0x42b   : > { %v8183_v8 = vpop.eup %8182  ;;  %v3850_v30 = vadd.f32 %v3849_v5, %v3761_v40 }
 0x42c   : > { %6422 = vst [vmem:[%s10058_s15 + $0x690] sm:$0xff] %v8183_v8  ;;  %v3861_v12 = vpop.f32.mrf.mxu2  ;;  %4479 = vmatpush.bf16.msrb.mxu1 %v7654_v16  ;;  %v6953_v8 = vld [vmem:[%s12013_s5 + $0x78] sm:$0xf] }
 0x42d   : > { %8184 = vtanh.f32 %v3850_v30  ;;  %v3862_v19 = vadd.f32 %v3861_v12, %v10364_v21  ;;  %v3950_v2 = vpop.f32.mrf.mxu3  ;;  %4078 = vmatmul.bf16.gmra.mxu0 %v9870_v54  ;;  %v7891_v30 = vld [vmem:[%s12013_s5 + $0x90] sm:$0xf0] }
 0x42e   : > { %v6954_v47 = vor.u32 %v7891_v30, %v6953_v8 }
 0x42f   : > { %v3951_v46 = vadd.f32 %v3950_v2, %v3862_v19  ;;  %v4130_v5 = vpop.f32.mrf.mxu1 }
 0x430   : > { %4213 = vmatpush.bf16.msrb.mxu2 %v6954_v47 }
 0x431   : > { %v4040_v58 = vadd.f32 %v4039_v23, %v3951_v46 }
 0x432   : > { %v4041_v11 = vpop.f32.mrf.mxu0 }
 0x433   : > { %v8185_v10 = vpop.eup %8184  ;;  %v4129_v40 = vadd.f32 %v4128_v0, %v4040_v58 }
 0x434   : > { %6429 = vst [vmem:[%s10058_s15 + $0x6c8] sm:$0xff] %v8185_v10  ;;  %v3863_v18 = vpop.f32.mrf.mxu2  ;;  %v7429_v10 = vld [vmem:[%s12013_s5 + $0x430] sm:$0xf] }
 0x435   : > { %8186 = vtanh.f32 %v4129_v40  ;;  %v3864_v12 = vadd.f32 %v3863_v18, %v10364_v21  ;;  %v3952_v56 = vpop.f32.mrf.mxu3 }
 0x437   : > { %v3953_v23 = vadd.f32 %v3952_v56, %v3864_v12  ;;  %v4133_v19 = vpop.f32.mrf.mxu1 }
 0x439   : > { %v4042_v0 = vadd.f32 %v4041_v11, %v3953_v23  ;;  %3905 = vmatmul.bf16.gmra.mxu2 %v9503_v36  ;;  %v8010_v11 = vld [vmem:[%s12013_s5 + $0x448] sm:$0xf0] }
 0x43a   : > { %3994 = vmatmul.bf16.gmra.mxu3 %v9498_v13  ;;  %4172 = vmatmul.bf16.gmra.mxu1 %v9889_v49  ;;  %v4044_v2 = vpop.f32.mrf.mxu0  ;;  %v7430_v8 = vor.u32 %v8010_v11, %v7429_v10 }
 0x43b   : > { %v8187_v16 = vpop.eup %8186  ;;  %v4131_v46 = vadd.f32 %v4130_v5, %v4042_v0 }
 0x43c   : > { %6213 = vst [vmem:[%s10058_s15 + $0x8] sm:$0xff] %v8187_v16  ;;  %v3866_v58 = vpop.f32.mrf.mxu2  ;;  %4390 = vmatpush.bf16.msrb.mxu0 %v7430_v8  ;;  %v7177_v16 = vld [vmem:[%s12013_s5 + $0x238] sm:$0xf] }
 0x43d   : > { %8188 = vtanh.f32 %v4131_v46  ;;  %v3867_v40 = vadd.f32 %v3866_v58, %v10364_v21  ;;  %v3955_v18 = vpop.f32.mrf.mxu3  ;;  %4083 = vmatmul.bf16.gmra.mxu0 %v9894_v51  ;;  %v7947_v46 = vld [vmem:[%s12013_s5 + $0x250] sm:$0xf0] }
 0x43e   : > { %v7178_v11 = vor.u32 %v7947_v46, %v7177_v16 }
 0x43f   : > { %v3956_v30 = vadd.f32 %v3955_v18, %v3867_v40  ;;  %v4135_v5 = vpop.f32.mrf.mxu1 }
 0x440   : > { %4302 = vmatpush.bf16.msrb.mxu3 %v7178_v11 }
 0x441   : > { %v4045_v12 = vadd.f32 %v4044_v2, %v3956_v30 }
 0x442   : > { %v4046_v56 = vpop.f32.mrf.mxu0 }
 0x443   : > { %v8189_v47 = vpop.eup %8188  ;;  %v4134_v23 = vadd.f32 %v4133_v19, %v4045_v12 }
 0x444   : > { %6220 = vst [vmem:[%s10058_s15 + $0x40] sm:$0xff] %v8189_v47  ;;  %v3868_v0 = vpop.f32.mrf.mxu2  ;;  %v7625_v47 = vld [vmem:[%s12013_s5 + $0x5b8] sm:$0xf] }
 0x445   : > { %8190 = vtanh.f32 %v4134_v23  ;;  %v3869_v58 = vadd.f32 %v3868_v0, %v10364_v21  ;;  %v3957_v10 = vpop.f32.mrf.mxu3 }
 0x447   : > { %v3958_v2 = vadd.f32 %v3957_v10, %v3869_v58  ;;  %v4138_v40 = vpop.f32.mrf.mxu1 }
 0x449   : > { %v4047_v19 = vadd.f32 %v4046_v56, %v3958_v2  ;;  %3910 = vmatmul.bf16.gmra.mxu2 %v9527_v1  ;;  %v8059_v56 = vld [vmem:[%s12013_s5 + $0x5d0] sm:$0xf0] }
 0x44a   : > { %3999 = vmatmul.bf16.gmra.mxu3 %v9522_v7  ;;  %4177 = vmatmul.bf16.gmra.mxu1 %v9913_v53  ;;  %v4049_v18 = vpop.f32.mrf.mxu0  ;;  %v7626_v16 = vor.u32 %v8059_v56, %v7625_v47 }
 0x44b   : > { %v8191_v8 = vpop.eup %8190  ;;  %v4136_v30 = vadd.f32 %v4135_v5, %v4047_v19 }
 0x44c   : > { %6227 = vst [vmem:[%s10058_s15 + $0x78] sm:$0xff] %v8191_v8  ;;  %v3871_v12 = vpop.f32.mrf.mxu2  ;;  %4480 = vmatpush.bf16.msrb.mxu1 %v7626_v16  ;;  %v6925_v8 = vld [vmem:[%s12013_s5 + $0x40] sm:$0xf] }
 0x44d   : > { %8192 = vtanh.f32 %v4136_v30  ;;  %v3872_v23 = vadd.f32 %v3871_v12, %v10364_v21  ;;  %v3960_v0 = vpop.f32.mrf.mxu3  ;;  %4088 = vmatmul.bf16.gmra.mxu0 %v9918_v48  ;;  %v7884_v30 = vld [vmem:[%s12013_s5 + $0x58] sm:$0xf0] }
 0x44e   : > { %v6926_v56 = vor.u32 %v7884_v30, %v6925_v8 }
 0x44f   : > { %v3961_v46 = vadd.f32 %v3960_v0, %v3872_v23  ;;  %v4140_v5 = vpop.f32.mrf.mxu1 }
 0x450   : > { %4214 = vmatpush.bf16.msrb.mxu2 %v6926_v56 }
 0x451   : > { %v4050_v58 = vadd.f32 %v4049_v18, %v3961_v46 }
 0x452   : > { %v4051_v10 = vpop.f32.mrf.mxu0 }
 0x453   : > { %v8193_v11 = vpop.eup %8192  ;;  %v4139_v2 = vadd.f32 %v4138_v40, %v4050_v58 }
 0x454   : > { %6234 = vst [vmem:[%s10058_s15 + $0xb0] sm:$0xff] %v8193_v11  ;;  %v3873_v19 = vpop.f32.mrf.mxu2  ;;  %v7401_v11 = vld [vmem:[%s12013_s5 + $0x3f8] sm:$0xf] }
 0x455   : > { %8194 = vtanh.f32 %v4139_v2  ;;  %v3874_v12 = vadd.f32 %v3873_v19, %v10364_v21  ;;  %v3962_v47 = vpop.f32.mrf.mxu3 }
 0x457   : > { %v3963_v18 = vadd.f32 %v3962_v47, %v3874_v12  ;;  %v4143_v23 = vpop.f32.mrf.mxu1 }
 0x459   : > { %v4052_v40 = vadd.f32 %v4051_v10, %v3963_v18  ;;  %3915 = vmatmul.bf16.gmra.mxu2 %v9551_v31  ;;  %v8003_v10 = vld [vmem:[%s12013_s5 + $0x410] sm:$0xf0] }
 0x45a   : > { %4004 = vmatmul.bf16.gmra.mxu3 %v9546_v61  ;;  %4182 = vmatmul.bf16.gmra.mxu1 %v9937_v24  ;;  %v4054_v0 = vpop.f32.mrf.mxu0  ;;  %v7402_v8 = vor.u32 %v8003_v10, %v7401_v11 }
 0x45b   : > { %v8195_v16 = vpop.eup %8194  ;;  %v4141_v46 = vadd.f32 %v4140_v5, %v4052_v40 }
 0x45c   : > { %6241 = vst [vmem:[%s10058_s15 + $0xe8] sm:$0xff] %v8195_v16  ;;  %v3876_v58 = vpop.f32.mrf.mxu2  ;;  %4391 = vmatpush.bf16.msrb.mxu0 %v7402_v8  ;;  %v7149_v16 = vld [vmem:[%s12013_s5 + $0x200] sm:$0xf] }
 0x45d   : > { %8196 = vtanh.f32 %v4141_v46  ;;  %v3877_v2 = vadd.f32 %v3876_v58, %v10364_v21  ;;  %v3965_v19 = vpop.f32.mrf.mxu3  ;;  %4093 = vmatmul.bf16.gmra.mxu0 %v9942_v62  ;;  %v7940_v46 = vld [vmem:[%s12013_s5 + $0x218] sm:$0xf0] }
 0x45e   : > { %v7150_v10 = vor.u32 %v7940_v46, %v7149_v16 }
 0x45f   : > { %v3966_v30 = vadd.f32 %v3965_v19, %v3877_v2  ;;  %v4145_v5 = vpop.f32.mrf.mxu1 }
 0x460   : > { %4303 = vmatpush.bf16.msrb.mxu3 %v7150_v10 }
 0x461   : > { %v4055_v12 = vadd.f32 %v4054_v0, %v3966_v30 }
 0x462   : > { %v4056_v47 = vpop.f32.mrf.mxu0 }
 0x463   : > { %v8197_v56 = vpop.eup %8196  ;;  %v4144_v18 = vadd.f32 %v4143_v23, %v4055_v12 }
 0x464   : > { %6248 = vst [vmem:[%s10058_s15 + $0x120] sm:$0xff] %v8197_v56  ;;  %v3878_v40 = vpop.f32.mrf.mxu2  ;;  %v7597_v56 = vld [vmem:[%s12013_s5 + $0x580] sm:$0xf] }
 0x465   : > { %8198 = vtanh.f32 %v4144_v18  ;;  %v3879_v58 = vadd.f32 %v3878_v40, %v10364_v21  ;;  %v3967_v11 = vpop.f32.mrf.mxu3 }
 0x467   : > { %v3968_v0 = vadd.f32 %v3967_v11, %v3879_v58  ;;  %v4148_v2 = vpop.f32.mrf.mxu1 }
 0x469   : > { %v4057_v23 = vadd.f32 %v4056_v47, %v3968_v0  ;;  %3920 = vmatmul.bf16.gmra.mxu2 %v9575_v4  ;;  %v8052_v47 = vld [vmem:[%s12013_s5 + $0x598] sm:$0xf0] }
 0x46a   : > { %4009 = vmatmul.bf16.gmra.mxu3 %v9570_v3  ;;  %4187 = vmatmul.bf16.gmra.mxu1 %v9961_v32  ;;  %v4059_v19 = vpop.f32.mrf.mxu0  ;;  %v7598_v16 = vor.u32 %v8052_v47, %v7597_v56 }
 0x46b   : > { %v8199_v8 = vpop.eup %8198  ;;  %v4146_v30 = vadd.f32 %v4145_v5, %v4057_v23 }
 0x46c   : > { %6255 = vst [vmem:[%s10058_s15 + $0x158] sm:$0xff] %v8199_v8  ;;  %v3881_v12 = vpop.f32.mrf.mxu2  ;;  %4481 = vmatpush.bf16.msrb.mxu1 %v7598_v16  ;;  %v6897_v8 = vld [vmem:[%s12013_s5 + $0x8] sm:$0xf] }
 0x46d   : > { %8200 = vtanh.f32 %v4146_v30  ;;  %v3882_v18 = vadd.f32 %v3881_v12, %v10364_v21  ;;  %v3970_v40 = vpop.f32.mrf.mxu3  ;;  %4098 = vmatmul.bf16.gmra.mxu0 %v9966_v63  ;;  %v7877_v30 = vld [vmem:[%s12013_s5 + $0x20] sm:$0xf0] }
 0x46e   : > { %v6898_v47 = vor.u32 %v7877_v30, %v6897_v8 }
 0x46f   : > { %v3971_v46 = vadd.f32 %v3970_v40, %v3882_v18  ;;  %v4150_v5 = vpop.f32.mrf.mxu1 }
 0x470   : > { %4215 = vmatpush.bf16.msrb.mxu2 %v6898_v47 }
 0x471   : > { %v4060_v58 = vadd.f32 %v4059_v19, %v3971_v46 }
 0x472   : > { %v4061_v11 = vpop.f32.mrf.mxu0 }
 0x473   : > { %v8201_v10 = vpop.eup %8200  ;;  %v4149_v0 = vadd.f32 %v4148_v2, %v4060_v58 }
 0x474   : > { %6262 = vst [vmem:[%s10058_s15 + $0x190] sm:$0xff] %v8201_v10  ;;  %v3883_v23 = vpop.f32.mrf.mxu2  ;;  %v7373_v10 = vld [vmem:[%s12013_s5 + $0x3c0] sm:$0xf] }
 0x475   : > { %8202 = vtanh.f32 %v4149_v0  ;;  %v3884_v12 = vadd.f32 %v3883_v23, %v10364_v21  ;;  %v3972_v56 = vpop.f32.mrf.mxu3 }
 0x477   : > { %v3973_v19 = vadd.f32 %v3972_v56, %v3884_v12  ;;  %v4153_v18 = vpop.f32.mrf.mxu1 }
 0x479   : > { %v4062_v2 = vadd.f32 %v4061_v11, %v3973_v19  ;;  %3925 = vmatmul.bf16.gmra.mxu2 %v9599_v42  ;;  %v7996_v11 = vld [vmem:[%s12013_s5 + $0x3d8] sm:$0xf0] }
 0x47a   : > { %4014 = vmatmul.bf16.gmra.mxu3 %v9594_v60  ;;  %4192 = vmatmul.bf16.gmra.mxu1 %v9985_v38  ;;  %v4064_v40 = vpop.f32.mrf.mxu0  ;;  %v7374_v8 = vor.u32 %v7996_v11, %v7373_v10 }
 0x47b   : > { %v8203_v16 = vpop.eup %8202  ;;  %v4151_v46 = vadd.f32 %v4150_v5, %v4062_v2 }
 0x47c   : > { %6269 = vst [vmem:[%s10058_s15 + $0x1c8] sm:$0xff] %v8203_v16  ;;  %v3886_v58 = vpop.f32.mrf.mxu2  ;;  %4392 = vmatpush.bf16.msrb.mxu0 %v7374_v8  ;;  %v7121_v16 = vld [vmem:[%s12013_s5 + $0x1c8] sm:$0xf] }
 0x47d   : > { %8204 = vtanh.f32 %v4151_v46  ;;  %v3887_v0 = vadd.f32 %v3886_v58, %v10364_v21  ;;  %v3975_v23 = vpop.f32.mrf.mxu3  ;;  %4103 = vmatmul.bf16.gmra.mxu0 %v9990_v52  ;;  %v7933_v46 = vld [vmem:[%s12013_s5 + $0x1e0] sm:$0xf0] }
 0x47e   : > { %v7122_v11 = vor.u32 %v7933_v46, %v7121_v16 }
 0x47f   : > { %v3976_v30 = vadd.f32 %v3975_v23, %v3887_v0  ;;  %v4155_v5 = vpop.f32.mrf.mxu1 }
 0x480   : > { %4304 = vmatpush.bf16.msrb.mxu3 %v7122_v11 }
 0x481   : > { %v4065_v12 = vadd.f32 %v4064_v40, %v3976_v30  ;;  %v7569_v40 = vld [vmem:[%s12013_s5 + $0x548] sm:$0xf] }
 0x482   : > { %v4066_v56 = vpop.f32.mrf.mxu0  ;;  %v7345_v30 = vld [vmem:[%s12013_s5 + $0x388] sm:$0xf] }
 0x483   : > { %v8205_v47 = vpop.eup %8204  ;;  %v4154_v19 = vadd.f32 %v4153_v18, %v4065_v12  ;;  %v8045_v18 = vld [vmem:[%s12013_s5 + $0x560] sm:$0xf0] }
 0x484   : > { %6276 = vst [vmem:[%s10058_s15 + $0x200] sm:$0xff] %v8205_v47  ;;  %v3888_v2 = vpop.f32.mrf.mxu2  ;;  %v7570_v0 = vor.u32 %v8045_v18, %v7569_v40  ;;  %v7989_v12 = vld [vmem:[%s12013_s5 + $0x3a0] sm:$0xf0] }
 0x485   : > { %8206 = vtanh.f32 %v4154_v19  ;;  %v3889_v58 = vadd.f32 %v3888_v2, %v10364_v21  ;;  %v3977_v10 = vpop.f32.mrf.mxu3  ;;  %v7346_v19 = vor.u32 %v7989_v12, %v7345_v30 }
 0x486   : > { %4482 = vmatpush.bf16.msrb.mxu1 %v7570_v0 }
 0x487   : > { %v3978_v23 = vadd.f32 %v3977_v10, %v3889_v58  ;;  %v4158_v8 = vpop.f32.mrf.mxu1  ;;  %4393 = vmatpush.bf16.msrb.mxu0 %v7346_v19 }
 0x489   : > { %v4067_v47 = vadd.f32 %v4066_v56, %v3978_v23  ;;  %3930 = vmatmul.bf16.gmra.mxu2 %v9623_v22 }
 0x48a   : > { %4019 = vmatmul.bf16.gmra.mxu3 %v9618_v37  ;;  %4197 = vmatmul.bf16.gmra.mxu1 %v10003_v44  ;;  %v4069_v2 = vpop.f32.mrf.mxu0 }
 0x48b   : > { %v8207_v16 = vpop.eup %8206  ;;  %v4156_v46 = vadd.f32 %v4155_v5, %v4067_v47  ;;  %v7923_v5 = vld [vmem:[%s12013_s5 + $0x194] sm:$0xf]  ;;  %v7095_v47 = vld [vmem:[%s12013_s5 + $0x1ac] sm:$0xf0] }
 0x48c   : > { %6283 = vst [vmem:[%s10058_s15 + $0x238] sm:$0xff] %v8207_v16  ;;  %v3891_v58 = vpop.f32.mrf.mxu2 }
 0x48d   : > { %8208 = vtanh.f32 %v4156_v46  ;;  %v3892_v10 = vadd.f32 %v3891_v58, %v10364_v21  ;;  %v3980_v11 = vpop.f32.mrf.mxu3  ;;  %4108 = vmatmul.bf16.gmra.mxu0 %v10008_v33  ;;  %v7098_v46 = vor.u32 %v7923_v5, %v7095_v47 }
 0x48f   : > { %v3981_v56 = vadd.f32 %v3980_v11, %v3892_v10  ;;  %v4160_v40 = vpop.f32.mrf.mxu1  ;;  %4564 = vmatpush.bf16.msra.mxu2 %v7098_v46 }
 0x491   : > { %v4070_v18 = vadd.f32 %v4069_v2, %v3981_v56 }
 0x492   : > { %v4071_v0 = vpop.f32.mrf.mxu0 }
 0x493   : > { %v8209_v23 = vpop.eup %8208  ;;  %v4159_v30 = vadd.f32 %v4158_v8, %v4070_v18 }
 0x494   : > { %6290 = vst [vmem:[%s10058_s15 + $0x270] sm:$0xff] %v8209_v23  ;;  %v3893_v12 = vpop.f32.mrf.mxu2 }
 0x495   : > { %8210 = vtanh.f32 %v4159_v30  ;;  %v3894_v19 = vadd.f32 %v3893_v12, %v10364_v21  ;;  %v3982_v16 = vpop.f32.mrf.mxu3 }
 0x497   : > { %v3983_v2 = vadd.f32 %v3982_v16, %v3894_v19  ;;  %v4163_v58 = vpop.f32.mrf.mxu1 }
 0x499   : > { %v4072_v8 = vadd.f32 %v4071_v0, %v3983_v2  ;;  %3935 = vmatmul.bf16.gmra.mxu2 %v9654_v41  ;;  %v7319_v2 = vld [vmem:[%s12013_s5 + $0x36c] sm:$0xf0] }
 0x49a   : > { %4024 = vmatmul.bf16.gmra.mxu3 %v9647_v43  ;;  %4202 = vmatmul.bf16.gmra.mxu1 %v10030_v26  ;;  %v4074_v10 = vpop.f32.mrf.mxu0 }
 0x49b   : > { %v8211_v11 = vpop.eup %8210  ;;  %v4161_v56 = vadd.f32 %v4160_v40, %v4072_v8  ;;  %v7979_v40 = vld [vmem:[%s12013_s5 + $0x354] sm:$0xf] }
 0x49c   : > { %6297 = vst [vmem:[%s10058_s15 + $0x2a8] sm:$0xff] %v8211_v11  ;;  %v3896_v18 = vpop.f32.mrf.mxu2 }
 0x49d   : > { %8212 = vtanh.f32 %v4161_v56  ;;  %v3897_v23 = vadd.f32 %v3896_v18, %v10364_v21  ;;  %v3985_v30 = vpop.f32.mrf.mxu3  ;;  %4113 = vmatmul.bf16.gmra.mxu0 %v10037_v34  ;;  %v7322_v56 = vor.u32 %v7979_v40, %v7319_v2 }
 0x49f   : > { %v3986_v12 = vadd.f32 %v3985_v30, %v3897_v23  ;;  %v4165_v0 = vpop.f32.mrf.mxu1  ;;  %4653 = vmatpush.bf16.msra.mxu3 %v7322_v56  ;;  %v12140_v23 = vld [vmem:[#allocation2_spill] sm:$0xff]  ;;  %v12141_v30 = vld [vmem:[#allocation15_spill] sm:$0xff] }
 0x4a1   : > { %v4075_v5 = vadd.f32 %v4074_v10, %v3986_v12 }
 0x4a2   : > { %v4076_v47 = vpop.f32.mrf.mxu0 }
 0x4a3   : > { %v8213_v19 = vpop.eup %8212  ;;  %v4164_v16 = vadd.f32 %v4163_v58, %v4075_v5 }
 0x4a4   : > { %6304 = vst [vmem:[%s10058_s15 + $0x2e0] sm:$0xff] %v8213_v19  ;;  %v3898_v46 = vpop.f32.mrf.mxu2 }
 0x4a5   : > { %8214 = vtanh.f32 %v4164_v16  ;;  %v3899_v8 = vadd.f32 %v3898_v46, %v10364_v21  ;;  %v3987_v11 = vpop.f32.mrf.mxu3  ;;  %v8091_v46 = vld [vmem:[%s12013_s5 + $0x6d4] sm:$0xf] }
 0x4a7   : > { %v3988_v10 = vadd.f32 %v3987_v11, %v3899_v8  ;;  %v4168_v18 = vpop.f32.mrf.mxu1 }
 0x4a9   : > { %v4077_v58 = vadd.f32 %v4076_v47, %v3988_v10  ;;  %4216 = vmatmul.bf16.vlgmr.msrb.gmra.mxu2 %v9251_v14  ;;  %v7767_v47 = vld [vmem:[%s12013_s5 + $0x6ec] sm:$0xf0] }
 0x4aa   : > { %4305 = vmatmul.bf16.vlgmr.msrb.gmra.mxu3 %v12140_v23  ;;  %4483 = vmatmul.bf16.vlgmr.msrb.gmra.mxu1 %v12141_v30  ;;  %v4079_v12 = vpop.f32.mrf.mxu0  ;;  %v7770_v8 = vor.u32 %v8091_v46, %v7767_v47  ;;  %v7916_v23 = vld [vmem:[%s12013_s5 + $0x15c] sm:$0xf] }
 0x4ab   : > { %v8215_v5 = vpop.eup %8214  ;;  %v4166_v19 = vadd.f32 %v4165_v0, %v4077_v58 }
 0x4ac   : > { %6311 = vst [vmem:[%s10058_s15 + $0x318] sm:$0xff] %v8215_v5  ;;  %v3901_v16 = vpop.f32.mrf.mxu2  ;;  %4831 = vmatpush.bf16.msra.mxu1 %v7770_v8  ;;  %v12143_v8 = vld [vmem:[#allocation4_spill] sm:$0xff] }
 0x4ad   : > { %8216 = vtanh.f32 %v4166_v19  ;;  %v3902_v40 = vadd.f32 %v3901_v16, %v10364_v21  ;;  %v3990_v2 = vpop.f32.mrf.mxu3  ;;  %4394 = vmatmul.bf16.vlgmr.msrb.gmra.mxu0 %v12123_v29  ;;  %v7067_v19 = vld [vmem:[%s12013_s5 + $0x174] sm:$0xf0] }
 0x4ae   : > { %v7070_v47 = vor.u32 %v7916_v23, %v7067_v19  ;;  %v8035_v23 = vld [vmem:[%s12013_s5 + $0x514] sm:$0xf] }
 0x4af   : > { %v3991_v11 = vadd.f32 %v3990_v2, %v3902_v40  ;;  %v4170_v0 = vpop.f32.mrf.mxu1  ;;  %v12142_v2 = vld [vmem:[#allocation5_spill] sm:$0xff] }
 0x4b0   : > { %4565 = vmatpush.bf16.msra.mxu2 %v7070_v47 }
 0x4b1   : > { %v4080_v56 = vadd.f32 %v4079_v12, %v3991_v11  ;;  %v12144_v11 = vld [vmem:[#allocation17_spill] sm:$0xff] }
 0x4b2   : > { %v4081_v10 = vpop.f32.mrf.mxu0 }
 0x4b3   : > { %v8217_v58 = vpop.eup %8216  ;;  %v4169_v5 = vadd.f32 %v4168_v18, %v4080_v56 }
 0x4b4   : > { %6318 = vst [vmem:[%s10058_s15 + $0x350] sm:$0xff] %v8217_v58  ;;  %v3903_v30 = vpop.f32.mrf.mxu2 }
 0x4b5   : > { %8218 = vtanh.f32 %v4169_v5  ;;  %v3904_v16 = vadd.f32 %v3903_v30, %v10364_v21  ;;  %v3992_v46 = vpop.f32.mrf.mxu3  ;;  %v7543_v30 = vld [vmem:[%s12013_s5 + $0x52c] sm:$0xf0] }
 0x4b7   : > { %v3993_v12 = vadd.f32 %v3992_v46, %v3904_v16  ;;  %v4173_v40 = vpop.f32.mrf.mxu1  ;;  %v7546_v16 = vor.u32 %v8035_v23, %v7543_v30 }
 0x4b9   : > { %v4082_v18 = vadd.f32 %v4081_v10, %v3993_v12  ;;  %4221 = vmatmul.bf16.gmra.mxu2 %v12142_v2  ;;  %4742 = vmatpush.bf16.msra.mxu0 %v7546_v16  ;;  %v12146_v16 = vld [vmem:[#allocation6_spill] sm:$0xff] }
 0x4ba   : > { %4310 = vmatmul.bf16.gmra.mxu3 %v12143_v8  ;;  %4488 = vmatmul.bf16.gmra.mxu1 %v12144_v11  ;;  %v4084_v56 = vpop.f32.mrf.mxu0  ;;  %v7972_v8 = vld [vmem:[%s12013_s5 + $0x31c] sm:$0xf] }
 0x4bb   : > { %v8219_v58 = vpop.eup %8218  ;;  %v4171_v29 = vadd.f32 %v4170_v0, %v4082_v18 }
 0x4bc   : > { %6325 = vst [vmem:[%s10058_s15 + $0x388] sm:$0xff] %v8219_v58  ;;  %v3906_v5 = vpop.f32.mrf.mxu2 }
 0x4bd   : > { %8220 = vtanh.f32 %v4171_v29  ;;  %v3907_v10 = vadd.f32 %v3906_v5, %v10364_v21  ;;  %v3995_v19 = vpop.f32.mrf.mxu3  ;;  %4399 = vmatmul.bf16.gmra.mxu0 %v12126_v59  ;;  %v7291_v29 = vld [vmem:[%s12013_s5 + $0x334] sm:$0xf0] }
 0x4be   : > { %v7294_v30 = vor.u32 %v7972_v8, %v7291_v29  ;;  %v8084_v8 = vld [vmem:[%s12013_s5 + $0x69c] sm:$0xf] }
 0x4bf   : > { %v3996_v46 = vadd.f32 %v3995_v19, %v3907_v10  ;;  %v4175_v0 = vpop.f32.mrf.mxu1  ;;  %v12145_v19 = vld [vmem:[#allocation7_spill] sm:$0xff] }
 0x4c0   : > { %4654 = vmatpush.bf16.msra.mxu3 %v7294_v30 }
 0x4c1   : > { %v4085_v47 = vadd.f32 %v4084_v56, %v3996_v46  ;;  %v12147_v46 = vld [vmem:[#allocation19_spill] sm:$0xff] }
 0x4c2   : > { %v4086_v12 = vpop.f32.mrf.mxu0 }
 0x4c3   : > { %v8221_v18 = vpop.eup %8220  ;;  %v4174_v58 = vadd.f32 %v4173_v40, %v4085_v47 }
 0x4c4   : > { %6332 = vst [vmem:[%s10058_s15 + $0x3c0] sm:$0xff] %v8221_v18  ;;  %v3908_v11 = vpop.f32.mrf.mxu2 }
 0x4c5   : > { %8222 = vtanh.f32 %v4174_v58  ;;  %v3909_v5 = vadd.f32 %v3908_v11, %v10364_v21  ;;  %v3997_v23 = vpop.f32.mrf.mxu3  ;;  %v7739_v11 = vld [vmem:[%s12013_s5 + $0x6b4] sm:$0xf0] }
 0x4c7   : > { %v3998_v56 = vadd.f32 %v3997_v23, %v3909_v5  ;;  %v4178_v10 = vpop.f32.mrf.mxu1  ;;  %v7742_v5 = vor.u32 %v8084_v8, %v7739_v11 }
 0x4c9   : > { %v4087_v40 = vadd.f32 %v4086_v12, %v3998_v56  ;;  %4226 = vmatmul.bf16.gmra.mxu2 %v12145_v19  ;;  %4832 = vmatpush.bf16.msra.mxu1 %v7742_v5  ;;  %v12149_v5 = vld [vmem:[#allocation21_spill] sm:$0xff] }
 0x4ca   : > { %4315 = vmatmul.bf16.gmra.mxu3 %v12146_v16  ;;  %4493 = vmatmul.bf16.gmra.mxu1 %v12147_v46  ;;  %v4089_v47 = vpop.f32.mrf.mxu0  ;;  %v7909_v16 = vld [vmem:[%s12013_s5 + $0x124] sm:$0xf] }
 0x4cb   : > { %v8223_v18 = vpop.eup %8222  ;;  %v4176_v59 = vadd.f32 %v4175_v0, %v4087_v40 }
 0x4cc   : > { %6339 = vst [vmem:[%s10058_s15 + $0x3f8] sm:$0xff] %v8223_v18  ;;  %v3911_v58 = vpop.f32.mrf.mxu2 }
 0x4cd   : > { %8224 = vtanh.f32 %v4176_v59  ;;  %v3912_v12 = vadd.f32 %v3911_v58, %v10364_v21  ;;  %v4000_v29 = vpop.f32.mrf.mxu3  ;;  %4404 = vmatmul.bf16.gmra.mxu0 %v12129_v50  ;;  %v7039_v59 = vld [vmem:[%s12013_s5 + $0x13c] sm:$0xf0] }
 0x4ce   : > { %v7042_v11 = vor.u32 %v7909_v16, %v7039_v59  ;;  %v8028_v16 = vld [vmem:[%s12013_s5 + $0x4dc] sm:$0xf] }
 0x4cf   : > { %v4001_v23 = vadd.f32 %v4000_v29, %v3912_v12  ;;  %v4180_v0 = vpop.f32.mrf.mxu1  ;;  %v12148_v29 = vld [vmem:[#allocation8_spill] sm:$0xff] }
 0x4d0   : > { %4566 = vmatpush.bf16.msra.mxu2 %v7042_v11 }
 0x4d1   : > { %v4090_v30 = vadd.f32 %v4089_v47, %v4001_v23 }
 0x4d2   : > { %v4091_v56 = vpop.f32.mrf.mxu0 }
 0x4d3   : > { %v8225_v40 = vpop.eup %8224  ;;  %v4179_v18 = vadd.f32 %v4178_v10, %v4090_v30 }
 0x4d4   : > { %6346 = vst [vmem:[%s10058_s15 + $0x430] sm:$0xff] %v8225_v40  ;;  %v3913_v46 = vpop.f32.mrf.mxu2 }
 0x4d5   : > { %8226 = vtanh.f32 %v4179_v18  ;;  %v3914_v58 = vadd.f32 %v3913_v46, %v10364_v21  ;;  %v4002_v8 = vpop.f32.mrf.mxu3  ;;  %v7515_v46 = vld [vmem:[%s12013_s5 + $0x4f4] sm:$0xf0] }
 0x4d7   : > { %v4003_v47 = vadd.f32 %v4002_v8, %v3914_v58  ;;  %v4183_v12 = vpop.f32.mrf.mxu1  ;;  %v7518_v58 = vor.u32 %v8028_v16, %v7515_v46 }
 0x4d9   : > { %v4092_v10 = vadd.f32 %v4091_v56, %v4003_v47  ;;  %4231 = vmatmul.bf16.gmra.mxu2 %v9341_v39  ;;  %4743 = vmatpush.bf16.msra.mxu0 %v7518_v58  ;;  %v12151_v58 = vld [vmem:[#allocation10_spill] sm:$0xff] }
 0x4da   : > { %4320 = vmatmul.bf16.gmra.mxu3 %v12148_v29  ;;  %4498 = vmatmul.bf16.gmra.mxu1 %v12149_v5  ;;  %v4094_v23 = vpop.f32.mrf.mxu0  ;;  %v7965_v29 = vld [vmem:[%s12013_s5 + $0x2e4] sm:$0xf] }
 0x4db   : > { %v8227_v30 = vpop.eup %8226  ;;  %v4181_v40 = vadd.f32 %v4180_v0, %v4092_v10 }
 0x4dc   : > { %6353 = vst [vmem:[%s10058_s15 + $0x468] sm:$0xff] %v8227_v30  ;;  %v3916_v18 = vpop.f32.mrf.mxu2 }
 0x4dd   : > { %8228 = vtanh.f32 %v4181_v40  ;;  %v3917_v56 = vadd.f32 %v3916_v18, %v10364_v21  ;;  %v4005_v59 = vpop.f32.mrf.mxu3  ;;  %4409 = vmatmul.bf16.gmra.mxu0 %v12131_v45  ;;  %v7263_v40 = vld [vmem:[%s12013_s5 + $0x2fc] sm:$0xf0] }
 0x4de   : > { %v7266_v46 = vor.u32 %v7965_v29, %v7263_v40  ;;  %v8077_v29 = vld [vmem:[%s12013_s5 + $0x664] sm:$0xf] }
 0x4df   : > { %v4006_v8 = vadd.f32 %v4005_v59, %v3917_v56  ;;  %v4185_v0 = vpop.f32.mrf.mxu1  ;;  %v12150_v59 = vld [vmem:[#allocation11_spill] sm:$0xff] }
 0x4e0   : > { %4655 = vmatpush.bf16.msra.mxu3 %v7266_v46 }
 0x4e1   : > { %v4095_v11 = vadd.f32 %v4094_v23, %v4006_v8  ;;  %v12152_v8 = vld [vmem:[#allocation23_spill] sm:$0xff] }
 0x4e2   : > { %v4096_v47 = vpop.f32.mrf.mxu0 }
 0x4e3   : > { %v8229_v10 = vpop.eup %8228  ;;  %v4184_v30 = vadd.f32 %v4183_v12, %v4095_v11 }
 0x4e4   : > { %6360 = vst [vmem:[%s10058_s15 + $0x4a0] sm:$0xff] %v8229_v10  ;;  %v3918_v5 = vpop.f32.mrf.mxu2 }
 0x4e5   : > { %8230 = vtanh.f32 %v4184_v30  ;;  %v3919_v18 = vadd.f32 %v3918_v5, %v10364_v21  ;;  %v4007_v16 = vpop.f32.mrf.mxu3  ;;  %v7711_v5 = vld [vmem:[%s12013_s5 + $0x67c] sm:$0xf0] }
 0x4e7   : > { %v4008_v23 = vadd.f32 %v4007_v16, %v3919_v18  ;;  %v4188_v56 = vpop.f32.mrf.mxu1  ;;  %v7714_v18 = vor.u32 %v8077_v29, %v7711_v5 }
 0x4e9   : > { %v4097_v12 = vadd.f32 %v4096_v47, %v4008_v23  ;;  %4236 = vmatmul.bf16.gmra.mxu2 %v12150_v59  ;;  %4833 = vmatpush.bf16.msra.mxu1 %v7714_v18  ;;  %v12154_v18 = vld [vmem:[#allocation25_spill] sm:$0xff] }
 0x4ea   : > { %4325 = vmatmul.bf16.gmra.mxu3 %v12151_v58  ;;  %4503 = vmatmul.bf16.gmra.mxu1 %v12152_v8  ;;  %v4099_v11 = vpop.f32.mrf.mxu0  ;;  %v7902_v58 = vld [vmem:[%s12013_s5 + $0xec] sm:$0xf] }
 0x4eb   : > { %v8231_v10 = vpop.eup %8230  ;;  %v4186_v45 = vadd.f32 %v4185_v0, %v4097_v12 }
 0x4ec   : > { %6367 = vst [vmem:[%s10058_s15 + $0x4d8] sm:$0xff] %v8231_v10  ;;  %v3921_v30 = vpop.f32.mrf.mxu2 }
 0x4ed   : > { %8232 = vtanh.f32 %v4186_v45  ;;  %v3922_v47 = vadd.f32 %v3921_v30, %v10364_v21  ;;  %v4010_v40 = vpop.f32.mrf.mxu3  ;;  %4414 = vmatmul.bf16.gmra.mxu0 %v12134_v35  ;;  %v7011_v45 = vld [vmem:[%s12013_s5 + $0x104] sm:$0xf0] }
 0x4ee   : > { %v7014_v5 = vor.u32 %v7902_v58, %v7011_v45  ;;  %v8021_v58 = vld [vmem:[%s12013_s5 + $0x4a4] sm:$0xf] }
 0x4ef   : > { %v4011_v16 = vadd.f32 %v4010_v40, %v3922_v47  ;;  %v4190_v0 = vpop.f32.mrf.mxu1  ;;  %v12153_v40 = vld [vmem:[#allocation12_spill] sm:$0xff] }
 0x4f0   : > { %4567 = vmatpush.bf16.msra.mxu2 %v7014_v5 }
 0x4f1   : > { %v4100_v46 = vadd.f32 %v4099_v11, %v4011_v16 }
 0x4f2   : > { %v4101_v23 = vpop.f32.mrf.mxu0 }
 0x4f3   : > { %v8233_v12 = vpop.eup %8232  ;;  %v4189_v10 = vadd.f32 %v4188_v56, %v4100_v46 }
 0x4f4   : > { %6374 = vst [vmem:[%s10058_s15 + $0x510] sm:$0xff] %v8233_v12  ;;  %v3923_v8 = vpop.f32.mrf.mxu2 }
 0x4f5   : > { %8234 = vtanh.f32 %v4189_v10  ;;  %v3924_v30 = vadd.f32 %v3923_v8, %v10364_v21  ;;  %v4012_v29 = vpop.f32.mrf.mxu3  ;;  %v7487_v8 = vld [vmem:[%s12013_s5 + $0x4bc] sm:$0xf0] }
 0x4f7   : > { %v4013_v11 = vadd.f32 %v4012_v29, %v3924_v30  ;;  %v4193_v47 = vpop.f32.mrf.mxu1  ;;  %v7490_v30 = vor.u32 %v8021_v58, %v7487_v8 }
 0x4f9   : > { %v4102_v56 = vadd.f32 %v4101_v23, %v4013_v11  ;;  %4241 = vmatmul.bf16.gmra.mxu2 %v9407_v27  ;;  %4744 = vmatpush.bf16.msra.mxu0 %v7490_v30  ;;  %v12156_v30 = vld [vmem:[#allocation27_spill] sm:$0xff] }
 0x4fa   : > { %4330 = vmatmul.bf16.gmra.mxu3 %v12153_v40  ;;  %4508 = vmatmul.bf16.gmra.mxu1 %v12154_v18  ;;  %v4104_v16 = vpop.f32.mrf.mxu0  ;;  %v7958_v40 = vld [vmem:[%s12013_s5 + $0x2ac] sm:$0xf] }
 0x4fb   : > { %v8235_v46 = vpop.eup %8234  ;;  %v4191_v12 = vadd.f32 %v4190_v0, %v4102_v56 }
 0x4fc   : > { %6381 = vst [vmem:[%s10058_s15 + $0x548] sm:$0xff] %v8235_v46  ;;  %v3926_v10 = vpop.f32.mrf.mxu2 }
 0x4fd   : > { %8236 = vtanh.f32 %v4191_v12  ;;  %v3927_v23 = vadd.f32 %v3926_v10, %v10364_v21  ;;  %v4015_v45 = vpop.f32.mrf.mxu3  ;;  %4419 = vmatmul.bf16.gmra.mxu0 %v12136_v6  ;;  %v7235_v12 = vld [vmem:[%s12013_s5 + $0x2c4] sm:$0xf0] }
 0x4fe   : > { %v7238_v8 = vor.u32 %v7958_v40, %v7235_v12  ;;  %v8070_v40 = vld [vmem:[%s12013_s5 + $0x62c] sm:$0xf] }
 0x4ff   : > { %v4016_v29 = vadd.f32 %v4015_v45, %v3927_v23  ;;  %v4195_v0 = vpop.f32.mrf.mxu1  ;;  %v12155_v45 = vld [vmem:[#allocation13_spill] sm:$0xff] }
 0x500   : > { %4656 = vmatpush.bf16.msra.mxu3 %v7238_v8 }
 0x501   : > { %v4105_v5 = vadd.f32 %v4104_v16, %v4016_v29 }
 0x502   : > { %v4106_v11 = vpop.f32.mrf.mxu0 }
 0x503   : > { %v8237_v56 = vpop.eup %8236  ;;  %v4194_v46 = vadd.f32 %v4193_v47, %v4105_v5 }
 0x504   : > { %6388 = vst [vmem:[%s10058_s15 + $0x580] sm:$0xff] %v8237_v56  ;;  %v3928_v18 = vpop.f32.mrf.mxu2 }
 0x505   : > { %8238 = vtanh.f32 %v4194_v46  ;;  %v3929_v10 = vadd.f32 %v3928_v18, %v10364_v21  ;;  %v4017_v58 = vpop.f32.mrf.mxu3  ;;  %v7683_v18 = vld [vmem:[%s12013_s5 + $0x644] sm:$0xf0] }
 0x507   : > { %v4018_v16 = vadd.f32 %v4017_v58, %v3929_v10  ;;  %v4198_v23 = vpop.f32.mrf.mxu1  ;;  %v7686_v10 = vor.u32 %v8070_v40, %v7683_v18 }
 0x509   : > { %v4107_v47 = vadd.f32 %v4106_v11, %v4018_v16  ;;  %4246 = vmatmul.bf16.gmra.mxu2 %v9431_v28  ;;  %4834 = vmatpush.bf16.msra.mxu1 %v7686_v10 }
 0x50a   : > { %4335 = vmatmul.bf16.gmra.mxu3 %v12155_v45  ;;  %4513 = vmatmul.bf16.gmra.mxu1 %v12156_v30  ;;  %v4109_v29 = vpop.f32.mrf.mxu0  ;;  %v7895_v45 = vld [vmem:[%s12013_s5 + $0xb4] sm:$0xf] }
 0x50b   : > { %v8239_v5 = vpop.eup %8238  ;;  %v4196_v56 = vadd.f32 %v4195_v0, %v4107_v47 }
 0x50c   : > { %6395 = vst [vmem:[%s10058_s15 + $0x5b8] sm:$0xff] %v8239_v5  ;;  %v3931_v46 = vpop.f32.mrf.mxu2 }
 0x50d   : > { %8240 = vtanh.f32 %v4196_v56  ;;  %v3932_v11 = vadd.f32 %v3931_v46, %v10364_v21  ;;  %v4020_v12 = vpop.f32.mrf.mxu3  ;;  %4424 = vmatmul.bf16.gmra.mxu0 %v9822_v20  ;;  %v6983_v56 = vld [vmem:[%s12013_s5 + $0xcc] sm:$0xf0] }
 0x50e   : > { %v6986_v18 = vor.u32 %v7895_v45, %v6983_v56  ;;  %v8014_v45 = vld [vmem:[%s12013_s5 + $0x46c] sm:$0xf] }
 0x50f   : > { %v4021_v58 = vadd.f32 %v4020_v12, %v3932_v11  ;;  %v4200_v0 = vpop.f32.mrf.mxu1  ;;  %v12157_v12 = vld [vmem:[#allocation28_spill] sm:$0xff] }
 0x510   : > { %4568 = vmatpush.bf16.msra.mxu2 %v6986_v18 }
 0x511   : > { %v4110_v8 = vadd.f32 %v4109_v29, %v4021_v58 }
 0x512   : > { %v4111_v16 = vpop.f32.mrf.mxu0 }
 0x513   : > { %v8241_v47 = vpop.eup %8240  ;;  %v4199_v5 = vadd.f32 %v4198_v23, %v4110_v8 }
 0x514   : > { %6402 = vst [vmem:[%s10058_s15 + $0x5f0] sm:$0xff] %v8241_v47  ;;  %v3933_v30 = vpop.f32.mrf.mxu2 }
 0x515   : > { %8242 = vtanh.f32 %v4199_v5  ;;  %v3934_v46 = vadd.f32 %v3933_v30, %v10364_v21  ;;  %v4022_v40 = vpop.f32.mrf.mxu3  ;;  %v7459_v30 = vld [vmem:[%s12013_s5 + $0x484] sm:$0xf0] }
 0x516   : > { %v7462_v56 = vor.u32 %v8014_v45, %v7459_v30 }
 0x517   : > { %v4023_v29 = vadd.f32 %v4022_v40, %v3934_v46  ;;  %v4203_v11 = vpop.f32.mrf.mxu1 }
 0x518   : > { %4745 = vmatpush.bf16.msra.mxu0 %v7462_v56 }
 0x519   : > { %v4112_v23 = vadd.f32 %v4111_v16, %v4023_v29  ;;  %4251 = vmatmul.bf16.gmra.mxu2 %v9455_v25 }
 0x51a   : > { %4340 = vmatmul.bf16.gmra.mxu3 %v9450_v9  ;;  %4518 = vmatmul.bf16.gmra.mxu1 %v12157_v12  ;;  %v4114_v10 = vpop.f32.mrf.mxu0  ;;  %v7951_v12 = vld [vmem:[%s12013_s5 + $0x274] sm:$0xf] }
 0x51b   : > { %v8243_v58 = vpop.eup %8242  ;;  %v4201_v8 = vadd.f32 %v4200_v0, %v4112_v23 }
 0x51c   : > { %6409 = vst [vmem:[%s10058_s15 + $0x628] sm:$0xff] %v8243_v58  ;;  %v3936_v47 = vpop.f32.mrf.mxu2 }
 0x51d   : > { %8244 = vtanh.f32 %v4201_v8  ;;  %v3937_v16 = vadd.f32 %v3936_v47, %v10364_v21  ;;  %v4025_v5 = vpop.f32.mrf.mxu3  ;;  %4429 = vmatmul.bf16.gmra.mxu0 %v12139_v55  ;;  %v7207_v8 = vld [vmem:[%s12013_s5 + $0x28c] sm:$0xf0] }
 0x51e   : > { %v7210_v30 = vor.u32 %v7951_v12, %v7207_v8 }
 0x51f   : > { %v4026_v46 = vadd.f32 %v4025_v5, %v3937_v16  ;;  %v4205_v0 = vpop.f32.mrf.mxu1  ;;  %v8572_v5 = vld [vmem:[%s12014_s6] sm:$0xff] }
 0x520   : > { %4657 = vmatpush.bf16.msra.mxu3 %v7210_v30  ;;  %v10689_v56 = vperm.slane %v8572_v5, 2 }
 0x521   : > { %v4115_v40 = vadd.f32 %v4114_v10, %v4026_v46 }
 0x522   : > { %v4116_v18 = vpop.f32.mrf.mxu0 }
 0x523   : > { %v8245_v29 = vpop.eup %8244  ;;  %v4204_v23 = vadd.f32 %v4203_v11, %v4115_v40 }
 0x524   : > { %6416 = vst [vmem:[%s10058_s15 + $0x660] sm:$0xff] %v8245_v29  ;;  %v3938_v58 = vpop.f32.mrf.mxu2  ;;  %v7655_v29 = vld [vmem:[%s12013_s5 + $0x60c] sm:$0xf0] }
 0x525   : > { %8246 = vtanh.f32 %v4204_v23  ;;  %v3939_v47 = vadd.f32 %v3938_v58, %v10364_v21  ;;  %v4027_v45 = vpop.f32.mrf.mxu3 }
 0x527   : > { %v4028_v10 = vadd.f32 %v4027_v45, %v3939_v47  ;;  %v4484_v16 = vpop.f32.mrf.mxu1 }
 0x529   : > { %v4117_v11 = vadd.f32 %v4116_v18, %v4028_v10  ;;  %4256 = vmatmul.bf16.gmra.mxu2 %v9479_v17  ;;  %v8063_v18 = vld [vmem:[%s12013_s5 + $0x5f4] sm:$0xf] }
 0x52a   : > { %4345 = vmatmul.bf16.gmra.mxu3 %v9474_v15  ;;  %4523 = vmatmul.bf16.gmra.mxu1 %v9865_v57  ;;  %v4395_v46 = vpop.f32.mrf.mxu0  ;;  %v7658_v8 = vor.u32 %v8063_v18, %v7655_v29 }
 0x52b   : > { %v8247_v21 = vpop.eup %8246  ;;  %v4206_v40 = vadd.f32 %v4205_v0, %v4117_v11 }
 0x52c   : > { %6423 = vst [vmem:[%s10058_s15 + $0x698] sm:$0xff] %v8247_v21  ;;  %v4217_v12 = vpop.f32.mrf.mxu2  ;;  %4835 = vmatpush.bf16.msra.mxu1 %v7658_v8  ;;  %v7888_v21 = vld [vmem:[%s12013_s5 + $0x7c] sm:$0xf] }
 0x52d   : > { %8248 = vtanh.f32 %v4206_v40  ;;  %v4218_v23 = vadd.f32 %v4217_v12, %v10689_v56  ;;  %v4306_v58 = vpop.f32.mrf.mxu3  ;;  %4434 = vmatmul.bf16.gmra.mxu0 %v9870_v54  ;;  %v6955_v40 = vld [vmem:[%s12013_s5 + $0x94] sm:$0xf0] }
 0x52e   : > { %v6958_v29 = vor.u32 %v7888_v21, %v6955_v40 }
 0x52f   : > { %v4307_v47 = vadd.f32 %v4306_v58, %v4218_v23  ;;  %v4486_v0 = vpop.f32.mrf.mxu1 }
 0x530   : > { %4569 = vmatpush.bf16.msra.mxu2 %v6958_v29 }
 0x531   : > { %v4396_v45 = vadd.f32 %v4395_v46, %v4307_v47 }
 0x532   : > { %v4397_v30 = vpop.f32.mrf.mxu0 }
 0x533   : > { %v8249_v10 = vpop.eup %8248  ;;  %v4485_v11 = vadd.f32 %v4484_v16, %v4396_v45 }
 0x534   : > { %6430 = vst [vmem:[%s10058_s15 + $0x6d0] sm:$0xff] %v8249_v10  ;;  %v4219_v5 = vpop.f32.mrf.mxu2  ;;  %v8007_v10 = vld [vmem:[%s12013_s5 + $0x434] sm:$0xf] }
 0x535   : > { %8250 = vtanh.f32 %v4485_v11  ;;  %v4220_v12 = vadd.f32 %v4219_v5, %v10689_v56  ;;  %v4308_v18 = vpop.f32.mrf.mxu3 }
 0x537   : > { %v4309_v46 = vadd.f32 %v4308_v18, %v4220_v12  ;;  %v4489_v23 = vpop.f32.mrf.mxu1 }
 0x539   : > { %v4398_v16 = vadd.f32 %v4397_v30, %v4309_v46  ;;  %4261 = vmatmul.bf16.gmra.mxu2 %v9503_v36  ;;  %v7431_v30 = vld [vmem:[%s12013_s5 + $0x44c] sm:$0xf0] }
 0x53a   : > { %4350 = vmatmul.bf16.gmra.mxu3 %v9498_v13  ;;  %4528 = vmatmul.bf16.gmra.mxu1 %v9889_v49  ;;  %v4400_v58 = vpop.f32.mrf.mxu0  ;;  %v7434_v21 = vor.u32 %v8007_v10, %v7431_v30 }
 0x53b   : > { %v8251_v8 = vpop.eup %8250  ;;  %v4487_v47 = vadd.f32 %v4486_v0, %v4398_v16 }
 0x53c   : > { %6214 = vst [vmem:[%s10058_s15 + $0x10] sm:$0xff] %v8251_v8  ;;  %v4222_v45 = vpop.f32.mrf.mxu2  ;;  %4746 = vmatpush.bf16.msra.mxu0 %v7434_v21  ;;  %v7944_v8 = vld [vmem:[%s12013_s5 + $0x23c] sm:$0xf] }
 0x53d   : > { %8252 = vtanh.f32 %v4487_v47  ;;  %v4223_v11 = vadd.f32 %v4222_v45, %v10689_v56  ;;  %v4311_v5 = vpop.f32.mrf.mxu3  ;;  %4439 = vmatmul.bf16.gmra.mxu0 %v9894_v51  ;;  %v7179_v47 = vld [vmem:[%s12013_s5 + $0x254] sm:$0xf0] }
 0x53e   : > { %v7182_v30 = vor.u32 %v7944_v8, %v7179_v47 }
 0x53f   : > { %v4312_v40 = vadd.f32 %v4311_v5, %v4223_v11  ;;  %v4491_v0 = vpop.f32.mrf.mxu1 }
 0x540   : > { %4658 = vmatpush.bf16.msra.mxu3 %v7182_v30 }
 0x541   : > { %v4401_v12 = vadd.f32 %v4400_v58, %v4312_v40 }
 0x542   : > { %v4402_v18 = vpop.f32.mrf.mxu0 }
 0x543   : > { %v8253_v29 = vpop.eup %8252  ;;  %v4490_v46 = vadd.f32 %v4489_v23, %v4401_v12 }
 0x544   : > { %6221 = vst [vmem:[%s10058_s15 + $0x48] sm:$0xff] %v8253_v29  ;;  %v4224_v16 = vpop.f32.mrf.mxu2  ;;  %v8056_v29 = vld [vmem:[%s12013_s5 + $0x5bc] sm:$0xf] }
 0x545   : > { %8254 = vtanh.f32 %v4490_v46  ;;  %v4225_v45 = vadd.f32 %v4224_v16, %v10689_v56  ;;  %v4313_v10 = vpop.f32.mrf.mxu3 }
 0x547   : > { %v4314_v58 = vadd.f32 %v4313_v10, %v4225_v45  ;;  %v4494_v11 = vpop.f32.mrf.mxu1 }
 0x549   : > { %v4403_v23 = vadd.f32 %v4402_v18, %v4314_v58  ;;  %4266 = vmatmul.bf16.gmra.mxu2 %v9527_v1  ;;  %v7627_v18 = vld [vmem:[%s12013_s5 + $0x5d4] sm:$0xf0] }
 0x54a   : > { %4355 = vmatmul.bf16.gmra.mxu3 %v9522_v7  ;;  %4533 = vmatmul.bf16.gmra.mxu1 %v9913_v53  ;;  %v4405_v5 = vpop.f32.mrf.mxu0  ;;  %v7630_v8 = vor.u32 %v8056_v29, %v7627_v18 }
 0x54b   : > { %v8255_v21 = vpop.eup %8254  ;;  %v4492_v40 = vadd.f32 %v4491_v0, %v4403_v23 }
 0x54c   : > { %6228 = vst [vmem:[%s10058_s15 + $0x80] sm:$0xff] %v8255_v21  ;;  %v4227_v12 = vpop.f32.mrf.mxu2  ;;  %4836 = vmatpush.bf16.msra.mxu1 %v7630_v8  ;;  %v7881_v21 = vld [vmem:[%s12013_s5 + $0x44] sm:$0xf] }
 0x54d   : > { %8256 = vtanh.f32 %v4492_v40  ;;  %v4228_v46 = vadd.f32 %v4227_v12, %v10689_v56  ;;  %v4316_v16 = vpop.f32.mrf.mxu3  ;;  %4444 = vmatmul.bf16.gmra.mxu0 %v9918_v48  ;;  %v6927_v40 = vld [vmem:[%s12013_s5 + $0x5c] sm:$0xf0] }
 0x54e   : > { %v6930_v18 = vor.u32 %v7881_v21, %v6927_v40 }
 0x54f   : > { %v4317_v47 = vadd.f32 %v4316_v16, %v4228_v46  ;;  %v4496_v0 = vpop.f32.mrf.mxu1 }
 0x550   : > { %4570 = vmatpush.bf16.msra.mxu2 %v6930_v18 }
 0x551   : > { %v4406_v45 = vadd.f32 %v4405_v5, %v4317_v47 }
 0x552   : > { %v4407_v10 = vpop.f32.mrf.mxu0 }
 0x553   : > { %v8257_v30 = vpop.eup %8256  ;;  %v4495_v58 = vadd.f32 %v4494_v11, %v4406_v45 }
 0x554   : > { %6235 = vst [vmem:[%s10058_s15 + $0xb8] sm:$0xff] %v8257_v30  ;;  %v4229_v23 = vpop.f32.mrf.mxu2  ;;  %v8000_v30 = vld [vmem:[%s12013_s5 + $0x3fc] sm:$0xf] }
 0x555   : > { %8258 = vtanh.f32 %v4495_v58  ;;  %v4230_v12 = vadd.f32 %v4229_v23, %v10689_v56  ;;  %v4318_v29 = vpop.f32.mrf.mxu3 }
 0x557   : > { %v4319_v5 = vadd.f32 %v4318_v29, %v4230_v12  ;;  %v4499_v46 = vpop.f32.mrf.mxu1 }
 0x559   : > { %v4408_v11 = vadd.f32 %v4407_v10, %v4319_v5  ;;  %4271 = vmatmul.bf16.gmra.mxu2 %v9551_v31  ;;  %v7403_v10 = vld [vmem:[%s12013_s5 + $0x414] sm:$0xf0] }
 0x55a   : > { %4360 = vmatmul.bf16.gmra.mxu3 %v9546_v61  ;;  %4538 = vmatmul.bf16.gmra.mxu1 %v9937_v24  ;;  %v4410_v16 = vpop.f32.mrf.mxu0  ;;  %v7406_v21 = vor.u32 %v8000_v30, %v7403_v10 }
 0x55b   : > { %v8259_v8 = vpop.eup %8258  ;;  %v4497_v47 = vadd.f32 %v4496_v0, %v4408_v11 }
 0x55c   : > { %6242 = vst [vmem:[%s10058_s15 + $0xf0] sm:$0xff] %v8259_v8  ;;  %v4232_v45 = vpop.f32.mrf.mxu2  ;;  %4747 = vmatpush.bf16.msra.mxu0 %v7406_v21  ;;  %v7937_v8 = vld [vmem:[%s12013_s5 + $0x204] sm:$0xf] }
 0x55d   : > { %8260 = vtanh.f32 %v4497_v47  ;;  %v4233_v58 = vadd.f32 %v4232_v45, %v10689_v56  ;;  %v4321_v23 = vpop.f32.mrf.mxu3  ;;  %4449 = vmatmul.bf16.gmra.mxu0 %v9942_v62  ;;  %v7151_v47 = vld [vmem:[%s12013_s5 + $0x21c] sm:$0xf0] }
 0x55e   : > { %v7154_v10 = vor.u32 %v7937_v8, %v7151_v47 }
 0x55f   : > { %v4322_v40 = vadd.f32 %v4321_v23, %v4233_v58  ;;  %v4501_v0 = vpop.f32.mrf.mxu1 }
 0x560   : > { %4659 = vmatpush.bf16.msra.mxu3 %v7154_v10 }
 0x561   : > { %v4411_v12 = vadd.f32 %v4410_v16, %v4322_v40 }
 0x562   : > { %v4412_v29 = vpop.f32.mrf.mxu0 }
 0x563   : > { %v8261_v18 = vpop.eup %8260  ;;  %v4500_v5 = vadd.f32 %v4499_v46, %v4411_v12 }
 0x564   : > { %6249 = vst [vmem:[%s10058_s15 + $0x128] sm:$0xff] %v8261_v18  ;;  %v4234_v11 = vpop.f32.mrf.mxu2  ;;  %v8049_v18 = vld [vmem:[%s12013_s5 + $0x584] sm:$0xf] }
 0x565   : > { %8262 = vtanh.f32 %v4500_v5  ;;  %v4235_v45 = vadd.f32 %v4234_v11, %v10689_v56  ;;  %v4323_v30 = vpop.f32.mrf.mxu3 }
 0x567   : > { %v4324_v16 = vadd.f32 %v4323_v30, %v4235_v45  ;;  %v4504_v58 = vpop.f32.mrf.mxu1 }
 0x569   : > { %v4413_v46 = vadd.f32 %v4412_v29, %v4324_v16  ;;  %4276 = vmatmul.bf16.gmra.mxu2 %v9575_v4  ;;  %v7599_v29 = vld [vmem:[%s12013_s5 + $0x59c] sm:$0xf0] }
 0x56a   : > { %4365 = vmatmul.bf16.gmra.mxu3 %v9570_v3  ;;  %4543 = vmatmul.bf16.gmra.mxu1 %v9961_v32  ;;  %v4415_v23 = vpop.f32.mrf.mxu0  ;;  %v7602_v8 = vor.u32 %v8049_v18, %v7599_v29 }
 0x56b   : > { %v8263_v21 = vpop.eup %8262  ;;  %v4502_v40 = vadd.f32 %v4501_v0, %v4413_v46 }
 0x56c   : > { %6256 = vst [vmem:[%s10058_s15 + $0x160] sm:$0xff] %v8263_v21  ;;  %v4237_v12 = vpop.f32.mrf.mxu2  ;;  %4837 = vmatpush.bf16.msra.mxu1 %v7602_v8  ;;  %v7874_v21 = vld [vmem:[%s12013_s5 + $0xc] sm:$0xf] }
 0x56d   : > { %8264 = vtanh.f32 %v4502_v40  ;;  %v4238_v5 = vadd.f32 %v4237_v12, %v10689_v56  ;;  %v4326_v11 = vpop.f32.mrf.mxu3  ;;  %4454 = vmatmul.bf16.gmra.mxu0 %v9966_v63  ;;  %v6899_v40 = vld [vmem:[%s12013_s5 + $0x24] sm:$0xf0] }
 0x56e   : > { %v6902_v29 = vor.u32 %v7874_v21, %v6899_v40 }
 0x56f   : > { %v4327_v47 = vadd.f32 %v4326_v11, %v4238_v5  ;;  %v4506_v0 = vpop.f32.mrf.mxu1 }
 0x570   : > { %4571 = vmatpush.bf16.msra.mxu2 %v6902_v29 }
 0x571   : > { %v4416_v45 = vadd.f32 %v4415_v23, %v4327_v47 }
 0x572   : > { %v4417_v30 = vpop.f32.mrf.mxu0 }
 0x573   : > { %v8265_v10 = vpop.eup %8264  ;;  %v4505_v16 = vadd.f32 %v4504_v58, %v4416_v45 }
 0x574   : > { %6263 = vst [vmem:[%s10058_s15 + $0x198] sm:$0xff] %v8265_v10  ;;  %v4239_v46 = vpop.f32.mrf.mxu2  ;;  %v7993_v10 = vld [vmem:[%s12013_s5 + $0x3c4] sm:$0xf] }
 0x575   : > { %8266 = vtanh.f32 %v4505_v16  ;;  %v4240_v12 = vadd.f32 %v4239_v46, %v10689_v56  ;;  %v4328_v18 = vpop.f32.mrf.mxu3 }
 0x577   : > { %v4329_v23 = vadd.f32 %v4328_v18, %v4240_v12  ;;  %v4509_v5 = vpop.f32.mrf.mxu1 }
 0x579   : > { %v4418_v58 = vadd.f32 %v4417_v30, %v4329_v23  ;;  %4281 = vmatmul.bf16.gmra.mxu2 %v9599_v42  ;;  %v7375_v30 = vld [vmem:[%s12013_s5 + $0x3dc] sm:$0xf0] }
 0x57a   : > { %4370 = vmatmul.bf16.gmra.mxu3 %v9594_v60  ;;  %4548 = vmatmul.bf16.gmra.mxu1 %v9985_v38  ;;  %v4420_v11 = vpop.f32.mrf.mxu0  ;;  %v7378_v21 = vor.u32 %v7993_v10, %v7375_v30 }
 0x57b   : > { %v8267_v8 = vpop.eup %8266  ;;  %v4507_v47 = vadd.f32 %v4506_v0, %v4418_v58 }
 0x57c   : > { %6270 = vst [vmem:[%s10058_s15 + $0x1d0] sm:$0xff] %v8267_v8  ;;  %v4242_v45 = vpop.f32.mrf.mxu2  ;;  %4748 = vmatpush.bf16.msra.mxu0 %v7378_v21  ;;  %v7930_v8 = vld [vmem:[%s12013_s5 + $0x1cc] sm:$0xf] }
 0x57d   : > { %8268 = vtanh.f32 %v4507_v47  ;;  %v4243_v16 = vadd.f32 %v4242_v45, %v10689_v56  ;;  %v4331_v46 = vpop.f32.mrf.mxu3  ;;  %4459 = vmatmul.bf16.gmra.mxu0 %v9990_v52  ;;  %v7123_v47 = vld [vmem:[%s12013_s5 + $0x1e4] sm:$0xf0] }
 0x57e   : > { %v7126_v30 = vor.u32 %v7930_v8, %v7123_v47 }
 0x57f   : > { %v4332_v40 = vadd.f32 %v4331_v46, %v4243_v16  ;;  %v4511_v0 = vpop.f32.mrf.mxu1 }
 0x580   : > { %4660 = vmatpush.bf16.msra.mxu3 %v7126_v30 }
 0x581   : > { %v4421_v12 = vadd.f32 %v4420_v11, %v4332_v40  ;;  %v8042_v11 = vld [vmem:[%s12013_s5 + $0x54c] sm:$0xf] }
 0x582   : > { %v4422_v18 = vpop.f32.mrf.mxu0  ;;  %v7986_v40 = vld [vmem:[%s12013_s5 + $0x38c] sm:$0xf] }
 0x583   : > { %v8269_v29 = vpop.eup %8268  ;;  %v4510_v23 = vadd.f32 %v4509_v5, %v4421_v12  ;;  %v7571_v5 = vld [vmem:[%s12013_s5 + $0x564] sm:$0xf0] }
 0x584   : > { %6277 = vst [vmem:[%s10058_s15 + $0x208] sm:$0xff] %v8269_v29  ;;  %v4244_v58 = vpop.f32.mrf.mxu2  ;;  %v7574_v16 = vor.u32 %v8042_v11, %v7571_v5  ;;  %v7347_v12 = vld [vmem:[%s12013_s5 + $0x3a4] sm:$0xf0] }
 0x585   : > { %8270 = vtanh.f32 %v4510_v23  ;;  %v4245_v45 = vadd.f32 %v4244_v58, %v10689_v56  ;;  %v4333_v10 = vpop.f32.mrf.mxu3  ;;  %v7350_v23 = vor.u32 %v7986_v40, %v7347_v12 }
 0x586   : > { %4838 = vmatpush.bf16.msra.mxu1 %v7574_v16 }
 0x587   : > { %v4334_v46 = vadd.f32 %v4333_v10, %v4245_v45  ;;  %v4514_v21 = vpop.f32.mrf.mxu1  ;;  %4749 = vmatpush.bf16.msra.mxu0 %v7350_v23 }
 0x589   : > { %v4423_v29 = vadd.f32 %v4422_v18, %v4334_v46  ;;  %4286 = vmatmul.bf16.gmra.mxu2 %v9623_v22 }
 0x58a   : > { %4375 = vmatmul.bf16.gmra.mxu3 %v9618_v37  ;;  %4553 = vmatmul.bf16.gmra.mxu1 %v10003_v44  ;;  %v4425_v58 = vpop.f32.mrf.mxu0 }
 0x58b   : > { %v8271_v8 = vpop.eup %8270  ;;  %v4512_v47 = vadd.f32 %v4511_v0, %v4423_v29  ;;  %v7101_v0 = vld [vmem:[%s12013_s5 + $0x198] sm:$0xf]  ;;  %v7927_v29 = vld [vmem:[%s12013_s5 + $0x1b0] sm:$0xf0] }
 0x58c   : > { %6284 = vst [vmem:[%s10058_s15 + $0x240] sm:$0xff] %v8271_v8  ;;  %v4247_v45 = vpop.f32.mrf.mxu2 }
 0x58d   : > { %8272 = vtanh.f32 %v4512_v47  ;;  %v4248_v10 = vadd.f32 %v4247_v45, %v10689_v56  ;;  %v4336_v30 = vpop.f32.mrf.mxu3  ;;  %4464 = vmatmul.bf16.gmra.mxu0 %v10008_v33  ;;  %v7102_v47 = vor.u32 %v7927_v29, %v7101_v0 }
 0x58f   : > { %v4337_v18 = vadd.f32 %v4336_v30, %v4248_v10  ;;  %v4516_v11 = vpop.f32.mrf.mxu1  ;;  %4920 = vmatpush.bf16.msrb.mxu2 %v7102_v47 }
 0x591   : > { %v4426_v5 = vadd.f32 %v4425_v58, %v4337_v18 }
 0x592   : > { %v4427_v16 = vpop.f32.mrf.mxu0 }
 0x593   : > { %v8273_v46 = vpop.eup %8272  ;;  %v4515_v40 = vadd.f32 %v4514_v21, %v4426_v5 }
 0x594   : > { %6291 = vst [vmem:[%s10058_s15 + $0x278] sm:$0xff] %v8273_v46  ;;  %v4249_v12 = vpop.f32.mrf.mxu2 }
 0x595   : > { %8274 = vtanh.f32 %v4515_v40  ;;  %v4250_v23 = vadd.f32 %v4249_v12, %v10689_v56  ;;  %v4338_v8 = vpop.f32.mrf.mxu3 }
 0x597   : > { %v4339_v58 = vadd.f32 %v4338_v8, %v4250_v23  ;;  %v4519_v45 = vpop.f32.mrf.mxu1 }
 0x599   : > { %v4428_v21 = vadd.f32 %v4427_v16, %v4339_v58  ;;  %4291 = vmatmul.bf16.gmra.mxu2 %v9654_v41  ;;  %v7983_v58 = vld [vmem:[%s12013_s5 + $0x370] sm:$0xf0] }
 0x59a   : > { %4380 = vmatmul.bf16.gmra.mxu3 %v9647_v43  ;;  %4558 = vmatmul.bf16.gmra.mxu1 %v10030_v26  ;;  %v4430_v10 = vpop.f32.mrf.mxu0 }
 0x59b   : > { %v8275_v30 = vpop.eup %8274  ;;  %v4517_v18 = vadd.f32 %v4516_v11, %v4428_v21  ;;  %v7325_v11 = vld [vmem:[%s12013_s5 + $0x358] sm:$0xf] }
 0x59c   : > { %6298 = vst [vmem:[%s10058_s15 + $0x2b0] sm:$0xff] %v8275_v30  ;;  %v4252_v5 = vpop.f32.mrf.mxu2 }
 0x59d   : > { %8276 = vtanh.f32 %v4517_v18  ;;  %v4253_v46 = vadd.f32 %v4252_v5, %v10689_v56  ;;  %v4341_v40 = vpop.f32.mrf.mxu3  ;;  %4469 = vmatmul.bf16.gmra.mxu0 %v10037_v34  ;;  %v7326_v18 = vor.u32 %v7983_v58, %v7325_v11 }
 0x59f   : > { %v4342_v12 = vadd.f32 %v4341_v40, %v4253_v46  ;;  %v4521_v16 = vpop.f32.mrf.mxu1  ;;  %5009 = vmatpush.bf16.msrb.mxu3 %v7326_v18  ;;  %v12158_v46 = vld [vmem:[#allocation2_spill] sm:$0xff]  ;;  %v12159_v40 = vld [vmem:[#allocation15_spill] sm:$0xff] }
 0x5a1   : > { %v4431_v0 = vadd.f32 %v4430_v10, %v4342_v12 }
 0x5a2   : > { %v4432_v29 = vpop.f32.mrf.mxu0 }
 0x5a3   : > { %v8277_v23 = vpop.eup %8276  ;;  %v4520_v8 = vadd.f32 %v4519_v45, %v4431_v0 }
 0x5a4   : > { %6305 = vst [vmem:[%s10058_s15 + $0x2e8] sm:$0xff] %v8277_v23  ;;  %v4254_v47 = vpop.f32.mrf.mxu2 }
 0x5a5   : > { %8278 = vtanh.f32 %v4520_v8  ;;  %v4255_v21 = vadd.f32 %v4254_v47, %v10689_v56  ;;  %v4343_v30 = vpop.f32.mrf.mxu3  ;;  %v7773_v47 = vld [vmem:[%s12013_s5 + $0x6d8] sm:$0xf] }
 0x5a7   : > { %v4344_v10 = vadd.f32 %v4343_v30, %v4255_v21  ;;  %v4524_v5 = vpop.f32.mrf.mxu1  ;;  %v12160_v21 = vld [vmem:[#allocation16_spill] sm:$0xff] }
 0x5a9   : > { %v4433_v45 = vadd.f32 %v4432_v29, %v4344_v10  ;;  %4572 = vmatmul.bf16.vlgmr.msra.gmra.mxu2 %v9251_v14  ;;  %v8095_v29 = vld [vmem:[%s12013_s5 + $0x6f0] sm:$0xf0]  ;;  %v7073_v14 = vld [vmem:[%s12013_s5 + $0x160] sm:$0xf] }
 0x5aa   : > { %4661 = vmatmul.bf16.vlgmr.msra.gmra.mxu3 %v12158_v46  ;;  %4839 = vmatmul.bf16.vlgmr.msra.gmra.mxu1 %v12159_v40  ;;  %v4435_v12 = vpop.f32.mrf.mxu0  ;;  %v7774_v30 = vor.u32 %v8095_v29, %v7773_v47 }
 0x5ab   : > { %v8279_v0 = vpop.eup %8278  ;;  %v4522_v23 = vadd.f32 %v4521_v16, %v4433_v45 }
 0x5ac   : > { %6312 = vst [vmem:[%s10058_s15 + $0x320] sm:$0xff] %v8279_v0  ;;  %v4257_v8 = vpop.f32.mrf.mxu2  ;;  %5187 = vmatpush.bf16.msrb.mxu1 %v7774_v30  ;;  %v12162_v30 = vld [vmem:[#allocation17_spill] sm:$0xff] }
 0x5ad   : > { %8280 = vtanh.f32 %v4522_v23  ;;  %v4258_v11 = vadd.f32 %v4257_v8, %v10689_v56  ;;  %v4346_v58 = vpop.f32.mrf.mxu3  ;;  %4750 = vmatmul.bf16.vlgmr.msra.gmra.mxu0 %v12160_v21  ;;  %v7920_v23 = vld [vmem:[%s12013_s5 + $0x178] sm:$0xf0] }
 0x5ae   : > { %v7074_v29 = vor.u32 %v7920_v23, %v7073_v14  ;;  %v7549_v14 = vld [vmem:[%s12013_s5 + $0x518] sm:$0xf] }
 0x5af   : > { %v4347_v18 = vadd.f32 %v4346_v58, %v4258_v11  ;;  %v4526_v16 = vpop.f32.mrf.mxu1  ;;  %v12161_v58 = vld [vmem:[#allocation4_spill] sm:$0xff] }
 0x5b0   : > { %4921 = vmatpush.bf16.msrb.mxu2 %v7074_v29 }
 0x5b1   : > { %v4436_v10 = vadd.f32 %v4435_v12, %v4347_v18 }
 0x5b2   : > { %v4437_v45 = vpop.f32.mrf.mxu0 }
 0x5b3   : > { %v8281_v0 = vpop.eup %8280  ;;  %v4525_v40 = vadd.f32 %v4524_v5, %v4436_v10 }
 0x5b4   : > { %6319 = vst [vmem:[%s10058_s15 + $0x358] sm:$0xff] %v8281_v0  ;;  %v4259_v46 = vpop.f32.mrf.mxu2 }
 0x5b5   : > { %8282 = vtanh.f32 %v4525_v40  ;;  %v4260_v8 = vadd.f32 %v4259_v46, %v10689_v56  ;;  %v4348_v47 = vpop.f32.mrf.mxu3  ;;  %v8039_v46 = vld [vmem:[%s12013_s5 + $0x530] sm:$0xf0] }
 0x5b7   : > { %v4349_v12 = vadd.f32 %v4348_v47, %v4260_v8  ;;  %v4529_v11 = vpop.f32.mrf.mxu1  ;;  %v12163_v8 = vld [vmem:[#allocation18_spill] sm:$0xff]  ;;  %v7550_v47 = vor.u32 %v8039_v46, %v7549_v14 }
 0x5b9   : > { %v4438_v5 = vadd.f32 %v4437_v45, %v4349_v12  ;;  %4577 = vmatmul.bf16.gmra.mxu2 %v12142_v2  ;;  %5098 = vmatpush.bf16.msrb.mxu0 %v7550_v47  ;;  %v7297_v2 = vld [vmem:[%s12013_s5 + $0x320] sm:$0xf]  ;;  %v12165_v47 = vld [vmem:[#allocation19_spill] sm:$0xff] }
 0x5ba   : > { %4666 = vmatmul.bf16.gmra.mxu3 %v12161_v58  ;;  %4844 = vmatmul.bf16.gmra.mxu1 %v12162_v30  ;;  %v4440_v18 = vpop.f32.mrf.mxu0 }
 0x5bb   : > { %v8283_v10 = vpop.eup %8282  ;;  %v4527_v0 = vadd.f32 %v4526_v16, %v4438_v5 }
 0x5bc   : > { %6326 = vst [vmem:[%s10058_s15 + $0x390] sm:$0xff] %v8283_v10  ;;  %v4262_v40 = vpop.f32.mrf.mxu2 }
 0x5bd   : > { %8284 = vtanh.f32 %v4527_v0  ;;  %v4263_v45 = vadd.f32 %v4262_v40, %v10689_v56  ;;  %v4351_v23 = vpop.f32.mrf.mxu3  ;;  %4755 = vmatmul.bf16.gmra.mxu0 %v12163_v8  ;;  %v7976_v0 = vld [vmem:[%s12013_s5 + $0x338] sm:$0xf0] }
 0x5be   : > { %v7298_v46 = vor.u32 %v7976_v0, %v7297_v2  ;;  %v7745_v2 = vld [vmem:[%s12013_s5 + $0x6a0] sm:$0xf] }
 0x5bf   : > { %v4352_v29 = vadd.f32 %v4351_v23, %v4263_v45  ;;  %v4531_v16 = vpop.f32.mrf.mxu1  ;;  %v12164_v23 = vld [vmem:[#allocation6_spill] sm:$0xff] }
 0x5c0   : > { %5010 = vmatpush.bf16.msrb.mxu3 %v7298_v46 }
 0x5c1   : > { %v4441_v12 = vadd.f32 %v4440_v18, %v4352_v29 }
 0x5c2   : > { %v4442_v5 = vpop.f32.mrf.mxu0 }
 0x5c3   : > { %v8285_v10 = vpop.eup %8284  ;;  %v4530_v30 = vadd.f32 %v4529_v11, %v4441_v12 }
 0x5c4   : > { %6333 = vst [vmem:[%s10058_s15 + $0x3c8] sm:$0xff] %v8285_v10  ;;  %v4264_v58 = vpop.f32.mrf.mxu2 }
 0x5c5   : > { %8286 = vtanh.f32 %v4530_v30  ;;  %v4265_v40 = vadd.f32 %v4264_v58, %v10689_v56  ;;  %v4353_v14 = vpop.f32.mrf.mxu3  ;;  %v8088_v58 = vld [vmem:[%s12013_s5 + $0x6b8] sm:$0xf0] }
 0x5c7   : > { %v4354_v18 = vadd.f32 %v4353_v14, %v4265_v40  ;;  %v4534_v45 = vpop.f32.mrf.mxu1  ;;  %v7746_v40 = vor.u32 %v8088_v58, %v7745_v2 }
 0x5c9   : > { %v4443_v11 = vadd.f32 %v4442_v5, %v4354_v18  ;;  %4582 = vmatmul.bf16.gmra.mxu2 %v12145_v19  ;;  %5188 = vmatpush.bf16.msrb.mxu1 %v7746_v40  ;;  %v12167_v40 = vld [vmem:[#allocation21_spill] sm:$0xff] }
 0x5ca   : > { %4671 = vmatmul.bf16.gmra.mxu3 %v12164_v23  ;;  %4849 = vmatmul.bf16.gmra.mxu1 %v12165_v47  ;;  %v4445_v29 = vpop.f32.mrf.mxu0  ;;  %v7045_v23 = vld [vmem:[%s12013_s5 + $0x128] sm:$0xf] }
 0x5cb   : > { %v8287_v12 = vpop.eup %8286  ;;  %v4532_v10 = vadd.f32 %v4531_v16, %v4443_v11 }
 0x5cc   : > { %6340 = vst [vmem:[%s10058_s15 + $0x400] sm:$0xff] %v8287_v12  ;;  %v4267_v30 = vpop.f32.mrf.mxu2 }
 0x5cd   : > { %8288 = vtanh.f32 %v4532_v10  ;;  %v4268_v5 = vadd.f32 %v4267_v30, %v10689_v56  ;;  %v4356_v0 = vpop.f32.mrf.mxu3  ;;  %4760 = vmatmul.bf16.gmra.mxu0 %v12129_v50  ;;  %v7913_v10 = vld [vmem:[%s12013_s5 + $0x140] sm:$0xf0] }
 0x5ce   : > { %v7046_v58 = vor.u32 %v7913_v10, %v7045_v23  ;;  %v7521_v23 = vld [vmem:[%s12013_s5 + $0x4e0] sm:$0xf] }
 0x5cf   : > { %v4357_v14 = vadd.f32 %v4356_v0, %v4268_v5  ;;  %v4536_v16 = vpop.f32.mrf.mxu1  ;;  %v12166_v0 = vld [vmem:[#allocation8_spill] sm:$0xff] }
 0x5d0   : > { %4922 = vmatpush.bf16.msrb.mxu2 %v7046_v58 }
 0x5d1   : > { %v4446_v46 = vadd.f32 %v4445_v29, %v4357_v14 }
 0x5d2   : > { %v4447_v18 = vpop.f32.mrf.mxu0 }
 0x5d3   : > { %v8289_v11 = vpop.eup %8288  ;;  %v4535_v12 = vadd.f32 %v4534_v45, %v4446_v46 }
 0x5d4   : > { %6347 = vst [vmem:[%s10058_s15 + $0x438] sm:$0xff] %v8289_v11  ;;  %v4269_v47 = vpop.f32.mrf.mxu2 }
 0x5d5   : > { %8290 = vtanh.f32 %v4535_v12  ;;  %v4270_v30 = vadd.f32 %v4269_v47, %v10689_v56  ;;  %v4358_v2 = vpop.f32.mrf.mxu3  ;;  %v8032_v47 = vld [vmem:[%s12013_s5 + $0x4f8] sm:$0xf0] }
 0x5d7   : > { %v4359_v29 = vadd.f32 %v4358_v2, %v4270_v30  ;;  %v4539_v5 = vpop.f32.mrf.mxu1  ;;  %v12168_v30 = vld [vmem:[#allocation22_spill] sm:$0xff]  ;;  %v7522_v2 = vor.u32 %v8032_v47, %v7521_v23 }
 0x5d9   : > { %v4448_v45 = vadd.f32 %v4447_v18, %v4359_v29  ;;  %4587 = vmatmul.bf16.gmra.mxu2 %v9341_v39  ;;  %5099 = vmatpush.bf16.msrb.mxu0 %v7522_v2  ;;  %v7269_v39 = vld [vmem:[%s12013_s5 + $0x2e8] sm:$0xf] }
 0x5da   : > { %4676 = vmatmul.bf16.gmra.mxu3 %v12166_v0  ;;  %4854 = vmatmul.bf16.gmra.mxu1 %v12167_v40  ;;  %v4450_v14 = vpop.f32.mrf.mxu0  ;;  %v12170_v2 = vld [vmem:[#allocation23_spill] sm:$0xff] }
 0x5db   : > { %v8291_v46 = vpop.eup %8290  ;;  %v4537_v11 = vadd.f32 %v4536_v16, %v4448_v45 }
 0x5dc   : > { %6354 = vst [vmem:[%s10058_s15 + $0x470] sm:$0xff] %v8291_v46  ;;  %v4272_v12 = vpop.f32.mrf.mxu2 }
 0x5dd   : > { %8292 = vtanh.f32 %v4537_v11  ;;  %v4273_v18 = vadd.f32 %v4272_v12, %v10689_v56  ;;  %v4361_v10 = vpop.f32.mrf.mxu3  ;;  %4765 = vmatmul.bf16.gmra.mxu0 %v12168_v30  ;;  %v7969_v11 = vld [vmem:[%s12013_s5 + $0x300] sm:$0xf0] }
 0x5de   : > { %v7270_v47 = vor.u32 %v7969_v11, %v7269_v39  ;;  %v7717_v39 = vld [vmem:[%s12013_s5 + $0x668] sm:$0xf] }
 0x5df   : > { %v4362_v58 = vadd.f32 %v4361_v10, %v4273_v18  ;;  %v4541_v16 = vpop.f32.mrf.mxu1  ;;  %v12169_v10 = vld [vmem:[#allocation10_spill] sm:$0xff] }
 0x5e0   : > { %5011 = vmatpush.bf16.msrb.mxu3 %v7270_v47 }
 0x5e1   : > { %v4451_v29 = vadd.f32 %v4450_v14, %v4362_v58 }
 0x5e2   : > { %v4452_v45 = vpop.f32.mrf.mxu0 }
 0x5e3   : > { %v8293_v46 = vpop.eup %8292  ;;  %v4540_v40 = vadd.f32 %v4539_v5, %v4451_v29 }
 0x5e4   : > { %6361 = vst [vmem:[%s10058_s15 + $0x4a8] sm:$0xff] %v8293_v46  ;;  %v4274_v0 = vpop.f32.mrf.mxu2 }
 0x5e5   : > { %8294 = vtanh.f32 %v4540_v40  ;;  %v4275_v12 = vadd.f32 %v4274_v0, %v10689_v56  ;;  %v4363_v23 = vpop.f32.mrf.mxu3  ;;  %v8081_v0 = vld [vmem:[%s12013_s5 + $0x680] sm:$0xf0] }
 0x5e7   : > { %v4364_v14 = vadd.f32 %v4363_v23, %v4275_v12  ;;  %v4544_v18 = vpop.f32.mrf.mxu1  ;;  %v7718_v12 = vor.u32 %v8081_v0, %v7717_v39 }
 0x5e9   : > { %v4453_v5 = vadd.f32 %v4452_v45, %v4364_v14  ;;  %4592 = vmatmul.bf16.gmra.mxu2 %v12150_v59  ;;  %5189 = vmatpush.bf16.msrb.mxu1 %v7718_v12  ;;  %v12172_v12 = vld [vmem:[#allocation25_spill] sm:$0xff] }
 0x5ea   : > { %4681 = vmatmul.bf16.gmra.mxu3 %v12169_v10  ;;  %4859 = vmatmul.bf16.gmra.mxu1 %v12170_v2  ;;  %v4455_v58 = vpop.f32.mrf.mxu0  ;;  %v7017_v10 = vld [vmem:[%s12013_s5 + $0xf0] sm:$0xf] }
 0x5eb   : > { %v8295_v29 = vpop.eup %8294  ;;  %v4542_v46 = vadd.f32 %v4541_v16, %v4453_v5 }
 0x5ec   : > { %6368 = vst [vmem:[%s10058_s15 + $0x4e0] sm:$0xff] %v8295_v29  ;;  %v4277_v40 = vpop.f32.mrf.mxu2 }
 0x5ed   : > { %8296 = vtanh.f32 %v4542_v46  ;;  %v4278_v45 = vadd.f32 %v4277_v40, %v10689_v56  ;;  %v4366_v11 = vpop.f32.mrf.mxu3  ;;  %4770 = vmatmul.bf16.gmra.mxu0 %v12134_v35  ;;  %v7906_v46 = vld [vmem:[%s12013_s5 + $0x108] sm:$0xf0] }
 0x5ee   : > { %v7018_v0 = vor.u32 %v7906_v46, %v7017_v10  ;;  %v7493_v10 = vld [vmem:[%s12013_s5 + $0x4a8] sm:$0xf] }
 0x5ef   : > { %v4367_v23 = vadd.f32 %v4366_v11, %v4278_v45  ;;  %v4546_v16 = vpop.f32.mrf.mxu1  ;;  %v12171_v11 = vld [vmem:[#allocation12_spill] sm:$0xff] }
 0x5f0   : > { %4923 = vmatpush.bf16.msrb.mxu2 %v7018_v0 }
 0x5f1   : > { %v4456_v47 = vadd.f32 %v4455_v58, %v4367_v23 }
 0x5f2   : > { %v4457_v14 = vpop.f32.mrf.mxu0 }
 0x5f3   : > { %v8297_v5 = vpop.eup %8296  ;;  %v4545_v29 = vadd.f32 %v4544_v18, %v4456_v47 }
 0x5f4   : > { %6375 = vst [vmem:[%s10058_s15 + $0x518] sm:$0xff] %v8297_v5  ;;  %v4279_v2 = vpop.f32.mrf.mxu2 }
 0x5f5   : > { %8298 = vtanh.f32 %v4545_v29  ;;  %v4280_v40 = vadd.f32 %v4279_v2, %v10689_v56  ;;  %v4368_v39 = vpop.f32.mrf.mxu3  ;;  %v8025_v2 = vld [vmem:[%s12013_s5 + $0x4c0] sm:$0xf0] }
 0x5f7   : > { %v4369_v58 = vadd.f32 %v4368_v39, %v4280_v40  ;;  %v4549_v45 = vpop.f32.mrf.mxu1  ;;  %v7494_v40 = vor.u32 %v8025_v2, %v7493_v10 }
 0x5f9   : > { %v4458_v18 = vadd.f32 %v4457_v14, %v4369_v58  ;;  %4597 = vmatmul.bf16.gmra.mxu2 %v9407_v27  ;;  %5100 = vmatpush.bf16.msrb.mxu0 %v7494_v40  ;;  %v12174_v40 = vld [vmem:[#allocation27_spill] sm:$0xff] }
 0x5fa   : > { %4686 = vmatmul.bf16.gmra.mxu3 %v12171_v11  ;;  %4864 = vmatmul.bf16.gmra.mxu1 %v12172_v12  ;;  %v4460_v23 = vpop.f32.mrf.mxu0  ;;  %v7241_v11 = vld [vmem:[%s12013_s5 + $0x2b0] sm:$0xf] }
 0x5fb   : > { %v8299_v47 = vpop.eup %8298  ;;  %v4547_v5 = vadd.f32 %v4546_v16, %v4458_v18 }
 0x5fc   : > { %6382 = vst [vmem:[%s10058_s15 + $0x550] sm:$0xff] %v8299_v47  ;;  %v4282_v29 = vpop.f32.mrf.mxu2 }
 0x5fd   : > { %8300 = vtanh.f32 %v4547_v5  ;;  %v4283_v14 = vadd.f32 %v4282_v29, %v10689_v56  ;;  %v4371_v46 = vpop.f32.mrf.mxu3  ;;  %4775 = vmatmul.bf16.gmra.mxu0 %v12136_v6  ;;  %v7962_v5 = vld [vmem:[%s12013_s5 + $0x2c8] sm:$0xf0] }
 0x5fe   : > { %v7242_v2 = vor.u32 %v7962_v5, %v7241_v11  ;;  %v7689_v11 = vld [vmem:[%s12013_s5 + $0x630] sm:$0xf] }
 0x5ff   : > { %v4372_v39 = vadd.f32 %v4371_v46, %v4283_v14  ;;  %v4551_v16 = vpop.f32.mrf.mxu1  ;;  %v12173_v46 = vld [vmem:[#allocation13_spill] sm:$0xff] }
 0x600   : > { %5012 = vmatpush.bf16.msrb.mxu3 %v7242_v2 }
 0x601   : > { %v4461_v0 = vadd.f32 %v4460_v23, %v4372_v39 }
 0x602   : > { %v4462_v58 = vpop.f32.mrf.mxu0 }
 0x603   : > { %v8301_v18 = vpop.eup %8300  ;;  %v4550_v47 = vadd.f32 %v4549_v45, %v4461_v0 }
 0x604   : > { %6389 = vst [vmem:[%s10058_s15 + $0x588] sm:$0xff] %v8301_v18  ;;  %v4284_v12 = vpop.f32.mrf.mxu2 }
 0x605   : > { %8302 = vtanh.f32 %v4550_v47  ;;  %v4285_v29 = vadd.f32 %v4284_v12, %v10689_v56  ;;  %v4373_v10 = vpop.f32.mrf.mxu3  ;;  %v8074_v12 = vld [vmem:[%s12013_s5 + $0x648] sm:$0xf0] }
 0x607   : > { %v4374_v23 = vadd.f32 %v4373_v10, %v4285_v29  ;;  %v4554_v14 = vpop.f32.mrf.mxu1  ;;  %v7690_v29 = vor.u32 %v8074_v12, %v7689_v11 }
 0x609   : > { %v4463_v45 = vadd.f32 %v4462_v58, %v4374_v23  ;;  %4602 = vmatmul.bf16.gmra.mxu2 %v9431_v28  ;;  %5190 = vmatpush.bf16.msrb.mxu1 %v7690_v29 }
 0x60a   : > { %4691 = vmatmul.bf16.gmra.mxu3 %v12173_v46  ;;  %4869 = vmatmul.bf16.gmra.mxu1 %v12174_v40  ;;  %v4465_v39 = vpop.f32.mrf.mxu0  ;;  %v6989_v46 = vld [vmem:[%s12013_s5 + $0xb8] sm:$0xf] }
 0x60b   : > { %v8303_v0 = vpop.eup %8302  ;;  %v4552_v18 = vadd.f32 %v4551_v16, %v4463_v45 }
 0x60c   : > { %6396 = vst [vmem:[%s10058_s15 + $0x5c0] sm:$0xff] %v8303_v0  ;;  %v4287_v47 = vpop.f32.mrf.mxu2 }
 0x60d   : > { %8304 = vtanh.f32 %v4552_v18  ;;  %v4288_v58 = vadd.f32 %v4287_v47, %v10689_v56  ;;  %v4376_v5 = vpop.f32.mrf.mxu3  ;;  %4780 = vmatmul.bf16.gmra.mxu0 %v9822_v20  ;;  %v7899_v18 = vld [vmem:[%s12013_s5 + $0xd0] sm:$0xf0] }
 0x60e   : > { %v6990_v12 = vor.u32 %v7899_v18, %v6989_v46  ;;  %v7465_v46 = vld [vmem:[%s12013_s5 + $0x470] sm:$0xf] }
 0x60f   : > { %v4377_v10 = vadd.f32 %v4376_v5, %v4288_v58  ;;  %v4556_v16 = vpop.f32.mrf.mxu1  ;;  %v12175_v5 = vld [vmem:[#allocation28_spill] sm:$0xff] }
 0x610   : > { %4924 = vmatpush.bf16.msrb.mxu2 %v6990_v12 }
 0x611   : > { %v4466_v2 = vadd.f32 %v4465_v39, %v4377_v10 }
 0x612   : > { %v4467_v23 = vpop.f32.mrf.mxu0 }
 0x613   : > { %v8305_v45 = vpop.eup %8304  ;;  %v4555_v0 = vadd.f32 %v4554_v14, %v4466_v2 }
 0x614   : > { %6403 = vst [vmem:[%s10058_s15 + $0x5f8] sm:$0xff] %v8305_v45  ;;  %v4289_v40 = vpop.f32.mrf.mxu2 }
 0x615   : > { %8306 = vtanh.f32 %v4555_v0  ;;  %v4290_v47 = vadd.f32 %v4289_v40, %v10689_v56  ;;  %v4378_v11 = vpop.f32.mrf.mxu3  ;;  %v8018_v40 = vld [vmem:[%s12013_s5 + $0x488] sm:$0xf0] }
 0x616   : > { %v7466_v18 = vor.u32 %v8018_v40, %v7465_v46 }
 0x617   : > { %v4379_v39 = vadd.f32 %v4378_v11, %v4290_v47  ;;  %v4559_v58 = vpop.f32.mrf.mxu1 }
 0x618   : > { %5101 = vmatpush.bf16.msrb.mxu0 %v7466_v18 }
 0x619   : > { %v4468_v14 = vadd.f32 %v4467_v23, %v4379_v39  ;;  %4607 = vmatmul.bf16.gmra.mxu2 %v9455_v25 }
 0x61a   : > { %4696 = vmatmul.bf16.gmra.mxu3 %v9450_v9  ;;  %4874 = vmatmul.bf16.gmra.mxu1 %v12175_v5  ;;  %v4470_v29 = vpop.f32.mrf.mxu0  ;;  %v7213_v5 = vld [vmem:[%s12013_s5 + $0x278] sm:$0xf] }
 0x61b   : > { %v8307_v10 = vpop.eup %8306  ;;  %v4557_v2 = vadd.f32 %v4556_v16, %v4468_v14 }
 0x61c   : > { %6410 = vst [vmem:[%s10058_s15 + $0x630] sm:$0xff] %v8307_v10  ;;  %v4292_v45 = vpop.f32.mrf.mxu2 }
 0x61d   : > { %8308 = vtanh.f32 %v4557_v2  ;;  %v4293_v23 = vadd.f32 %v4292_v45, %v10689_v56  ;;  %v4381_v0 = vpop.f32.mrf.mxu3  ;;  %4785 = vmatmul.bf16.gmra.mxu0 %v12139_v55  ;;  %v7955_v2 = vld [vmem:[%s12013_s5 + $0x290] sm:$0xf0] }
 0x61e   : > { %v7214_v40 = vor.u32 %v7955_v2, %v7213_v5 }
 0x61f   : > { %v4382_v47 = vadd.f32 %v4381_v0, %v4293_v23  ;;  %v4561_v16 = vpop.f32.mrf.mxu1  ;;  %v8573_v0 = vld [vmem:[%s12014_s6] sm:$0xff] }
 0x620   : > { %5013 = vmatpush.bf16.msrb.mxu3 %v7214_v40  ;;  %v11014_v18 = vperm.slane %v8573_v0, 3 }
 0x621   : > { %v4471_v11 = vadd.f32 %v4470_v29, %v4382_v47 }
 0x622   : > { %v4472_v12 = vpop.f32.mrf.mxu0 }
 0x623   : > { %v8309_v39 = vpop.eup %8308  ;;  %v4560_v14 = vadd.f32 %v4559_v58, %v4471_v11 }
 0x624   : > { %6417 = vst [vmem:[%s10058_s15 + $0x668] sm:$0xff] %v8309_v39  ;;  %v4294_v10 = vpop.f32.mrf.mxu2  ;;  %v8067_v39 = vld [vmem:[%s12013_s5 + $0x610] sm:$0xf0] }
 0x625   : > { %8310 = vtanh.f32 %v4560_v14  ;;  %v4295_v45 = vadd.f32 %v4294_v10, %v10689_v56  ;;  %v4383_v46 = vpop.f32.mrf.mxu3 }
 0x627   : > { %v4384_v29 = vadd.f32 %v4383_v46, %v4295_v45  ;;  %v4840_v23 = vpop.f32.mrf.mxu1 }
 0x629   : > { %v4473_v58 = vadd.f32 %v4472_v12, %v4384_v29  ;;  %4612 = vmatmul.bf16.gmra.mxu2 %v9479_v17  ;;  %v7661_v12 = vld [vmem:[%s12013_s5 + $0x5f8] sm:$0xf] }
 0x62a   : > { %4701 = vmatmul.bf16.gmra.mxu3 %v9474_v15  ;;  %4879 = vmatmul.bf16.gmra.mxu1 %v9865_v57  ;;  %v4751_v47 = vpop.f32.mrf.mxu0  ;;  %v7662_v2 = vor.u32 %v8067_v39, %v7661_v12 }
 0x62b   : > { %v8311_v56 = vpop.eup %8310  ;;  %v4562_v11 = vadd.f32 %v4561_v16, %v4473_v58 }
 0x62c   : > { %6424 = vst [vmem:[%s10058_s15 + $0x6a0] sm:$0xff] %v8311_v56  ;;  %v4573_v5 = vpop.f32.mrf.mxu2  ;;  %5191 = vmatpush.bf16.msrb.mxu1 %v7662_v2  ;;  %v6961_v56 = vld [vmem:[%s12013_s5 + $0x80] sm:$0xf] }
 0x62d   : > { %8312 = vtanh.f32 %v4562_v11  ;;  %v4574_v14 = vadd.f32 %v4573_v5, %v11014_v18  ;;  %v4662_v10 = vpop.f32.mrf.mxu3  ;;  %4790 = vmatmul.bf16.gmra.mxu0 %v9870_v54  ;;  %v7892_v11 = vld [vmem:[%s12013_s5 + $0x98] sm:$0xf0] }
 0x62e   : > { %v6962_v39 = vor.u32 %v7892_v11, %v6961_v56 }
 0x62f   : > { %v4663_v45 = vadd.f32 %v4662_v10, %v4574_v14  ;;  %v4842_v16 = vpop.f32.mrf.mxu1 }
 0x630   : > { %4925 = vmatpush.bf16.msrb.mxu2 %v6962_v39 }
 0x631   : > { %v4752_v46 = vadd.f32 %v4751_v47, %v4663_v45 }
 0x632   : > { %v4753_v40 = vpop.f32.mrf.mxu0 }
 0x633   : > { %v8313_v29 = vpop.eup %8312  ;;  %v4841_v58 = vadd.f32 %v4840_v23, %v4752_v46 }
 0x634   : > { %6431 = vst [vmem:[%s10058_s15 + $0x6d8] sm:$0xff] %v8313_v29  ;;  %v4575_v0 = vpop.f32.mrf.mxu2  ;;  %v7437_v29 = vld [vmem:[%s12013_s5 + $0x438] sm:$0xf] }
 0x635   : > { %8314 = vtanh.f32 %v4841_v58  ;;  %v4576_v5 = vadd.f32 %v4575_v0, %v11014_v18  ;;  %v4664_v12 = vpop.f32.mrf.mxu3 }
 0x637   : > { %v4665_v47 = vadd.f32 %v4664_v12, %v4576_v5  ;;  %v4845_v14 = vpop.f32.mrf.mxu1 }
 0x639   : > { %v4754_v23 = vadd.f32 %v4753_v40, %v4665_v47  ;;  %4617 = vmatmul.bf16.gmra.mxu2 %v9503_v36  ;;  %v8011_v40 = vld [vmem:[%s12013_s5 + $0x450] sm:$0xf0] }
 0x63a   : > { %4706 = vmatmul.bf16.gmra.mxu3 %v9498_v13  ;;  %4884 = vmatmul.bf16.gmra.mxu1 %v9889_v49  ;;  %v4756_v10 = vpop.f32.mrf.mxu0  ;;  %v7438_v56 = vor.u32 %v8011_v40, %v7437_v29 }
 0x63b   : > { %v8315_v2 = vpop.eup %8314  ;;  %v4843_v45 = vadd.f32 %v4842_v16, %v4754_v23 }
 0x63c   : > { %6215 = vst [vmem:[%s10058_s15 + $0x18] sm:$0xff] %v8315_v2  ;;  %v4578_v46 = vpop.f32.mrf.mxu2  ;;  %5102 = vmatpush.bf16.msrb.mxu0 %v7438_v56  ;;  %v7185_v2 = vld [vmem:[%s12013_s5 + $0x240] sm:$0xf] }
 0x63d   : > { %8316 = vtanh.f32 %v4843_v45  ;;  %v4579_v58 = vadd.f32 %v4578_v46, %v11014_v18  ;;  %v4667_v0 = vpop.f32.mrf.mxu3  ;;  %4795 = vmatmul.bf16.gmra.mxu0 %v9894_v51  ;;  %v7948_v45 = vld [vmem:[%s12013_s5 + $0x258] sm:$0xf0] }
 0x63e   : > { %v7186_v40 = vor.u32 %v7948_v45, %v7185_v2 }
 0x63f   : > { %v4668_v11 = vadd.f32 %v4667_v0, %v4579_v58  ;;  %v4847_v16 = vpop.f32.mrf.mxu1 }
 0x640   : > { %5014 = vmatpush.bf16.msrb.mxu3 %v7186_v40 }
 0x641   : > { %v4757_v5 = vadd.f32 %v4756_v10, %v4668_v11 }
 0x642   : > { %v4758_v12 = vpop.f32.mrf.mxu0 }
 0x643   : > { %v8317_v39 = vpop.eup %8316  ;;  %v4846_v47 = vadd.f32 %v4845_v14, %v4757_v5 }
 0x644   : > { %6222 = vst [vmem:[%s10058_s15 + $0x50] sm:$0xff] %v8317_v39  ;;  %v4580_v23 = vpop.f32.mrf.mxu2  ;;  %v7633_v39 = vld [vmem:[%s12013_s5 + $0x5c0] sm:$0xf] }
 0x645   : > { %8318 = vtanh.f32 %v4846_v47  ;;  %v4581_v46 = vadd.f32 %v4580_v23, %v11014_v18  ;;  %v4669_v29 = vpop.f32.mrf.mxu3 }
 0x647   : > { %v4670_v10 = vadd.f32 %v4669_v29, %v4581_v46  ;;  %v4850_v58 = vpop.f32.mrf.mxu1 }
 0x649   : > { %v4759_v14 = vadd.f32 %v4758_v12, %v4670_v10  ;;  %4622 = vmatmul.bf16.gmra.mxu2 %v9527_v1  ;;  %v8060_v12 = vld [vmem:[%s12013_s5 + $0x5d8] sm:$0xf0] }
 0x64a   : > { %4711 = vmatmul.bf16.gmra.mxu3 %v9522_v7  ;;  %4889 = vmatmul.bf16.gmra.mxu1 %v9913_v53  ;;  %v4761_v0 = vpop.f32.mrf.mxu0  ;;  %v7634_v2 = vor.u32 %v8060_v12, %v7633_v39 }
 0x64b   : > { %v8319_v56 = vpop.eup %8318  ;;  %v4848_v11 = vadd.f32 %v4847_v16, %v4759_v14 }
 0x64c   : > { %6229 = vst [vmem:[%s10058_s15 + $0x88] sm:$0xff] %v8319_v56  ;;  %v4583_v5 = vpop.f32.mrf.mxu2  ;;  %5192 = vmatpush.bf16.msrb.mxu1 %v7634_v2  ;;  %v6933_v56 = vld [vmem:[%s12013_s5 + $0x48] sm:$0xf] }
 0x64d   : > { %8320 = vtanh.f32 %v4848_v11  ;;  %v4584_v47 = vadd.f32 %v4583_v5, %v11014_v18  ;;  %v4672_v23 = vpop.f32.mrf.mxu3  ;;  %4800 = vmatmul.bf16.gmra.mxu0 %v9918_v48  ;;  %v7885_v11 = vld [vmem:[%s12013_s5 + $0x60] sm:$0xf0] }
 0x64e   : > { %v6934_v12 = vor.u32 %v7885_v11, %v6933_v56 }
 0x64f   : > { %v4673_v45 = vadd.f32 %v4672_v23, %v4584_v47  ;;  %v4852_v16 = vpop.f32.mrf.mxu1 }
 0x650   : > { %4926 = vmatpush.bf16.msrb.mxu2 %v6934_v12 }
 0x651   : > { %v4762_v46 = vadd.f32 %v4761_v0, %v4673_v45 }
 0x652   : > { %v4763_v29 = vpop.f32.mrf.mxu0 }
 0x653   : > { %v8321_v40 = vpop.eup %8320  ;;  %v4851_v10 = vadd.f32 %v4850_v58, %v4762_v46 }
 0x654   : > { %6236 = vst [vmem:[%s10058_s15 + $0xc0] sm:$0xff] %v8321_v40  ;;  %v4585_v14 = vpop.f32.mrf.mxu2  ;;  %v7409_v40 = vld [vmem:[%s12013_s5 + $0x400] sm:$0xf] }
 0x655   : > { %8322 = vtanh.f32 %v4851_v10  ;;  %v4586_v5 = vadd.f32 %v4585_v14, %v11014_v18  ;;  %v4674_v39 = vpop.f32.mrf.mxu3 }
 0x657   : > { %v4675_v0 = vadd.f32 %v4674_v39, %v4586_v5  ;;  %v4855_v47 = vpop.f32.mrf.mxu1 }
 0x659   : > { %v4764_v58 = vadd.f32 %v4763_v29, %v4675_v0  ;;  %4627 = vmatmul.bf16.gmra.mxu2 %v9551_v31  ;;  %v8004_v29 = vld [vmem:[%s12013_s5 + $0x418] sm:$0xf0] }
 0x65a   : > { %4716 = vmatmul.bf16.gmra.mxu3 %v9546_v61  ;;  %4894 = vmatmul.bf16.gmra.mxu1 %v9937_v24  ;;  %v4766_v23 = vpop.f32.mrf.mxu0  ;;  %v7410_v56 = vor.u32 %v8004_v29, %v7409_v40 }
 0x65b   : > { %v8323_v2 = vpop.eup %8322  ;;  %v4853_v45 = vadd.f32 %v4852_v16, %v4764_v58 }
 0x65c   : > { %6243 = vst [vmem:[%s10058_s15 + $0xf8] sm:$0xff] %v8323_v2  ;;  %v4588_v46 = vpop.f32.mrf.mxu2  ;;  %5103 = vmatpush.bf16.msrb.mxu0 %v7410_v56  ;;  %v7157_v2 = vld [vmem:[%s12013_s5 + $0x208] sm:$0xf] }
 0x65d   : > { %8324 = vtanh.f32 %v4853_v45  ;;  %v4589_v10 = vadd.f32 %v4588_v46, %v11014_v18  ;;  %v4677_v14 = vpop.f32.mrf.mxu3  ;;  %4805 = vmatmul.bf16.gmra.mxu0 %v9942_v62  ;;  %v7941_v45 = vld [vmem:[%s12013_s5 + $0x220] sm:$0xf0] }
 0x65e   : > { %v7158_v29 = vor.u32 %v7941_v45, %v7157_v2 }
 0x65f   : > { %v4678_v11 = vadd.f32 %v4677_v14, %v4589_v10  ;;  %v4857_v16 = vpop.f32.mrf.mxu1 }
 0x660   : > { %5015 = vmatpush.bf16.msrb.mxu3 %v7158_v29 }
 0x661   : > { %v4767_v5 = vadd.f32 %v4766_v23, %v4678_v11 }
 0x662   : > { %v4768_v39 = vpop.f32.mrf.mxu0 }
 0x663   : > { %v8325_v12 = vpop.eup %8324  ;;  %v4856_v0 = vadd.f32 %v4855_v47, %v4767_v5 }
 0x664   : > { %6250 = vst [vmem:[%s10058_s15 + $0x130] sm:$0xff] %v8325_v12  ;;  %v4590_v58 = vpop.f32.mrf.mxu2  ;;  %v7605_v12 = vld [vmem:[%s12013_s5 + $0x588] sm:$0xf] }
 0x665   : > { %8326 = vtanh.f32 %v4856_v0  ;;  %v4591_v46 = vadd.f32 %v4590_v58, %v11014_v18  ;;  %v4679_v40 = vpop.f32.mrf.mxu3 }
 0x667   : > { %v4680_v23 = vadd.f32 %v4679_v40, %v4591_v46  ;;  %v4860_v10 = vpop.f32.mrf.mxu1 }
 0x669   : > { %v4769_v47 = vadd.f32 %v4768_v39, %v4680_v23  ;;  %4632 = vmatmul.bf16.gmra.mxu2 %v9575_v4  ;;  %v8053_v39 = vld [vmem:[%s12013_s5 + $0x5a0] sm:$0xf0] }
 0x66a   : > { %4721 = vmatmul.bf16.gmra.mxu3 %v9570_v3  ;;  %4899 = vmatmul.bf16.gmra.mxu1 %v9961_v32  ;;  %v4771_v14 = vpop.f32.mrf.mxu0  ;;  %v7606_v2 = vor.u32 %v8053_v39, %v7605_v12 }
 0x66b   : > { %v8327_v56 = vpop.eup %8326  ;;  %v4858_v11 = vadd.f32 %v4857_v16, %v4769_v47 }
 0x66c   : > { %6257 = vst [vmem:[%s10058_s15 + $0x168] sm:$0xff] %v8327_v56  ;;  %v4593_v5 = vpop.f32.mrf.mxu2  ;;  %5193 = vmatpush.bf16.msrb.mxu1 %v7606_v2  ;;  %v6905_v56 = vld [vmem:[%s12013_s5 + $0x10] sm:$0xf] }
 0x66d   : > { %8328 = vtanh.f32 %v4858_v11  ;;  %v4594_v0 = vadd.f32 %v4593_v5, %v11014_v18  ;;  %v4682_v58 = vpop.f32.mrf.mxu3  ;;  %4810 = vmatmul.bf16.gmra.mxu0 %v9966_v63  ;;  %v7878_v11 = vld [vmem:[%s12013_s5 + $0x28] sm:$0xf0] }
 0x66e   : > { %v6906_v39 = vor.u32 %v7878_v11, %v6905_v56 }
 0x66f   : > { %v4683_v45 = vadd.f32 %v4682_v58, %v4594_v0  ;;  %v4862_v16 = vpop.f32.mrf.mxu1 }
 0x670   : > { %4927 = vmatpush.bf16.msrb.mxu2 %v6906_v39 }
 0x671   : > { %v4772_v46 = vadd.f32 %v4771_v14, %v4683_v45 }
 0x672   : > { %v4773_v40 = vpop.f32.mrf.mxu0 }
 0x673   : > { %v8329_v29 = vpop.eup %8328  ;;  %v4861_v23 = vadd.f32 %v4860_v10, %v4772_v46 }
 0x674   : > { %6264 = vst [vmem:[%s10058_s15 + $0x1a0] sm:$0xff] %v8329_v29  ;;  %v4595_v47 = vpop.f32.mrf.mxu2  ;;  %v7381_v29 = vld [vmem:[%s12013_s5 + $0x3c8] sm:$0xf] }
 0x675   : > { %8330 = vtanh.f32 %v4861_v23  ;;  %v4596_v5 = vadd.f32 %v4595_v47, %v11014_v18  ;;  %v4684_v12 = vpop.f32.mrf.mxu3 }
 0x677   : > { %v4685_v14 = vadd.f32 %v4684_v12, %v4596_v5  ;;  %v4865_v0 = vpop.f32.mrf.mxu1 }
 0x679   : > { %v4774_v10 = vadd.f32 %v4773_v40, %v4685_v14  ;;  %4637 = vmatmul.bf16.gmra.mxu2 %v9599_v42  ;;  %v7997_v40 = vld [vmem:[%s12013_s5 + $0x3e0] sm:$0xf0] }
 0x67a   : > { %4726 = vmatmul.bf16.gmra.mxu3 %v9594_v60  ;;  %4904 = vmatmul.bf16.gmra.mxu1 %v9985_v38  ;;  %v4776_v58 = vpop.f32.mrf.mxu0  ;;  %v7382_v56 = vor.u32 %v7997_v40, %v7381_v29 }
 0x67b   : > { %v8331_v2 = vpop.eup %8330  ;;  %v4863_v45 = vadd.f32 %v4862_v16, %v4774_v10 }
 0x67c   : > { %6271 = vst [vmem:[%s10058_s15 + $0x1d8] sm:$0xff] %v8331_v2  ;;  %v4598_v46 = vpop.f32.mrf.mxu2  ;;  %5104 = vmatpush.bf16.msrb.mxu0 %v7382_v56  ;;  %v7129_v2 = vld [vmem:[%s12013_s5 + $0x1d0] sm:$0xf] }
 0x67d   : > { %8332 = vtanh.f32 %v4863_v45  ;;  %v4599_v23 = vadd.f32 %v4598_v46, %v11014_v18  ;;  %v4687_v47 = vpop.f32.mrf.mxu3  ;;  %4815 = vmatmul.bf16.gmra.mxu0 %v9990_v52  ;;  %v7934_v45 = vld [vmem:[%s12013_s5 + $0x1e8] sm:$0xf0] }
 0x67e   : > { %v7130_v40 = vor.u32 %v7934_v45, %v7129_v2 }
 0x67f   : > { %v4688_v11 = vadd.f32 %v4687_v47, %v4599_v23  ;;  %v4867_v16 = vpop.f32.mrf.mxu1 }
 0x680   : > { %5016 = vmatpush.bf16.msrb.mxu3 %v7130_v40 }
 0x681   : > { %v4777_v5 = vadd.f32 %v4776_v58, %v4688_v11  ;;  %v7577_v58 = vld [vmem:[%s12013_s5 + $0x550] sm:$0xf] }
 0x682   : > { %v4778_v12 = vpop.f32.mrf.mxu0  ;;  %v7353_v11 = vld [vmem:[%s12013_s5 + $0x390] sm:$0xf] }
 0x683   : > { %v8333_v39 = vpop.eup %8332  ;;  %v4866_v14 = vadd.f32 %v4865_v0, %v4777_v5  ;;  %v8046_v0 = vld [vmem:[%s12013_s5 + $0x568] sm:$0xf0] }
 0x684   : > { %6278 = vst [vmem:[%s10058_s15 + $0x210] sm:$0xff] %v8333_v39  ;;  %v4600_v10 = vpop.f32.mrf.mxu2  ;;  %v7578_v23 = vor.u32 %v8046_v0, %v7577_v58  ;;  %v7990_v5 = vld [vmem:[%s12013_s5 + $0x3a8] sm:$0xf0] }
 0x685   : > { %8334 = vtanh.f32 %v4866_v14  ;;  %v4601_v46 = vadd.f32 %v4600_v10, %v11014_v18  ;;  %v4689_v29 = vpop.f32.mrf.mxu3  ;;  %v7354_v14 = vor.u32 %v7990_v5, %v7353_v11 }
 0x686   : > { %5194 = vmatpush.bf16.msrb.mxu1 %v7578_v23 }
 0x687   : > { %v4690_v47 = vadd.f32 %v4689_v29, %v4601_v46  ;;  %v4870_v56 = vpop.f32.mrf.mxu1  ;;  %5105 = vmatpush.bf16.msrb.mxu0 %v7354_v14 }
 0x689   : > { %v4779_v39 = vadd.f32 %v4778_v12, %v4690_v47  ;;  %4642 = vmatmul.bf16.gmra.mxu2 %v9623_v22 }
 0x68a   : > { %4731 = vmatmul.bf16.gmra.mxu3 %v9618_v37  ;;  %4909 = vmatmul.bf16.gmra.mxu1 %v10003_v44  ;;  %v4781_v10 = vpop.f32.mrf.mxu0 }
 0x68b   : > { %v8335_v2 = vpop.eup %8334  ;;  %v4868_v45 = vadd.f32 %v4867_v16, %v4779_v39  ;;  %v7924_v16 = vld [vmem:[%s12013_s5 + $0x19c] sm:$0xf]  ;;  %v7103_v39 = vld [vmem:[%s12013_s5 + $0x1b4] sm:$0xf0] }
 0x68c   : > { %6285 = vst [vmem:[%s10058_s15 + $0x248] sm:$0xff] %v8335_v2  ;;  %v4603_v46 = vpop.f32.mrf.mxu2 }
 0x68d   : > { %8336 = vtanh.f32 %v4868_v45  ;;  %v4604_v29 = vadd.f32 %v4603_v46, %v11014_v18  ;;  %v4692_v40 = vpop.f32.mrf.mxu3  ;;  %4820 = vmatmul.bf16.gmra.mxu0 %v10008_v33  ;;  %v7106_v45 = vor.u32 %v7924_v16, %v7103_v39 }
 0x68f   : > { %v4693_v12 = vadd.f32 %v4692_v40, %v4604_v29  ;;  %v4872_v58 = vpop.f32.mrf.mxu1  ;;  %5276 = vmatpush.bf16.msra.mxu2 %v7106_v45 }
 0x691   : > { %v4782_v0 = vadd.f32 %v4781_v10, %v4693_v12 }
 0x692   : > { %v4783_v23 = vpop.f32.mrf.mxu0 }
 0x693   : > { %v8337_v47 = vpop.eup %8336  ;;  %v4871_v11 = vadd.f32 %v4870_v56, %v4782_v0 }
 0x694   : > { %6292 = vst [vmem:[%s10058_s15 + $0x280] sm:$0xff] %v8337_v47  ;;  %v4605_v5 = vpop.f32.mrf.mxu2 }
 0x695   : > { %8338 = vtanh.f32 %v4871_v11  ;;  %v4606_v14 = vadd.f32 %v4605_v5, %v11014_v18  ;;  %v4694_v2 = vpop.f32.mrf.mxu3 }
 0x697   : > { %v4695_v10 = vadd.f32 %v4694_v2, %v4606_v14  ;;  %v4875_v46 = vpop.f32.mrf.mxu1 }
 0x699   : > { %v4784_v56 = vadd.f32 %v4783_v23, %v4695_v10  ;;  %4647 = vmatmul.bf16.gmra.mxu2 %v9654_v41  ;;  %v7327_v10 = vld [vmem:[%s12013_s5 + $0x374] sm:$0xf0] }
 0x69a   : > { %4736 = vmatmul.bf16.gmra.mxu3 %v9647_v43  ;;  %4914 = vmatmul.bf16.gmra.mxu1 %v10030_v26  ;;  %v4786_v29 = vpop.f32.mrf.mxu0 }
 0x69b   : > { %v8339_v40 = vpop.eup %8338  ;;  %v4873_v12 = vadd.f32 %v4872_v58, %v4784_v56  ;;  %v7980_v58 = vld [vmem:[%s12013_s5 + $0x35c] sm:$0xf] }
 0x69c   : > { %6299 = vst [vmem:[%s10058_s15 + $0x2b8] sm:$0xff] %v8339_v40  ;;  %v4608_v0 = vpop.f32.mrf.mxu2 }
 0x69d   : > { %8340 = vtanh.f32 %v4873_v12  ;;  %v4609_v47 = vadd.f32 %v4608_v0, %v11014_v18  ;;  %v4697_v11 = vpop.f32.mrf.mxu3  ;;  %4825 = vmatmul.bf16.gmra.mxu0 %v10037_v34  ;;  %v7330_v12 = vor.u32 %v7980_v58, %v7327_v10 }
 0x69f   : > { %v4698_v5 = vadd.f32 %v4697_v11, %v4609_v47  ;;  %v4877_v23 = vpop.f32.mrf.mxu1  ;;  %5365 = vmatpush.bf16.msra.mxu3 %v7330_v12  ;;  %v12176_v47 = vld [vmem:[#allocation3_spill] sm:$0xff]  ;;  %v12177_v11 = vld [vmem:[#allocation2_spill] sm:$0xff] }
 0x6a1   : > { %v4787_v16 = vadd.f32 %v4786_v29, %v4698_v5  ;;  %v12178_v5 = vld [vmem:[#allocation15_spill] sm:$0xff] }
 0x6a2   : > { %v4788_v39 = vpop.f32.mrf.mxu0 }
 0x6a3   : > { %v8341_v14 = vpop.eup %8340  ;;  %v4876_v2 = vadd.f32 %v4875_v46, %v4787_v16 }
 0x6a4   : > { %6306 = vst [vmem:[%s10058_s15 + $0x2f0] sm:$0xff] %v8341_v14  ;;  %v4610_v45 = vpop.f32.mrf.mxu2 }
 0x6a5   : > { %8342 = vtanh.f32 %v4876_v2  ;;  %v4611_v56 = vadd.f32 %v4610_v45, %v11014_v18  ;;  %v4699_v40 = vpop.f32.mrf.mxu3  ;;  %v8092_v45 = vld [vmem:[%s12013_s5 + $0x6dc] sm:$0xf] }
 0x6a7   : > { %v4700_v29 = vadd.f32 %v4699_v40, %v4611_v56  ;;  %v4880_v0 = vpop.f32.mrf.mxu1 }
 0x6a9   : > { %v4789_v46 = vadd.f32 %v4788_v39, %v4700_v29  ;;  %4928 = vmatmul.bf16.vlgmr.msrb.gmra.mxu2 %v12176_v47  ;;  %v7775_v39 = vld [vmem:[%s12013_s5 + $0x6f4] sm:$0xf0] }
 0x6aa   : > { %5017 = vmatmul.bf16.vlgmr.msrb.gmra.mxu3 %v12177_v11  ;;  %5195 = vmatmul.bf16.vlgmr.msrb.gmra.mxu1 %v12178_v5  ;;  %v4791_v16 = vpop.f32.mrf.mxu0  ;;  %v7778_v56 = vor.u32 %v8092_v45, %v7775_v39  ;;  %v7917_v11 = vld [vmem:[%s12013_s5 + $0x164] sm:$0xf] }
 0x6ab   : > { %v8343_v14 = vpop.eup %8342  ;;  %v4878_v34 = vadd.f32 %v4877_v23, %v4789_v46 }
 0x6ac   : > { %6313 = vst [vmem:[%s10058_s15 + $0x328] sm:$0xff] %v8343_v14  ;;  %v4613_v2 = vpop.f32.mrf.mxu2  ;;  %5543 = vmatpush.bf16.msra.mxu1 %v7778_v56  ;;  %v12180_v56 = vld [vmem:[#allocation4_spill] sm:$0xff] }
 0x6ad   : > { %8344 = vtanh.f32 %v4878_v34  ;;  %v4614_v58 = vadd.f32 %v4613_v2, %v11014_v18  ;;  %v4702_v10 = vpop.f32.mrf.mxu3  ;;  %5106 = vmatmul.bf16.vlgmr.msrb.gmra.mxu0 %v12160_v21  ;;  %v7075_v34 = vld [vmem:[%s12013_s5 + $0x17c] sm:$0xf0] }
 0x6ae   : > { %v7078_v39 = vor.u32 %v7917_v11, %v7075_v34  ;;  %v8036_v11 = vld [vmem:[%s12013_s5 + $0x51c] sm:$0xf] }
 0x6af   : > { %v4703_v40 = vadd.f32 %v4702_v10, %v4614_v58  ;;  %v4882_v23 = vpop.f32.mrf.mxu1  ;;  %v12179_v10 = vld [vmem:[#allocation5_spill] sm:$0xff] }
 0x6b0   : > { %5277 = vmatpush.bf16.msra.mxu2 %v7078_v39 }
 0x6b1   : > { %v4792_v12 = vadd.f32 %v4791_v16, %v4703_v40  ;;  %v12181_v40 = vld [vmem:[#allocation17_spill] sm:$0xff] }
 0x6b2   : > { %v4793_v29 = vpop.f32.mrf.mxu0 }
 0x6b3   : > { %v8345_v46 = vpop.eup %8344  ;;  %v4881_v14 = vadd.f32 %v4880_v0, %v4792_v12 }
 0x6b4   : > { %6320 = vst [vmem:[%s10058_s15 + $0x360] sm:$0xff] %v8345_v46  ;;  %v4615_v5 = vpop.f32.mrf.mxu2 }
 0x6b5   : > { %8346 = vtanh.f32 %v4881_v14  ;;  %v4616_v2 = vadd.f32 %v4615_v5, %v11014_v18  ;;  %v4704_v45 = vpop.f32.mrf.mxu3  ;;  %v7551_v5 = vld [vmem:[%s12013_s5 + $0x534] sm:$0xf0] }
 0x6b7   : > { %v4705_v16 = vadd.f32 %v4704_v45, %v4616_v2  ;;  %v4885_v58 = vpop.f32.mrf.mxu1  ;;  %v7554_v2 = vor.u32 %v8036_v11, %v7551_v5 }
 0x6b9   : > { %v4794_v0 = vadd.f32 %v4793_v29, %v4705_v16  ;;  %4933 = vmatmul.bf16.gmra.mxu2 %v12179_v10  ;;  %5454 = vmatpush.bf16.msra.mxu0 %v7554_v2  ;;  %v12183_v2 = vld [vmem:[#allocation19_spill] sm:$0xff] }
 0x6ba   : > { %5022 = vmatmul.bf16.gmra.mxu3 %v12180_v56  ;;  %5200 = vmatmul.bf16.gmra.mxu1 %v12181_v40  ;;  %v4796_v12 = vpop.f32.mrf.mxu0  ;;  %v7973_v56 = vld [vmem:[%s12013_s5 + $0x324] sm:$0xf] }
 0x6bb   : > { %v8347_v46 = vpop.eup %8346  ;;  %v4883_v21 = vadd.f32 %v4882_v23, %v4794_v0 }
 0x6bc   : > { %6327 = vst [vmem:[%s10058_s15 + $0x398] sm:$0xff] %v8347_v46  ;;  %v4618_v14 = vpop.f32.mrf.mxu2 }
 0x6bd   : > { %8348 = vtanh.f32 %v4883_v21  ;;  %v4619_v29 = vadd.f32 %v4618_v14, %v11014_v18  ;;  %v4707_v34 = vpop.f32.mrf.mxu3  ;;  %5111 = vmatmul.bf16.gmra.mxu0 %v12163_v8  ;;  %v7299_v21 = vld [vmem:[%s12013_s5 + $0x33c] sm:$0xf0] }
 0x6be   : > { %v7302_v5 = vor.u32 %v7973_v56, %v7299_v21  ;;  %v8085_v56 = vld [vmem:[%s12013_s5 + $0x6a4] sm:$0xf] }
 0x6bf   : > { %v4708_v45 = vadd.f32 %v4707_v34, %v4619_v29  ;;  %v4887_v23 = vpop.f32.mrf.mxu1  ;;  %v12182_v34 = vld [vmem:[#allocation6_spill] sm:$0xff] }
 0x6c0   : > { %5366 = vmatpush.bf16.msra.mxu3 %v7302_v5 }
 0x6c1   : > { %v4797_v39 = vadd.f32 %v4796_v12, %v4708_v45 }
 0x6c2   : > { %v4798_v16 = vpop.f32.mrf.mxu0 }
 0x6c3   : > { %v8349_v0 = vpop.eup %8348  ;;  %v4886_v46 = vadd.f32 %v4885_v58, %v4797_v39 }
 0x6c4   : > { %6334 = vst [vmem:[%s10058_s15 + $0x3d0] sm:$0xff] %v8349_v0  ;;  %v4620_v40 = vpop.f32.mrf.mxu2 }
 0x6c5   : > { %8350 = vtanh.f32 %v4886_v46  ;;  %v4621_v14 = vadd.f32 %v4620_v40, %v11014_v18  ;;  %v4709_v11 = vpop.f32.mrf.mxu3  ;;  %v7747_v40 = vld [vmem:[%s12013_s5 + $0x6bc] sm:$0xf0] }
 0x6c7   : > { %v4710_v12 = vadd.f32 %v4709_v11, %v4621_v14  ;;  %v4890_v29 = vpop.f32.mrf.mxu1  ;;  %v7750_v14 = vor.u32 %v8085_v56, %v7747_v40 }
 0x6c9   : > { %v4799_v58 = vadd.f32 %v4798_v16, %v4710_v12  ;;  %4938 = vmatmul.bf16.gmra.mxu2 %v12145_v19  ;;  %5544 = vmatpush.bf16.msra.mxu1 %v7750_v14  ;;  %v12185_v14 = vld [vmem:[#allocation8_spill] sm:$0xff] }
 0x6ca   : > { %5027 = vmatmul.bf16.gmra.mxu3 %v12182_v34  ;;  %5205 = vmatmul.bf16.gmra.mxu1 %v12183_v2  ;;  %v4801_v45 = vpop.f32.mrf.mxu0  ;;  %v7910_v34 = vld [vmem:[%s12013_s5 + $0x12c] sm:$0xf] }
 0x6cb   : > { %v8351_v39 = vpop.eup %8350  ;;  %v4888_v0 = vadd.f32 %v4887_v23, %v4799_v58 }
 0x6cc   : > { %6341 = vst [vmem:[%s10058_s15 + $0x408] sm:$0xff] %v8351_v39  ;;  %v4623_v46 = vpop.f32.mrf.mxu2 }
 0x6cd   : > { %8352 = vtanh.f32 %v4888_v0  ;;  %v4624_v16 = vadd.f32 %v4623_v46, %v11014_v18  ;;  %v4712_v21 = vpop.f32.mrf.mxu3  ;;  %5116 = vmatmul.bf16.gmra.mxu0 %v12129_v50  ;;  %v7047_v0 = vld [vmem:[%s12013_s5 + $0x144] sm:$0xf0] }
 0x6ce   : > { %v7050_v40 = vor.u32 %v7910_v34, %v7047_v0  ;;  %v8029_v34 = vld [vmem:[%s12013_s5 + $0x4e4] sm:$0xf] }
 0x6cf   : > { %v4713_v11 = vadd.f32 %v4712_v21, %v4624_v16  ;;  %v4892_v23 = vpop.f32.mrf.mxu1  ;;  %v12184_v21 = vld [vmem:[#allocation9_spill] sm:$0xff] }
 0x6d0   : > { %5278 = vmatpush.bf16.msra.mxu2 %v7050_v40 }
 0x6d1   : > { %v4802_v5 = vadd.f32 %v4801_v45, %v4713_v11  ;;  %v12186_v11 = vld [vmem:[#allocation21_spill] sm:$0xff] }
 0x6d2   : > { %v4803_v12 = vpop.f32.mrf.mxu0 }
 0x6d3   : > { %v8353_v58 = vpop.eup %8352  ;;  %v4891_v39 = vadd.f32 %v4890_v29, %v4802_v5 }
 0x6d4   : > { %6348 = vst [vmem:[%s10058_s15 + $0x440] sm:$0xff] %v8353_v58  ;;  %v4625_v2 = vpop.f32.mrf.mxu2 }
 0x6d5   : > { %8354 = vtanh.f32 %v4891_v39  ;;  %v4626_v46 = vadd.f32 %v4625_v2, %v11014_v18  ;;  %v4714_v56 = vpop.f32.mrf.mxu3  ;;  %v7523_v2 = vld [vmem:[%s12013_s5 + $0x4fc] sm:$0xf0] }
 0x6d7   : > { %v4715_v45 = vadd.f32 %v4714_v56, %v4626_v46  ;;  %v4895_v16 = vpop.f32.mrf.mxu1  ;;  %v7526_v46 = vor.u32 %v8029_v34, %v7523_v2 }
 0x6d9   : > { %v4804_v29 = vadd.f32 %v4803_v12, %v4715_v45  ;;  %4943 = vmatmul.bf16.gmra.mxu2 %v12184_v21  ;;  %5455 = vmatpush.bf16.msra.mxu0 %v7526_v46  ;;  %v12188_v46 = vld [vmem:[#allocation23_spill] sm:$0xff] }
 0x6da   : > { %5032 = vmatmul.bf16.gmra.mxu3 %v12185_v14  ;;  %5210 = vmatmul.bf16.gmra.mxu1 %v12186_v11  ;;  %v4806_v5 = vpop.f32.mrf.mxu0  ;;  %v7966_v14 = vld [vmem:[%s12013_s5 + $0x2ec] sm:$0xf] }
 0x6db   : > { %v8355_v58 = vpop.eup %8354  ;;  %v4893_v50 = vadd.f32 %v4892_v23, %v4804_v29 }
 0x6dc   : > { %6355 = vst [vmem:[%s10058_s15 + $0x478] sm:$0xff] %v8355_v58  ;;  %v4628_v39 = vpop.f32.mrf.mxu2 }
 0x6dd   : > { %8356 = vtanh.f32 %v4893_v50  ;;  %v4629_v12 = vadd.f32 %v4628_v39, %v11014_v18  ;;  %v4717_v0 = vpop.f32.mrf.mxu3  ;;  %5121 = vmatmul.bf16.gmra.mxu0 %v12168_v30  ;;  %v7271_v50 = vld [vmem:[%s12013_s5 + $0x304] sm:$0xf0] }
 0x6de   : > { %v7274_v2 = vor.u32 %v7966_v14, %v7271_v50  ;;  %v8078_v14 = vld [vmem:[%s12013_s5 + $0x66c] sm:$0xf] }
 0x6df   : > { %v4718_v56 = vadd.f32 %v4717_v0, %v4629_v12  ;;  %v4897_v23 = vpop.f32.mrf.mxu1  ;;  %v12187_v0 = vld [vmem:[#allocation10_spill] sm:$0xff] }
 0x6e0   : > { %5367 = vmatpush.bf16.msra.mxu3 %v7274_v2 }
 0x6e1   : > { %v4807_v40 = vadd.f32 %v4806_v5, %v4718_v56 }
 0x6e2   : > { %v4808_v45 = vpop.f32.mrf.mxu0 }
 0x6e3   : > { %v8357_v29 = vpop.eup %8356  ;;  %v4896_v58 = vadd.f32 %v4895_v16, %v4807_v40 }
 0x6e4   : > { %6362 = vst [vmem:[%s10058_s15 + $0x4b0] sm:$0xff] %v8357_v29  ;;  %v4630_v11 = vpop.f32.mrf.mxu2 }
 0x6e5   : > { %8358 = vtanh.f32 %v4896_v58  ;;  %v4631_v39 = vadd.f32 %v4630_v11, %v11014_v18  ;;  %v4719_v34 = vpop.f32.mrf.mxu3  ;;  %v7719_v11 = vld [vmem:[%s12013_s5 + $0x684] sm:$0xf0] }
 0x6e7   : > { %v4720_v5 = vadd.f32 %v4719_v34, %v4631_v39  ;;  %v4900_v12 = vpop.f32.mrf.mxu1  ;;  %v7722_v39 = vor.u32 %v8078_v14, %v7719_v11 }
 0x6e9   : > { %v4809_v16 = vadd.f32 %v4808_v45, %v4720_v5  ;;  %4948 = vmatmul.bf16.gmra.mxu2 %v12150_v59  ;;  %5545 = vmatpush.bf16.msra.mxu1 %v7722_v39  ;;  %v12190_v39 = vld [vmem:[#allocation25_spill] sm:$0xff] }
 0x6ea   : > { %5037 = vmatmul.bf16.gmra.mxu3 %v12187_v0  ;;  %5215 = vmatmul.bf16.gmra.mxu1 %v12188_v46  ;;  %v4811_v56 = vpop.f32.mrf.mxu0  ;;  %v7903_v0 = vld [vmem:[%s12013_s5 + $0xf4] sm:$0xf] }
 0x6eb   : > { %v8359_v40 = vpop.eup %8358  ;;  %v4898_v29 = vadd.f32 %v4897_v23, %v4809_v16 }
 0x6ec   : > { %6369 = vst [vmem:[%s10058_s15 + $0x4e8] sm:$0xff] %v8359_v40  ;;  %v4633_v58 = vpop.f32.mrf.mxu2 }
 0x6ed   : > { %8360 = vtanh.f32 %v4898_v29  ;;  %v4634_v45 = vadd.f32 %v4633_v58, %v11014_v18  ;;  %v4722_v50 = vpop.f32.mrf.mxu3  ;;  %5126 = vmatmul.bf16.gmra.mxu0 %v12134_v35  ;;  %v7019_v29 = vld [vmem:[%s12013_s5 + $0x10c] sm:$0xf0] }
 0x6ee   : > { %v7022_v11 = vor.u32 %v7903_v0, %v7019_v29  ;;  %v8022_v0 = vld [vmem:[%s12013_s5 + $0x4ac] sm:$0xf] }
 0x6ef   : > { %v4723_v34 = vadd.f32 %v4722_v50, %v4634_v45  ;;  %v4902_v23 = vpop.f32.mrf.mxu1  ;;  %v12189_v50 = vld [vmem:[#allocation12_spill] sm:$0xff] }
 0x6f0   : > { %5279 = vmatpush.bf16.msra.mxu2 %v7022_v11 }
 0x6f1   : > { %v4812_v2 = vadd.f32 %v4811_v56, %v4723_v34 }
 0x6f2   : > { %v4813_v5 = vpop.f32.mrf.mxu0 }
 0x6f3   : > { %v8361_v16 = vpop.eup %8360  ;;  %v4901_v40 = vadd.f32 %v4900_v12, %v4812_v2 }
 0x6f4   : > { %6376 = vst [vmem:[%s10058_s15 + $0x520] sm:$0xff] %v8361_v16  ;;  %v4635_v46 = vpop.f32.mrf.mxu2 }
 0x6f5   : > { %8362 = vtanh.f32 %v4901_v40  ;;  %v4636_v58 = vadd.f32 %v4635_v46, %v11014_v18  ;;  %v4724_v14 = vpop.f32.mrf.mxu3  ;;  %v7495_v46 = vld [vmem:[%s12013_s5 + $0x4c4] sm:$0xf0] }
 0x6f7   : > { %v4725_v56 = vadd.f32 %v4724_v14, %v4636_v58  ;;  %v4905_v45 = vpop.f32.mrf.mxu1  ;;  %v7498_v58 = vor.u32 %v8022_v0, %v7495_v46 }
 0x6f9   : > { %v4814_v12 = vadd.f32 %v4813_v5, %v4725_v56  ;;  %4953 = vmatmul.bf16.gmra.mxu2 %v9407_v27  ;;  %5456 = vmatpush.bf16.msra.mxu0 %v7498_v58  ;;  %v12192_v58 = vld [vmem:[#allocation27_spill] sm:$0xff] }
 0x6fa   : > { %5042 = vmatmul.bf16.gmra.mxu3 %v12189_v50  ;;  %5220 = vmatmul.bf16.gmra.mxu1 %v12190_v39  ;;  %v4816_v34 = vpop.f32.mrf.mxu0  ;;  %v7959_v50 = vld [vmem:[%s12013_s5 + $0x2b4] sm:$0xf] }
 0x6fb   : > { %v8363_v2 = vpop.eup %8362  ;;  %v4903_v16 = vadd.f32 %v4902_v23, %v4814_v12 }
 0x6fc   : > { %6383 = vst [vmem:[%s10058_s15 + $0x558] sm:$0xff] %v8363_v2  ;;  %v4638_v40 = vpop.f32.mrf.mxu2 }
 0x6fd   : > { %8364 = vtanh.f32 %v4903_v16  ;;  %v4639_v5 = vadd.f32 %v4638_v40, %v11014_v18  ;;  %v4727_v29 = vpop.f32.mrf.mxu3  ;;  %5131 = vmatmul.bf16.gmra.mxu0 %v12136_v6  ;;  %v7243_v16 = vld [vmem:[%s12013_s5 + $0x2cc] sm:$0xf0] }
 0x6fe   : > { %v7246_v46 = vor.u32 %v7959_v50, %v7243_v16  ;;  %v8071_v50 = vld [vmem:[%s12013_s5 + $0x634] sm:$0xf] }
 0x6ff   : > { %v4728_v14 = vadd.f32 %v4727_v29, %v4639_v5  ;;  %v4907_v23 = vpop.f32.mrf.mxu1  ;;  %v12191_v29 = vld [vmem:[#allocation13_spill] sm:$0xff] }
 0x700   : > { %5368 = vmatpush.bf16.msra.mxu3 %v7246_v46 }
 0x701   : > { %v4817_v11 = vadd.f32 %v4816_v34, %v4728_v14 }
 0x702   : > { %v4818_v56 = vpop.f32.mrf.mxu0 }
 0x703   : > { %v8365_v12 = vpop.eup %8364  ;;  %v4906_v2 = vadd.f32 %v4905_v45, %v4817_v11 }
 0x704   : > { %6390 = vst [vmem:[%s10058_s15 + $0x590] sm:$0xff] %v8365_v12  ;;  %v4640_v39 = vpop.f32.mrf.mxu2 }
 0x705   : > { %8366 = vtanh.f32 %v4906_v2  ;;  %v4641_v40 = vadd.f32 %v4640_v39, %v11014_v18  ;;  %v4729_v0 = vpop.f32.mrf.mxu3  ;;  %v7691_v39 = vld [vmem:[%s12013_s5 + $0x64c] sm:$0xf0] }
 0x707   : > { %v4730_v34 = vadd.f32 %v4729_v0, %v4641_v40  ;;  %v4910_v5 = vpop.f32.mrf.mxu1  ;;  %v7694_v40 = vor.u32 %v8071_v50, %v7691_v39 }
 0x709   : > { %v4819_v45 = vadd.f32 %v4818_v56, %v4730_v34  ;;  %4958 = vmatmul.bf16.gmra.mxu2 %v9431_v28  ;;  %5546 = vmatpush.bf16.msra.mxu1 %v7694_v40 }
 0x70a   : > { %5047 = vmatmul.bf16.gmra.mxu3 %v12191_v29  ;;  %5225 = vmatmul.bf16.gmra.mxu1 %v12192_v58  ;;  %v4821_v14 = vpop.f32.mrf.mxu0  ;;  %v7896_v29 = vld [vmem:[%s12013_s5 + $0xbc] sm:$0xf] }
 0x70b   : > { %v8367_v11 = vpop.eup %8366  ;;  %v4908_v12 = vadd.f32 %v4907_v23, %v4819_v45 }
 0x70c   : > { %6397 = vst [vmem:[%s10058_s15 + $0x5c8] sm:$0xff] %v8367_v11  ;;  %v4643_v2 = vpop.f32.mrf.mxu2 }
 0x70d   : > { %8368 = vtanh.f32 %v4908_v12  ;;  %v4644_v56 = vadd.f32 %v4643_v2, %v11014_v18  ;;  %v4732_v16 = vpop.f32.mrf.mxu3  ;;  %5136 = vmatmul.bf16.gmra.mxu0 %v9822_v20  ;;  %v6991_v12 = vld [vmem:[%s12013_s5 + $0xd4] sm:$0xf0] }
 0x70e   : > { %v6994_v39 = vor.u32 %v7896_v29, %v6991_v12  ;;  %v8015_v29 = vld [vmem:[%s12013_s5 + $0x474] sm:$0xf] }
 0x70f   : > { %v4733_v0 = vadd.f32 %v4732_v16, %v4644_v56  ;;  %v4912_v23 = vpop.f32.mrf.mxu1  ;;  %v12193_v16 = vld [vmem:[#allocation28_spill] sm:$0xff] }
 0x710   : > { %5280 = vmatpush.bf16.msra.mxu2 %v6994_v39 }
 0x711   : > { %v4822_v46 = vadd.f32 %v4821_v14, %v4733_v0 }
 0x712   : > { %v4823_v34 = vpop.f32.mrf.mxu0 }
 0x713   : > { %v8369_v45 = vpop.eup %8368  ;;  %v4911_v11 = vadd.f32 %v4910_v5, %v4822_v46 }
 0x714   : > { %6404 = vst [vmem:[%s10058_s15 + $0x600] sm:$0xff] %v8369_v45  ;;  %v4645_v58 = vpop.f32.mrf.mxu2 }
 0x715   : > { %8370 = vtanh.f32 %v4911_v11  ;;  %v4646_v2 = vadd.f32 %v4645_v58, %v11014_v18  ;;  %v4734_v50 = vpop.f32.mrf.mxu3  ;;  %v7467_v58 = vld [vmem:[%s12013_s5 + $0x48c] sm:$0xf0] }
 0x716   : > { %v7470_v12 = vor.u32 %v8015_v29, %v7467_v58 }
 0x717   : > { %v4735_v14 = vadd.f32 %v4734_v50, %v4646_v2  ;;  %v4915_v56 = vpop.f32.mrf.mxu1 }
 0x718   : > { %5457 = vmatpush.bf16.msra.mxu0 %v7470_v12 }
 0x719   : > { %v4824_v5 = vadd.f32 %v4823_v34, %v4735_v14  ;;  %4963 = vmatmul.bf16.gmra.mxu2 %v9455_v25 }
 0x71a   : > { %5052 = vmatmul.bf16.gmra.mxu3 %v9450_v9  ;;  %5230 = vmatmul.bf16.gmra.mxu1 %v12193_v16  ;;  %v4826_v40 = vpop.f32.mrf.mxu0  ;;  %v7952_v16 = vld [vmem:[%s12013_s5 + $0x27c] sm:$0xf] }
 0x71b   : > { %v8371_v0 = vpop.eup %8370  ;;  %v4913_v46 = vadd.f32 %v4912_v23, %v4824_v5 }
 0x71c   : > { %6411 = vst [vmem:[%s10058_s15 + $0x638] sm:$0xff] %v8371_v0  ;;  %v4648_v45 = vpop.f32.mrf.mxu2 }
 0x71d   : > { %8372 = vtanh.f32 %v4913_v46  ;;  %v4649_v34 = vadd.f32 %v4648_v45, %v11014_v18  ;;  %v4737_v11 = vpop.f32.mrf.mxu3  ;;  %5141 = vmatmul.bf16.gmra.mxu0 %v12139_v55  ;;  %v7215_v46 = vld [vmem:[%s12013_s5 + $0x294] sm:$0xf0] }
 0x71e   : > { %v7218_v58 = vor.u32 %v7952_v16, %v7215_v46 }
 0x71f   : > { %v4738_v2 = vadd.f32 %v4737_v11, %v4649_v34  ;;  %v4917_v23 = vpop.f32.mrf.mxu1  ;;  %v8574_v11 = vld [vmem:[%s12014_s6] sm:$0xff] }
 0x720   : > { %5369 = vmatpush.bf16.msra.mxu3 %v7218_v58  ;;  %v11339_v12 = vperm.slane %v8574_v11, 4 }
 0x721   : > { %v4827_v50 = vadd.f32 %v4826_v40, %v4738_v2 }
 0x722   : > { %v4828_v39 = vpop.f32.mrf.mxu0 }
 0x723   : > { %v8373_v14 = vpop.eup %8372  ;;  %v4916_v5 = vadd.f32 %v4915_v56, %v4827_v50 }
 0x724   : > { %6418 = vst [vmem:[%s10058_s15 + $0x670] sm:$0xff] %v8373_v14  ;;  %v4650_v0 = vpop.f32.mrf.mxu2  ;;  %v7663_v14 = vld [vmem:[%s12013_s5 + $0x614] sm:$0xf0] }
 0x725   : > { %8374 = vtanh.f32 %v4916_v5  ;;  %v4651_v45 = vadd.f32 %v4650_v0, %v11014_v18  ;;  %v4739_v29 = vpop.f32.mrf.mxu3 }
 0x727   : > { %v4740_v40 = vadd.f32 %v4739_v29, %v4651_v45  ;;  %v5196_v34 = vpop.f32.mrf.mxu1 }
 0x729   : > { %v4829_v56 = vadd.f32 %v4828_v39, %v4740_v40  ;;  %4968 = vmatmul.bf16.gmra.mxu2 %v9479_v17  ;;  %v8064_v39 = vld [vmem:[%s12013_s5 + $0x5fc] sm:$0xf] }
 0x72a   : > { %5057 = vmatmul.bf16.gmra.mxu3 %v9474_v15  ;;  %5235 = vmatmul.bf16.gmra.mxu1 %v9865_v57  ;;  %v5107_v2 = vpop.f32.mrf.mxu0  ;;  %v7666_v46 = vor.u32 %v8064_v39, %v7663_v14 }
 0x72b   : > { %v8375_v18 = vpop.eup %8374  ;;  %v4918_v50 = vadd.f32 %v4917_v23, %v4829_v56 }
 0x72c   : > { %6425 = vst [vmem:[%s10058_s15 + $0x6a8] sm:$0xff] %v8375_v18  ;;  %v4929_v16 = vpop.f32.mrf.mxu2  ;;  %5547 = vmatpush.bf16.msra.mxu1 %v7666_v46  ;;  %v7889_v18 = vld [vmem:[%s12013_s5 + $0x84] sm:$0xf] }
 0x72d   : > { %8376 = vtanh.f32 %v4918_v50  ;;  %v4930_v5 = vadd.f32 %v4929_v16, %v11339_v12  ;;  %v5018_v0 = vpop.f32.mrf.mxu3  ;;  %5146 = vmatmul.bf16.gmra.mxu0 %v9870_v54  ;;  %v6963_v50 = vld [vmem:[%s12013_s5 + $0x9c] sm:$0xf0] }
 0x72e   : > { %v6966_v14 = vor.u32 %v7889_v18, %v6963_v50 }
 0x72f   : > { %v5019_v45 = vadd.f32 %v5018_v0, %v4930_v5  ;;  %v5198_v23 = vpop.f32.mrf.mxu1 }
 0x730   : > { %5281 = vmatpush.bf16.msra.mxu2 %v6966_v14 }
 0x731   : > { %v5108_v29 = vadd.f32 %v5107_v2, %v5019_v45 }
 0x732   : > { %v5109_v58 = vpop.f32.mrf.mxu0 }
 0x733   : > { %v8377_v40 = vpop.eup %8376  ;;  %v5197_v56 = vadd.f32 %v5196_v34, %v5108_v29 }
 0x734   : > { %6432 = vst [vmem:[%s10058_s15 + $0x6e0] sm:$0xff] %v8377_v40  ;;  %v4931_v11 = vpop.f32.mrf.mxu2  ;;  %v8008_v40 = vld [vmem:[%s12013_s5 + $0x43c] sm:$0xf] }
 0x735   : > { %8378 = vtanh.f32 %v5197_v56  ;;  %v4932_v16 = vadd.f32 %v4931_v11, %v11339_v12  ;;  %v5020_v39 = vpop.f32.mrf.mxu3 }
 0x737   : > { %v5021_v2 = vadd.f32 %v5020_v39, %v4932_v16  ;;  %v5201_v5 = vpop.f32.mrf.mxu1 }
 0x739   : > { %v5110_v34 = vadd.f32 %v5109_v58, %v5021_v2  ;;  %4973 = vmatmul.bf16.gmra.mxu2 %v9503_v36  ;;  %v7439_v58 = vld [vmem:[%s12013_s5 + $0x454] sm:$0xf0] }
 0x73a   : > { %5062 = vmatmul.bf16.gmra.mxu3 %v9498_v13  ;;  %5240 = vmatmul.bf16.gmra.mxu1 %v9889_v49  ;;  %v5112_v0 = vpop.f32.mrf.mxu0  ;;  %v7442_v18 = vor.u32 %v8008_v40, %v7439_v58 }
 0x73b   : > { %v8379_v46 = vpop.eup %8378  ;;  %v5199_v45 = vadd.f32 %v5198_v23, %v5110_v34 }
 0x73c   : > { %6216 = vst [vmem:[%s10058_s15 + $0x20] sm:$0xff] %v8379_v46  ;;  %v4934_v29 = vpop.f32.mrf.mxu2  ;;  %5458 = vmatpush.bf16.msra.mxu0 %v7442_v18  ;;  %v7945_v46 = vld [vmem:[%s12013_s5 + $0x244] sm:$0xf] }
 0x73d   : > { %8380 = vtanh.f32 %v5199_v45  ;;  %v4935_v56 = vadd.f32 %v4934_v29, %v11339_v12  ;;  %v5023_v11 = vpop.f32.mrf.mxu3  ;;  %5151 = vmatmul.bf16.gmra.mxu0 %v9894_v51  ;;  %v7187_v45 = vld [vmem:[%s12013_s5 + $0x25c] sm:$0xf0] }
 0x73e   : > { %v7190_v58 = vor.u32 %v7945_v46, %v7187_v45 }
 0x73f   : > { %v5024_v50 = vadd.f32 %v5023_v11, %v4935_v56  ;;  %v5203_v23 = vpop.f32.mrf.mxu1 }
 0x740   : > { %5370 = vmatpush.bf16.msra.mxu3 %v7190_v58 }
 0x741   : > { %v5113_v16 = vadd.f32 %v5112_v0, %v5024_v50 }
 0x742   : > { %v5114_v39 = vpop.f32.mrf.mxu0 }
 0x743   : > { %v8381_v14 = vpop.eup %8380  ;;  %v5202_v2 = vadd.f32 %v5201_v5, %v5113_v16 }
 0x744   : > { %6223 = vst [vmem:[%s10058_s15 + $0x58] sm:$0xff] %v8381_v14  ;;  %v4936_v34 = vpop.f32.mrf.mxu2  ;;  %v8057_v14 = vld [vmem:[%s12013_s5 + $0x5c4] sm:$0xf] }
 0x745   : > { %8382 = vtanh.f32 %v5202_v2  ;;  %v4937_v29 = vadd.f32 %v4936_v34, %v11339_v12  ;;  %v5025_v40 = vpop.f32.mrf.mxu3 }
 0x747   : > { %v5026_v0 = vadd.f32 %v5025_v40, %v4937_v29  ;;  %v5206_v56 = vpop.f32.mrf.mxu1 }
 0x749   : > { %v5115_v5 = vadd.f32 %v5114_v39, %v5026_v0  ;;  %4978 = vmatmul.bf16.gmra.mxu2 %v9527_v1  ;;  %v7635_v39 = vld [vmem:[%s12013_s5 + $0x5dc] sm:$0xf0] }
 0x74a   : > { %5067 = vmatmul.bf16.gmra.mxu3 %v9522_v7  ;;  %5245 = vmatmul.bf16.gmra.mxu1 %v9913_v53  ;;  %v5117_v11 = vpop.f32.mrf.mxu0  ;;  %v7638_v46 = vor.u32 %v8057_v14, %v7635_v39 }
 0x74b   : > { %v8383_v18 = vpop.eup %8382  ;;  %v5204_v50 = vadd.f32 %v5203_v23, %v5115_v5 }
 0x74c   : > { %6230 = vst [vmem:[%s10058_s15 + $0x90] sm:$0xff] %v8383_v18  ;;  %v4939_v16 = vpop.f32.mrf.mxu2  ;;  %5548 = vmatpush.bf16.msra.mxu1 %v7638_v46  ;;  %v7882_v18 = vld [vmem:[%s12013_s5 + $0x4c] sm:$0xf] }
 0x74d   : > { %8384 = vtanh.f32 %v5204_v50  ;;  %v4940_v2 = vadd.f32 %v4939_v16, %v11339_v12  ;;  %v5028_v34 = vpop.f32.mrf.mxu3  ;;  %5156 = vmatmul.bf16.gmra.mxu0 %v9918_v48  ;;  %v6935_v50 = vld [vmem:[%s12013_s5 + $0x64] sm:$0xf0] }
 0x74e   : > { %v6938_v39 = vor.u32 %v7882_v18, %v6935_v50 }
 0x74f   : > { %v5029_v45 = vadd.f32 %v5028_v34, %v4940_v2  ;;  %v5208_v23 = vpop.f32.mrf.mxu1 }
 0x750   : > { %5282 = vmatpush.bf16.msra.mxu2 %v6938_v39 }
 0x751   : > { %v5118_v29 = vadd.f32 %v5117_v11, %v5029_v45 }
 0x752   : > { %v5119_v40 = vpop.f32.mrf.mxu0 }
 0x753   : > { %v8385_v58 = vpop.eup %8384  ;;  %v5207_v0 = vadd.f32 %v5206_v56, %v5118_v29 }
 0x754   : > { %6237 = vst [vmem:[%s10058_s15 + $0xc8] sm:$0xff] %v8385_v58  ;;  %v4941_v5 = vpop.f32.mrf.mxu2  ;;  %v8001_v58 = vld [vmem:[%s12013_s5 + $0x404] sm:$0xf] }
 0x755   : > { %8386 = vtanh.f32 %v5207_v0  ;;  %v4942_v16 = vadd.f32 %v4941_v5, %v11339_v12  ;;  %v5030_v14 = vpop.f32.mrf.mxu3 }
 0x757   : > { %v5031_v11 = vadd.f32 %v5030_v14, %v4942_v16  ;;  %v5211_v2 = vpop.f32.mrf.mxu1 }
 0x759   : > { %v5120_v56 = vadd.f32 %v5119_v40, %v5031_v11  ;;  %4983 = vmatmul.bf16.gmra.mxu2 %v9551_v31  ;;  %v7411_v40 = vld [vmem:[%s12013_s5 + $0x41c] sm:$0xf0] }
 0x75a   : > { %5072 = vmatmul.bf16.gmra.mxu3 %v9546_v61  ;;  %5250 = vmatmul.bf16.gmra.mxu1 %v9937_v24  ;;  %v5122_v34 = vpop.f32.mrf.mxu0  ;;  %v7414_v18 = vor.u32 %v8001_v58, %v7411_v40 }
 0x75b   : > { %v8387_v46 = vpop.eup %8386  ;;  %v5209_v45 = vadd.f32 %v5208_v23, %v5120_v56 }
 0x75c   : > { %6244 = vst [vmem:[%s10058_s15 + $0x100] sm:$0xff] %v8387_v46  ;;  %v4944_v29 = vpop.f32.mrf.mxu2  ;;  %5459 = vmatpush.bf16.msra.mxu0 %v7414_v18  ;;  %v7938_v46 = vld [vmem:[%s12013_s5 + $0x20c] sm:$0xf] }
 0x75d   : > { %8388 = vtanh.f32 %v5209_v45  ;;  %v4945_v0 = vadd.f32 %v4944_v29, %v11339_v12  ;;  %v5033_v5 = vpop.f32.mrf.mxu3  ;;  %5161 = vmatmul.bf16.gmra.mxu0 %v9942_v62  ;;  %v7159_v45 = vld [vmem:[%s12013_s5 + $0x224] sm:$0xf0] }
 0x75e   : > { %v7162_v40 = vor.u32 %v7938_v46, %v7159_v45 }
 0x75f   : > { %v5034_v50 = vadd.f32 %v5033_v5, %v4945_v0  ;;  %v5213_v23 = vpop.f32.mrf.mxu1 }
 0x760   : > { %5371 = vmatpush.bf16.msra.mxu3 %v7162_v40 }
 0x761   : > { %v5123_v16 = vadd.f32 %v5122_v34, %v5034_v50 }
 0x762   : > { %v5124_v14 = vpop.f32.mrf.mxu0 }
 0x763   : > { %v8389_v39 = vpop.eup %8388  ;;  %v5212_v11 = vadd.f32 %v5211_v2, %v5123_v16 }
 0x764   : > { %6251 = vst [vmem:[%s10058_s15 + $0x138] sm:$0xff] %v8389_v39  ;;  %v4946_v56 = vpop.f32.mrf.mxu2  ;;  %v8050_v39 = vld [vmem:[%s12013_s5 + $0x58c] sm:$0xf] }
 0x765   : > { %8390 = vtanh.f32 %v5212_v11  ;;  %v4947_v29 = vadd.f32 %v4946_v56, %v11339_v12  ;;  %v5035_v58 = vpop.f32.mrf.mxu3 }
 0x767   : > { %v5036_v34 = vadd.f32 %v5035_v58, %v4947_v29  ;;  %v5216_v0 = vpop.f32.mrf.mxu1 }
 0x769   : > { %v5125_v2 = vadd.f32 %v5124_v14, %v5036_v34  ;;  %4988 = vmatmul.bf16.gmra.mxu2 %v9575_v4  ;;  %v7607_v14 = vld [vmem:[%s12013_s5 + $0x5a4] sm:$0xf0] }
 0x76a   : > { %5077 = vmatmul.bf16.gmra.mxu3 %v9570_v3  ;;  %5255 = vmatmul.bf16.gmra.mxu1 %v9961_v32  ;;  %v5127_v5 = vpop.f32.mrf.mxu0  ;;  %v7610_v46 = vor.u32 %v8050_v39, %v7607_v14 }
 0x76b   : > { %v8391_v18 = vpop.eup %8390  ;;  %v5214_v50 = vadd.f32 %v5213_v23, %v5125_v2 }
 0x76c   : > { %6258 = vst [vmem:[%s10058_s15 + $0x170] sm:$0xff] %v8391_v18  ;;  %v4949_v16 = vpop.f32.mrf.mxu2  ;;  %5549 = vmatpush.bf16.msra.mxu1 %v7610_v46  ;;  %v7875_v18 = vld [vmem:[%s12013_s5 + $0x14] sm:$0xf] }
 0x76d   : > { %8392 = vtanh.f32 %v5214_v50  ;;  %v4950_v11 = vadd.f32 %v4949_v16, %v11339_v12  ;;  %v5038_v56 = vpop.f32.mrf.mxu3  ;;  %5166 = vmatmul.bf16.gmra.mxu0 %v9966_v63  ;;  %v6907_v50 = vld [vmem:[%s12013_s5 + $0x2c] sm:$0xf0] }
 0x76e   : > { %v6910_v14 = vor.u32 %v7875_v18, %v6907_v50 }
 0x76f   : > { %v5039_v45 = vadd.f32 %v5038_v56, %v4950_v11  ;;  %v5218_v23 = vpop.f32.mrf.mxu1 }
 0x770   : > { %5283 = vmatpush.bf16.msra.mxu2 %v6910_v14 }
 0x771   : > { %v5128_v29 = vadd.f32 %v5127_v5, %v5039_v45 }
 0x772   : > { %v5129_v58 = vpop.f32.mrf.mxu0 }
 0x773   : > { %v8393_v40 = vpop.eup %8392  ;;  %v5217_v34 = vadd.f32 %v5216_v0, %v5128_v29 }
 0x774   : > { %6265 = vst [vmem:[%s10058_s15 + $0x1a8] sm:$0xff] %v8393_v40  ;;  %v4951_v2 = vpop.f32.mrf.mxu2  ;;  %v7994_v40 = vld [vmem:[%s12013_s5 + $0x3cc] sm:$0xf] }
 0x775   : > { %8394 = vtanh.f32 %v5217_v34  ;;  %v4952_v16 = vadd.f32 %v4951_v2, %v11339_v12  ;;  %v5040_v39 = vpop.f32.mrf.mxu3 }
 0x777   : > { %v5041_v5 = vadd.f32 %v5040_v39, %v4952_v16  ;;  %v5221_v11 = vpop.f32.mrf.mxu1 }
 0x779   : > { %v5130_v0 = vadd.f32 %v5129_v58, %v5041_v5  ;;  %4993 = vmatmul.bf16.gmra.mxu2 %v9599_v42  ;;  %v7383_v58 = vld [vmem:[%s12013_s5 + $0x3e4] sm:$0xf0] }
 0x77a   : > { %5082 = vmatmul.bf16.gmra.mxu3 %v9594_v60  ;;  %5260 = vmatmul.bf16.gmra.mxu1 %v9985_v38  ;;  %v5132_v56 = vpop.f32.mrf.mxu0  ;;  %v7386_v18 = vor.u32 %v7994_v40, %v7383_v58 }
 0x77b   : > { %v8395_v46 = vpop.eup %8394  ;;  %v5219_v45 = vadd.f32 %v5218_v23, %v5130_v0 }
 0x77c   : > { %6272 = vst [vmem:[%s10058_s15 + $0x1e0] sm:$0xff] %v8395_v46  ;;  %v4954_v29 = vpop.f32.mrf.mxu2  ;;  %5460 = vmatpush.bf16.msra.mxu0 %v7386_v18  ;;  %v7931_v46 = vld [vmem:[%s12013_s5 + $0x1d4] sm:$0xf] }
 0x77d   : > { %8396 = vtanh.f32 %v5219_v45  ;;  %v4955_v34 = vadd.f32 %v4954_v29, %v11339_v12  ;;  %v5043_v2 = vpop.f32.mrf.mxu3  ;;  %5171 = vmatmul.bf16.gmra.mxu0 %v9990_v52  ;;  %v7131_v45 = vld [vmem:[%s12013_s5 + $0x1ec] sm:$0xf0] }
 0x77e   : > { %v7134_v58 = vor.u32 %v7931_v46, %v7131_v45 }
 0x77f   : > { %v5044_v50 = vadd.f32 %v5043_v2, %v4955_v34  ;;  %v5223_v23 = vpop.f32.mrf.mxu1 }
 0x780   : > { %5372 = vmatpush.bf16.msra.mxu3 %v7134_v58 }
 0x781   : > { %v5133_v16 = vadd.f32 %v5132_v56, %v5044_v50  ;;  %v8043_v56 = vld [vmem:[%s12013_s5 + $0x554] sm:$0xf] }
 0x782   : > { %v5134_v39 = vpop.f32.mrf.mxu0  ;;  %v7987_v50 = vld [vmem:[%s12013_s5 + $0x394] sm:$0xf] }
 0x783   : > { %v8397_v14 = vpop.eup %8396  ;;  %v5222_v5 = vadd.f32 %v5221_v11, %v5133_v16  ;;  %v7579_v11 = vld [vmem:[%s12013_s5 + $0x56c] sm:$0xf0] }
 0x784   : > { %6279 = vst [vmem:[%s10058_s15 + $0x218] sm:$0xff] %v8397_v14  ;;  %v4956_v0 = vpop.f32.mrf.mxu2  ;;  %v7582_v34 = vor.u32 %v8043_v56, %v7579_v11  ;;  %v7355_v16 = vld [vmem:[%s12013_s5 + $0x3ac] sm:$0xf0] }
 0x785   : > { %8398 = vtanh.f32 %v5222_v5  ;;  %v4957_v29 = vadd.f32 %v4956_v0, %v11339_v12  ;;  %v5045_v40 = vpop.f32.mrf.mxu3  ;;  %v7358_v5 = vor.u32 %v7987_v50, %v7355_v16 }
 0x786   : > { %5550 = vmatpush.bf16.msra.mxu1 %v7582_v34 }
 0x787   : > { %v5046_v2 = vadd.f32 %v5045_v40, %v4957_v29  ;;  %v5226_v18 = vpop.f32.mrf.mxu1  ;;  %5461 = vmatpush.bf16.msra.mxu0 %v7358_v5 }
 0x789   : > { %v5135_v14 = vadd.f32 %v5134_v39, %v5046_v2  ;;  %4998 = vmatmul.bf16.gmra.mxu2 %v9623_v22 }
 0x78a   : > { %5087 = vmatmul.bf16.gmra.mxu3 %v9618_v37  ;;  %5265 = vmatmul.bf16.gmra.mxu1 %v10003_v44  ;;  %v5137_v0 = vpop.f32.mrf.mxu0 }
 0x78b   : > { %v8399_v46 = vpop.eup %8398  ;;  %v5224_v45 = vadd.f32 %v5223_v23, %v5135_v14  ;;  %v7109_v23 = vld [vmem:[%s12013_s5 + $0x1a0] sm:$0xf]  ;;  %v7928_v14 = vld [vmem:[%s12013_s5 + $0x1b8] sm:$0xf0] }
 0x78c   : > { %6286 = vst [vmem:[%s10058_s15 + $0x250] sm:$0xff] %v8399_v46  ;;  %v4959_v29 = vpop.f32.mrf.mxu2 }
 0x78d   : > { %8400 = vtanh.f32 %v5224_v45  ;;  %v4960_v40 = vadd.f32 %v4959_v29, %v11339_v12  ;;  %v5048_v58 = vpop.f32.mrf.mxu3  ;;  %5176 = vmatmul.bf16.gmra.mxu0 %v10008_v33  ;;  %v7110_v45 = vor.u32 %v7928_v14, %v7109_v23 }
 0x78f   : > { %v5049_v39 = vadd.f32 %v5048_v58, %v4960_v40  ;;  %v5228_v56 = vpop.f32.mrf.mxu1  ;;  %5632 = vmatpush.bf16.msrb.mxu2 %v7110_v45 }
 0x791   : > { %v5138_v11 = vadd.f32 %v5137_v0, %v5049_v39 }
 0x792   : > { %v5139_v34 = vpop.f32.mrf.mxu0 }
 0x793   : > { %v8401_v2 = vpop.eup %8400  ;;  %v5227_v50 = vadd.f32 %v5226_v18, %v5138_v11 }
 0x794   : > { %6293 = vst [vmem:[%s10058_s15 + $0x288] sm:$0xff] %v8401_v2  ;;  %v4961_v16 = vpop.f32.mrf.mxu2 }
 0x795   : > { %8402 = vtanh.f32 %v5227_v50  ;;  %v4962_v5 = vadd.f32 %v4961_v16, %v11339_v12  ;;  %v5050_v46 = vpop.f32.mrf.mxu3  ;;  %v12194_v16 = vld [vmem:[#allocation33_spill] sm:$0xff] }
 0x797   : > { %v5051_v0 = vadd.f32 %v5050_v46, %v4962_v5  ;;  %v5231_v29 = vpop.f32.mrf.mxu1 }
 0x799   : > { %v5140_v18 = vadd.f32 %v5139_v34, %v5051_v0  ;;  %5003 = vmatmul.bf16.gmra.mxu2 %v9654_v41 }
 0x79a   : > { %5092 = vmatmul.bf16.gmra.mxu3 %v9647_v43  ;;  %5270 = vmatmul.bf16.gmra.mxu1 %v10030_v26  ;;  %v5142_v40 = vpop.f32.mrf.mxu0 }
 0x79b   : > { %v8403_v58 = vpop.eup %8402  ;;  %v5229_v39 = vadd.f32 %v5228_v56, %v5140_v18  ;;  %v7333_v56 = vld [vmem:[%s12013_s5 + $0x360] sm:$0xf]  ;;  %v7984_v18 = vld [vmem:[%s12013_s5 + $0x378] sm:$0xf0] }
 0x79c   : > { %6300 = vst [vmem:[%s10058_s15 + $0x2c0] sm:$0xff] %v8403_v58  ;;  %v4964_v11 = vpop.f32.mrf.mxu2 }
 0x79d   : > { %8404 = vtanh.f32 %v5229_v39  ;;  %v4965_v2 = vadd.f32 %v4964_v11, %v11339_v12  ;;  %v5053_v50 = vpop.f32.mrf.mxu3  ;;  %5181 = vmatmul.bf16.gmra.mxu0 %v12194_v16  ;;  %v7334_v11 = vor.u32 %v7984_v18, %v7333_v56 }
 0x79f   : > { %v5054_v23 = vadd.f32 %v5053_v50, %v4965_v2  ;;  %v5233_v34 = vpop.f32.mrf.mxu1  ;;  %5721 = vmatpush.bf16.msrb.mxu3 %v7334_v11  ;;  %v12195_v50 = vld [vmem:[#allocation2_spill] sm:$0xff] }
 0x7a1   : > { %v5143_v14 = vadd.f32 %v5142_v40, %v5054_v23  ;;  %v12196_v23 = vld [vmem:[#allocation15_spill] sm:$0xff] }
 0x7a2   : > { %v5144_v5 = vpop.f32.mrf.mxu0 }
 0x7a3   : > { %v8405_v46 = vpop.eup %8404  ;;  %v5232_v45 = vadd.f32 %v5231_v29, %v5143_v14 }
 0x7a4   : > { %6307 = vst [vmem:[%s10058_s15 + $0x2f8] sm:$0xff] %v8405_v46  ;;  %v4966_v0 = vpop.f32.mrf.mxu2 }
 0x7a5   : > { %8406 = vtanh.f32 %v5232_v45  ;;  %v4967_v58 = vadd.f32 %v4966_v0, %v11339_v12  ;;  %v5055_v39 = vpop.f32.mrf.mxu3  ;;  %v7781_v0 = vld [vmem:[%s12013_s5 + $0x6e0] sm:$0xf] }
 0x7a7   : > { %v5056_v40 = vadd.f32 %v5055_v39, %v4967_v58  ;;  %v5236_v2 = vpop.f32.mrf.mxu1  ;;  %v12197_v58 = vld [vmem:[#allocation16_spill] sm:$0xff] }
 0x7a9   : > { %v5145_v29 = vadd.f32 %v5144_v5, %v5056_v40  ;;  %5284 = vmatmul.bf16.vlgmr.msra.gmra.mxu2 %v12176_v47  ;;  %v8096_v5 = vld [vmem:[%s12013_s5 + $0x6f8] sm:$0xf0]  ;;  %v7081_v47 = vld [vmem:[%s12013_s5 + $0x168] sm:$0xf] }
 0x7aa   : > { %5373 = vmatmul.bf16.vlgmr.msra.gmra.mxu3 %v12195_v50  ;;  %5551 = vmatmul.bf16.vlgmr.msra.gmra.mxu1 %v12196_v23  ;;  %v5147_v14 = vpop.f32.mrf.mxu0  ;;  %v7782_v39 = vor.u32 %v8096_v5, %v7781_v0 }
 0x7ab   : > { %v8407_v46 = vpop.eup %8406  ;;  %v5234_v16 = vadd.f32 %v5233_v34, %v5145_v29 }
 0x7ac   : > { %6314 = vst [vmem:[%s10058_s15 + $0x330] sm:$0xff] %v8407_v46  ;;  %v4969_v45 = vpop.f32.mrf.mxu2  ;;  %5899 = vmatpush.bf16.msrb.mxu1 %v7782_v39  ;;  %v12199_v39 = vld [vmem:[#allocation17_spill] sm:$0xff] }
 0x7ad   : > { %8408 = vtanh.f32 %v5234_v16  ;;  %v4970_v56 = vadd.f32 %v4969_v45, %v11339_v12  ;;  %v5058_v18 = vpop.f32.mrf.mxu3  ;;  %5462 = vmatmul.bf16.vlgmr.msra.gmra.mxu0 %v12197_v58  ;;  %v7921_v16 = vld [vmem:[%s12013_s5 + $0x180] sm:$0xf0] }
 0x7ae   : > { %v7082_v5 = vor.u32 %v7921_v16, %v7081_v47  ;;  %v7557_v47 = vld [vmem:[%s12013_s5 + $0x520] sm:$0xf] }
 0x7af   : > { %v5059_v11 = vadd.f32 %v5058_v18, %v4970_v56  ;;  %v5238_v34 = vpop.f32.mrf.mxu1  ;;  %v12198_v18 = vld [vmem:[#allocation4_spill] sm:$0xff] }
 0x7b0   : > { %5633 = vmatpush.bf16.msrb.mxu2 %v7082_v5 }
 0x7b1   : > { %v5148_v40 = vadd.f32 %v5147_v14, %v5059_v11 }
 0x7b2   : > { %v5149_v29 = vpop.f32.mrf.mxu0 }
 0x7b3   : > { %v8409_v46 = vpop.eup %8408  ;;  %v5237_v23 = vadd.f32 %v5236_v2, %v5148_v40 }
 0x7b4   : > { %6321 = vst [vmem:[%s10058_s15 + $0x368] sm:$0xff] %v8409_v46  ;;  %v4971_v50 = vpop.f32.mrf.mxu2 }
 0x7b5   : > { %8410 = vtanh.f32 %v5237_v23  ;;  %v4972_v45 = vadd.f32 %v4971_v50, %v11339_v12  ;;  %v5060_v0 = vpop.f32.mrf.mxu3  ;;  %v8040_v50 = vld [vmem:[%s12013_s5 + $0x538] sm:$0xf0] }
 0x7b7   : > { %v5061_v14 = vadd.f32 %v5060_v0, %v4972_v45  ;;  %v5241_v56 = vpop.f32.mrf.mxu1  ;;  %v11532_v45 = vor.u32 %v8040_v50, %v7557_v47 }
 0x7b9   : > { %v5150_v2 = vadd.f32 %v5149_v29, %v5061_v14  ;;  %5289 = vmatmul.bf16.gmra.mxu2 %v12179_v10  ;;  %5810 = vmatpush.bf16.msrb.mxu0 %v11532_v45 }
 0x7ba   : > { %5378 = vmatmul.bf16.gmra.mxu3 %v12198_v18  ;;  %5556 = vmatmul.bf16.gmra.mxu1 %v12199_v39  ;;  %v5152_v11 = vpop.f32.mrf.mxu0 }
 0x7bb   : > { %v8411_v40 = vpop.eup %8410  ;;  %v5239_v46 = vadd.f32 %v5238_v34, %v5150_v2 }
 0x7bc   : > { %6328 = vst [vmem:[%s10058_s15 + $0x3a0] sm:$0xff] %v8411_v40  ;;  %v4974_v23 = vpop.f32.mrf.mxu2 }
 0x7bd   : > { %8412 = vtanh.f32 %v5239_v46  ;;  %v4975_v29 = vadd.f32 %v4974_v23, %v11339_v12  ;;  %v5063_v16 = vpop.f32.mrf.mxu3  ;;  %5467 = vmatmul.bf16.gmra.mxu0 %v12163_v8  ;;  %v7305_v46 = vld [vmem:[%s12013_s5 + $0x328] sm:$0xf]  ;;  %v7977_v23 = vld [vmem:[%s12013_s5 + $0x340] sm:$0xf0] }
 0x7bf   : > { %v5064_v34 = vadd.f32 %v5063_v16, %v4975_v29  ;;  %v5243_v0 = vpop.f32.mrf.mxu1  ;;  %v7306_v29 = vor.u32 %v7977_v23, %v7305_v46 }
 0x7c1   : > { %v5153_v5 = vadd.f32 %v5152_v11, %v5064_v34  ;;  %5722 = vmatpush.bf16.msrb.mxu3 %v7306_v29  ;;  %v12200_v34 = vld [vmem:[#allocation6_spill] sm:$0xff] }
 0x7c2   : > { %v5154_v14 = vpop.f32.mrf.mxu0 }
 0x7c3   : > { %v8413_v2 = vpop.eup %8412  ;;  %v5242_v40 = vadd.f32 %v5241_v56, %v5153_v5  ;;  %v12201_v5 = vld [vmem:[#allocation19_spill] sm:$0xff] }
 0x7c4   : > { %6335 = vst [vmem:[%s10058_s15 + $0x3d8] sm:$0xff] %v8413_v2  ;;  %v4976_v39 = vpop.f32.mrf.mxu2 }
 0x7c5   : > { %8414 = vtanh.f32 %v5242_v40  ;;  %v4977_v47 = vadd.f32 %v4976_v39, %v11339_v12  ;;  %v5065_v50 = vpop.f32.mrf.mxu3  ;;  %v7753_v39 = vld [vmem:[%s12013_s5 + $0x6a8] sm:$0xf] }
 0x7c7   : > { %v5066_v11 = vadd.f32 %v5065_v50, %v4977_v47  ;;  %v5246_v16 = vpop.f32.mrf.mxu1  ;;  %v12202_v47 = vld [vmem:[#allocation20_spill] sm:$0xff] }
 0x7c9   : > { %v5155_v56 = vadd.f32 %v5154_v14, %v5066_v11  ;;  %5294 = vmatmul.bf16.gmra.mxu2 %v12145_v19  ;;  %v8089_v14 = vld [vmem:[%s12013_s5 + $0x6c0] sm:$0xf0]  ;;  %v7053_v19 = vld [vmem:[%s12013_s5 + $0x130] sm:$0xf] }
 0x7ca   : > { %5383 = vmatmul.bf16.gmra.mxu3 %v12200_v34  ;;  %5561 = vmatmul.bf16.gmra.mxu1 %v12201_v5  ;;  %v5157_v2 = vpop.f32.mrf.mxu0  ;;  %v7754_v50 = vor.u32 %v8089_v14, %v7753_v39 }
 0x7cb   : > { %v8415_v8 = vpop.eup %8414  ;;  %v5244_v18 = vadd.f32 %v5243_v0, %v5155_v56 }
 0x7cc   : > { %6342 = vst [vmem:[%s10058_s15 + $0x410] sm:$0xff] %v8415_v8  ;;  %v4979_v40 = vpop.f32.mrf.mxu2  ;;  %5900 = vmatpush.bf16.msrb.mxu1 %v7754_v50  ;;  %v12204_v50 = vld [vmem:[#allocation21_spill] sm:$0xff] }
 0x7cd   : > { %8416 = vtanh.f32 %v5244_v18  ;;  %v4980_v46 = vadd.f32 %v4979_v40, %v11339_v12  ;;  %v5068_v23 = vpop.f32.mrf.mxu3  ;;  %5472 = vmatmul.bf16.gmra.mxu0 %v12202_v47  ;;  %v7914_v18 = vld [vmem:[%s12013_s5 + $0x148] sm:$0xf0] }
 0x7ce   : > { %v7054_v14 = vor.u32 %v7914_v18, %v7053_v19  ;;  %v7529_v19 = vld [vmem:[%s12013_s5 + $0x4e8] sm:$0xf] }
 0x7cf   : > { %v5069_v29 = vadd.f32 %v5068_v23, %v4980_v46  ;;  %v5248_v0 = vpop.f32.mrf.mxu1  ;;  %v12203_v23 = vld [vmem:[#allocation8_spill] sm:$0xff] }
 0x7d0   : > { %5634 = vmatpush.bf16.msrb.mxu2 %v7054_v14 }
 0x7d1   : > { %v5158_v8 = vadd.f32 %v5157_v2, %v5069_v29 }
 0x7d2   : > { %v5159_v11 = vpop.f32.mrf.mxu0 }
 0x7d3   : > { %v8417_v56 = vpop.eup %8416  ;;  %v5247_v5 = vadd.f32 %v5246_v16, %v5158_v8 }
 0x7d4   : > { %6349 = vst [vmem:[%s10058_s15 + $0x448] sm:$0xff] %v8417_v56  ;;  %v4981_v34 = vpop.f32.mrf.mxu2 }
 0x7d5   : > { %8418 = vtanh.f32 %v5247_v5  ;;  %v4982_v40 = vadd.f32 %v4981_v34, %v11339_v12  ;;  %v5070_v39 = vpop.f32.mrf.mxu3  ;;  %v8033_v34 = vld [vmem:[%s12013_s5 + $0x500] sm:$0xf0] }
 0x7d7   : > { %v5071_v2 = vadd.f32 %v5070_v39, %v4982_v40  ;;  %v5251_v46 = vpop.f32.mrf.mxu1  ;;  %v11575_v40 = vor.u32 %v8033_v34, %v7529_v19 }
 0x7d9   : > { %v5160_v16 = vadd.f32 %v5159_v11, %v5071_v2  ;;  %5299 = vmatmul.bf16.gmra.mxu2 %v12184_v21  ;;  %5811 = vmatpush.bf16.msrb.mxu0 %v11575_v40 }
 0x7da   : > { %5388 = vmatmul.bf16.gmra.mxu3 %v12203_v23  ;;  %5566 = vmatmul.bf16.gmra.mxu1 %v12204_v50  ;;  %v5162_v29 = vpop.f32.mrf.mxu0 }
 0x7db   : > { %v8419_v8 = vpop.eup %8418  ;;  %v5249_v56 = vadd.f32 %v5248_v0, %v5160_v16 }
 0x7dc   : > { %6356 = vst [vmem:[%s10058_s15 + $0x480] sm:$0xff] %v8419_v8  ;;  %v4984_v5 = vpop.f32.mrf.mxu2 }
 0x7dd   : > { %8420 = vtanh.f32 %v5249_v56  ;;  %v4985_v11 = vadd.f32 %v4984_v5, %v11339_v12  ;;  %v5073_v18 = vpop.f32.mrf.mxu3  ;;  %5477 = vmatmul.bf16.gmra.mxu0 %v12168_v30  ;;  %v7277_v56 = vld [vmem:[%s12013_s5 + $0x2f0] sm:$0xf]  ;;  %v7970_v5 = vld [vmem:[%s12013_s5 + $0x308] sm:$0xf0] }
 0x7df   : > { %v5074_v0 = vadd.f32 %v5073_v18, %v4985_v11  ;;  %v5253_v39 = vpop.f32.mrf.mxu1  ;;  %v7278_v11 = vor.u32 %v7970_v5, %v7277_v56 }
 0x7e1   : > { %v5163_v14 = vadd.f32 %v5162_v29, %v5074_v0  ;;  %5723 = vmatpush.bf16.msrb.mxu3 %v7278_v11  ;;  %v12205_v0 = vld [vmem:[#allocation10_spill] sm:$0xff] }
 0x7e2   : > { %v5164_v2 = vpop.f32.mrf.mxu0 }
 0x7e3   : > { %v8421_v16 = vpop.eup %8420  ;;  %v5252_v8 = vadd.f32 %v5251_v46, %v5163_v14  ;;  %v12206_v14 = vld [vmem:[#allocation23_spill] sm:$0xff] }
 0x7e4   : > { %6363 = vst [vmem:[%s10058_s15 + $0x4b8] sm:$0xff] %v8421_v16  ;;  %v4986_v50 = vpop.f32.mrf.mxu2 }
 0x7e5   : > { %8422 = vtanh.f32 %v5252_v8  ;;  %v4987_v19 = vadd.f32 %v4986_v50, %v11339_v12  ;;  %v5075_v34 = vpop.f32.mrf.mxu3  ;;  %v7725_v50 = vld [vmem:[%s12013_s5 + $0x670] sm:$0xf] }
 0x7e7   : > { %v5076_v29 = vadd.f32 %v5075_v34, %v4987_v19  ;;  %v5256_v18 = vpop.f32.mrf.mxu1 }
 0x7e9   : > { %v5165_v46 = vadd.f32 %v5164_v2, %v5076_v29  ;;  %5304 = vmatmul.bf16.gmra.mxu2 %v12150_v59  ;;  %v8082_v2 = vld [vmem:[%s12013_s5 + $0x688] sm:$0xf0] }
 0x7ea   : > { %5393 = vmatmul.bf16.gmra.mxu3 %v12205_v0  ;;  %5571 = vmatmul.bf16.gmra.mxu1 %v12206_v14  ;;  %v5167_v16 = vpop.f32.mrf.mxu0  ;;  %v7726_v19 = vor.u32 %v8082_v2, %v7725_v50  ;;  %v7025_v0 = vld [vmem:[%s12013_s5 + $0xf8] sm:$0xf] }
 0x7eb   : > { %v8423_v30 = vpop.eup %8422  ;;  %v5254_v23 = vadd.f32 %v5253_v39, %v5165_v46 }
 0x7ec   : > { %6370 = vst [vmem:[%s10058_s15 + $0x4f0] sm:$0xff] %v8423_v30  ;;  %v4989_v8 = vpop.f32.mrf.mxu2  ;;  %5901 = vmatpush.bf16.msrb.mxu1 %v7726_v19  ;;  %v12208_v19 = vld [vmem:[#allocation25_spill] sm:$0xff] }
 0x7ed   : > { %8424 = vtanh.f32 %v5254_v23  ;;  %v4990_v56 = vadd.f32 %v4989_v8, %v11339_v12  ;;  %v5078_v5 = vpop.f32.mrf.mxu3  ;;  %5482 = vmatmul.bf16.gmra.mxu0 %v12134_v35  ;;  %v7907_v23 = vld [vmem:[%s12013_s5 + $0x110] sm:$0xf0] }
 0x7ee   : > { %v7026_v2 = vor.u32 %v7907_v23, %v7025_v0  ;;  %v7501_v0 = vld [vmem:[%s12013_s5 + $0x4b0] sm:$0xf] }
 0x7ef   : > { %v5079_v34 = vadd.f32 %v5078_v5, %v4990_v56  ;;  %v5258_v39 = vpop.f32.mrf.mxu1  ;;  %v12207_v5 = vld [vmem:[#allocation12_spill] sm:$0xff] }
 0x7f0   : > { %5635 = vmatpush.bf16.msrb.mxu2 %v7026_v2 }
 0x7f1   : > { %v5168_v30 = vadd.f32 %v5167_v16, %v5079_v34 }
 0x7f2   : > { %v5169_v11 = vpop.f32.mrf.mxu0 }
 0x7f3   : > { %v8425_v29 = vpop.eup %8424  ;;  %v5257_v46 = vadd.f32 %v5256_v18, %v5168_v30 }
 0x7f4   : > { %6377 = vst [vmem:[%s10058_s15 + $0x528] sm:$0xff] %v8425_v29  ;;  %v4991_v14 = vpop.f32.mrf.mxu2 }
 0x7f5   : > { %8426 = vtanh.f32 %v5257_v46  ;;  %v4992_v8 = vadd.f32 %v4991_v14, %v11339_v12  ;;  %v5080_v50 = vpop.f32.mrf.mxu3  ;;  %v8026_v14 = vld [vmem:[%s12013_s5 + $0x4c8] sm:$0xf0] }
 0x7f7   : > { %v5081_v16 = vadd.f32 %v5080_v50, %v4992_v8  ;;  %v5261_v56 = vpop.f32.mrf.mxu1  ;;  %v11618_v8 = vor.u32 %v8026_v14, %v7501_v0 }
 0x7f9   : > { %v5170_v18 = vadd.f32 %v5169_v11, %v5081_v16  ;;  %5309 = vmatmul.bf16.gmra.mxu2 %v9407_v27  ;;  %5812 = vmatpush.bf16.msrb.mxu0 %v11618_v8 }
 0x7fa   : > { %5398 = vmatmul.bf16.gmra.mxu3 %v12207_v5  ;;  %5576 = vmatmul.bf16.gmra.mxu1 %v12208_v19  ;;  %v5172_v34 = vpop.f32.mrf.mxu0 }
 0x7fb   : > { %v8427_v30 = vpop.eup %8426  ;;  %v5259_v29 = vadd.f32 %v5258_v39, %v5170_v18 }
 0x7fc   : > { %6384 = vst [vmem:[%s10058_s15 + $0x560] sm:$0xff] %v8427_v30  ;;  %v4994_v46 = vpop.f32.mrf.mxu2 }
 0x7fd   : > { %8428 = vtanh.f32 %v5259_v29  ;;  %v4995_v11 = vadd.f32 %v4994_v46, %v11339_v12  ;;  %v5083_v23 = vpop.f32.mrf.mxu3  ;;  %5487 = vmatmul.bf16.gmra.mxu0 %v12136_v6  ;;  %v7249_v29 = vld [vmem:[%s12013_s5 + $0x2b8] sm:$0xf]  ;;  %v7963_v46 = vld [vmem:[%s12013_s5 + $0x2d0] sm:$0xf0] }
 0x7ff   : > { %v5084_v39 = vadd.f32 %v5083_v23, %v4995_v11  ;;  %v5263_v50 = vpop.f32.mrf.mxu1  ;;  %v7250_v11 = vor.u32 %v7963_v46, %v7249_v29 }
 0x801   : > { %v5173_v2 = vadd.f32 %v5172_v34, %v5084_v39  ;;  %5724 = vmatpush.bf16.msrb.mxu3 %v7250_v11  ;;  %v12209_v39 = vld [vmem:[#allocation13_spill] sm:$0xff] }
 0x802   : > { %v5174_v16 = vpop.f32.mrf.mxu0 }
 0x803   : > { %v8429_v18 = vpop.eup %8428  ;;  %v5262_v30 = vadd.f32 %v5261_v56, %v5173_v2  ;;  %v12210_v2 = vld [vmem:[#allocation27_spill] sm:$0xff] }
 0x804   : > { %6391 = vst [vmem:[%s10058_s15 + $0x598] sm:$0xff] %v8429_v18  ;;  %v4996_v19 = vpop.f32.mrf.mxu2 }
 0x805   : > { %8430 = vtanh.f32 %v5262_v30  ;;  %v4997_v0 = vadd.f32 %v4996_v19, %v11339_v12  ;;  %v5085_v14 = vpop.f32.mrf.mxu3  ;;  %v7697_v19 = vld [vmem:[%s12013_s5 + $0x638] sm:$0xf] }
 0x807   : > { %v5086_v34 = vadd.f32 %v5085_v14, %v4997_v0  ;;  %v5266_v23 = vpop.f32.mrf.mxu1 }
 0x809   : > { %v5175_v56 = vadd.f32 %v5174_v16, %v5086_v34  ;;  %5314 = vmatmul.bf16.gmra.mxu2 %v9431_v28  ;;  %v8075_v16 = vld [vmem:[%s12013_s5 + $0x650] sm:$0xf0] }
 0x80a   : > { %5403 = vmatmul.bf16.gmra.mxu3 %v12209_v39  ;;  %5581 = vmatmul.bf16.gmra.mxu1 %v12210_v2  ;;  %v5177_v18 = vpop.f32.mrf.mxu0  ;;  %v7698_v0 = vor.u32 %v8075_v16, %v7697_v19  ;;  %v6997_v39 = vld [vmem:[%s12013_s5 + $0xc0] sm:$0xf] }
 0x80b   : > { %v8431_v6 = vpop.eup %8430  ;;  %v5264_v5 = vadd.f32 %v5263_v50, %v5175_v56 }
 0x80c   : > { %6398 = vst [vmem:[%s10058_s15 + $0x5d0] sm:$0xff] %v8431_v6  ;;  %v4999_v30 = vpop.f32.mrf.mxu2  ;;  %5902 = vmatpush.bf16.msrb.mxu1 %v7698_v0 }
 0x80d   : > { %8432 = vtanh.f32 %v5264_v5  ;;  %v5000_v29 = vadd.f32 %v4999_v30, %v11339_v12  ;;  %v5088_v46 = vpop.f32.mrf.mxu3  ;;  %5492 = vmatmul.bf16.gmra.mxu0 %v9822_v20  ;;  %v7900_v5 = vld [vmem:[%s12013_s5 + $0xd8] sm:$0xf0] }
 0x80e   : > { %v6998_v16 = vor.u32 %v7900_v5, %v6997_v39  ;;  %v7473_v39 = vld [vmem:[%s12013_s5 + $0x478] sm:$0xf] }
 0x80f   : > { %v5089_v14 = vadd.f32 %v5088_v46, %v5000_v29  ;;  %v5268_v50 = vpop.f32.mrf.mxu1  ;;  %v12211_v46 = vld [vmem:[#allocation28_spill] sm:$0xff] }
 0x810   : > { %5636 = vmatpush.bf16.msrb.mxu2 %v6998_v16 }
 0x811   : > { %v5178_v6 = vadd.f32 %v5177_v18, %v5089_v14 }
 0x812   : > { %v5179_v11 = vpop.f32.mrf.mxu0 }
 0x813   : > { %v8433_v34 = vpop.eup %8432  ;;  %v5267_v56 = vadd.f32 %v5266_v23, %v5178_v6 }
 0x814   : > { %6405 = vst [vmem:[%s10058_s15 + $0x608] sm:$0xff] %v8433_v34  ;;  %v5001_v2 = vpop.f32.mrf.mxu2 }
 0x815   : > { %8434 = vtanh.f32 %v5267_v56  ;;  %v5002_v30 = vadd.f32 %v5001_v2, %v11339_v12  ;;  %v5090_v19 = vpop.f32.mrf.mxu3  ;;  %v8019_v2 = vld [vmem:[%s12013_s5 + $0x490] sm:$0xf0] }
 0x816   : > { %v11661_v5 = vor.u32 %v8019_v2, %v7473_v39 }
 0x817   : > { %v5091_v18 = vadd.f32 %v5090_v19, %v5002_v30  ;;  %v5271_v29 = vpop.f32.mrf.mxu1 }
 0x818   : > { %5813 = vmatpush.bf16.msrb.mxu0 %v11661_v5 }
 0x819   : > { %v5180_v23 = vadd.f32 %v5179_v11, %v5091_v18  ;;  %5319 = vmatmul.bf16.gmra.mxu2 %v9455_v25 }
 0x81a   : > { %5408 = vmatmul.bf16.gmra.mxu3 %v9450_v9  ;;  %5586 = vmatmul.bf16.gmra.mxu1 %v12211_v46  ;;  %v5182_v0 = vpop.f32.mrf.mxu0 }
 0x81b   : > { %v8435_v14 = vpop.eup %8434  ;;  %v5269_v6 = vadd.f32 %v5268_v50, %v5180_v23 }
 0x81c   : > { %6412 = vst [vmem:[%s10058_s15 + $0x640] sm:$0xff] %v8435_v14  ;;  %v5004_v34 = vpop.f32.mrf.mxu2 }
 0x81d   : > { %8436 = vtanh.f32 %v5269_v6  ;;  %v5005_v11 = vadd.f32 %v5004_v34, %v11339_v12  ;;  %v5093_v56 = vpop.f32.mrf.mxu3  ;;  %5497 = vmatmul.bf16.gmra.mxu0 %v12139_v55  ;;  %v7221_v6 = vld [vmem:[%s12013_s5 + $0x280] sm:$0xf]  ;;  %v7956_v34 = vld [vmem:[%s12013_s5 + $0x298] sm:$0xf0] }
 0x81f   : > { %v5094_v50 = vadd.f32 %v5093_v56, %v5005_v11  ;;  %v5273_v30 = vpop.f32.mrf.mxu1  ;;  %v7222_v11 = vor.u32 %v7956_v34, %v7221_v6  ;;  %v8068_v6 = vld [vmem:[%s12013_s5 + $0x618] sm:$0xf0] }
 0x821   : > { %v5183_v19 = vadd.f32 %v5182_v0, %v5094_v50  ;;  %5725 = vmatpush.bf16.msrb.mxu3 %v7222_v11  ;;  %v11676_v50 = vld [vmem:[%s12014_s6] sm:$0xff] }
 0x822   : > { %v5184_v16 = vpop.f32.mrf.mxu0  ;;  %12212 = vst [vmem:[#allocation24_spill] sm:$0xff] %v11676_v50 }
 0x823   : > { %v8437_v18 = vpop.eup %8436  ;;  %v5272_v23 = vadd.f32 %v5271_v29, %v5183_v19  ;;  %v11679_v19 = vperm.slane %v11676_v50, 5  ;;  %v6969_v50 = vld [vmem:[%s12013_s5 + $0x88] sm:$0xf] }
 0x824   : > { %6419 = vst [vmem:[%s10058_s15 + $0x678] sm:$0xff] %v8437_v18  ;;  %v5006_v14 = vpop.f32.mrf.mxu2 }
 0x825   : > { %8438 = vtanh.f32 %v5272_v23  ;;  %v5007_v39 = vadd.f32 %v5006_v14, %v11339_v12  ;;  %v5095_v2 = vpop.f32.mrf.mxu3  ;;  %v7669_v14 = vld [vmem:[%s12013_s5 + $0x600] sm:$0xf] }
 0x827   : > { %v5096_v0 = vadd.f32 %v5095_v2, %v5007_v39  ;;  %v5552_v56 = vpop.f32.mrf.mxu1  ;;  %v7670_v2 = vor.u32 %v8068_v6, %v7669_v14 }
 0x829   : > { %v5185_v29 = vadd.f32 %v5184_v16, %v5096_v0  ;;  %5324 = vmatmul.bf16.gmra.mxu2 %v9479_v17  ;;  %5903 = vmatpush.bf16.msrb.mxu1 %v7670_v2 }
 0x82a   : > { %5413 = vmatmul.bf16.gmra.mxu3 %v9474_v15  ;;  %5591 = vmatmul.bf16.gmra.mxu1 %v9865_v57  ;;  %v5463_v12 = vpop.f32.mrf.mxu0 }
 0x82b   : > { %v8439_v18 = vpop.eup %8438  ;;  %v5274_v23 = vadd.f32 %v5273_v30, %v5185_v29 }
 0x82c   : > { %6426 = vst [vmem:[%s10058_s15 + $0x6b0] sm:$0xff] %v8439_v18  ;;  %v5285_v16 = vpop.f32.mrf.mxu2 }
 0x82d   : > { %8440 = vtanh.f32 %v5274_v23  ;;  %v5286_v34 = vadd.f32 %v5285_v16, %v11679_v19  ;;  %v5374_v39 = vpop.f32.mrf.mxu3  ;;  %5502 = vmatmul.bf16.gmra.mxu0 %v9870_v54  ;;  %v7893_v23 = vld [vmem:[%s12013_s5 + $0xa0] sm:$0xf0] }
 0x82e   : > { %v6970_v6 = vor.u32 %v7893_v23, %v6969_v50  ;;  %v8012_v50 = vld [vmem:[%s12013_s5 + $0x458] sm:$0xf0] }
 0x82f   : > { %v5375_v11 = vadd.f32 %v5374_v39, %v5286_v34  ;;  %v5554_v30 = vpop.f32.mrf.mxu1 }
 0x830   : > { %5637 = vmatpush.bf16.msrb.mxu2 %v6970_v6 }
 0x831   : > { %v5464_v0 = vadd.f32 %v5463_v12, %v5375_v11 }
 0x832   : > { %v5465_v29 = vpop.f32.mrf.mxu0 }
 0x833   : > { %v8441_v18 = vpop.eup %8440  ;;  %v5553_v57 = vadd.f32 %v5552_v56, %v5464_v0 }
 0x834   : > { %6433 = vst [vmem:[%s10058_s15 + $0x6e8] sm:$0xff] %v8441_v18  ;;  %v5287_v15 = vpop.f32.mrf.mxu2 }
 0x835   : > { %8442 = vtanh.f32 %v5553_v57  ;;  %v5288_v16 = vadd.f32 %v5287_v15, %v11679_v19  ;;  %v5376_v14 = vpop.f32.mrf.mxu3  ;;  %v7445_v15 = vld [vmem:[%s12013_s5 + $0x440] sm:$0xf] }
 0x836   : > { %v11712_v18 = vor.u32 %v8012_v50, %v7445_v15 }
 0x837   : > { %v5377_v12 = vadd.f32 %v5376_v14, %v5288_v16  ;;  %v5557_v34 = vpop.f32.mrf.mxu1 }
 0x838   : > { %5814 = vmatpush.bf16.msrb.mxu0 %v11712_v18 }
 0x839   : > { %v5466_v56 = vadd.f32 %v5465_v29, %v5377_v12  ;;  %5329 = vmatmul.bf16.gmra.mxu2 %v9503_v36 }
 0x83a   : > { %5418 = vmatmul.bf16.gmra.mxu3 %v9498_v13  ;;  %5596 = vmatmul.bf16.gmra.mxu1 %v9889_v49  ;;  %v5468_v39 = vpop.f32.mrf.mxu0 }
 0x83b   : > { %v8443_v2 = vpop.eup %8442  ;;  %v5555_v11 = vadd.f32 %v5554_v30, %v5466_v56 }
 0x83c   : > { %6217 = vst [vmem:[%s10058_s15 + $0x28] sm:$0xff] %v8443_v2  ;;  %v5290_v57 = vpop.f32.mrf.mxu2  ;;  %v7193_v2 = vld [vmem:[%s12013_s5 + $0x248] sm:$0xf] }
 0x83d   : > { %8444 = vtanh.f32 %v5555_v11  ;;  %v5291_v0 = vadd.f32 %v5290_v57, %v11679_v19  ;;  %v5379_v29 = vpop.f32.mrf.mxu3  ;;  %5507 = vmatmul.bf16.gmra.mxu0 %v9894_v51  ;;  %v7949_v11 = vld [vmem:[%s12013_s5 + $0x260] sm:$0xf0] }
 0x83e   : > { %v7194_v50 = vor.u32 %v7949_v11, %v7193_v2 }
 0x83f   : > { %v5380_v30 = vadd.f32 %v5379_v29, %v5291_v0  ;;  %v5559_v23 = vpop.f32.mrf.mxu1 }
 0x840   : > { %5726 = vmatpush.bf16.msrb.mxu3 %v7194_v50 }
 0x841   : > { %v5469_v16 = vadd.f32 %v5468_v39, %v5380_v30 }
 0x842   : > { %v5470_v14 = vpop.f32.mrf.mxu0 }
 0x843   : > { %v8445_v6 = vpop.eup %8444  ;;  %v5558_v12 = vadd.f32 %v5557_v34, %v5469_v16 }
 0x844   : > { %6224 = vst [vmem:[%s10058_s15 + $0x60] sm:$0xff] %v8445_v6  ;;  %v5292_v56 = vpop.f32.mrf.mxu2 }
 0x845   : > { %8446 = vtanh.f32 %v5558_v12  ;;  %v5293_v57 = vadd.f32 %v5292_v56, %v11679_v19  ;;  %v5381_v15 = vpop.f32.mrf.mxu3  ;;  %v7641_v12 = vld [vmem:[%s12013_s5 + $0x5c8] sm:$0xf] }
 0x847   : > { %v5382_v39 = vadd.f32 %v5381_v15, %v5293_v57  ;;  %v5562_v0 = vpop.f32.mrf.mxu1 }
 0x849   : > { %v5471_v34 = vadd.f32 %v5470_v14, %v5382_v39  ;;  %5334 = vmatmul.bf16.gmra.mxu2 %v9527_v1  ;;  %v8061_v14 = vld [vmem:[%s12013_s5 + $0x5e0] sm:$0xf0] }
 0x84a   : > { %5423 = vmatmul.bf16.gmra.mxu3 %v9522_v7  ;;  %5601 = vmatmul.bf16.gmra.mxu1 %v9913_v53  ;;  %v5473_v29 = vpop.f32.mrf.mxu0  ;;  %v7642_v11 = vor.u32 %v8061_v14, %v7641_v12  ;;  %v6941_v53 = vld [vmem:[%s12013_s5 + $0x50] sm:$0xf] }
 0x84b   : > { %v8447_v30 = vpop.eup %8446  ;;  %v5560_v16 = vadd.f32 %v5559_v23, %v5471_v34 }
 0x84c   : > { %6231 = vst [vmem:[%s10058_s15 + $0x98] sm:$0xff] %v8447_v30  ;;  %v5295_v6 = vpop.f32.mrf.mxu2  ;;  %5904 = vmatpush.bf16.msrb.mxu1 %v7642_v11 }
 0x84d   : > { %8448 = vtanh.f32 %v5560_v16  ;;  %v5296_v56 = vadd.f32 %v5295_v6, %v11679_v19  ;;  %v5384_v2 = vpop.f32.mrf.mxu3  ;;  %5512 = vmatmul.bf16.gmra.mxu0 %v9918_v48  ;;  %v7886_v16 = vld [vmem:[%s12013_s5 + $0x68] sm:$0xf0] }
 0x84e   : > { %v6942_v14 = vor.u32 %v7886_v16, %v6941_v53  ;;  %v7417_v53 = vld [vmem:[%s12013_s5 + $0x408] sm:$0xf] }
 0x84f   : > { %v5385_v57 = vadd.f32 %v5384_v2, %v5296_v56  ;;  %v5564_v23 = vpop.f32.mrf.mxu1 }
 0x850   : > { %5638 = vmatpush.bf16.msrb.mxu2 %v6942_v14 }
 0x851   : > { %v5474_v15 = vadd.f32 %v5473_v29, %v5385_v57 }
 0x852   : > { %v5475_v50 = vpop.f32.mrf.mxu0 }
 0x853   : > { %v8449_v39 = vpop.eup %8448  ;;  %v5563_v34 = vadd.f32 %v5562_v0, %v5474_v15 }
 0x854   : > { %6238 = vst [vmem:[%s10058_s15 + $0xd0] sm:$0xff] %v8449_v39  ;;  %v5297_v30 = vpop.f32.mrf.mxu2 }
 0x855   : > { %8450 = vtanh.f32 %v5563_v34  ;;  %v5298_v6 = vadd.f32 %v5297_v30, %v11679_v19  ;;  %v5386_v12 = vpop.f32.mrf.mxu3 }
 0x857   : > { %v5387_v29 = vadd.f32 %v5386_v12, %v5298_v6  ;;  %v5567_v56 = vpop.f32.mrf.mxu1 }
 0x859   : > { %v5476_v0 = vadd.f32 %v5475_v50, %v5387_v29  ;;  %5339 = vmatmul.bf16.gmra.mxu2 %v9551_v31  ;;  %v8005_v50 = vld [vmem:[%s12013_s5 + $0x420] sm:$0xf0] }
 0x85a   : > { %5428 = vmatmul.bf16.gmra.mxu3 %v9546_v61  ;;  %5606 = vmatmul.bf16.gmra.mxu1 %v9937_v24  ;;  %v5478_v2 = vpop.f32.mrf.mxu0  ;;  %v11755_v30 = vor.u32 %v8005_v50, %v7417_v53 }
 0x85b   : > { %v8451_v11 = vpop.eup %8450  ;;  %v5565_v57 = vadd.f32 %v5564_v23, %v5476_v0 }
 0x85c   : > { %6245 = vst [vmem:[%s10058_s15 + $0x108] sm:$0xff] %v8451_v11  ;;  %v5300_v15 = vpop.f32.mrf.mxu2  ;;  %5815 = vmatpush.bf16.msrb.mxu0 %v11755_v30  ;;  %v7165_v11 = vld [vmem:[%s12013_s5 + $0x210] sm:$0xf] }
 0x85d   : > { %8452 = vtanh.f32 %v5565_v57  ;;  %v5301_v39 = vadd.f32 %v5300_v15, %v11679_v19  ;;  %v5389_v34 = vpop.f32.mrf.mxu3  ;;  %5517 = vmatmul.bf16.gmra.mxu0 %v9942_v62  ;;  %v7942_v57 = vld [vmem:[%s12013_s5 + $0x228] sm:$0xf0] }
 0x85e   : > { %v7166_v50 = vor.u32 %v7942_v57, %v7165_v11 }
 0x85f   : > { %v5390_v23 = vadd.f32 %v5389_v34, %v5301_v39  ;;  %v5569_v16 = vpop.f32.mrf.mxu1 }
 0x860   : > { %5727 = vmatpush.bf16.msrb.mxu3 %v7166_v50 }
 0x861   : > { %v5479_v6 = vadd.f32 %v5478_v2, %v5390_v23 }
 0x862   : > { %v5480_v12 = vpop.f32.mrf.mxu0 }
 0x863   : > { %v8453_v14 = vpop.eup %8452  ;;  %v5568_v29 = vadd.f32 %v5567_v56, %v5479_v6 }
 0x864   : > { %6252 = vst [vmem:[%s10058_s15 + $0x140] sm:$0xff] %v8453_v14  ;;  %v5302_v0 = vpop.f32.mrf.mxu2 }
 0x865   : > { %8454 = vtanh.f32 %v5568_v29  ;;  %v5303_v15 = vadd.f32 %v5302_v0, %v11679_v19  ;;  %v5391_v53 = vpop.f32.mrf.mxu3  ;;  %v7613_v29 = vld [vmem:[%s12013_s5 + $0x590] sm:$0xf] }
 0x867   : > { %v5392_v2 = vadd.f32 %v5391_v53, %v5303_v15  ;;  %v5572_v39 = vpop.f32.mrf.mxu1 }
 0x869   : > { %v5481_v56 = vadd.f32 %v5480_v12, %v5392_v2  ;;  %5344 = vmatmul.bf16.gmra.mxu2 %v9575_v4  ;;  %v8054_v12 = vld [vmem:[%s12013_s5 + $0x5a8] sm:$0xf0] }
 0x86a   : > { %5433 = vmatmul.bf16.gmra.mxu3 %v9570_v3  ;;  %5611 = vmatmul.bf16.gmra.mxu1 %v9961_v32  ;;  %v5483_v34 = vpop.f32.mrf.mxu0  ;;  %v7614_v57 = vor.u32 %v8054_v12, %v7613_v29  ;;  %v6913_v32 = vld [vmem:[%s12013_s5 + $0x18] sm:$0xf] }
 0x86b   : > { %v8455_v23 = vpop.eup %8454  ;;  %v5570_v6 = vadd.f32 %v5569_v16, %v5481_v56 }
 0x86c   : > { %6259 = vst [vmem:[%s10058_s15 + $0x178] sm:$0xff] %v8455_v23  ;;  %v5305_v14 = vpop.f32.mrf.mxu2  ;;  %5905 = vmatpush.bf16.msrb.mxu1 %v7614_v57 }
 0x86d   : > { %8456 = vtanh.f32 %v5570_v6  ;;  %v5306_v0 = vadd.f32 %v5305_v14, %v11679_v19  ;;  %v5394_v11 = vpop.f32.mrf.mxu3  ;;  %5522 = vmatmul.bf16.gmra.mxu0 %v9966_v63  ;;  %v7879_v6 = vld [vmem:[%s12013_s5 + $0x30] sm:$0xf0] }
 0x86e   : > { %v6914_v12 = vor.u32 %v7879_v6, %v6913_v32  ;;  %v7389_v32 = vld [vmem:[%s12013_s5 + $0x3d0] sm:$0xf] }
 0x86f   : > { %v5395_v15 = vadd.f32 %v5394_v11, %v5306_v0  ;;  %v5574_v16 = vpop.f32.mrf.mxu1 }
 0x870   : > { %5639 = vmatpush.bf16.msrb.mxu2 %v6914_v12 }
 0x871   : > { %v5484_v53 = vadd.f32 %v5483_v34, %v5395_v15 }
 0x872   : > { %v5485_v50 = vpop.f32.mrf.mxu0 }
 0x873   : > { %v8457_v2 = vpop.eup %8456  ;;  %v5573_v56 = vadd.f32 %v5572_v39, %v5484_v53 }
 0x874   : > { %6266 = vst [vmem:[%s10058_s15 + $0x1b0] sm:$0xff] %v8457_v2  ;;  %v5307_v23 = vpop.f32.mrf.mxu2  ;;  %8105 = vmatpush.bf16.msra.mxu2 %v11532_v45  ;;  %v7998_v45 = vld [vmem:[%s12013_s5 + $0x3e8] sm:$0xf0] }
 0x875   : > { %8458 = vtanh.f32 %v5573_v56  ;;  %v5308_v14 = vadd.f32 %v5307_v23, %v11679_v19  ;;  %v5396_v29 = vpop.f32.mrf.mxu3 }
 0x877   : > { %v5397_v34 = vadd.f32 %v5396_v29, %v5308_v14  ;;  %v5577_v0 = vpop.f32.mrf.mxu1 }
 0x878   : > { %8106 = vmatpush.bf16.msra.mxu2 %v11575_v40  ;;  %v7137_v40 = vld [vmem:[%s12013_s5 + $0x1d8] sm:$0xf] }
 0x879   : > { %v5486_v39 = vadd.f32 %v5485_v50, %v5397_v34  ;;  %5349 = vmatmul.bf16.gmra.mxu2 %v9599_v42 }
 0x87a   : > { %5438 = vmatmul.bf16.gmra.mxu3 %v9594_v60  ;;  %5616 = vmatmul.bf16.gmra.mxu1 %v9985_v38  ;;  %v5488_v11 = vpop.f32.mrf.mxu0 }
 0x87b   : > { %v8459_v57 = vpop.eup %8458  ;;  %v5575_v15 = vadd.f32 %v5574_v16, %v5486_v39  ;;  %v7390_v16 = vor.u32 %v7998_v45, %v7389_v32  ;;  %v7935_v39 = vld [vmem:[%s12013_s5 + $0x1f0] sm:$0xf0] }
 0x87c   : > { %6273 = vst [vmem:[%s10058_s15 + $0x1e8] sm:$0xff] %v8459_v57  ;;  %v5310_v53 = vpop.f32.mrf.mxu2  ;;  %8107 = vmatpush.bf16.msra.mxu2 %v11618_v8 }
 0x87d   : > { %8460 = vtanh.f32 %v5575_v15  ;;  %v5311_v50 = vadd.f32 %v5310_v53, %v11679_v19  ;;  %v5399_v2 = vpop.f32.mrf.mxu3  ;;  %5527 = vmatmul.bf16.gmra.mxu0 %v9990_v52  ;;  %v8047_v15 = vld [vmem:[%s12013_s5 + $0x570] sm:$0xf0] }
 0x87e   : > { %5816 = vmatpush.bf16.msrb.mxu0 %v7390_v16 }
 0x87f   : > { %v5400_v56 = vadd.f32 %v5399_v2, %v5311_v50  ;;  %v5579_v23 = vpop.f32.mrf.mxu1  ;;  %v7991_v50 = vld [vmem:[%s12013_s5 + $0x3b0] sm:$0xf0] }
 0x880   : > { %8108 = vmatpush.bf16.msra.mxu2 %v11661_v5  ;;  %v7361_v5 = vld [vmem:[%s12013_s5 + $0x398] sm:$0xf] }
 0x881   : > { %v5489_v6 = vadd.f32 %v5488_v11, %v5400_v56  ;;  %v7138_v11 = vor.u32 %v7935_v39, %v7137_v40  ;;  %v7362_v56 = vor.u32 %v7991_v50, %v7361_v5 }
 0x882   : > { %v5490_v14 = vpop.f32.mrf.mxu0 }
 0x883   : > { %v8461_v29 = vpop.eup %8460  ;;  %v5578_v12 = vadd.f32 %v5577_v0, %v5489_v6  ;;  %v7585_v0 = vld [vmem:[%s12013_s5 + $0x558] sm:$0xf]  ;;  %5728 = vmatpush.bf16.msrb.mxu3 %v7138_v11  ;;  %5817 = vmatpush.bf16.msrb.mxu0 %v7362_v56 }
 0x884   : > { %6280 = vst [vmem:[%s10058_s15 + $0x220] sm:$0xff] %v8461_v29  ;;  %v5312_v34 = vpop.f32.mrf.mxu2  ;;  %v7586_v53 = vor.u32 %v8047_v15, %v7585_v0  ;;  %8109 = vmatpush.bf16.msra.mxu2 %v11712_v18 }
 0x885   : > { %8462 = vtanh.f32 %v5578_v12  ;;  %v5313_v57 = vadd.f32 %v5312_v34, %v11679_v19  ;;  %v5401_v8 = vpop.f32.mrf.mxu3 }
 0x886   : > { %5906 = vmatpush.bf16.msrb.mxu1 %v7586_v53 }
 0x887   : > { %v5402_v32 = vadd.f32 %v5401_v8, %v5313_v57  ;;  %v5582_v45 = vpop.f32.mrf.mxu1 }
 0x888   : > { %8110 = vmatpush.bf16.msra.mxu2 %v11755_v30 }
 0x889   : > { %v5491_v2 = vadd.f32 %v5490_v14, %v5402_v32  ;;  %5354 = vmatmul.bf16.gmra.mxu2 %v9623_v22 }
 0x88a   : > { %5443 = vmatmul.bf16.gmra.mxu3 %v9618_v37  ;;  %5621 = vmatmul.bf16.gmra.mxu1 %v10003_v44  ;;  %v5493_v6 = vpop.f32.mrf.mxu0 }
 0x88b   : > { %v8463_v29 = vpop.eup %8462  ;;  %v5580_v12 = vadd.f32 %v5579_v23, %v5491_v2 }
 0x88c   : > { %6287 = vst [vmem:[%s10058_s15 + $0x258] sm:$0xff] %v8463_v29  ;;  %v5315_v34 = vpop.f32.mrf.mxu2  ;;  %8111 = vmatpush.bf16.msra.mxu2 %v7390_v16  ;;  %v12213_v29 = vld [vmem:[#allocation33_spill] sm:$0xff] }
 0x88d   : > { %8464 = vtanh.f32 %v5580_v12  ;;  %v5316_v18 = vadd.f32 %v5315_v34, %v11679_v19  ;;  %v5404_v14 = vpop.f32.mrf.mxu3  ;;  %5532 = vmatmul.bf16.gmra.mxu0 %v10008_v33 }
 0x88f   : > { %v5405_v40 = vadd.f32 %v5404_v14, %v5316_v18  ;;  %v5584_v39 = vpop.f32.mrf.mxu1 }
 0x890   : > { %8112 = vmatpush.bf16.msra.mxu2 %v7362_v56 }
 0x891   : > { %v5494_v57 = vadd.f32 %v5493_v6, %v5405_v40 }
 0x892   : > { %v5495_v8 = vpop.f32.mrf.mxu0 }
 0x893   : > { %v8465_v11 = vpop.eup %8464  ;;  %v5583_v0 = vadd.f32 %v5582_v45, %v5494_v57 }
 0x894   : > { %6294 = vst [vmem:[%s10058_s15 + $0x290] sm:$0xff] %v8465_v11  ;;  %v5317_v23 = vpop.f32.mrf.mxu2 }
 0x895   : > { %8466 = vtanh.f32 %v5583_v0  ;;  %v5318_v30 = vadd.f32 %v5317_v23, %v11679_v19  ;;  %v5406_v15 = vpop.f32.mrf.mxu3 }
 0x897   : > { %v5407_v53 = vadd.f32 %v5406_v15, %v5318_v30  ;;  %v5587_v32 = vpop.f32.mrf.mxu1  ;;  %v12214_v15 = vld [vmem:[#allocation3_spill] sm:$0xff] }
 0x899   : > { %v5496_v5 = vadd.f32 %v5495_v8, %v5407_v53  ;;  %5359 = vmatmul.bf16.gmra.mxu2 %v9654_v41  ;;  %v12215_v53 = vld [vmem:[#allocation2_spill] sm:$0xff] }
 0x89a   : > { %5448 = vmatmul.bf16.gmra.mxu3 %v9647_v43  ;;  %5626 = vmatmul.bf16.gmra.mxu1 %v10030_v26  ;;  %v5498_v16 = vpop.f32.mrf.mxu0 }
 0x89b   : > { %v8467_v45 = vpop.eup %8466  ;;  %v5585_v50 = vadd.f32 %v5584_v39, %v5496_v5  ;;  %v12216_v5 = vld [vmem:[#allocation15_spill] sm:$0xff] }
 0x89c   : > { %6301 = vst [vmem:[%s10058_s15 + $0x2c8] sm:$0xff] %v8467_v45  ;;  %v5320_v2 = vpop.f32.mrf.mxu2 }
 0x89d   : > { %8468 = vtanh.f32 %v5585_v50  ;;  %v5321_v56 = vadd.f32 %v5320_v2, %v11679_v19  ;;  %v5409_v6 = vpop.f32.mrf.mxu3  ;;  %5537 = vmatmul.bf16.gmra.mxu0 %v12213_v29 }
 0x89f   : > { %v5410_v12 = vadd.f32 %v5409_v6, %v5321_v56  ;;  %v5589_v34 = vpop.f32.mrf.mxu1 }
 0x8a1   : > { %v5499_v18 = vadd.f32 %v5498_v16, %v5410_v12 }
 0x8a2   : > { %v5500_v14 = vpop.f32.mrf.mxu0 }
 0x8a3   : > { %v8469_v40 = vpop.eup %8468  ;;  %v5588_v57 = vadd.f32 %v5587_v32, %v5499_v18 }
 0x8a4   : > { %6308 = vst [vmem:[%s10058_s15 + $0x300] sm:$0xff] %v8469_v40  ;;  %v5322_v8 = vpop.f32.mrf.mxu2 }
 0x8a5   : > { %8470 = vtanh.f32 %v5588_v57  ;;  %v5323_v39 = vadd.f32 %v5322_v8, %v11679_v19  ;;  %v5411_v11 = vpop.f32.mrf.mxu3 }
 0x8a7   : > { %v5412_v0 = vadd.f32 %v5411_v11, %v5323_v39  ;;  %v5592_v23 = vpop.f32.mrf.mxu1 }
 0x8a9   : > { %v5501_v30 = vadd.f32 %v5500_v14, %v5412_v0  ;;  %5640 = vmatmul.bf16.vlgmr.msrb.gmra.mxu2 %v12214_v15  ;;  %v12217_v15 = vld [vmem:[#allocation4_spill] sm:$0xff] }
 0x8aa   : > { %5729 = vmatmul.bf16.vlgmr.msrb.gmra.mxu3 %v12215_v53  ;;  %5907 = vmatmul.bf16.vlgmr.msrb.gmra.mxu1 %v12216_v5  ;;  %v5503_v16 = vpop.f32.mrf.mxu0 }
 0x8ab   : > { %v8471_v45 = vpop.eup %8470  ;;  %v5590_v50 = vadd.f32 %v5589_v34, %v5501_v30 }
 0x8ac   : > { %6315 = vst [vmem:[%s10058_s15 + $0x338] sm:$0xff] %v8471_v45  ;;  %v5325_v32 = vpop.f32.mrf.mxu2 }
 0x8ad   : > { %8472 = vtanh.f32 %v5590_v50  ;;  %v5326_v2 = vadd.f32 %v5325_v32, %v11679_v19  ;;  %v5414_v56 = vpop.f32.mrf.mxu3  ;;  %5818 = vmatmul.bf16.vlgmr.msrb.gmra.mxu0 %v12197_v58  ;;  %v12218_v58 = vld [vmem:[#allocation17_spill] sm:$0xff]  ;;  %v12219_v32 = vld [vmem:[#allocation18_spill] sm:$0xff] }
 0x8af   : > { %v5415_v6 = vadd.f32 %v5414_v56, %v5326_v2  ;;  %v5594_v12 = vpop.f32.mrf.mxu1 }
 0x8b1   : > { %v5504_v18 = vadd.f32 %v5503_v16, %v5415_v6 }
 0x8b2   : > { %v5505_v14 = vpop.f32.mrf.mxu0 }
 0x8b3   : > { %v8473_v40 = vpop.eup %8472  ;;  %v5593_v57 = vadd.f32 %v5592_v23, %v5504_v18 }
 0x8b4   : > { %6322 = vst [vmem:[%s10058_s15 + $0x370] sm:$0xff] %v8473_v40  ;;  %v5327_v8 = vpop.f32.mrf.mxu2 }
 0x8b5   : > { %8474 = vtanh.f32 %v5593_v57  ;;  %v5328_v34 = vadd.f32 %v5327_v8, %v11679_v19  ;;  %v5416_v39 = vpop.f32.mrf.mxu3 }
 0x8b7   : > { %v5417_v11 = vadd.f32 %v5416_v39, %v5328_v34  ;;  %v5597_v0 = vpop.f32.mrf.mxu1 }
 0x8b9   : > { %v5506_v30 = vadd.f32 %v5505_v14, %v5417_v11  ;;  %5645 = vmatmul.bf16.gmra.mxu2 %v12179_v10  ;;  %v12220_v11 = vld [vmem:[#allocation7_spill] sm:$0xff] }
 0x8ba   : > { %5734 = vmatmul.bf16.gmra.mxu3 %v12217_v15  ;;  %5912 = vmatmul.bf16.gmra.mxu1 %v12218_v58  ;;  %v5508_v53 = vpop.f32.mrf.mxu0  ;;  %v12222_v15 = vld [vmem:[#allocation19_spill] sm:$0xff] }
 0x8bb   : > { %v8475_v5 = vpop.eup %8474  ;;  %v5595_v16 = vadd.f32 %v5594_v12, %v5506_v30  ;;  %v12221_v30 = vld [vmem:[#allocation6_spill] sm:$0xff] }
 0x8bc   : > { %6329 = vst [vmem:[%s10058_s15 + $0x3a8] sm:$0xff] %v8475_v5  ;;  %v5330_v23 = vpop.f32.mrf.mxu2 }
 0x8bd   : > { %8476 = vtanh.f32 %v5595_v16  ;;  %v5331_v45 = vadd.f32 %v5330_v23, %v11679_v19  ;;  %v5419_v50 = vpop.f32.mrf.mxu3  ;;  %5823 = vmatmul.bf16.gmra.mxu0 %v12219_v32 }
 0x8bf   : > { %v5420_v2 = vadd.f32 %v5419_v50, %v5331_v45  ;;  %v5599_v56 = vpop.f32.mrf.mxu1 }
 0x8c1   : > { %v5509_v6 = vadd.f32 %v5508_v53, %v5420_v2 }
 0x8c2   : > { %v5510_v10 = vpop.f32.mrf.mxu0 }
 0x8c3   : > { %v8477_v18 = vpop.eup %8476  ;;  %v5598_v14 = vadd.f32 %v5597_v0, %v5509_v6 }
 0x8c4   : > { %6336 = vst [vmem:[%s10058_s15 + $0x3e0] sm:$0xff] %v8477_v18  ;;  %v5332_v40 = vpop.f32.mrf.mxu2 }
 0x8c5   : > { %8478 = vtanh.f32 %v5598_v14  ;;  %v5333_v12 = vadd.f32 %v5332_v40, %v11679_v19  ;;  %v5421_v57 = vpop.f32.mrf.mxu3 }
 0x8c7   : > { %v5422_v8 = vadd.f32 %v5421_v57, %v5333_v12  ;;  %v5602_v34 = vpop.f32.mrf.mxu1 }
 0x8c9   : > { %v5511_v39 = vadd.f32 %v5510_v10, %v5422_v8  ;;  %5650 = vmatmul.bf16.gmra.mxu2 %v12220_v11  ;;  %v12223_v8 = vld [vmem:[#allocation8_spill] sm:$0xff] }
 0x8ca   : > { %5739 = vmatmul.bf16.gmra.mxu3 %v12221_v30  ;;  %5917 = vmatmul.bf16.gmra.mxu1 %v12222_v15  ;;  %v5513_v58 = vpop.f32.mrf.mxu0 }
 0x8cb   : > { %v8479_v53 = vpop.eup %8478  ;;  %v5600_v5 = vadd.f32 %v5599_v56, %v5511_v39 }
 0x8cc   : > { %6343 = vst [vmem:[%s10058_s15 + $0x418] sm:$0xff] %v8479_v53  ;;  %v5335_v0 = vpop.f32.mrf.mxu2  ;;  %v12225_v53 = vld [vmem:[#allocation22_spill] sm:$0xff] }
 0x8cd   : > { %8480 = vtanh.f32 %v5600_v5  ;;  %v5336_v16 = vadd.f32 %v5335_v0, %v11679_v19  ;;  %v5424_v23 = vpop.f32.mrf.mxu3  ;;  %5828 = vmatmul.bf16.gmra.mxu0 %v12202_v47  ;;  %v12224_v47 = vld [vmem:[#allocation21_spill] sm:$0xff] }
 0x8cf   : > { %v5425_v45 = vadd.f32 %v5424_v23, %v5336_v16  ;;  %v5604_v50 = vpop.f32.mrf.mxu1 }
 0x8d1   : > { %v5514_v32 = vadd.f32 %v5513_v58, %v5425_v45 }
 0x8d2   : > { %v5515_v2 = vpop.f32.mrf.mxu0 }
 0x8d3   : > { %v8481_v6 = vpop.eup %8480  ;;  %v5603_v10 = vadd.f32 %v5602_v34, %v5514_v32 }
 0x8d4   : > { %6350 = vst [vmem:[%s10058_s15 + $0x450] sm:$0xff] %v8481_v6  ;;  %v5337_v18 = vpop.f32.mrf.mxu2 }
 0x8d5   : > { %8482 = vtanh.f32 %v5603_v10  ;;  %v5338_v56 = vadd.f32 %v5337_v18, %v11679_v19  ;;  %v5426_v14 = vpop.f32.mrf.mxu3 }
 0x8d7   : > { %v5427_v40 = vadd.f32 %v5426_v14, %v5338_v56  ;;  %v5607_v12 = vpop.f32.mrf.mxu1  ;;  %v12226_v56 = vld [vmem:[#allocation10_spill] sm:$0xff]  ;;  %v12227_v14 = vld [vmem:[#allocation23_spill] sm:$0xff] }
 0x8d9   : > { %v5516_v57 = vadd.f32 %v5515_v2, %v5427_v40  ;;  %5655 = vmatmul.bf16.gmra.mxu2 %v12184_v21 }
 0x8da   : > { %5744 = vmatmul.bf16.gmra.mxu3 %v12223_v8  ;;  %5922 = vmatmul.bf16.gmra.mxu1 %v12224_v47  ;;  %v5518_v39 = vpop.f32.mrf.mxu0 }
 0x8db   : > { %v8483_v11 = vpop.eup %8482  ;;  %v5605_v30 = vadd.f32 %v5604_v50, %v5516_v57 }
 0x8dc   : > { %6357 = vst [vmem:[%s10058_s15 + $0x488] sm:$0xff] %v8483_v11  ;;  %v5340_v34 = vpop.f32.mrf.mxu2 }
 0x8dd   : > { %8484 = vtanh.f32 %v5605_v30  ;;  %v5341_v15 = vadd.f32 %v5340_v34, %v11679_v19  ;;  %v5429_v58 = vpop.f32.mrf.mxu3  ;;  %5833 = vmatmul.bf16.gmra.mxu0 %v12225_v53 }
 0x8df   : > { %v5430_v5 = vadd.f32 %v5429_v58, %v5341_v15  ;;  %v5609_v0 = vpop.f32.mrf.mxu1 }
 0x8e1   : > { %v5519_v16 = vadd.f32 %v5518_v39, %v5430_v5 }
 0x8e2   : > { %v5520_v21 = vpop.f32.mrf.mxu0 }
 0x8e3   : > { %v8485_v23 = vpop.eup %8484  ;;  %v5608_v45 = vadd.f32 %v5607_v12, %v5519_v16 }
 0x8e4   : > { %6364 = vst [vmem:[%s10058_s15 + $0x4c0] sm:$0xff] %v8485_v23  ;;  %v5342_v32 = vpop.f32.mrf.mxu2 }
 0x8e5   : > { %8486 = vtanh.f32 %v5608_v45  ;;  %v5343_v50 = vadd.f32 %v5342_v32, %v11679_v19  ;;  %v5431_v2 = vpop.f32.mrf.mxu3  ;;  %v12228_v45 = vld [vmem:[#allocation12_spill] sm:$0xff] }
 0x8e7   : > { %v5432_v6 = vadd.f32 %v5431_v2, %v5343_v50  ;;  %v5612_v10 = vpop.f32.mrf.mxu1 }
 0x8e9   : > { %v5521_v18 = vadd.f32 %v5520_v21, %v5432_v6  ;;  %5660 = vmatmul.bf16.gmra.mxu2 %v12150_v59 }
 0x8ea   : > { %5749 = vmatmul.bf16.gmra.mxu3 %v12226_v56  ;;  %5927 = vmatmul.bf16.gmra.mxu1 %v12227_v14  ;;  %v5523_v40 = vpop.f32.mrf.mxu0  ;;  %v12230_v56 = vld [vmem:[#allocation26_spill] sm:$0xff] }
 0x8eb   : > { %v8487_v57 = vpop.eup %8486  ;;  %v5610_v8 = vadd.f32 %v5609_v0, %v5521_v18 }
 0x8ec   : > { %6371 = vst [vmem:[%s10058_s15 + $0x4f8] sm:$0xff] %v8487_v57  ;;  %v5345_v12 = vpop.f32.mrf.mxu2 }
 0x8ed   : > { %8488 = vtanh.f32 %v5610_v8  ;;  %v5346_v47 = vadd.f32 %v5345_v12, %v11679_v19  ;;  %v5434_v39 = vpop.f32.mrf.mxu3  ;;  %5838 = vmatmul.bf16.gmra.mxu0 %v12134_v35  ;;  %v12229_v35 = vld [vmem:[#allocation25_spill] sm:$0xff] }
 0x8ef   : > { %v5435_v11 = vadd.f32 %v5434_v39, %v5346_v47  ;;  %v5614_v30 = vpop.f32.mrf.mxu1 }
 0x8f1   : > { %v5524_v34 = vadd.f32 %v5523_v40, %v5435_v11 }
 0x8f2   : > { %v5525_v59 = vpop.f32.mrf.mxu0 }
 0x8f3   : > { %v8489_v15 = vpop.eup %8488  ;;  %v5613_v58 = vadd.f32 %v5612_v10, %v5524_v34 }
 0x8f4   : > { %6378 = vst [vmem:[%s10058_s15 + $0x530] sm:$0xff] %v8489_v15  ;;  %v5347_v53 = vpop.f32.mrf.mxu2  ;;  %v12231_v15 = vld [vmem:[#allocation13_spill] sm:$0xff] }
 0x8f5   : > { %8490 = vtanh.f32 %v5613_v58  ;;  %v5348_v5 = vadd.f32 %v5347_v53, %v11679_v19  ;;  %v5436_v0 = vpop.f32.mrf.mxu3  ;;  %v12232_v58 = vld [vmem:[#allocation27_spill] sm:$0xff] }
 0x8f7   : > { %v5437_v16 = vadd.f32 %v5436_v0, %v5348_v5  ;;  %v5617_v21 = vpop.f32.mrf.mxu1 }
 0x8f9   : > { %v5526_v23 = vadd.f32 %v5525_v59, %v5437_v16  ;;  %5665 = vmatmul.bf16.gmra.mxu2 %v9407_v27 }
 0x8fa   : > { %5754 = vmatmul.bf16.gmra.mxu3 %v12228_v45  ;;  %5932 = vmatmul.bf16.gmra.mxu1 %v12229_v35  ;;  %v5528_v32 = vpop.f32.mrf.mxu0 }
 0x8fb   : > { %v8491_v50 = vpop.eup %8490  ;;  %v5615_v2 = vadd.f32 %v5614_v30, %v5526_v23 }
 0x8fc   : > { %6385 = vst [vmem:[%s10058_s15 + $0x568] sm:$0xff] %v8491_v50  ;;  %v5350_v6 = vpop.f32.mrf.mxu2 }
 0x8fd   : > { %8492 = vtanh.f32 %v5615_v2  ;;  %v5351_v10 = vadd.f32 %v5350_v6, %v11679_v19  ;;  %v5439_v18 = vpop.f32.mrf.mxu3  ;;  %5843 = vmatmul.bf16.gmra.mxu0 %v12230_v56 }
 0x8ff   : > { %v5440_v14 = vadd.f32 %v5439_v18, %v5351_v10  ;;  %v5619_v40 = vpop.f32.mrf.mxu1 }
 0x901   : > { %v5529_v57 = vadd.f32 %v5528_v32, %v5440_v14 }
 0x902   : > { %v5530_v27 = vpop.f32.mrf.mxu0 }
 0x903   : > { %v8493_v8 = vpop.eup %8492  ;;  %v5618_v12 = vadd.f32 %v5617_v21, %v5529_v57 }
 0x904   : > { %6392 = vst [vmem:[%s10058_s15 + $0x5a0] sm:$0xff] %v8493_v8  ;;  %v5352_v47 = vpop.f32.mrf.mxu2 }
 0x905   : > { %8494 = vtanh.f32 %v5618_v12  ;;  %v5353_v39 = vadd.f32 %v5352_v47, %v11679_v19  ;;  %v5441_v11 = vpop.f32.mrf.mxu3 }
 0x907   : > { %v5442_v30 = vadd.f32 %v5441_v11, %v5353_v39  ;;  %v5622_v34 = vpop.f32.mrf.mxu1 }
 0x909   : > { %v5531_v59 = vadd.f32 %v5530_v27, %v5442_v30  ;;  %5670 = vmatmul.bf16.gmra.mxu2 %v9431_v28 }
 0x90a   : > { %5759 = vmatmul.bf16.gmra.mxu3 %v12231_v15  ;;  %5937 = vmatmul.bf16.gmra.mxu1 %v12232_v58  ;;  %v5533_v53 = vpop.f32.mrf.mxu0 }
 0x90b   : > { %v8495_v5 = vpop.eup %8494  ;;  %v5620_v0 = vadd.f32 %v5619_v40, %v5531_v59 }
 0x90c   : > { %6399 = vst [vmem:[%s10058_s15 + $0x5d8] sm:$0xff] %v8495_v5  ;;  %v5355_v16 = vpop.f32.mrf.mxu2 }
 0x90d   : > { %8496 = vtanh.f32 %v5620_v0  ;;  %v5356_v21 = vadd.f32 %v5355_v16, %v11679_v19  ;;  %v5444_v23 = vpop.f32.mrf.mxu3  ;;  %5848 = vmatmul.bf16.gmra.mxu0 %v9822_v20  ;;  %v12233_v0 = vld [vmem:[#allocation24_spill] sm:$0xff]  ;;  %v12234_v16 = vld [vmem:[#allocation14_spill] sm:$0xff] }
 0x90f   : > { %v5445_v45 = vadd.f32 %v5444_v23, %v5356_v21  ;;  %v5624_v35 = vpop.f32.mrf.mxu1  ;;  %v12235_v21 = vld [vmem:[#allocation30_spill] sm:$0xff] }
 0x911   : > { %v5534_v32 = vadd.f32 %v5533_v53, %v5445_v45 }
 0x912   : > { %v5535_v28 = vpop.f32.mrf.mxu0 }
 0x913   : > { %v8497_v50 = vpop.eup %8496  ;;  %v5623_v2 = vadd.f32 %v5622_v34, %v5534_v32 }
 0x914   : > { %6406 = vst [vmem:[%s10058_s15 + $0x610] sm:$0xff] %v8497_v50  ;;  %v5357_v6 = vpop.f32.mrf.mxu2 }
 0x915   : > { %8498 = vtanh.f32 %v5623_v2  ;;  %v5358_v10 = vadd.f32 %v5357_v6, %v11679_v19  ;;  %v5446_v18 = vpop.f32.mrf.mxu3 }
 0x917   : > { %v5447_v56 = vadd.f32 %v5446_v18, %v5358_v10  ;;  %v5627_v14 = vpop.f32.mrf.mxu1 }
 0x919   : > { %v5536_v40 = vadd.f32 %v5535_v28, %v5447_v56  ;;  %5675 = vmatmul.bf16.gmra.mxu2 %v9455_v25 }
 0x91a   : > { %5764 = vmatmul.bf16.gmra.mxu3 %v9450_v9  ;;  %5942 = vmatmul.bf16.gmra.mxu1 %v12211_v46  ;;  %v5538_v20 = vpop.f32.mrf.mxu0 }
 0x91b   : > { %v8499_v57 = vpop.eup %8498  ;;  %v5625_v27 = vadd.f32 %v5624_v35, %v5536_v40 }
 0x91c   : > { %6413 = vst [vmem:[%s10058_s15 + $0x648] sm:$0xff] %v8499_v57  ;;  %v5360_v8 = vpop.f32.mrf.mxu2 }
 0x91d   : > { %8500 = vtanh.f32 %v5625_v27  ;;  %v5361_v12 = vadd.f32 %v5360_v8, %v11679_v19  ;;  %v5449_v47 = vpop.f32.mrf.mxu3  ;;  %5853 = vmatmul.bf16.gmra.mxu0 %v12139_v55  ;;  %v11906_v55 = vperm.slane %v12233_v0, 6 }
 0x91f   : > { %v5450_v39 = vadd.f32 %v5449_v47, %v5361_v12  ;;  %v5629_v11 = vpop.f32.mrf.mxu1 }
 0x921   : > { %v5539_v30 = vadd.f32 %v5538_v20, %v5450_v39 }
 0x922   : > { %v5540_v25 = vpop.f32.mrf.mxu0 }
 0x923   : > { %v8501_v34 = vpop.eup %8500  ;;  %v5628_v9 = vadd.f32 %v5627_v14, %v5539_v30 }
 0x924   : > { %6420 = vst [vmem:[%s10058_s15 + $0x680] sm:$0xff] %v8501_v34  ;;  %v5362_v46 = vpop.f32.mrf.mxu2 }
 0x925   : > { %8502 = vtanh.f32 %v5628_v9  ;;  %v5363_v59 = vadd.f32 %v5362_v46, %v11679_v19  ;;  %v5451_v15 = vpop.f32.mrf.mxu3 }
 0x927   : > { %v5452_v58 = vadd.f32 %v5451_v15, %v5363_v59  ;;  %v5908_v53 = vpop.f32.mrf.mxu1 }
 0x929   : > { %v5541_v5 = vadd.f32 %v5540_v25, %v5452_v58  ;;  %5680 = vmatmul.bf16.gmra.mxu2 %v9479_v17 }
 0x92a   : > { %5769 = vmatmul.bf16.gmra.mxu3 %v12234_v16  ;;  %5947 = vmatmul.bf16.gmra.mxu1 %v12235_v21  ;;  %v5819_v23 = vpop.f32.mrf.mxu0 }
 0x92b   : > { %v8503_v45 = vpop.eup %8502  ;;  %v5630_v35 = vadd.f32 %v5629_v11, %v5541_v5 }
 0x92c   : > { %6427 = vst [vmem:[%s10058_s15 + $0x6b8] sm:$0xff] %v8503_v45  ;;  %v5641_v32 = vpop.f32.mrf.mxu2 }
 0x92d   : > { %8504 = vtanh.f32 %v5630_v35  ;;  %v5642_v19 = vadd.f32 %v5641_v32, %v11906_v55  ;;  %v5730_v28 = vpop.f32.mrf.mxu3  ;;  %5858 = vmatmul.bf16.gmra.mxu0 %v9870_v54 }
 0x92f   : > { %v5731_v17 = vadd.f32 %v5730_v28, %v5642_v19  ;;  %v5910_v50 = vpop.f32.mrf.mxu1 }
 0x931   : > { %v5820_v2 = vadd.f32 %v5819_v23, %v5731_v17 }
 0x932   : > { %v5821_v6 = vpop.f32.mrf.mxu0 }
 0x933   : > { %v8505_v10 = vpop.eup %8504  ;;  %v5909_v18 = vadd.f32 %v5908_v53, %v5820_v2 }
 0x934   : > { %6434 = vst [vmem:[%s10058_s15 + $0x6f0] sm:$0xff] %v8505_v10  ;;  %v5643_v56 = vpop.f32.mrf.mxu2 }
 0x935   : > { %8506 = vtanh.f32 %v5909_v18  ;;  %v5644_v14 = vadd.f32 %v5643_v56, %v11906_v55  ;;  %v5732_v40 = vpop.f32.mrf.mxu3 }
 0x937   : > { %v5733_v20 = vadd.f32 %v5732_v40, %v5644_v14  ;;  %v5913_v57 = vpop.f32.mrf.mxu1 }
 0x939   : > { %v5822_v27 = vadd.f32 %v5821_v6, %v5733_v20  ;;  %5685 = vmatmul.bf16.gmra.mxu2 %v9503_v36 }
 0x93a   : > { %5774 = vmatmul.bf16.gmra.mxu3 %v9498_v13  ;;  %5952 = vmatmul.bf16.gmra.mxu1 %v9889_v49  ;;  %v5824_v54 = vpop.f32.mrf.mxu0 }
 0x93b   : > { %v8507_v8 = vpop.eup %8506  ;;  %v5911_v12 = vadd.f32 %v5910_v50, %v5822_v27 }
 0x93c   : > { %6218 = vst [vmem:[%s10058_s15 + $0x30] sm:$0xff] %v8507_v8  ;;  %v5646_v47 = vpop.f32.mrf.mxu2 }
 0x93d   : > { %8508 = vtanh.f32 %v5911_v12  ;;  %v5647_v39 = vadd.f32 %v5646_v47, %v11906_v55  ;;  %v5735_v11 = vpop.f32.mrf.mxu3  ;;  %5863 = vmatmul.bf16.gmra.mxu0 %v9894_v51  ;;  %v12236_v51 = vld [vmem:[#allocation31_spill] sm:$0xff] }
 0x93f   : > { %v5736_v30 = vadd.f32 %v5735_v11, %v5647_v39  ;;  %v5915_v25 = vpop.f32.mrf.mxu1 }
 0x941   : > { %v5825_v34 = vadd.f32 %v5824_v54, %v5736_v30 }
 0x942   : > { %v5826_v36 = vpop.f32.mrf.mxu0 }
 0x943   : > { %v8509_v9 = vpop.eup %8508  ;;  %v5914_v13 = vadd.f32 %v5913_v57, %v5825_v34 }
 0x944   : > { %6225 = vst [vmem:[%s10058_s15 + $0x68] sm:$0xff] %v8509_v9  ;;  %v5648_v49 = vpop.f32.mrf.mxu2 }
 0x945   : > { %8510 = vtanh.f32 %v5914_v13  ;;  %v5649_v46 = vadd.f32 %v5648_v49, %v11906_v55  ;;  %v5737_v59 = vpop.f32.mrf.mxu3 }
 0x947   : > { %v5738_v15 = vadd.f32 %v5737_v59, %v5649_v46  ;;  %v5918_v58 = vpop.f32.mrf.mxu1 }
 0x949   : > { %v5827_v53 = vadd.f32 %v5826_v36, %v5738_v15  ;;  %5690 = vmatmul.bf16.gmra.mxu2 %v9527_v1 }
 0x94a   : > { %5779 = vmatmul.bf16.gmra.mxu3 %v9522_v7  ;;  %5957 = vmatmul.bf16.gmra.mxu1 %v12236_v51  ;;  %v5829_v5 = vpop.f32.mrf.mxu0 }
 0x94b   : > { %v8511_v0 = vpop.eup %8510  ;;  %v5916_v16 = vadd.f32 %v5915_v25, %v5827_v53 }
 0x94c   : > { %6232 = vst [vmem:[%s10058_s15 + $0xa0] sm:$0xff] %v8511_v0  ;;  %v5651_v21 = vpop.f32.mrf.mxu2 }
 0x94d   : > { %8512 = vtanh.f32 %v5916_v16  ;;  %v5652_v23 = vadd.f32 %v5651_v21, %v11906_v55  ;;  %v5740_v45 = vpop.f32.mrf.mxu3  ;;  %5868 = vmatmul.bf16.gmra.mxu0 %v9918_v48 }
 0x94f   : > { %v5741_v35 = vadd.f32 %v5740_v45, %v5652_v23  ;;  %v5920_v32 = vpop.f32.mrf.mxu1 }
 0x951   : > { %v5830_v19 = vadd.f32 %v5829_v5, %v5741_v35 }
 0x952   : > { %v5831_v1 = vpop.f32.mrf.mxu0 }
 0x953   : > { %v8513_v28 = vpop.eup %8512  ;;  %v5919_v7 = vadd.f32 %v5918_v58, %v5830_v19 }
 0x954   : > { %6239 = vst [vmem:[%s10058_s15 + $0xd8] sm:$0xff] %v8513_v28  ;;  %v5653_v17 = vpop.f32.mrf.mxu2 }
 0x955   : > { %8514 = vtanh.f32 %v5919_v7  ;;  %v5654_v50 = vadd.f32 %v5653_v17, %v11906_v55  ;;  %v5742_v2 = vpop.f32.mrf.mxu3 }
 0x957   : > { %v5743_v6 = vadd.f32 %v5742_v2, %v5654_v50  ;;  %v5923_v10 = vpop.f32.mrf.mxu1 }
 0x959   : > { %v5832_v18 = vadd.f32 %v5831_v1, %v5743_v6  ;;  %5695 = vmatmul.bf16.gmra.mxu2 %v9551_v31 }
 0x95a   : > { %5784 = vmatmul.bf16.gmra.mxu3 %v9546_v61  ;;  %5962 = vmatmul.bf16.gmra.mxu1 %v9937_v24  ;;  %v5834_v48 = vpop.f32.mrf.mxu0 }
 0x95b   : > { %v8515_v56 = vpop.eup %8514  ;;  %v5921_v14 = vadd.f32 %v5920_v32, %v5832_v18 }
 0x95c   : > { %6246 = vst [vmem:[%s10058_s15 + $0x110] sm:$0xff] %v8515_v56  ;;  %v5656_v40 = vpop.f32.mrf.mxu2 }
 0x95d   : > { %8516 = vtanh.f32 %v5921_v14  ;;  %v5657_v20 = vadd.f32 %v5656_v40, %v11906_v55  ;;  %v5745_v57 = vpop.f32.mrf.mxu3  ;;  %5873 = vmatmul.bf16.gmra.mxu0 %v9942_v62  ;;  %v12237_v62 = vld [vmem:[#allocation32_spill] sm:$0xff] }
 0x95f   : > { %v5746_v27 = vadd.f32 %v5745_v57, %v5657_v20  ;;  %v5925_v54 = vpop.f32.mrf.mxu1 }
 0x961   : > { %v5835_v8 = vadd.f32 %v5834_v48, %v5746_v27 }
 0x962   : > { %v5836_v31 = vpop.f32.mrf.mxu0 }
 0x963   : > { %v8517_v12 = vpop.eup %8516  ;;  %v5924_v61 = vadd.f32 %v5923_v10, %v5835_v8 }
 0x964   : > { %6253 = vst [vmem:[%s10058_s15 + $0x148] sm:$0xff] %v8517_v12  ;;  %v5658_v24 = vpop.f32.mrf.mxu2 }
 0x965   : > { %8518 = vtanh.f32 %v5924_v61  ;;  %v5659_v47 = vadd.f32 %v5658_v24, %v11906_v55  ;;  %v5747_v39 = vpop.f32.mrf.mxu3 }
 0x967   : > { %v5748_v11 = vadd.f32 %v5747_v39, %v5659_v47  ;;  %v5928_v30 = vpop.f32.mrf.mxu1 }
 0x969   : > { %v5837_v25 = vadd.f32 %v5836_v31, %v5748_v11  ;;  %5700 = vmatmul.bf16.gmra.mxu2 %v9575_v4 }
 0x96a   : > { %5789 = vmatmul.bf16.gmra.mxu3 %v9570_v3  ;;  %5967 = vmatmul.bf16.gmra.mxu1 %v12237_v62  ;;  %v5839_v34 = vpop.f32.mrf.mxu0 }
 0x96b   : > { %v8519_v36 = vpop.eup %8518  ;;  %v5926_v9 = vadd.f32 %v5925_v54, %v5837_v25 }
 0x96c   : > { %6260 = vst [vmem:[%s10058_s15 + $0x180] sm:$0xff] %v8519_v36  ;;  %v5661_v13 = vpop.f32.mrf.mxu2 }
 0x96d   : > { %8520 = vtanh.f32 %v5926_v9  ;;  %v5662_v49 = vadd.f32 %v5661_v13, %v11906_v55  ;;  %v5750_v46 = vpop.f32.mrf.mxu3  ;;  %5878 = vmatmul.bf16.gmra.mxu0 %v9966_v63 }
 0x96f   : > { %v5751_v59 = vadd.f32 %v5750_v46, %v5662_v49  ;;  %v5930_v15 = vpop.f32.mrf.mxu1 }
 0x971   : > { %v5840_v58 = vadd.f32 %v5839_v34, %v5751_v59 }
 0x972   : > { %v5841_v4 = vpop.f32.mrf.mxu0 }
 0x973   : > { %v8521_v53 = vpop.eup %8520  ;;  %v5929_v3 = vadd.f32 %v5928_v30, %v5840_v58 }
 0x974   : > { %6267 = vst [vmem:[%s10058_s15 + $0x1b8] sm:$0xff] %v8521_v53  ;;  %v5663_v51 = vpop.f32.mrf.mxu2 }
 0x975   : > { %8522 = vtanh.f32 %v5929_v3  ;;  %v5664_v5 = vadd.f32 %v5663_v51, %v11906_v55  ;;  %v5752_v0 = vpop.f32.mrf.mxu3 }
 0x977   : > { %v5753_v16 = vadd.f32 %v5752_v0, %v5664_v5  ;;  %v5933_v21 = vpop.f32.mrf.mxu1 }
 0x979   : > { %v5842_v23 = vadd.f32 %v5841_v4, %v5753_v16  ;;  %5705 = vmatmul.bf16.gmra.mxu2 %v9599_v42 }
 0x97a   : > { %5794 = vmatmul.bf16.gmra.mxu3 %v9594_v60  ;;  %5972 = vmatmul.bf16.gmra.mxu1 %v9985_v38  ;;  %v5844_v63 = vpop.f32.mrf.mxu0 }
 0x97b   : > { %v8523_v45 = vpop.eup %8522  ;;  %v5931_v35 = vadd.f32 %v5930_v15, %v5842_v23 }
 0x97c   : > { %6274 = vst [vmem:[%s10058_s15 + $0x1f0] sm:$0xff] %v8523_v45  ;;  %v5666_v32 = vpop.f32.mrf.mxu2 }
 0x97d   : > { %8524 = vtanh.f32 %v5931_v35  ;;  %v5667_v19 = vadd.f32 %v5666_v32, %v11906_v55  ;;  %v5755_v1 = vpop.f32.mrf.mxu3  ;;  %5883 = vmatmul.bf16.gmra.mxu0 %v9990_v52 }
 0x97f   : > { %v5756_v28 = vadd.f32 %v5755_v1, %v5667_v19  ;;  %v5935_v7 = vpop.f32.mrf.mxu1 }
 0x981   : > { %v5845_v17 = vadd.f32 %v5844_v63, %v5756_v28 }
 0x982   : > { %v5846_v42 = vpop.f32.mrf.mxu0 }
 0x983   : > { %v8525_v50 = vpop.eup %8524  ;;  %v5934_v60 = vadd.f32 %v5933_v21, %v5845_v17 }
 0x984   : > { %6281 = vst [vmem:[%s10058_s15 + $0x228] sm:$0xff] %v8525_v50  ;;  %v5668_v38 = vpop.f32.mrf.mxu2 }
 0x985   : > { %8526 = vtanh.f32 %v5934_v60  ;;  %v5669_v2 = vadd.f32 %v5668_v38, %v11906_v55  ;;  %v5757_v6 = vpop.f32.mrf.mxu3 }
 0x987   : > { %v5758_v10 = vadd.f32 %v5757_v6, %v5669_v2  ;;  %v5938_v18 = vpop.f32.mrf.mxu1 }
 0x989   : > { %v5847_v48 = vadd.f32 %v5846_v42, %v5758_v10  ;;  %5710 = vmatmul.bf16.gmra.mxu2 %v9623_v22 }
 0x98a   : > { %5799 = vmatmul.bf16.gmra.mxu3 %v9618_v37  ;;  %5977 = vmatmul.bf16.gmra.mxu1 %v10003_v44  ;;  %v5849_v52 = vpop.f32.mrf.mxu0 }
 0x98b   : > { %v8527_v56 = vpop.eup %8526  ;;  %v5936_v14 = vadd.f32 %v5935_v7, %v5847_v48 }
 0x98c   : > { %6288 = vst [vmem:[%s10058_s15 + $0x260] sm:$0xff] %v8527_v56  ;;  %v5671_v40 = vpop.f32.mrf.mxu2 }
 0x98d   : > { %8528 = vtanh.f32 %v5936_v14  ;;  %v5672_v20 = vadd.f32 %v5671_v40, %v11906_v55  ;;  %v5760_v57 = vpop.f32.mrf.mxu3  ;;  %5888 = vmatmul.bf16.gmra.mxu0 %v10008_v33 }
 0x98f   : > { %v5761_v27 = vadd.f32 %v5760_v57, %v5672_v20  ;;  %v5940_v54 = vpop.f32.mrf.mxu1 }
 0x991   : > { %v5850_v8 = vadd.f32 %v5849_v52, %v5761_v27 }
 0x992   : > { %v5851_v22 = vpop.f32.mrf.mxu0 }
 0x993   : > { %v8529_v31 = vpop.eup %8528  ;;  %v5939_v37 = vadd.f32 %v5938_v18, %v5850_v8 }
 0x994   : > { %6295 = vst [vmem:[%s10058_s15 + $0x298] sm:$0xff] %v8529_v31  ;;  %v5673_v44 = vpop.f32.mrf.mxu2 }
 0x995   : > { %8530 = vtanh.f32 %v5939_v37  ;;  %v5674_v12 = vadd.f32 %v5673_v44, %v11906_v55  ;;  %v5762_v61 = vpop.f32.mrf.mxu3 }
 0x997   : > { %v5763_v24 = vadd.f32 %v5762_v61, %v5674_v12  ;;  %v5943_v47 = vpop.f32.mrf.mxu1 }
 0x999   : > { %v5852_v39 = vadd.f32 %v5851_v22, %v5763_v24  ;;  %5715 = vmatmul.bf16.gmra.mxu2 %v9654_v41 }
 0x99a   : > { %5804 = vmatmul.bf16.gmra.mxu3 %v9647_v43  ;;  %5982 = vmatmul.bf16.gmra.mxu1 %v10030_v26  ;;  %v5854_v33 = vpop.f32.mrf.mxu0 }
 0x99b   : > { %v8531_v11 = vpop.eup %8530  ;;  %v5941_v30 = vadd.f32 %v5940_v54, %v5852_v39 }
 0x99c   : > { %6302 = vst [vmem:[%s10058_s15 + $0x2d0] sm:$0xff] %v8531_v11  ;;  %v5676_v25 = vpop.f32.mrf.mxu2 }
 0x99d   : > { %8532 = vtanh.f32 %v5941_v30  ;;  %v5677_v62 = vadd.f32 %v5676_v25, %v11906_v55  ;;  %v5765_v34 = vpop.f32.mrf.mxu3 }
 0x99f   : > { %v5766_v36 = vadd.f32 %v5765_v34, %v5677_v62  ;;  %v5945_v9 = vpop.f32.mrf.mxu1 }
 0x9a1   : > { %v5855_v13 = vadd.f32 %v5854_v33, %v5766_v36 }
 0x9a2   : > { %v5856_v49 = vpop.f32.mrf.mxu0 }
 0x9a3   : > { %v8533_v41 = vpop.eup %8532  ;;  %v5944_v46 = vadd.f32 %v5943_v47, %v5855_v13 }
 0x9a4   : > { %6309 = vst [vmem:[%s10058_s15 + $0x308] sm:$0xff] %v8533_v41  ;;  %v5678_v43 = vpop.f32.mrf.mxu2 }
 0x9a5   : > { %8534 = vtanh.f32 %v5944_v46  ;;  %v5679_v26 = vadd.f32 %v5678_v43, %v11906_v55  ;;  %v5767_v59 = vpop.f32.mrf.mxu3 }
 0x9a7   : > { %v5768_v15 = vadd.f32 %v5767_v59, %v5679_v26  ;;  %v5948_v58 = vpop.f32.mrf.mxu1 }
 0x9a9   : > { %v5857_v4 = vadd.f32 %v5856_v49, %v5768_v15  ;;  %5893 = vmatmul.bf16.vlgmr.msra.gmra.mxu2 %v12213_v29 }
 0x9aa   : > { %v5859_v53 = vpop.f32.mrf.mxu0 }
 0x9ab   : > { %v8535_v3 = vpop.eup %8534  ;;  %v5946_v51 = vadd.f32 %v5945_v9, %v5857_v4 }
 0x9ac   : > { %6316 = vst [vmem:[%s10058_s15 + $0x340] sm:$0xff] %v8535_v3  ;;  %v5681_v5 = vpop.f32.mrf.mxu2 }
 0x9ad   : > { %8536 = vtanh.f32 %v5946_v51  ;;  %v5682_v0 = vadd.f32 %v5681_v5, %v11906_v55  ;;  %v5770_v16 = vpop.f32.mrf.mxu3 }
 0x9af   : > { %v5771_v21 = vadd.f32 %v5770_v16, %v5682_v0  ;;  %v5950_v23 = vpop.f32.mrf.mxu1 }
 0x9b1   : > { %v5860_v63 = vadd.f32 %v5859_v53, %v5771_v21 }
 0x9b2   : > { %v5861_v45 = vpop.f32.mrf.mxu0 }
 0x9b3   : > { %v8537_v35 = vpop.eup %8536  ;;  %v5949_v32 = vadd.f32 %v5948_v58, %v5860_v63 }
 0x9b4   : > { %6323 = vst [vmem:[%s10058_s15 + $0x378] sm:$0xff] %v8537_v35  ;;  %v5683_v19 = vpop.f32.mrf.mxu2 }
 0x9b5   : > { %8538 = vtanh.f32 %v5949_v32  ;;  %v5684_v29 = vadd.f32 %v5683_v19, %v11906_v55  ;;  %v5772_v1 = vpop.f32.mrf.mxu3 }
 0x9b7   : > { %v5773_v28 = vadd.f32 %v5772_v1, %v5684_v29  ;;  %v5953_v7 = vpop.f32.mrf.mxu1 }
 0x9b9   : > { %v5862_v17 = vadd.f32 %v5861_v45, %v5773_v28 }
 0x9ba   : > { %v5864_v42 = vpop.f32.mrf.mxu0 }
 0x9bb   : > { %v8539_v50 = vpop.eup %8538  ;;  %v5951_v60 = vadd.f32 %v5950_v23, %v5862_v17 }
 0x9bc   : > { %6330 = vst [vmem:[%s10058_s15 + $0x3b0] sm:$0xff] %v8539_v50  ;;  %v5686_v38 = vpop.f32.mrf.mxu2 }
 0x9bd   : > { %8540 = vtanh.f32 %v5951_v60  ;;  %v5687_v2 = vadd.f32 %v5686_v38, %v11906_v55  ;;  %v5775_v6 = vpop.f32.mrf.mxu3 }
 0x9bf   : > { %v5776_v10 = vadd.f32 %v5775_v6, %v5687_v2  ;;  %v5955_v18 = vpop.f32.mrf.mxu1 }
 0x9c1   : > { %v5865_v48 = vadd.f32 %v5864_v42, %v5776_v10 }
 0x9c2   : > { %v5866_v52 = vpop.f32.mrf.mxu0 }
 0x9c3   : > { %v8541_v56 = vpop.eup %8540  ;;  %v5954_v14 = vadd.f32 %v5953_v7, %v5865_v48 }
 0x9c4   : > { %6337 = vst [vmem:[%s10058_s15 + $0x3e8] sm:$0xff] %v8541_v56  ;;  %v5688_v40 = vpop.f32.mrf.mxu2 }
 0x9c5   : > { %8542 = vtanh.f32 %v5954_v14  ;;  %v5689_v20 = vadd.f32 %v5688_v40, %v11906_v55  ;;  %v5777_v57 = vpop.f32.mrf.mxu3 }
 0x9c7   : > { %v5778_v27 = vadd.f32 %v5777_v57, %v5689_v20  ;;  %v5958_v54 = vpop.f32.mrf.mxu1 }
 0x9c9   : > { %v5867_v8 = vadd.f32 %v5866_v52, %v5778_v27 }
 0x9ca   : > { %v5869_v22 = vpop.f32.mrf.mxu0 }
 0x9cb   : > { %v8543_v31 = vpop.eup %8542  ;;  %v5956_v37 = vadd.f32 %v5955_v18, %v5867_v8 }
 0x9cc   : > { %6344 = vst [vmem:[%s10058_s15 + $0x420] sm:$0xff] %v8543_v31  ;;  %v5691_v44 = vpop.f32.mrf.mxu2 }
 0x9cd   : > { %8544 = vtanh.f32 %v5956_v37  ;;  %v5692_v12 = vadd.f32 %v5691_v44, %v11906_v55  ;;  %v5780_v61 = vpop.f32.mrf.mxu3 }
 0x9cf   : > { %v5781_v24 = vadd.f32 %v5780_v61, %v5692_v12  ;;  %v5960_v47 = vpop.f32.mrf.mxu1 }
 0x9d1   : > { %v5870_v39 = vadd.f32 %v5869_v22, %v5781_v24 }
 0x9d2   : > { %v5871_v33 = vpop.f32.mrf.mxu0 }
 0x9d3   : > { %v8545_v11 = vpop.eup %8544  ;;  %v5959_v30 = vadd.f32 %v5958_v54, %v5870_v39 }
 0x9d4   : > { %6351 = vst [vmem:[%s10058_s15 + $0x458] sm:$0xff] %v8545_v11  ;;  %v5693_v25 = vpop.f32.mrf.mxu2 }
 0x9d5   : > { %8546 = vtanh.f32 %v5959_v30  ;;  %v5694_v62 = vadd.f32 %v5693_v25, %v11906_v55  ;;  %v5782_v34 = vpop.f32.mrf.mxu3 }
 0x9d7   : > { %v5783_v36 = vadd.f32 %v5782_v34, %v5694_v62  ;;  %v5963_v9 = vpop.f32.mrf.mxu1 }
 0x9d9   : > { %v5872_v13 = vadd.f32 %v5871_v33, %v5783_v36 }
 0x9da   : > { %v5874_v49 = vpop.f32.mrf.mxu0 }
 0x9db   : > { %v8547_v41 = vpop.eup %8546  ;;  %v5961_v46 = vadd.f32 %v5960_v47, %v5872_v13 }
 0x9dc   : > { %6358 = vst [vmem:[%s10058_s15 + $0x490] sm:$0xff] %v8547_v41  ;;  %v5696_v43 = vpop.f32.mrf.mxu2 }
 0x9dd   : > { %8548 = vtanh.f32 %v5961_v46  ;;  %v5697_v26 = vadd.f32 %v5696_v43, %v11906_v55  ;;  %v5785_v59 = vpop.f32.mrf.mxu3 }
 0x9df   : > { %v5786_v15 = vadd.f32 %v5785_v59, %v5697_v26  ;;  %v5965_v58 = vpop.f32.mrf.mxu1 }
 0x9e1   : > { %v5875_v4 = vadd.f32 %v5874_v49, %v5786_v15 }
 0x9e2   : > { %v5876_v53 = vpop.f32.mrf.mxu0 }
 0x9e3   : > { %v8549_v3 = vpop.eup %8548  ;;  %v5964_v51 = vadd.f32 %v5963_v9, %v5875_v4 }
 0x9e4   : > { %6365 = vst [vmem:[%s10058_s15 + $0x4c8] sm:$0xff] %v8549_v3  ;;  %v5698_v5 = vpop.f32.mrf.mxu2 }
 0x9e5   : > { %8550 = vtanh.f32 %v5964_v51  ;;  %v5699_v0 = vadd.f32 %v5698_v5, %v11906_v55  ;;  %v5787_v16 = vpop.f32.mrf.mxu3 }
 0x9e7   : > { %v5788_v21 = vadd.f32 %v5787_v16, %v5699_v0  ;;  %v5968_v23 = vpop.f32.mrf.mxu1 }
 0x9e9   : > { %v5877_v63 = vadd.f32 %v5876_v53, %v5788_v21 }
 0x9ea   : > { %v5879_v45 = vpop.f32.mrf.mxu0 }
 0x9eb   : > { %v8551_v35 = vpop.eup %8550  ;;  %v5966_v32 = vadd.f32 %v5965_v58, %v5877_v63 }
 0x9ec   : > { %6372 = vst [vmem:[%s10058_s15 + $0x500] sm:$0xff] %v8551_v35  ;;  %v5701_v19 = vpop.f32.mrf.mxu2 }
 0x9ed   : > { %8552 = vtanh.f32 %v5966_v32  ;;  %v5702_v29 = vadd.f32 %v5701_v19, %v11906_v55  ;;  %v5790_v1 = vpop.f32.mrf.mxu3 }
 0x9ef   : > { %v5791_v28 = vadd.f32 %v5790_v1, %v5702_v29  ;;  %v5970_v17 = vpop.f32.mrf.mxu1 }
 0x9f1   : > { %v5880_v7 = vadd.f32 %v5879_v45, %v5791_v28 }
 0x9f2   : > { %v5881_v42 = vpop.f32.mrf.mxu0 }
 0x9f3   : > { %v8553_v50 = vpop.eup %8552  ;;  %v5969_v60 = vadd.f32 %v5968_v23, %v5880_v7 }
 0x9f4   : > { %6379 = vst [vmem:[%s10058_s15 + $0x538] sm:$0xff] %v8553_v50  ;;  %v5703_v38 = vpop.f32.mrf.mxu2 }
 0x9f5   : > { %8554 = vtanh.f32 %v5969_v60  ;;  %v5704_v2 = vadd.f32 %v5703_v38, %v11906_v55  ;;  %v5792_v6 = vpop.f32.mrf.mxu3 }
 0x9f7   : > { %v5793_v10 = vadd.f32 %v5792_v6, %v5704_v2  ;;  %v5973_v14 = vpop.f32.mrf.mxu1 }
 0x9f9   : > { %v5882_v18 = vadd.f32 %v5881_v42, %v5793_v10 }
 0x9fa   : > { %v5884_v48 = vpop.f32.mrf.mxu0 }
 0x9fb   : > { %v8555_v52 = vpop.eup %8554  ;;  %v5971_v56 = vadd.f32 %v5970_v17, %v5882_v18 }
 0x9fc   : > { %6386 = vst [vmem:[%s10058_s15 + $0x570] sm:$0xff] %v8555_v52  ;;  %v5706_v40 = vpop.f32.mrf.mxu2 }
 0x9fd   : > { %8556 = vtanh.f32 %v5971_v56  ;;  %v5707_v20 = vadd.f32 %v5706_v40, %v11906_v55  ;;  %v5795_v57 = vpop.f32.mrf.mxu3 }
 0x9ff   : > { %v5796_v27 = vadd.f32 %v5795_v57, %v5707_v20  ;;  %v5975_v61 = vpop.f32.mrf.mxu1 }
 0xa01   : > { %v5885_v54 = vadd.f32 %v5884_v48, %v5796_v27 }
 0xa02   : > { %v5886_v31 = vpop.f32.mrf.mxu0 }
 0xa03   : > { %v8557_v8 = vpop.eup %8556  ;;  %v5974_v22 = vadd.f32 %v5973_v14, %v5885_v54 }
 0xa04   : > { %6393 = vst [vmem:[%s10058_s15 + $0x5a8] sm:$0xff] %v8557_v8  ;;  %v5708_v37 = vpop.f32.mrf.mxu2 }
 0xa05   : > { %8558 = vtanh.f32 %v5974_v22  ;;  %v5709_v44 = vadd.f32 %v5708_v37, %v11906_v55  ;;  %v5797_v12 = vpop.f32.mrf.mxu3 }
 0xa07   : > { %v5798_v24 = vadd.f32 %v5797_v12, %v5709_v44  ;;  %v5978_v36 = vpop.f32.mrf.mxu1 }
 0xa09   : > { %v5887_v47 = vadd.f32 %v5886_v31, %v5798_v24 }
 0xa0a   : > { %v5889_v62 = vpop.f32.mrf.mxu0 }
 0xa0b   : > { %v8559_v39 = vpop.eup %8558  ;;  %v5976_v33 = vadd.f32 %v5975_v61, %v5887_v47 }
 0xa0c   : > { %6400 = vst [vmem:[%s10058_s15 + $0x5e0] sm:$0xff] %v8559_v39  ;;  %v5711_v11 = vpop.f32.mrf.mxu2 }
 0xa0d   : > { %8560 = vtanh.f32 %v5976_v33  ;;  %v5712_v30 = vadd.f32 %v5711_v11, %v11906_v55  ;;  %v5800_v25 = vpop.f32.mrf.mxu3 }
 0xa0f   : > { %v5801_v34 = vadd.f32 %v5800_v25, %v5712_v30  ;;  %v5980_v58 = vpop.f32.mrf.mxu1 }
 0xa11   : > { %v5890_v9 = vadd.f32 %v5889_v62, %v5801_v34 }
 0xa12   : > { %v5891_v59 = vpop.f32.mrf.mxu0 }
 0xa13   : > { %v8561_v13 = vpop.eup %8560  ;;  %v5979_v49 = vadd.f32 %v5978_v36, %v5890_v9 }
 0xa14   : > { %6407 = vst [vmem:[%s10058_s15 + $0x618] sm:$0xff] %v8561_v13  ;;  %v5713_v41 = vpop.f32.mrf.mxu2 }
 0xa15   : > { %8562 = vtanh.f32 %v5979_v49  ;;  %v5714_v46 = vadd.f32 %v5713_v41, %v11906_v55  ;;  %v5802_v43 = vpop.f32.mrf.mxu3 }
 0xa17   : > { %v5803_v26 = vadd.f32 %v5802_v43, %v5714_v46  ;;  %v5983_v23 = vpop.f32.mrf.mxu1 }
 0xa19   : > { %v5892_v15 = vadd.f32 %v5891_v59, %v5803_v26 }
 0xa1b   : > { %v8563_v4 = vpop.eup %8562  ;;  %v5981_v53 = vadd.f32 %v5980_v58, %v5892_v15 }
 0xa1c   : > { %6414 = vst [vmem:[%s10058_s15 + $0x650] sm:$0xff] %v8563_v4  ;;  %v5716_v3 = vpop.f32.mrf.mxu2 }
 0xa1d   : > { %8564 = vtanh.f32 %v5981_v53  ;;  %v5717_v0 = vadd.f32 %v5716_v3, %v11906_v55  ;;  %v5805_v16 = vpop.f32.mrf.mxu3 }
 0xa1f   : > { %v5806_v21 = vadd.f32 %v5805_v16, %v5717_v0  ;;  %v5985_v7 = vpop.f32.mrf.mxu1 }
 0xa23   : > { %v8565_v51 = vpop.eup %8564 }
 0xa24   : > { %6421 = vst [vmem:[%s10058_s15 + $0x688] sm:$0xff] %v8565_v51  ;;  %v5718_v5 = vpop.f32.mrf.mxu2 }
 0xa25   : > { %v5719_v35 = vadd.f32 %v5718_v5, %v11906_v55  ;;  %v5807_v19 = vpop.f32.mrf.mxu3 }
 0xa27   : > { %v5808_v29 = vadd.f32 %v5807_v19, %v5719_v35 }
 0xa2c   : > { %v5894_v63 = vpop.f32.mrf.mxu2 }
 0xa2d   : > { %v5895_v45 = vadd.f32 %v5894_v63, %v5806_v21 }
 0xa2f   : > { %v5984_v32 = vadd.f32 %v5983_v23, %v5895_v45 }
 0xa31   : > { %8566 = vtanh.f32 %v5984_v32 }
 0xa34   : > { %v5896_v1 = vpop.f32.mrf.mxu2 }
 0xa35   : > { %v5897_v28 = vadd.f32 %v5896_v1, %v5808_v29 }
 0xa37   : > { %v8567_v17 = vpop.eup %8566  ;;  %v5986_v42 = vadd.f32 %v5985_v7, %v5897_v28 }
 0xa38   : > { %6428 = vst [vmem:[%s10058_s15 + $0x6c0] sm:$0xff] %v8567_v17 }
 0xa39   : > { %8568 = vtanh.f32 %v5986_v42 }
 0xa3f   : > { %v8569_v50 = vpop.eup %8568 }
 0xa40   : > { %6435 = vst [vmem:[%s10058_s15 + $0x6f8] sm:$0xff] %v8569_v50 }
 0xa41 PF: > { %s17_s24 = sadd.s32 1, %s8582_s24  }
 0xa42   : > { %p14_p4 = scmp.ge.s32.totalorder %s17_s24, 4  }
 0xa44   :  { %16 = sbr.rel (!%p14_p4) target bundleno = 1 (0x1), region = 78 }

</bundles_post_ra>
